<compile_context>
chip_gen: v7x
topology: tpu7x:2x2x1
jax: 0.10.0
libtpu: 0.0.40
codegen_flags: <defaults>
</compile_context>

<pallas_src>
import numpy as np
import jax
import jax.numpy as jnp
from jax import lax
from jax.experimental import pallas as pl
from jax.experimental.pallas import tpu as pltpu


# ----------------------------- weight packing -------------------------------

def _spectral_normalize(w_oihw):
    cout = w_oihw.shape[0]
    sigma = float(np.linalg.svd(np.asarray(w_oihw, np.float32).reshape(cout, -1),
                                compute_uv=False)[0])
    return (np.asarray(w_oihw, np.float32) / sigma).astype(np.float32)


def _banded_weight(w_oihw, w_in, stride, pad):
    """W [Cout,Cin,kH,kW] -> B [kH, w_in*Cin, Wo*Cout], banded along width.

    (A_row @ B[kh]) contracts (kw, cin) of the conv at kernel row kh for every
    output column j; width stride and width padding are folded into the band
    structure so the kernel never needs strided access or explicit padding."""
    cout, cin, k_h, k_w = w_oihw.shape
    wo = (w_in + 2 * pad - k_w) // stride + 1
    b = np.zeros((k_h, w_in * cin, wo * cout), np.float32)
    w = np.asarray(w_oihw, np.float32)
    for kh in range(k_h):
        for j in range(wo):
            for kw in range(k_w):
                wi = j * stride + kw - pad
                if 0 <= wi < w_in:
                    b[kh, wi * cin:(wi + 1) * cin, j * cout:(j + 1) * cout] = \
                        w[:, :, kh, kw].T
    return b


def _row_select(n, h, ho, k, stride, pad):
    """0/1 selection matrices [k, n*ho, n*h], block-diagonal over the batch.

    S[kh, b*ho+i, b*h+r] = 1 iff r == i*stride + kh - pad (out-of-range = pad)."""
    s = np.zeros((k, n * ho, n * h), np.float32)
    for kh in range(k):
        for b in range(n):
            for i in range(ho):
                r = i * stride + kh - pad
                if 0 <= r < h:
                    s[kh, b * ho + i, b * h + r] = 1.0
    return s


def _blockdiag(m, n):
    a, b = m.shape
    out = np.zeros((n * a, n * b), np.float32)
    for i in range(n):
        out[i * a:(i + 1) * a, i * b:(i + 1) * b] = m
    return out


def _chan_matrices(w, c):
    """reduce_m [w*c, c] and tile_m [c, w*c] for per-channel BN statistics."""
    r = np.zeros((w * c, c), np.float32)
    for lane in range(w * c):
        r[lane, lane % c] = 1.0
    return r, np.ascontiguousarray(r.T)


def init_params(key, nc=3, ndf=16):
    shapes = {
        "conv1":  (ndf,     nc,      4, 4),
        "skip1a": (32,      ndf,     3, 3),
        "skip1b": (1,       32,      3, 3),
        "conv2":  (ndf * 2, ndf,     4, 4),
        "conv3":  (ndf * 4, ndf * 2, 4, 4),
        "skip2a": (32,      ndf * 4, 3, 3),
        "skip2b": (1,       32,      3, 3),
        "conv4":  (ndf * 8, ndf * 4, 4, 4),
        "conv5":  (1,       ndf * 8, 4, 4),
    }
    params = {}
    keys = jax.random.split(key, len(shapes))
    for (name, shp), k in zip(shapes.items(), keys):
        params[name] = np.asarray(jax.random.normal(k, shp, jnp.float32)) * np.float32(0.02)
    for name in ("conv1", "conv2", "conv3", "conv4", "conv5"):
        params[name] = _spectral_normalize(params[name])   # spectral_norm wraps these
    for name, c in (("bn2", ndf * 2), ("bn3", ndf * 4), ("bn4", ndf * 8)):
        params[name + "_gamma"] = np.ones((c,), np.float32)
        params[name + "_beta"] = np.zeros((c,), np.float32)
    return params


def pack_params(params, n, nc=3, ndf=16, hw=32):
    """Host-side packing for the fused kernel (once per batch size n)."""
    assert hw == 32
    s32, s16, s8, s4, s2 = hw, hw // 2, hw // 4, hw // 8, hw // 16
    lane_pad = ((hw * nc + 127) // 128) * 128          # conv1 input lanes -> 128

    def band_stack(w, w_in, stride, pad, row_pad_to=None):
        b = _banded_weight(w, w_in, stride, pad)        # [k, w_in*cin, wo*cout]
        if row_pad_to is not None and b.shape[1] < row_pad_to:
            b = np.pad(b, ((0, 0), (0, row_pad_to - b.shape[1]), (0, 0)))
        return b.reshape(b.shape[0] * b.shape[1], b.shape[2])

    # ---- trunk convs (banded + stacked over kh) ----
    b1 = band_stack(params["conv1"], s32, 2, 1, row_pad_to=lane_pad)   # [512, 256]
    b2 = band_stack(params["conv2"], s16, 2, 1)                        # [1024, 256]
    b3 = band_stack(params["conv3"], s8,  2, 1)                        # [1024, 256]
    b4 = band_stack(params["conv4"], s4,  2, 1)                        # [1024, 256]

    # ---- row-selection matrices (block-diagonal over the batch) ----
    s1m  = _row_select(n, s32, s16, 4, 2, 1)
    ss1a = _row_select(n, s16, s16, 3, 1, 1)
    s2m  = _row_select(n, s16, s8,  4, 2, 1)
    s3m  = _row_select(n, s8,  s4,  4, 2, 1)
    ss2a = _row_select(n, s4,  s4,  3, 1, 1)
    s4m  = _row_select(n, s4,  s2,  4, 2, 1)

    # ---- skip branch 1: conv3x3 then (pool 16->8 avg + conv3x3->1ch) fused ----
    bs1a = band_stack(params["skip1a"], s16, 1, 1)                     # [768, 512]
    R1 = np.zeros((8, s16), np.float32)
    for o in range(8):
        R1[o, 2 * o] = R1[o, 2 * o + 1] = 0.5
    S1b = _row_select(1, 8, 8, 3, 1, 1)                                # [3, 8, 8]
    m1 = np.stack([_blockdiag(S1b[kh] @ R1, n) for kh in range(3)])    # [3, n*8, n*16]
    C1 = np.zeros((s16 * 32, 8 * 32), np.float32)
    for j in range(8):
        for wsrc in (2 * j, 2 * j + 1):
            for ch in range(32):
                C1[wsrc * 32 + ch, j * 32 + ch] = 0.5
    B1b = _banded_weight(params["skip1b"], 8, 1, 1)                    # [3, 256, 8]
    ws1 = np.concatenate([C1 @ B1b[kh] for kh in range(3)], axis=0)    # [1536, 8]

    # ---- skip branch 2: conv3x3 then (pool 4->8 repeat + conv3x3->1ch) fused ----
    bs2a = band_stack(params["skip2a"], s4, 1, 1)                      # [768, 128]
    R2 = np.zeros((8, s4), np.float32)
    for o in range(8):
        R2[o, o // 2] = 1.0
    S2b = _row_select(1, 8, 8, 3, 1, 1)
    m2 = np.stack([_blockdiag(S2b[kh] @ R2, n) for kh in range(3)])    # [3, n*8, n*4]
    C2 = np.zeros((s4 * 32, 8 * 32), np.float32)
    for j in range(8):
        for ch in range(32):
            C2[(j // 2) * 32 + ch, j * 32 + ch] = 1.0
    B2b = _banded_weight(params["skip2b"], 8, 1, 1)                    # [3, 256, 8]
    ws2 = np.concatenate([C2 @ B2b[kh] for kh in range(3)], axis=0)    # [384, 8]

    # ---- conv5: 1x1 output broadcast to the 8x8 grid; only kh in {1,2} valid ----
    B5 = _banded_weight(params["conv5"], s2, 2, 1)                     # [4, 256, 1]
    s5m = np.zeros((2, n * 8, n * s2), np.float32)
    for idx, kh in enumerate((1, 2)):
        for b in range(n):
            s5m[idx, b * 8:(b + 1) * 8, b * s2 + (kh - 1)] = 1.0
    w5 = np.concatenate([np.tile(B5[kh], (1, 8)) for kh in (1, 2)], axis=0)  # [512, 8]

    # ---- BN channel reduce / tile matrices (0/1, exact in bf16) ----
    r2, t2 = _chan_matrices(s8, ndf * 2)
    r3, t3 = _chan_matrices(s4, ndf * 4)
    r4, t4 = _chan_matrices(s2, ndf * 8)

    assert b1.shape == (4 * lane_pad, s16 * ndf)
    assert ws1.shape[0] == 3 * s16 * 32 and ws2.shape[0] == 3 * s4 * 32

    def B(x):
        return jnp.asarray(x, jnp.bfloat16)

    def F(x):
        return jnp.asarray(x, jnp.float32)

    return dict(
        s1=B(s1m), b1=B(b1), ss1a=B(ss1a), m1=B(m1), ws1=B(ws1),
        s2=B(s2m), g2=F(params["bn2_gamma"].reshape(1, -1)),
        be2=F(params["bn2_beta"].reshape(1, -1)), r2=B(r2), t2=B(t2),
        s3=B(s3m), g3=F(params["bn3_gamma"].reshape(1, -1)),
        be3=F(params["bn3_beta"].reshape(1, -1)), r3=B(r3), t3=B(t3),
        ss2a=B(ss2a), m2=B(m2), ws2=B(ws2),
        s4=B(s4m), g4=F(params["bn4_gamma"].reshape(1, -1)),
        be4=F(params["bn4_beta"].reshape(1, -1)), r4=B(r4), t4=B(t4),
        s5=B(s5m), w5=B(w5),
        # big slabs -> manual (overlapped) DMA
        bs1a=B(bs1a), b2=B(b2), b3=B(b3), bs2a=B(bs2a), b4=B(b4),
    )


# ------------------------------ fused kernel --------------------------------

def build_forward(nc=3, ndf=16, hw=32):
    assert hw == 32          # conv5 must land on 1x1 to broadcast vs the 8x8 skips
    alpha = 0.2
    eps = 1e-5
    bf16 = jnp.bfloat16
    f32 = jnp.float32
    lane_pad = ((hw * nc + 127) // 128) * 128

    def _dotf(a, b):
        return jnp.dot(a, b, preferred_element_type=f32)

    def _leaky(x):
        return jnp.where(x >= 0.0, x, alpha * x)

    def _conv(a_bf, s_ref, b_val, k):
        # a_bf [M_in, K] bf16; s_ref [k, M_out, M_in] bf16; b_val [k*K, N] bf16.
        # k row-selected slabs concatenated along lanes -> one wide-K matmul.
        pieces = [_dotf(s_ref[kh], a_bf).astype(bf16) for kh in range(k)]
        return _dotf(jnp.concatenate(pieces, axis=1), b_val)

    def _bn_leaky(a, g_ref, be_ref, r_ref, t_ref, count):
        # training-mode BatchNorm (biased variance) over the whole stacked batch
        inv = 1.0 / float(count)
        rs = jnp.sum(a, axis=0, keepdims=True)
        rq = jnp.sum(a * a, axis=0, keepdims=True)
        rmat = r_ref[...].astype(f32)
        mean = _dotf(rs, rmat) * inv
        var = _dotf(rq, rmat) * inv - mean * mean
        scale = g_ref[...] * lax.rsqrt(var + eps)
        shift = be_ref[...] - mean * scale
        tmat = t_ref[...].astype(f32)
        y = a * _dotf(scale, tmat) + _dotf(shift, tmat)
        return _leaky(y)

    def kernel(x_ref, s1, b1, ss1a, m1, ws1,
               s2, g2, be2, r2, t2,
               s3, g3, be3, r3, t3,
               ss2a, m2, ws2,
               s4, g4, be4, r4, t4,
               s5, w5,
               bs1a_hbm, b2_hbm, b3_hbm, bs2a_hbm, b4_hbm,
               out_ref,
               vs1a, v2, v3, vs2a, v4, sems):
        n = x_ref.shape[0] // hw

        # Kick off the big mid-network weight fetches; they stream into VMEM
        # scratch while the earlier layers compute (weight DMA / compute overlap).
        copies = [
            pltpu.make_async_copy(bs1a_hbm, vs1a, sems.at[0]),
            pltpu.make_async_copy(b2_hbm,   v2,   sems.at[1]),
            pltpu.make_async_copy(b3_hbm,   v3,   sems.at[2]),
            pltpu.make_async_copy(bs2a_hbm, vs2a, sems.at[3]),
            pltpu.make_async_copy(b4_hbm,   v4,   sems.at[4]),
        ]
        for cp in copies:
            cp.start()

        # ---- conv1 + LeakyReLU --------------------------------------------
        x_bf = x_ref[...].astype(bf16)                          # [n*32, 128]
        h1 = _leaky(_conv(x_bf, s1, b1[...], 4))                # [n*16, 256] f32
        h1_bf = h1.astype(bf16)

        # ---- skip branch 1: conv3x3+lrelu, then fused pool8+conv3x3 ---------
        copies[0].wait()
        y1_bf = _leaky(_conv(h1_bf, ss1a, vs1a[...], 3)).astype(bf16)  # [n*16, 512]
        sk1 = _conv(y1_bf, m1, ws1[...], 3)                     # [n*8, 8]

        # ---- trunk: conv2/conv3 + BN + LeakyReLU ----------------------------
        copies[1].wait()
        h2 = _bn_leaky(_conv(h1_bf, s2, v2[...], 4),
                       g2, be2, r2, t2, n * (hw // 4) ** 2)      # [n*8, 256]
        copies[2].wait()
        h3 = _bn_leaky(_conv(h2.astype(bf16), s3, v3[...], 4),
                       g3, be3, r3, t3, n * (hw // 8) ** 2)      # [n*4, 256]
        h3_bf = h3.astype(bf16)

        # ---- skip branch 2 ---------------------------------------------------
        copies[3].wait()
        y2_bf = _leaky(_conv(h3_bf, ss2a, vs2a[...], 3)).astype(bf16)  # [n*4, 128]
        sk2 = _conv(y2_bf, m2, ws2[...], 3)                      # [n*8, 8]

        # ---- conv4 + BN + LeakyReLU, conv5 (broadcast to 8x8) ----------------
        copies[4].wait()
        h4 = _bn_leaky(_conv(h3_bf, s4, v4[...], 4),
                       g4, be4, r4, t4, n * (hw // 16) ** 2)     # [n*2, 256]
        v8 = _conv(h4.astype(bf16), s5, w5[...], 2)              # [n*8, 8]

        # ---- final combine, single store ------------------------------------
        out_ref[...] = (sk1 + sk2 + v8) * (1.0 / 3.0)

    names_vmem = ["s1", "b1", "ss1a", "m1", "ws1",
                  "s2", "g2", "be2", "r2", "t2",
                  "s3", "g3", "be3", "r3", "t3",
                  "ss2a", "m2", "ws2",
                  "s4", "g4", "be4", "r4", "t4",
                  "s5", "w5"]
    names_hbm = ["bs1a", "b2", "b3", "bs2a", "b4"]

    def forward(x_nchw, packed):
        n = x_nchw.shape[0]
        # one tiny layout transform of the network input: NCHW -> [N*H, W*C]
        x2d = jnp.transpose(x_nchw, (0, 2, 3, 1)).astype(f32).reshape(n * hw, hw * nc)
        x2d = jnp.pad(x2d, ((0, 0), (0, lane_pad - hw * nc)))

        args = [x2d] + [packed[k] for k in names_vmem] + [packed[k] for k in names_hbm]
        in_specs = ([pl.BlockSpec()] * (1 + len(names_vmem)) +
                    [pl.BlockSpec(memory_space=pl.ANY)] * len(names_hbm))
        scratch = ([pltpu.VMEM(packed[k].shape, jnp.bfloat16) for k in names_hbm] +
                   [pltpu.SemaphoreType.DMA((len(names_hbm),))])

        out = pl.pallas_call(
            kernel,
            out_shape=jax.ShapeDtypeStruct((n * 8, 8), f32),
            in_specs=in_specs,
            scratch_shapes=scratch,
            compiler_params=pltpu.CompilerParams(
                vmem_limit_bytes=32 * 1024 * 1024),
        )(*args)
        return out.reshape(n, 8, 8)

    return forward


# ------------------------- pure-JAX reference check --------------------------

def _leaky_ref(x):
    return jnp.where(x >= 0, x, 0.2 * x)


def _conv_ref(x, w, stride, pad):
    return lax.conv_general_dilated(
        x, jnp.asarray(w), (stride, stride), ((pad, pad), (pad, pad)),
        dimension_numbers=("NCHW", "OIHW", "NCHW"),
        precision=lax.Precision.HIGHEST)


def _bn_ref(x, gamma, beta, eps=1e-5):
    mean = jnp.mean(x, axis=(0, 2, 3), keepdims=True)
    var = jnp.var(x, axis=(0, 2, 3), keepdims=True)
    xn = (x - mean) / jnp.sqrt(var + eps)
    return xn * gamma.reshape(1, -1, 1, 1) + beta.reshape(1, -1, 1, 1)


def _adaptive_pool_axis(x, axis, out_size):
    in_size = x.shape[axis]
    parts = []
    for i in range(out_size):
        s = (i * in_size) // out_size
        e = -((-((i + 1) * in_size)) // out_size)
        sl = [slice(None)] * x.ndim
        sl[axis] = slice(s, e)
        parts.append(jnp.mean(x[tuple(sl)], axis=axis, keepdims=True))
    return jnp.concatenate(parts, axis=axis)


def reference_forward(x, p):
    h1 = _leaky_ref(_conv_ref(x, p["conv1"], 2, 1))
    s1 = _leaky_ref(_conv_ref(h1, p["skip1a"], 1, 1))
    s1 = _adaptive_pool_axis(_adaptive_pool_axis(s1, 2, 8), 3, 8)
    s1 = _conv_ref(s1, p["skip1b"], 1, 1)
    h2 = _leaky_ref(_bn_ref(_conv_ref(h1, p["conv2"], 2, 1), p["bn2_gamma"], p["bn2_beta"]))
    h3 = _leaky_ref(_bn_ref(_conv_ref(h2, p["conv3"], 2, 1), p["bn3_gamma"], p["bn3_beta"]))
    s2 = _leaky_ref(_conv_ref(h3, p["skip2a"], 1, 1))
    s2 = _adaptive_pool_axis(_adaptive_pool_axis(s2, 2, 8), 3, 8)
    s2 = _conv_ref(s2, p["skip2b"], 1, 1)
    h4 = _leaky_ref(_bn_ref(_conv_ref(h3, p["conv4"], 2, 1), p["bn4_gamma"], p["bn4_beta"]))
    h5 = _conv_ref(h4, p["conv5"], 2, 1)
    return jnp.squeeze((h5 + s1 + s2) * (1.0 / 3.0))


# ----------------------------------- main ------------------------------------

if __name__ == "__main__":
    key = jax.random.PRNGKey(0)
    pkey, xkey = jax.random.split(key)
    params = init_params(pkey, nc=3, ndf=16)
    x = jax.random.normal(xkey, (2, 3, 32, 32), jnp.float32)
    packed = pack_params(params, n=x.shape[0], nc=3, ndf=16, hw=32)

    forward = jax.jit(build_forward(nc=3, ndf=16, hw=32))
    out = jax.block_until_ready(forward(x, packed))
    assert out.shape == (2, 8, 8), out.shape
    assert bool(jnp.all(jnp.isfinite(out)))

    # correctness check against a plain-XLA f32 reference using the same weights.
    # Tolerance: the kernel intentionally runs bf16 weights / bf16 matmul inputs
    # (f32 accumulation), worth a few-percent worst-case deviation; structural
    # bugs (wrong band / padding / selection) produce O(1)-scale errors.
    params_j = {k: jnp.asarray(v) for k, v in params.items()}
    ref = jax.block_until_ready(jax.jit(reference_forward)(x, params_j))
    max_err = float(jnp.max(jnp.abs(out - ref)))
    ref_mag = float(jnp.max(jnp.abs(ref))) + 1e-6
    assert max_err <= 0.05 * ref_mag + 1e-2, (max_err, ref_mag)

    print("KERNEL_OK")
</pallas_src>

<mosaic_0001>
module attributes {stable_mosaic.version = 11 : i64} {
  func.func @kernel(%arg0: memref<64x128xf32, #tpu.memory_space<vmem>>, %arg1: memref<4x32x64xbf16, #tpu.memory_space<vmem>>, %arg2: memref<512x256xbf16, #tpu.memory_space<vmem>>, %arg3: memref<3x32x32xbf16, #tpu.memory_space<vmem>>, %arg4: memref<3x16x32xbf16, #tpu.memory_space<vmem>>, %arg5: memref<1536x8xbf16, #tpu.memory_space<vmem>>, %arg6: memref<4x16x32xbf16, #tpu.memory_space<vmem>>, %arg7: memref<1x32xf32, #tpu.memory_space<vmem>>, %arg8: memref<1x32xf32, #tpu.memory_space<vmem>>, %arg9: memref<256x32xbf16, #tpu.memory_space<vmem>>, %arg10: memref<32x256xbf16, #tpu.memory_space<vmem>>, %arg11: memref<4x8x16xbf16, #tpu.memory_space<vmem>>, %arg12: memref<1x64xf32, #tpu.memory_space<vmem>>, %arg13: memref<1x64xf32, #tpu.memory_space<vmem>>, %arg14: memref<256x64xbf16, #tpu.memory_space<vmem>>, %arg15: memref<64x256xbf16, #tpu.memory_space<vmem>>, %arg16: memref<3x8x8xbf16, #tpu.memory_space<vmem>>, %arg17: memref<3x16x8xbf16, #tpu.memory_space<vmem>>, %arg18: memref<384x8xbf16, #tpu.memory_space<vmem>>, %arg19: memref<4x4x8xbf16, #tpu.memory_space<vmem>>, %arg20: memref<1x128xf32, #tpu.memory_space<vmem>>, %arg21: memref<1x128xf32, #tpu.memory_space<vmem>>, %arg22: memref<256x128xbf16, #tpu.memory_space<vmem>>, %arg23: memref<128x256xbf16, #tpu.memory_space<vmem>>, %arg24: memref<2x16x4xbf16, #tpu.memory_space<vmem>>, %arg25: memref<512x8xbf16, #tpu.memory_space<vmem>>, %arg26: memref<768x512xbf16, #tpu.memory_space<any>>, %arg27: memref<1024x256xbf16, #tpu.memory_space<any>>, %arg28: memref<1024x256xbf16, #tpu.memory_space<any>>, %arg29: memref<768x128xbf16, #tpu.memory_space<any>>, %arg30: memref<1024x256xbf16, #tpu.memory_space<any>>, %arg31: memref<16x8xf32, #tpu.memory_space<vmem>>, %arg32: memref<768x512xbf16, #tpu.memory_space<vmem>>, %arg33: memref<1024x256xbf16, #tpu.memory_space<vmem>>, %arg34: memref<1024x256xbf16, #tpu.memory_space<vmem>>, %arg35: memref<768x128xbf16, #tpu.memory_space<vmem>>, %arg36: memref<1024x256xbf16, #tpu.memory_space<vmem>>, %arg37: memref<5x!tpu.dma_semaphore, #tpu.memory_space<semaphore_mem>>) attributes {dimension_semantics = [], scalar_prefetch = 0 : i64, scratch_operands = 6 : i64, tpu.core_type = #tpu.core_type<tc>} {
    %c0_i32 = arith.constant 0 : i32
    %0 = tpu.memref_slice %arg37[%c0_i32] : memref<5x!tpu.dma_semaphore, #tpu.memory_space<semaphore_mem>> -> memref<1x!tpu.dma_semaphore, #tpu.memory_space<semaphore_mem>>
    %1 = tpu.memref_squeeze %0 : memref<1x!tpu.dma_semaphore, #tpu.memory_space<semaphore_mem>> -> memref<!tpu.dma_semaphore, #tpu.memory_space<semaphore_mem>>
    tpu.enqueue_dma source(%arg26 : memref<768x512xbf16, #tpu.memory_space<any>>) target(%arg32 : memref<768x512xbf16, #tpu.memory_space<vmem>>) target_semaphore(%1 : memref<!tpu.dma_semaphore, #tpu.memory_space<semaphore_mem>>)
    %c1_i32 = arith.constant 1 : i32
    %2 = tpu.memref_slice %arg37[%c1_i32] : memref<5x!tpu.dma_semaphore, #tpu.memory_space<semaphore_mem>> -> memref<1x!tpu.dma_semaphore, #tpu.memory_space<semaphore_mem>>
    %3 = tpu.memref_squeeze %2 : memref<1x!tpu.dma_semaphore, #tpu.memory_space<semaphore_mem>> -> memref<!tpu.dma_semaphore, #tpu.memory_space<semaphore_mem>>
    tpu.enqueue_dma source(%arg27 : memref<1024x256xbf16, #tpu.memory_space<any>>) target(%arg33 : memref<1024x256xbf16, #tpu.memory_space<vmem>>) target_semaphore(%3 : memref<!tpu.dma_semaphore, #tpu.memory_space<semaphore_mem>>)
    %c2_i32 = arith.constant 2 : i32
    %4 = tpu.memref_slice %arg37[%c2_i32] : memref<5x!tpu.dma_semaphore, #tpu.memory_space<semaphore_mem>> -> memref<1x!tpu.dma_semaphore, #tpu.memory_space<semaphore_mem>>
    %5 = tpu.memref_squeeze %4 : memref<1x!tpu.dma_semaphore, #tpu.memory_space<semaphore_mem>> -> memref<!tpu.dma_semaphore, #tpu.memory_space<semaphore_mem>>
    tpu.enqueue_dma source(%arg28 : memref<1024x256xbf16, #tpu.memory_space<any>>) target(%arg34 : memref<1024x256xbf16, #tpu.memory_space<vmem>>) target_semaphore(%5 : memref<!tpu.dma_semaphore, #tpu.memory_space<semaphore_mem>>)
    %c3_i32 = arith.constant 3 : i32
    %6 = tpu.memref_slice %arg37[%c3_i32] : memref<5x!tpu.dma_semaphore, #tpu.memory_space<semaphore_mem>> -> memref<1x!tpu.dma_semaphore, #tpu.memory_space<semaphore_mem>>
    %7 = tpu.memref_squeeze %6 : memref<1x!tpu.dma_semaphore, #tpu.memory_space<semaphore_mem>> -> memref<!tpu.dma_semaphore, #tpu.memory_space<semaphore_mem>>
    tpu.enqueue_dma source(%arg29 : memref<768x128xbf16, #tpu.memory_space<any>>) target(%arg35 : memref<768x128xbf16, #tpu.memory_space<vmem>>) target_semaphore(%7 : memref<!tpu.dma_semaphore, #tpu.memory_space<semaphore_mem>>)
    %c4_i32 = arith.constant 4 : i32
    %8 = tpu.memref_slice %arg37[%c4_i32] : memref<5x!tpu.dma_semaphore, #tpu.memory_space<semaphore_mem>> -> memref<1x!tpu.dma_semaphore, #tpu.memory_space<semaphore_mem>>
    %9 = tpu.memref_squeeze %8 : memref<1x!tpu.dma_semaphore, #tpu.memory_space<semaphore_mem>> -> memref<!tpu.dma_semaphore, #tpu.memory_space<semaphore_mem>>
    tpu.enqueue_dma source(%arg30 : memref<1024x256xbf16, #tpu.memory_space<any>>) target(%arg36 : memref<1024x256xbf16, #tpu.memory_space<vmem>>) target_semaphore(%9 : memref<!tpu.dma_semaphore, #tpu.memory_space<semaphore_mem>>)
    %c0 = arith.constant 0 : index
    %c0_0 = arith.constant 0 : index
    %10 = vector.load %arg0[%c0, %c0_0] : memref<64x128xf32, #tpu.memory_space<vmem>>, vector<64x128xf32>
    %11 = arith.truncf %10 : vector<64x128xf32> to vector<64x128xbf16>
    %c0_1 = arith.constant 0 : index
    %c0_2 = arith.constant 0 : index
    %12 = vector.load %arg2[%c0_1, %c0_2] : memref<512x256xbf16, #tpu.memory_space<vmem>>, vector<512x256xbf16>
    %c0_3 = arith.constant 0 : index
    %c0_4 = arith.constant 0 : index
    %c0_5 = arith.constant 0 : index
    %13 = vector.load %arg1[%c0_3, %c0_4, %c0_5] : memref<4x32x64xbf16, #tpu.memory_space<vmem>>, vector<1x32x64xbf16>
    %14 = vector.shape_cast %13 : vector<1x32x64xbf16> to vector<32x64xbf16>
    %cst = arith.constant dense<0.000000e+00> : vector<32x128xf32>
    %15 = tpu.matmul %14, %11, %cst {dimension_numbers = #tpu.dot_dimension_numbers<[1], [0], [0], [1], [0, 0, 1, 1], [], []>} : vector<32x64xbf16>, vector<64x128xbf16>, vector<32x128xf32> -> vector<32x128xf32>
    %16 = arith.truncf %15 : vector<32x128xf32> to vector<32x128xbf16>
    %c1 = arith.constant 1 : index
    %c0_6 = arith.constant 0 : index
    %c0_7 = arith.constant 0 : index
    %17 = vector.load %arg1[%c1, %c0_6, %c0_7] : memref<4x32x64xbf16, #tpu.memory_space<vmem>>, vector<1x32x64xbf16>
    %18 = vector.shape_cast %17 : vector<1x32x64xbf16> to vector<32x64xbf16>
    %cst_8 = arith.constant dense<0.000000e+00> : vector<32x128xf32>
    %19 = tpu.matmul %18, %11, %cst_8 {dimension_numbers = #tpu.dot_dimension_numbers<[1], [0], [0], [1], [0, 0, 1, 1], [], []>} : vector<32x64xbf16>, vector<64x128xbf16>, vector<32x128xf32> -> vector<32x128xf32>
    %20 = arith.truncf %19 : vector<32x128xf32> to vector<32x128xbf16>
    %c2 = arith.constant 2 : index
    %c0_9 = arith.constant 0 : index
    %c0_10 = arith.constant 0 : index
    %21 = vector.load %arg1[%c2, %c0_9, %c0_10] : memref<4x32x64xbf16, #tpu.memory_space<vmem>>, vector<1x32x64xbf16>
    %22 = vector.shape_cast %21 : vector<1x32x64xbf16> to vector<32x64xbf16>
    %cst_11 = arith.constant dense<0.000000e+00> : vector<32x128xf32>
    %23 = tpu.matmul %22, %11, %cst_11 {dimension_numbers = #tpu.dot_dimension_numbers<[1], [0], [0], [1], [0, 0, 1, 1], [], []>} : vector<32x64xbf16>, vector<64x128xbf16>, vector<32x128xf32> -> vector<32x128xf32>
    %24 = arith.truncf %23 : vector<32x128xf32> to vector<32x128xbf16>
    %c3 = arith.constant 3 : index
    %c0_12 = arith.constant 0 : index
    %c0_13 = arith.constant 0 : index
    %25 = vector.load %arg1[%c3, %c0_12, %c0_13] : memref<4x32x64xbf16, #tpu.memory_space<vmem>>, vector<1x32x64xbf16>
    %26 = vector.shape_cast %25 : vector<1x32x64xbf16> to vector<32x64xbf16>
    %cst_14 = arith.constant dense<0.000000e+00> : vector<32x128xf32>
    %27 = tpu.matmul %26, %11, %cst_14 {dimension_numbers = #tpu.dot_dimension_numbers<[1], [0], [0], [1], [0, 0, 1, 1], [], []>} : vector<32x64xbf16>, vector<64x128xbf16>, vector<32x128xf32> -> vector<32x128xf32>
    %28 = arith.truncf %27 : vector<32x128xf32> to vector<32x128xbf16>
    %29 = tpu.concatenate %16, %20, %24, %28 in 1 : vector<32x128xbf16>, vector<32x128xbf16>, vector<32x128xbf16>, vector<32x128xbf16> -> vector<32x512xbf16>
    %cst_15 = arith.constant dense<0.000000e+00> : vector<32x256xf32>
    %30 = tpu.matmul %29, %12, %cst_15 {dimension_numbers = #tpu.dot_dimension_numbers<[1], [0], [0], [1], [0, 0, 1, 1], [], []>} : vector<32x512xbf16>, vector<512x256xbf16>, vector<32x256xf32> -> vector<32x256xf32>
    %cst_16 = arith.constant 0.000000e+00 : f32
    %31 = vector.broadcast %cst_16 : f32 to vector<32x256xf32>
    %32 = arith.cmpf oge, %30, %31 : vector<32x256xf32>
    %cst_17 = arith.constant 2.000000e-01 : f32
    %33 = vector.broadcast %cst_17 : f32 to vector<32x256xf32>
    %34 = arith.mulf %33, %30 : vector<32x256xf32>
    %35 = arith.select %32, %30, %34 : vector<32x256xi1>, vector<32x256xf32>
    %36 = arith.truncf %35 : vector<32x256xf32> to vector<32x256xbf16>
    %c0_i32_18 = arith.constant 0 : i32
    %37 = tpu.memref_slice %arg37[%c0_i32_18] : memref<5x!tpu.dma_semaphore, #tpu.memory_space<semaphore_mem>> -> memref<1x!tpu.dma_semaphore, #tpu.memory_space<semaphore_mem>>
    %38 = tpu.memref_squeeze %37 : memref<1x!tpu.dma_semaphore, #tpu.memory_space<semaphore_mem>> -> memref<!tpu.dma_semaphore, #tpu.memory_space<semaphore_mem>>
    tpu.wait_dma2 semaphore(%38 : memref<!tpu.dma_semaphore, #tpu.memory_space<semaphore_mem>>) src(%arg26 : memref<768x512xbf16, #tpu.memory_space<any>>) dst(%arg32 : memref<768x512xbf16, #tpu.memory_space<vmem>>)
    %c0_19 = arith.constant 0 : index
    %c0_20 = arith.constant 0 : index
    %39 = vector.load %arg32[%c0_19, %c0_20] : memref<768x512xbf16, #tpu.memory_space<vmem>>, vector<768x512xbf16>
    %c0_21 = arith.constant 0 : index
    %c0_22 = arith.constant 0 : index
    %c0_23 = arith.constant 0 : index
    %40 = vector.load %arg3[%c0_21, %c0_22, %c0_23] : memref<3x32x32xbf16, #tpu.memory_space<vmem>>, vector<1x32x32xbf16>
    %41 = vector.shape_cast %40 : vector<1x32x32xbf16> to vector<32x32xbf16>
    %cst_24 = arith.constant dense<0.000000e+00> : vector<32x256xf32>
    %42 = tpu.matmul %41, %36, %cst_24 {dimension_numbers = #tpu.dot_dimension_numbers<[1], [0], [0], [1], [0, 0, 1, 1], [], []>} : vector<32x32xbf16>, vector<32x256xbf16>, vector<32x256xf32> -> vector<32x256xf32>
    %43 = arith.truncf %42 : vector<32x256xf32> to vector<32x256xbf16>
    %c1_25 = arith.constant 1 : index
    %c0_26 = arith.constant 0 : index
    %c0_27 = arith.constant 0 : index
    %44 = vector.load %arg3[%c1_25, %c0_26, %c0_27] : memref<3x32x32xbf16, #tpu.memory_space<vmem>>, vector<1x32x32xbf16>
    %45 = vector.shape_cast %44 : vector<1x32x32xbf16> to vector<32x32xbf16>
    %cst_28 = arith.constant dense<0.000000e+00> : vector<32x256xf32>
    %46 = tpu.matmul %45, %36, %cst_28 {dimension_numbers = #tpu.dot_dimension_numbers<[1], [0], [0], [1], [0, 0, 1, 1], [], []>} : vector<32x32xbf16>, vector<32x256xbf16>, vector<32x256xf32> -> vector<32x256xf32>
    %47 = arith.truncf %46 : vector<32x256xf32> to vector<32x256xbf16>
    %c2_29 = arith.constant 2 : index
    %c0_30 = arith.constant 0 : index
    %c0_31 = arith.constant 0 : index
    %48 = vector.load %arg3[%c2_29, %c0_30, %c0_31] : memref<3x32x32xbf16, #tpu.memory_space<vmem>>, vector<1x32x32xbf16>
    %49 = vector.shape_cast %48 : vector<1x32x32xbf16> to vector<32x32xbf16>
    %cst_32 = arith.constant dense<0.000000e+00> : vector<32x256xf32>
    %50 = tpu.matmul %49, %36, %cst_32 {dimension_numbers = #tpu.dot_dimension_numbers<[1], [0], [0], [1], [0, 0, 1, 1], [], []>} : vector<32x32xbf16>, vector<32x256xbf16>, vector<32x256xf32> -> vector<32x256xf32>
    %51 = arith.truncf %50 : vector<32x256xf32> to vector<32x256xbf16>
    %52 = tpu.concatenate %43, %47, %51 in 1 : vector<32x256xbf16>, vector<32x256xbf16>, vector<32x256xbf16> -> vector<32x768xbf16>
    %cst_33 = arith.constant dense<0.000000e+00> : vector<32x512xf32>
    %53 = tpu.matmul %52, %39, %cst_33 {dimension_numbers = #tpu.dot_dimension_numbers<[1], [0], [0], [1], [0, 0, 1, 1], [], []>} : vector<32x768xbf16>, vector<768x512xbf16>, vector<32x512xf32> -> vector<32x512xf32>
    %cst_34 = arith.constant 0.000000e+00 : f32
    %54 = vector.broadcast %cst_34 : f32 to vector<32x512xf32>
    %55 = arith.cmpf oge, %53, %54 : vector<32x512xf32>
    %cst_35 = arith.constant 2.000000e-01 : f32
    %56 = vector.broadcast %cst_35 : f32 to vector<32x512xf32>
    %57 = arith.mulf %56, %53 : vector<32x512xf32>
    %58 = arith.select %55, %53, %57 : vector<32x512xi1>, vector<32x512xf32>
    %59 = arith.truncf %58 : vector<32x512xf32> to vector<32x512xbf16>
    %c0_36 = arith.constant 0 : index
    %c0_37 = arith.constant 0 : index
    %60 = vector.load %arg5[%c0_36, %c0_37] : memref<1536x8xbf16, #tpu.memory_space<vmem>>, vector<1536x8xbf16>
    %c0_38 = arith.constant 0 : index
    %c0_39 = arith.constant 0 : index
    %c0_40 = arith.constant 0 : index
    %61 = vector.load %arg4[%c0_38, %c0_39, %c0_40] : memref<3x16x32xbf16, #tpu.memory_space<vmem>>, vector<1x16x32xbf16>
    %62 = vector.shape_cast %61 : vector<1x16x32xbf16> to vector<16x32xbf16>
    %cst_41 = arith.constant dense<0.000000e+00> : vector<16x512xf32>
    %63 = tpu.matmul %62, %59, %cst_41 {dimension_numbers = #tpu.dot_dimension_numbers<[1], [0], [0], [1], [0, 0, 1, 1], [], []>} : vector<16x32xbf16>, vector<32x512xbf16>, vector<16x512xf32> -> vector<16x512xf32>
    %64 = arith.truncf %63 : vector<16x512xf32> to vector<16x512xbf16>
    %c1_42 = arith.constant 1 : index
    %c0_43 = arith.constant 0 : index
    %c0_44 = arith.constant 0 : index
    %65 = vector.load %arg4[%c1_42, %c0_43, %c0_44] : memref<3x16x32xbf16, #tpu.memory_space<vmem>>, vector<1x16x32xbf16>
    %66 = vector.shape_cast %65 : vector<1x16x32xbf16> to vector<16x32xbf16>
    %cst_45 = arith.constant dense<0.000000e+00> : vector<16x512xf32>
    %67 = tpu.matmul %66, %59, %cst_45 {dimension_numbers = #tpu.dot_dimension_numbers<[1], [0], [0], [1], [0, 0, 1, 1], [], []>} : vector<16x32xbf16>, vector<32x512xbf16>, vector<16x512xf32> -> vector<16x512xf32>
    %68 = arith.truncf %67 : vector<16x512xf32> to vector<16x512xbf16>
    %c2_46 = arith.constant 2 : index
    %c0_47 = arith.constant 0 : index
    %c0_48 = arith.constant 0 : index
    %69 = vector.load %arg4[%c2_46, %c0_47, %c0_48] : memref<3x16x32xbf16, #tpu.memory_space<vmem>>, vector<1x16x32xbf16>
    %70 = vector.shape_cast %69 : vector<1x16x32xbf16> to vector<16x32xbf16>
    %cst_49 = arith.constant dense<0.000000e+00> : vector<16x512xf32>
    %71 = tpu.matmul %70, %59, %cst_49 {dimension_numbers = #tpu.dot_dimension_numbers<[1], [0], [0], [1], [0, 0, 1, 1], [], []>} : vector<16x32xbf16>, vector<32x512xbf16>, vector<16x512xf32> -> vector<16x512xf32>
    %72 = arith.truncf %71 : vector<16x512xf32> to vector<16x512xbf16>
    %73 = tpu.concatenate %64, %68, %72 in 1 : vector<16x512xbf16>, vector<16x512xbf16>, vector<16x512xbf16> -> vector<16x1536xbf16>
    %cst_50 = arith.constant dense<0.000000e+00> : vector<16x8xf32>
    %74 = tpu.matmul %73, %60, %cst_50 {dimension_numbers = #tpu.dot_dimension_numbers<[1], [0], [0], [1], [0, 0, 1, 1], [], []>} : vector<16x1536xbf16>, vector<1536x8xbf16>, vector<16x8xf32> -> vector<16x8xf32>
    %c1_i32_51 = arith.constant 1 : i32
    %75 = tpu.memref_slice %arg37[%c1_i32_51] : memref<5x!tpu.dma_semaphore, #tpu.memory_space<semaphore_mem>> -> memref<1x!tpu.dma_semaphore, #tpu.memory_space<semaphore_mem>>
    %76 = tpu.memref_squeeze %75 : memref<1x!tpu.dma_semaphore, #tpu.memory_space<semaphore_mem>> -> memref<!tpu.dma_semaphore, #tpu.memory_space<semaphore_mem>>
    tpu.wait_dma2 semaphore(%76 : memref<!tpu.dma_semaphore, #tpu.memory_space<semaphore_mem>>) src(%arg27 : memref<1024x256xbf16, #tpu.memory_space<any>>) dst(%arg33 : memref<1024x256xbf16, #tpu.memory_space<vmem>>)
    %c0_52 = arith.constant 0 : index
    %c0_53 = arith.constant 0 : index
    %77 = vector.load %arg33[%c0_52, %c0_53] : memref<1024x256xbf16, #tpu.memory_space<vmem>>, vector<1024x256xbf16>
    %c0_54 = arith.constant 0 : index
    %c0_55 = arith.constant 0 : index
    %c0_56 = arith.constant 0 : index
    %78 = vector.load %arg6[%c0_54, %c0_55, %c0_56] : memref<4x16x32xbf16, #tpu.memory_space<vmem>>, vector<1x16x32xbf16>
    %79 = vector.shape_cast %78 : vector<1x16x32xbf16> to vector<16x32xbf16>
    %cst_57 = arith.constant dense<0.000000e+00> : vector<16x256xf32>
    %80 = tpu.matmul %79, %36, %cst_57 {dimension_numbers = #tpu.dot_dimension_numbers<[1], [0], [0], [1], [0, 0, 1, 1], [], []>} : vector<16x32xbf16>, vector<32x256xbf16>, vector<16x256xf32> -> vector<16x256xf32>
    %81 = arith.truncf %80 : vector<16x256xf32> to vector<16x256xbf16>
    %c1_58 = arith.constant 1 : index
    %c0_59 = arith.constant 0 : index
    %c0_60 = arith.constant 0 : index
    %82 = vector.load %arg6[%c1_58, %c0_59, %c0_60] : memref<4x16x32xbf16, #tpu.memory_space<vmem>>, vector<1x16x32xbf16>
    %83 = vector.shape_cast %82 : vector<1x16x32xbf16> to vector<16x32xbf16>
    %cst_61 = arith.constant dense<0.000000e+00> : vector<16x256xf32>
    %84 = tpu.matmul %83, %36, %cst_61 {dimension_numbers = #tpu.dot_dimension_numbers<[1], [0], [0], [1], [0, 0, 1, 1], [], []>} : vector<16x32xbf16>, vector<32x256xbf16>, vector<16x256xf32> -> vector<16x256xf32>
    %85 = arith.truncf %84 : vector<16x256xf32> to vector<16x256xbf16>
    %c2_62 = arith.constant 2 : index
    %c0_63 = arith.constant 0 : index
    %c0_64 = arith.constant 0 : index
    %86 = vector.load %arg6[%c2_62, %c0_63, %c0_64] : memref<4x16x32xbf16, #tpu.memory_space<vmem>>, vector<1x16x32xbf16>
    %87 = vector.shape_cast %86 : vector<1x16x32xbf16> to vector<16x32xbf16>
    %cst_65 = arith.constant dense<0.000000e+00> : vector<16x256xf32>
    %88 = tpu.matmul %87, %36, %cst_65 {dimension_numbers = #tpu.dot_dimension_numbers<[1], [0], [0], [1], [0, 0, 1, 1], [], []>} : vector<16x32xbf16>, vector<32x256xbf16>, vector<16x256xf32> -> vector<16x256xf32>
    %89 = arith.truncf %88 : vector<16x256xf32> to vector<16x256xbf16>
    %c3_66 = arith.constant 3 : index
    %c0_67 = arith.constant 0 : index
    %c0_68 = arith.constant 0 : index
    %90 = vector.load %arg6[%c3_66, %c0_67, %c0_68] : memref<4x16x32xbf16, #tpu.memory_space<vmem>>, vector<1x16x32xbf16>
    %91 = vector.shape_cast %90 : vector<1x16x32xbf16> to vector<16x32xbf16>
    %cst_69 = arith.constant dense<0.000000e+00> : vector<16x256xf32>
    %92 = tpu.matmul %91, %36, %cst_69 {dimension_numbers = #tpu.dot_dimension_numbers<[1], [0], [0], [1], [0, 0, 1, 1], [], []>} : vector<16x32xbf16>, vector<32x256xbf16>, vector<16x256xf32> -> vector<16x256xf32>
    %93 = arith.truncf %92 : vector<16x256xf32> to vector<16x256xbf16>
    %94 = tpu.concatenate %81, %85, %89, %93 in 1 : vector<16x256xbf16>, vector<16x256xbf16>, vector<16x256xbf16>, vector<16x256xbf16> -> vector<16x1024xbf16>
    %cst_70 = arith.constant dense<0.000000e+00> : vector<16x256xf32>
    %95 = tpu.matmul %94, %77, %cst_70 {dimension_numbers = #tpu.dot_dimension_numbers<[1], [0], [0], [1], [0, 0, 1, 1], [], []>} : vector<16x1024xbf16>, vector<1024x256xbf16>, vector<16x256xf32> -> vector<16x256xf32>
    %cst_71 = arith.constant dense<0.000000e+00> : vector<256xf32>
    %96 = vector.multi_reduction <add>, %95, %cst_71 [0] : vector<16x256xf32> to vector<256xf32>
    %97 = vector.shape_cast %96 : vector<256xf32> to vector<1x256xf32>
    %98 = arith.mulf %95, %95 : vector<16x256xf32>
    %cst_72 = arith.constant dense<0.000000e+00> : vector<256xf32>
    %99 = vector.multi_reduction <add>, %98, %cst_72 [0] : vector<16x256xf32> to vector<256xf32>
    %100 = vector.shape_cast %99 : vector<256xf32> to vector<1x256xf32>
    %c0_73 = arith.constant 0 : index
    %c0_74 = arith.constant 0 : index
    %101 = vector.load %arg9[%c0_73, %c0_74] : memref<256x32xbf16, #tpu.memory_space<vmem>>, vector<256x32xbf16>
    %102 = arith.extf %101 : vector<256x32xbf16> to vector<256x32xf32>
    %cst_75 = arith.constant dense<0.000000e+00> : vector<1x32xf32>
    %103 = tpu.matmul %97, %102, %cst_75 {dimension_numbers = #tpu.dot_dimension_numbers<[1], [0], [0], [1], [0, 0, 1, 1], [], []>} : vector<1x256xf32>, vector<256x32xf32>, vector<1x32xf32> -> vector<1x32xf32>
    %cst_76 = arith.constant 7.812500e-03 : f32
    %104 = vector.broadcast %cst_76 : f32 to vector<1x32xf32>
    %105 = arith.mulf %103, %104 : vector<1x32xf32>
    %cst_77 = arith.constant dense<0.000000e+00> : vector<1x32xf32>
    %106 = tpu.matmul %100, %102, %cst_77 {dimension_numbers = #tpu.dot_dimension_numbers<[1], [0], [0], [1], [0, 0, 1, 1], [], []>} : vector<1x256xf32>, vector<256x32xf32>, vector<1x32xf32> -> vector<1x32xf32>
    %cst_78 = arith.constant 7.812500e-03 : f32
    %107 = vector.broadcast %cst_78 : f32 to vector<1x32xf32>
    %108 = arith.mulf %106, %107 : vector<1x32xf32>
    %109 = arith.mulf %105, %105 : vector<1x32xf32>
    %110 = arith.subf %108, %109 : vector<1x32xf32>
    %c0_79 = arith.constant 0 : index
    %c0_80 = arith.constant 0 : index
    %111 = vector.load %arg7[%c0_79, %c0_80] : memref<1x32xf32, #tpu.memory_space<vmem>>, vector<1x32xf32>
    %cst_81 = arith.constant 9.99999974E-6 : f32
    %112 = vector.broadcast %cst_81 : f32 to vector<1x32xf32>
    %113 = arith.addf %110, %112 : vector<1x32xf32>
    %114 = math.rsqrt %113 : vector<1x32xf32>
    %115 = arith.mulf %111, %114 : vector<1x32xf32>
    %c0_82 = arith.constant 0 : index
    %c0_83 = arith.constant 0 : index
    %116 = vector.load %arg8[%c0_82, %c0_83] : memref<1x32xf32, #tpu.memory_space<vmem>>, vector<1x32xf32>
    %117 = arith.mulf %105, %115 : vector<1x32xf32>
    %118 = arith.subf %116, %117 : vector<1x32xf32>
    %c0_84 = arith.constant 0 : index
    %c0_85 = arith.constant 0 : index
    %119 = vector.load %arg10[%c0_84, %c0_85] : memref<32x256xbf16, #tpu.memory_space<vmem>>, vector<32x256xbf16>
    %120 = arith.extf %119 : vector<32x256xbf16> to vector<32x256xf32>
    %cst_86 = arith.constant dense<0.000000e+00> : vector<1x256xf32>
    %121 = tpu.matmul %115, %120, %cst_86 {dimension_numbers = #tpu.dot_dimension_numbers<[1], [0], [0], [1], [0, 0, 1, 1], [], []>} : vector<1x32xf32>, vector<32x256xf32>, vector<1x256xf32> -> vector<1x256xf32>
    %122 = vector.broadcast %121 : vector<1x256xf32> to vector<16x256xf32>
    %123 = arith.mulf %95, %122 : vector<16x256xf32>
    %cst_87 = arith.constant dense<0.000000e+00> : vector<1x256xf32>
    %124 = tpu.matmul %118, %120, %cst_87 {dimension_numbers = #tpu.dot_dimension_numbers<[1], [0], [0], [1], [0, 0, 1, 1], [], []>} : vector<1x32xf32>, vector<32x256xf32>, vector<1x256xf32> -> vector<1x256xf32>
    %125 = vector.broadcast %124 : vector<1x256xf32> to vector<16x256xf32>
    %126 = arith.addf %123, %125 : vector<16x256xf32>
    %cst_88 = arith.constant 0.000000e+00 : f32
    %127 = vector.broadcast %cst_88 : f32 to vector<16x256xf32>
    %128 = arith.cmpf oge, %126, %127 : vector<16x256xf32>
    %cst_89 = arith.constant 2.000000e-01 : f32
    %129 = vector.broadcast %cst_89 : f32 to vector<16x256xf32>
    %130 = arith.mulf %129, %126 : vector<16x256xf32>
    %131 = arith.select %128, %126, %130 : vector<16x256xi1>, vector<16x256xf32>
    %c2_i32_90 = arith.constant 2 : i32
    %132 = tpu.memref_slice %arg37[%c2_i32_90] : memref<5x!tpu.dma_semaphore, #tpu.memory_space<semaphore_mem>> -> memref<1x!tpu.dma_semaphore, #tpu.memory_space<semaphore_mem>>
    %133 = tpu.memref_squeeze %132 : memref<1x!tpu.dma_semaphore, #tpu.memory_space<semaphore_mem>> -> memref<!tpu.dma_semaphore, #tpu.memory_space<semaphore_mem>>
    tpu.wait_dma2 semaphore(%133 : memref<!tpu.dma_semaphore, #tpu.memory_space<semaphore_mem>>) src(%arg28 : memref<1024x256xbf16, #tpu.memory_space<any>>) dst(%arg34 : memref<1024x256xbf16, #tpu.memory_space<vmem>>)
    %134 = arith.truncf %131 : vector<16x256xf32> to vector<16x256xbf16>
    %c0_91 = arith.constant 0 : index
    %c0_92 = arith.constant 0 : index
    %135 = vector.load %arg34[%c0_91, %c0_92] : memref<1024x256xbf16, #tpu.memory_space<vmem>>, vector<1024x256xbf16>
    %c0_93 = arith.constant 0 : index
    %c0_94 = arith.constant 0 : index
    %c0_95 = arith.constant 0 : index
    %136 = vector.load %arg11[%c0_93, %c0_94, %c0_95] : memref<4x8x16xbf16, #tpu.memory_space<vmem>>, vector<1x8x16xbf16>
    %137 = vector.shape_cast %136 : vector<1x8x16xbf16> to vector<8x16xbf16>
    %cst_96 = arith.constant dense<0.000000e+00> : vector<8x256xf32>
    %138 = tpu.matmul %137, %134, %cst_96 {dimension_numbers = #tpu.dot_dimension_numbers<[1], [0], [0], [1], [0, 0, 1, 1], [], []>} : vector<8x16xbf16>, vector<16x256xbf16>, vector<8x256xf32> -> vector<8x256xf32>
    %139 = arith.truncf %138 : vector<8x256xf32> to vector<8x256xbf16>
    %c1_97 = arith.constant 1 : index
    %c0_98 = arith.constant 0 : index
    %c0_99 = arith.constant 0 : index
    %140 = vector.load %arg11[%c1_97, %c0_98, %c0_99] : memref<4x8x16xbf16, #tpu.memory_space<vmem>>, vector<1x8x16xbf16>
    %141 = vector.shape_cast %140 : vector<1x8x16xbf16> to vector<8x16xbf16>
    %cst_100 = arith.constant dense<0.000000e+00> : vector<8x256xf32>
    %142 = tpu.matmul %141, %134, %cst_100 {dimension_numbers = #tpu.dot_dimension_numbers<[1], [0], [0], [1], [0, 0, 1, 1], [], []>} : vector<8x16xbf16>, vector<16x256xbf16>, vector<8x256xf32> -> vector<8x256xf32>
    %143 = arith.truncf %142 : vector<8x256xf32> to vector<8x256xbf16>
    %c2_101 = arith.constant 2 : index
    %c0_102 = arith.constant 0 : index
    %c0_103 = arith.constant 0 : index
    %144 = vector.load %arg11[%c2_101, %c0_102, %c0_103] : memref<4x8x16xbf16, #tpu.memory_space<vmem>>, vector<1x8x16xbf16>
    %145 = vector.shape_cast %144 : vector<1x8x16xbf16> to vector<8x16xbf16>
    %cst_104 = arith.constant dense<0.000000e+00> : vector<8x256xf32>
    %146 = tpu.matmul %145, %134, %cst_104 {dimension_numbers = #tpu.dot_dimension_numbers<[1], [0], [0], [1], [0, 0, 1, 1], [], []>} : vector<8x16xbf16>, vector<16x256xbf16>, vector<8x256xf32> -> vector<8x256xf32>
    %147 = arith.truncf %146 : vector<8x256xf32> to vector<8x256xbf16>
    %c3_105 = arith.constant 3 : index
    %c0_106 = arith.constant 0 : index
    %c0_107 = arith.constant 0 : index
    %148 = vector.load %arg11[%c3_105, %c0_106, %c0_107] : memref<4x8x16xbf16, #tpu.memory_space<vmem>>, vector<1x8x16xbf16>
    %149 = vector.shape_cast %148 : vector<1x8x16xbf16> to vector<8x16xbf16>
    %cst_108 = arith.constant dense<0.000000e+00> : vector<8x256xf32>
    %150 = tpu.matmul %149, %134, %cst_108 {dimension_numbers = #tpu.dot_dimension_numbers<[1], [0], [0], [1], [0, 0, 1, 1], [], []>} : vector<8x16xbf16>, vector<16x256xbf16>, vector<8x256xf32> -> vector<8x256xf32>
    %151 = arith.truncf %150 : vector<8x256xf32> to vector<8x256xbf16>
    %152 = tpu.concatenate %139, %143, %147, %151 in 1 : vector<8x256xbf16>, vector<8x256xbf16>, vector<8x256xbf16>, vector<8x256xbf16> -> vector<8x1024xbf16>
    %cst_109 = arith.constant dense<0.000000e+00> : vector<8x256xf32>
    %153 = tpu.matmul %152, %135, %cst_109 {dimension_numbers = #tpu.dot_dimension_numbers<[1], [0], [0], [1], [0, 0, 1, 1], [], []>} : vector<8x1024xbf16>, vector<1024x256xbf16>, vector<8x256xf32> -> vector<8x256xf32>
    %cst_110 = arith.constant dense<0.000000e+00> : vector<256xf32>
    %154 = vector.multi_reduction <add>, %153, %cst_110 [0] : vector<8x256xf32> to vector<256xf32>
    %155 = vector.shape_cast %154 : vector<256xf32> to vector<1x256xf32>
    %156 = arith.mulf %153, %153 : vector<8x256xf32>
    %cst_111 = arith.constant dense<0.000000e+00> : vector<256xf32>
    %157 = vector.multi_reduction <add>, %156, %cst_111 [0] : vector<8x256xf32> to vector<256xf32>
    %158 = vector.shape_cast %157 : vector<256xf32> to vector<1x256xf32>
    %c0_112 = arith.constant 0 : index
    %c0_113 = arith.constant 0 : index
    %159 = vector.load %arg14[%c0_112, %c0_113] : memref<256x64xbf16, #tpu.memory_space<vmem>>, vector<256x64xbf16>
    %160 = arith.extf %159 : vector<256x64xbf16> to vector<256x64xf32>
    %cst_114 = arith.constant dense<0.000000e+00> : vector<1x64xf32>
    %161 = tpu.matmul %155, %160, %cst_114 {dimension_numbers = #tpu.dot_dimension_numbers<[1], [0], [0], [1], [0, 0, 1, 1], [], []>} : vector<1x256xf32>, vector<256x64xf32>, vector<1x64xf32> -> vector<1x64xf32>
    %cst_115 = arith.constant 3.125000e-02 : f32
    %162 = vector.broadcast %cst_115 : f32 to vector<1x64xf32>
    %163 = arith.mulf %161, %162 : vector<1x64xf32>
    %cst_116 = arith.constant dense<0.000000e+00> : vector<1x64xf32>
    %164 = tpu.matmul %158, %160, %cst_116 {dimension_numbers = #tpu.dot_dimension_numbers<[1], [0], [0], [1], [0, 0, 1, 1], [], []>} : vector<1x256xf32>, vector<256x64xf32>, vector<1x64xf32> -> vector<1x64xf32>
    %cst_117 = arith.constant 3.125000e-02 : f32
    %165 = vector.broadcast %cst_117 : f32 to vector<1x64xf32>
    %166 = arith.mulf %164, %165 : vector<1x64xf32>
    %167 = arith.mulf %163, %163 : vector<1x64xf32>
    %168 = arith.subf %166, %167 : vector<1x64xf32>
    %c0_118 = arith.constant 0 : index
    %c0_119 = arith.constant 0 : index
    %169 = vector.load %arg12[%c0_118, %c0_119] : memref<1x64xf32, #tpu.memory_space<vmem>>, vector<1x64xf32>
    %cst_120 = arith.constant 9.99999974E-6 : f32
    %170 = vector.broadcast %cst_120 : f32 to vector<1x64xf32>
    %171 = arith.addf %168, %170 : vector<1x64xf32>
    %172 = math.rsqrt %171 : vector<1x64xf32>
    %173 = arith.mulf %169, %172 : vector<1x64xf32>
    %c0_121 = arith.constant 0 : index
    %c0_122 = arith.constant 0 : index
    %174 = vector.load %arg13[%c0_121, %c0_122] : memref<1x64xf32, #tpu.memory_space<vmem>>, vector<1x64xf32>
    %175 = arith.mulf %163, %173 : vector<1x64xf32>
    %176 = arith.subf %174, %175 : vector<1x64xf32>
    %c0_123 = arith.constant 0 : index
    %c0_124 = arith.constant 0 : index
    %177 = vector.load %arg15[%c0_123, %c0_124] : memref<64x256xbf16, #tpu.memory_space<vmem>>, vector<64x256xbf16>
    %178 = arith.extf %177 : vector<64x256xbf16> to vector<64x256xf32>
    %cst_125 = arith.constant dense<0.000000e+00> : vector<1x256xf32>
    %179 = tpu.matmul %173, %178, %cst_125 {dimension_numbers = #tpu.dot_dimension_numbers<[1], [0], [0], [1], [0, 0, 1, 1], [], []>} : vector<1x64xf32>, vector<64x256xf32>, vector<1x256xf32> -> vector<1x256xf32>
    %180 = vector.broadcast %179 : vector<1x256xf32> to vector<8x256xf32>
    %181 = arith.mulf %153, %180 : vector<8x256xf32>
    %cst_126 = arith.constant dense<0.000000e+00> : vector<1x256xf32>
    %182 = tpu.matmul %176, %178, %cst_126 {dimension_numbers = #tpu.dot_dimension_numbers<[1], [0], [0], [1], [0, 0, 1, 1], [], []>} : vector<1x64xf32>, vector<64x256xf32>, vector<1x256xf32> -> vector<1x256xf32>
    %183 = vector.broadcast %182 : vector<1x256xf32> to vector<8x256xf32>
    %184 = arith.addf %181, %183 : vector<8x256xf32>
    %cst_127 = arith.constant 0.000000e+00 : f32
    %185 = vector.broadcast %cst_127 : f32 to vector<8x256xf32>
    %186 = arith.cmpf oge, %184, %185 : vector<8x256xf32>
    %cst_128 = arith.constant 2.000000e-01 : f32
    %187 = vector.broadcast %cst_128 : f32 to vector<8x256xf32>
    %188 = arith.mulf %187, %184 : vector<8x256xf32>
    %189 = arith.select %186, %184, %188 : vector<8x256xi1>, vector<8x256xf32>
    %190 = arith.truncf %189 : vector<8x256xf32> to vector<8x256xbf16>
    %c3_i32_129 = arith.constant 3 : i32
    %191 = tpu.memref_slice %arg37[%c3_i32_129] : memref<5x!tpu.dma_semaphore, #tpu.memory_space<semaphore_mem>> -> memref<1x!tpu.dma_semaphore, #tpu.memory_space<semaphore_mem>>
    %192 = tpu.memref_squeeze %191 : memref<1x!tpu.dma_semaphore, #tpu.memory_space<semaphore_mem>> -> memref<!tpu.dma_semaphore, #tpu.memory_space<semaphore_mem>>
    tpu.wait_dma2 semaphore(%192 : memref<!tpu.dma_semaphore, #tpu.memory_space<semaphore_mem>>) src(%arg29 : memref<768x128xbf16, #tpu.memory_space<any>>) dst(%arg35 : memref<768x128xbf16, #tpu.memory_space<vmem>>)
    %c0_130 = arith.constant 0 : index
    %c0_131 = arith.constant 0 : index
    %193 = vector.load %arg35[%c0_130, %c0_131] : memref<768x128xbf16, #tpu.memory_space<vmem>>, vector<768x128xbf16>
    %c0_132 = arith.constant 0 : index
    %c0_133 = arith.constant 0 : index
    %c0_134 = arith.constant 0 : index
    %194 = vector.load %arg16[%c0_132, %c0_133, %c0_134] : memref<3x8x8xbf16, #tpu.memory_space<vmem>>, vector<1x8x8xbf16>
    %195 = vector.shape_cast %194 : vector<1x8x8xbf16> to vector<8x8xbf16>
    %cst_135 = arith.constant dense<0.000000e+00> : vector<8x256xf32>
    %196 = tpu.matmul %195, %190, %cst_135 {dimension_numbers = #tpu.dot_dimension_numbers<[1], [0], [0], [1], [0, 0, 1, 1], [], []>} : vector<8x8xbf16>, vector<8x256xbf16>, vector<8x256xf32> -> vector<8x256xf32>
    %197 = arith.truncf %196 : vector<8x256xf32> to vector<8x256xbf16>
    %c1_136 = arith.constant 1 : index
    %c0_137 = arith.constant 0 : index
    %c0_138 = arith.constant 0 : index
    %198 = vector.load %arg16[%c1_136, %c0_137, %c0_138] : memref<3x8x8xbf16, #tpu.memory_space<vmem>>, vector<1x8x8xbf16>
    %199 = vector.shape_cast %198 : vector<1x8x8xbf16> to vector<8x8xbf16>
    %cst_139 = arith.constant dense<0.000000e+00> : vector<8x256xf32>
    %200 = tpu.matmul %199, %190, %cst_139 {dimension_numbers = #tpu.dot_dimension_numbers<[1], [0], [0], [1], [0, 0, 1, 1], [], []>} : vector<8x8xbf16>, vector<8x256xbf16>, vector<8x256xf32> -> vector<8x256xf32>
    %201 = arith.truncf %200 : vector<8x256xf32> to vector<8x256xbf16>
    %c2_140 = arith.constant 2 : index
    %c0_141 = arith.constant 0 : index
    %c0_142 = arith.constant 0 : index
    %202 = vector.load %arg16[%c2_140, %c0_141, %c0_142] : memref<3x8x8xbf16, #tpu.memory_space<vmem>>, vector<1x8x8xbf16>
    %203 = vector.shape_cast %202 : vector<1x8x8xbf16> to vector<8x8xbf16>
    %cst_143 = arith.constant dense<0.000000e+00> : vector<8x256xf32>
    %204 = tpu.matmul %203, %190, %cst_143 {dimension_numbers = #tpu.dot_dimension_numbers<[1], [0], [0], [1], [0, 0, 1, 1], [], []>} : vector<8x8xbf16>, vector<8x256xbf16>, vector<8x256xf32> -> vector<8x256xf32>
    %205 = arith.truncf %204 : vector<8x256xf32> to vector<8x256xbf16>
    %206 = tpu.concatenate %197, %201, %205 in 1 : vector<8x256xbf16>, vector<8x256xbf16>, vector<8x256xbf16> -> vector<8x768xbf16>
    %cst_144 = arith.constant dense<0.000000e+00> : vector<8x128xf32>
    %207 = tpu.matmul %206, %193, %cst_144 {dimension_numbers = #tpu.dot_dimension_numbers<[1], [0], [0], [1], [0, 0, 1, 1], [], []>} : vector<8x768xbf16>, vector<768x128xbf16>, vector<8x128xf32> -> vector<8x128xf32>
    %cst_145 = arith.constant 0.000000e+00 : f32
    %208 = vector.broadcast %cst_145 : f32 to vector<8x128xf32>
    %209 = arith.cmpf oge, %207, %208 : vector<8x128xf32>
    %cst_146 = arith.constant 2.000000e-01 : f32
    %210 = vector.broadcast %cst_146 : f32 to vector<8x128xf32>
    %211 = arith.mulf %210, %207 : vector<8x128xf32>
    %212 = arith.select %209, %207, %211 : vector<8x128xi1>, vector<8x128xf32>
    %213 = arith.truncf %212 : vector<8x128xf32> to vector<8x128xbf16>
    %c0_147 = arith.constant 0 : index
    %c0_148 = arith.constant 0 : index
    %214 = vector.load %arg18[%c0_147, %c0_148] : memref<384x8xbf16, #tpu.memory_space<vmem>>, vector<384x8xbf16>
    %c0_149 = arith.constant 0 : index
    %c0_150 = arith.constant 0 : index
    %c0_151 = arith.constant 0 : index
    %215 = vector.load %arg17[%c0_149, %c0_150, %c0_151] : memref<3x16x8xbf16, #tpu.memory_space<vmem>>, vector<1x16x8xbf16>
    %216 = vector.shape_cast %215 : vector<1x16x8xbf16> to vector<16x8xbf16>
    %cst_152 = arith.constant dense<0.000000e+00> : vector<16x128xf32>
    %217 = tpu.matmul %216, %213, %cst_152 {dimension_numbers = #tpu.dot_dimension_numbers<[1], [0], [0], [1], [0, 0, 1, 1], [], []>} : vector<16x8xbf16>, vector<8x128xbf16>, vector<16x128xf32> -> vector<16x128xf32>
    %218 = arith.truncf %217 : vector<16x128xf32> to vector<16x128xbf16>
    %c1_153 = arith.constant 1 : index
    %c0_154 = arith.constant 0 : index
    %c0_155 = arith.constant 0 : index
    %219 = vector.load %arg17[%c1_153, %c0_154, %c0_155] : memref<3x16x8xbf16, #tpu.memory_space<vmem>>, vector<1x16x8xbf16>
    %220 = vector.shape_cast %219 : vector<1x16x8xbf16> to vector<16x8xbf16>
    %cst_156 = arith.constant dense<0.000000e+00> : vector<16x128xf32>
    %221 = tpu.matmul %220, %213, %cst_156 {dimension_numbers = #tpu.dot_dimension_numbers<[1], [0], [0], [1], [0, 0, 1, 1], [], []>} : vector<16x8xbf16>, vector<8x128xbf16>, vector<16x128xf32> -> vector<16x128xf32>
    %222 = arith.truncf %221 : vector<16x128xf32> to vector<16x128xbf16>
    %c2_157 = arith.constant 2 : index
    %c0_158 = arith.constant 0 : index
    %c0_159 = arith.constant 0 : index
    %223 = vector.load %arg17[%c2_157, %c0_158, %c0_159] : memref<3x16x8xbf16, #tpu.memory_space<vmem>>, vector<1x16x8xbf16>
    %224 = vector.shape_cast %223 : vector<1x16x8xbf16> to vector<16x8xbf16>
    %cst_160 = arith.constant dense<0.000000e+00> : vector<16x128xf32>
    %225 = tpu.matmul %224, %213, %cst_160 {dimension_numbers = #tpu.dot_dimension_numbers<[1], [0], [0], [1], [0, 0, 1, 1], [], []>} : vector<16x8xbf16>, vector<8x128xbf16>, vector<16x128xf32> -> vector<16x128xf32>
    %226 = arith.truncf %225 : vector<16x128xf32> to vector<16x128xbf16>
    %227 = tpu.concatenate %218, %222, %226 in 1 : vector<16x128xbf16>, vector<16x128xbf16>, vector<16x128xbf16> -> vector<16x384xbf16>
    %cst_161 = arith.constant dense<0.000000e+00> : vector<16x8xf32>
    %228 = tpu.matmul %227, %214, %cst_161 {dimension_numbers = #tpu.dot_dimension_numbers<[1], [0], [0], [1], [0, 0, 1, 1], [], []>} : vector<16x384xbf16>, vector<384x8xbf16>, vector<16x8xf32> -> vector<16x8xf32>
    %c4_i32_162 = arith.constant 4 : i32
    %229 = tpu.memref_slice %arg37[%c4_i32_162] : memref<5x!tpu.dma_semaphore, #tpu.memory_space<semaphore_mem>> -> memref<1x!tpu.dma_semaphore, #tpu.memory_space<semaphore_mem>>
    %230 = tpu.memref_squeeze %229 : memref<1x!tpu.dma_semaphore, #tpu.memory_space<semaphore_mem>> -> memref<!tpu.dma_semaphore, #tpu.memory_space<semaphore_mem>>
    tpu.wait_dma2 semaphore(%230 : memref<!tpu.dma_semaphore, #tpu.memory_space<semaphore_mem>>) src(%arg30 : memref<1024x256xbf16, #tpu.memory_space<any>>) dst(%arg36 : memref<1024x256xbf16, #tpu.memory_space<vmem>>)
    %c0_163 = arith.constant 0 : index
    %c0_164 = arith.constant 0 : index
    %231 = vector.load %arg36[%c0_163, %c0_164] : memref<1024x256xbf16, #tpu.memory_space<vmem>>, vector<1024x256xbf16>
    %c0_165 = arith.constant 0 : index
    %c0_166 = arith.constant 0 : index
    %c0_167 = arith.constant 0 : index
    %232 = vector.load %arg19[%c0_165, %c0_166, %c0_167] : memref<4x4x8xbf16, #tpu.memory_space<vmem>>, vector<1x4x8xbf16>
    %233 = vector.shape_cast %232 : vector<1x4x8xbf16> to vector<4x8xbf16>
    %cst_168 = arith.constant dense<0.000000e+00> : vector<4x256xf32>
    %234 = tpu.matmul %233, %190, %cst_168 {dimension_numbers = #tpu.dot_dimension_numbers<[1], [0], [0], [1], [0, 0, 1, 1], [], []>} : vector<4x8xbf16>, vector<8x256xbf16>, vector<4x256xf32> -> vector<4x256xf32>
    %235 = arith.truncf %234 : vector<4x256xf32> to vector<4x256xbf16>
    %c1_169 = arith.constant 1 : index
    %c0_170 = arith.constant 0 : index
    %c0_171 = arith.constant 0 : index
    %236 = vector.load %arg19[%c1_169, %c0_170, %c0_171] : memref<4x4x8xbf16, #tpu.memory_space<vmem>>, vector<1x4x8xbf16>
    %237 = vector.shape_cast %236 : vector<1x4x8xbf16> to vector<4x8xbf16>
    %cst_172 = arith.constant dense<0.000000e+00> : vector<4x256xf32>
    %238 = tpu.matmul %237, %190, %cst_172 {dimension_numbers = #tpu.dot_dimension_numbers<[1], [0], [0], [1], [0, 0, 1, 1], [], []>} : vector<4x8xbf16>, vector<8x256xbf16>, vector<4x256xf32> -> vector<4x256xf32>
    %239 = arith.truncf %238 : vector<4x256xf32> to vector<4x256xbf16>
    %c2_173 = arith.constant 2 : index
    %c0_174 = arith.constant 0 : index
    %c0_175 = arith.constant 0 : index
    %240 = vector.load %arg19[%c2_173, %c0_174, %c0_175] : memref<4x4x8xbf16, #tpu.memory_space<vmem>>, vector<1x4x8xbf16>
    %241 = vector.shape_cast %240 : vector<1x4x8xbf16> to vector<4x8xbf16>
    %cst_176 = arith.constant dense<0.000000e+00> : vector<4x256xf32>
    %242 = tpu.matmul %241, %190, %cst_176 {dimension_numbers = #tpu.dot_dimension_numbers<[1], [0], [0], [1], [0, 0, 1, 1], [], []>} : vector<4x8xbf16>, vector<8x256xbf16>, vector<4x256xf32> -> vector<4x256xf32>
    %243 = arith.truncf %242 : vector<4x256xf32> to vector<4x256xbf16>
    %c3_177 = arith.constant 3 : index
    %c0_178 = arith.constant 0 : index
    %c0_179 = arith.constant 0 : index
    %244 = vector.load %arg19[%c3_177, %c0_178, %c0_179] : memref<4x4x8xbf16, #tpu.memory_space<vmem>>, vector<1x4x8xbf16>
    %245 = vector.shape_cast %244 : vector<1x4x8xbf16> to vector<4x8xbf16>
    %cst_180 = arith.constant dense<0.000000e+00> : vector<4x256xf32>
    %246 = tpu.matmul %245, %190, %cst_180 {dimension_numbers = #tpu.dot_dimension_numbers<[1], [0], [0], [1], [0, 0, 1, 1], [], []>} : vector<4x8xbf16>, vector<8x256xbf16>, vector<4x256xf32> -> vector<4x256xf32>
    %247 = arith.truncf %246 : vector<4x256xf32> to vector<4x256xbf16>
    %248 = tpu.concatenate %235, %239, %243, %247 in 1 : vector<4x256xbf16>, vector<4x256xbf16>, vector<4x256xbf16>, vector<4x256xbf16> -> vector<4x1024xbf16>
    %cst_181 = arith.constant dense<0.000000e+00> : vector<4x256xf32>
    %249 = tpu.matmul %248, %231, %cst_181 {dimension_numbers = #tpu.dot_dimension_numbers<[1], [0], [0], [1], [0, 0, 1, 1], [], []>} : vector<4x1024xbf16>, vector<1024x256xbf16>, vector<4x256xf32> -> vector<4x256xf32>
    %cst_182 = arith.constant dense<0.000000e+00> : vector<256xf32>
    %250 = vector.multi_reduction <add>, %249, %cst_182 [0] : vector<4x256xf32> to vector<256xf32>
    %251 = vector.shape_cast %250 : vector<256xf32> to vector<1x256xf32>
    %252 = arith.mulf %249, %249 : vector<4x256xf32>
    %cst_183 = arith.constant dense<0.000000e+00> : vector<256xf32>
    %253 = vector.multi_reduction <add>, %252, %cst_183 [0] : vector<4x256xf32> to vector<256xf32>
    %254 = vector.shape_cast %253 : vector<256xf32> to vector<1x256xf32>
    %c0_184 = arith.constant 0 : index
    %c0_185 = arith.constant 0 : index
    %255 = vector.load %arg22[%c0_184, %c0_185] : memref<256x128xbf16, #tpu.memory_space<vmem>>, vector<256x128xbf16>
    %256 = arith.extf %255 : vector<256x128xbf16> to vector<256x128xf32>
    %cst_186 = arith.constant dense<0.000000e+00> : vector<1x128xf32>
    %257 = tpu.matmul %251, %256, %cst_186 {dimension_numbers = #tpu.dot_dimension_numbers<[1], [0], [0], [1], [0, 0, 1, 1], [], []>} : vector<1x256xf32>, vector<256x128xf32>, vector<1x128xf32> -> vector<1x128xf32>
    %cst_187 = arith.constant 1.250000e-01 : f32
    %258 = vector.broadcast %cst_187 : f32 to vector<1x128xf32>
    %259 = arith.mulf %257, %258 : vector<1x128xf32>
    %cst_188 = arith.constant dense<0.000000e+00> : vector<1x128xf32>
    %260 = tpu.matmul %254, %256, %cst_188 {dimension_numbers = #tpu.dot_dimension_numbers<[1], [0], [0], [1], [0, 0, 1, 1], [], []>} : vector<1x256xf32>, vector<256x128xf32>, vector<1x128xf32> -> vector<1x128xf32>
    %cst_189 = arith.constant 1.250000e-01 : f32
    %261 = vector.broadcast %cst_189 : f32 to vector<1x128xf32>
    %262 = arith.mulf %260, %261 : vector<1x128xf32>
    %263 = arith.mulf %259, %259 : vector<1x128xf32>
    %264 = arith.subf %262, %263 : vector<1x128xf32>
    %c0_190 = arith.constant 0 : index
    %c0_191 = arith.constant 0 : index
    %265 = vector.load %arg20[%c0_190, %c0_191] : memref<1x128xf32, #tpu.memory_space<vmem>>, vector<1x128xf32>
    %cst_192 = arith.constant 9.99999974E-6 : f32
    %266 = vector.broadcast %cst_192 : f32 to vector<1x128xf32>
    %267 = arith.addf %264, %266 : vector<1x128xf32>
    %268 = math.rsqrt %267 : vector<1x128xf32>
    %269 = arith.mulf %265, %268 : vector<1x128xf32>
    %c0_193 = arith.constant 0 : index
    %c0_194 = arith.constant 0 : index
    %270 = vector.load %arg21[%c0_193, %c0_194] : memref<1x128xf32, #tpu.memory_space<vmem>>, vector<1x128xf32>
    %271 = arith.mulf %259, %269 : vector<1x128xf32>
    %272 = arith.subf %270, %271 : vector<1x128xf32>
    %c0_195 = arith.constant 0 : index
    %c0_196 = arith.constant 0 : index
    %273 = vector.load %arg23[%c0_195, %c0_196] : memref<128x256xbf16, #tpu.memory_space<vmem>>, vector<128x256xbf16>
    %274 = arith.extf %273 : vector<128x256xbf16> to vector<128x256xf32>
    %cst_197 = arith.constant dense<0.000000e+00> : vector<1x256xf32>
    %275 = tpu.matmul %269, %274, %cst_197 {dimension_numbers = #tpu.dot_dimension_numbers<[1], [0], [0], [1], [0, 0, 1, 1], [], []>} : vector<1x128xf32>, vector<128x256xf32>, vector<1x256xf32> -> vector<1x256xf32>
    %276 = vector.broadcast %275 : vector<1x256xf32> to vector<4x256xf32>
    %277 = arith.mulf %249, %276 : vector<4x256xf32>
    %cst_198 = arith.constant dense<0.000000e+00> : vector<1x256xf32>
    %278 = tpu.matmul %272, %274, %cst_198 {dimension_numbers = #tpu.dot_dimension_numbers<[1], [0], [0], [1], [0, 0, 1, 1], [], []>} : vector<1x128xf32>, vector<128x256xf32>, vector<1x256xf32> -> vector<1x256xf32>
    %279 = vector.broadcast %278 : vector<1x256xf32> to vector<4x256xf32>
    %280 = arith.addf %277, %279 : vector<4x256xf32>
    %cst_199 = arith.constant 0.000000e+00 : f32
    %281 = vector.broadcast %cst_199 : f32 to vector<4x256xf32>
    %282 = arith.cmpf oge, %280, %281 : vector<4x256xf32>
    %cst_200 = arith.constant 2.000000e-01 : f32
    %283 = vector.broadcast %cst_200 : f32 to vector<4x256xf32>
    %284 = arith.mulf %283, %280 : vector<4x256xf32>
    %285 = arith.select %282, %280, %284 : vector<4x256xi1>, vector<4x256xf32>
    %286 = arith.truncf %285 : vector<4x256xf32> to vector<4x256xbf16>
    %c0_201 = arith.constant 0 : index
    %c0_202 = arith.constant 0 : index
    %287 = vector.load %arg25[%c0_201, %c0_202] : memref<512x8xbf16, #tpu.memory_space<vmem>>, vector<512x8xbf16>
    %c0_203 = arith.constant 0 : index
    %c0_204 = arith.constant 0 : index
    %c0_205 = arith.constant 0 : index
    %288 = vector.load %arg24[%c0_203, %c0_204, %c0_205] : memref<2x16x4xbf16, #tpu.memory_space<vmem>>, vector<1x16x4xbf16>
    %289 = vector.shape_cast %288 : vector<1x16x4xbf16> to vector<16x4xbf16>
    %cst_206 = arith.constant dense<0.000000e+00> : vector<16x256xf32>
    %290 = tpu.matmul %289, %286, %cst_206 {dimension_numbers = #tpu.dot_dimension_numbers<[1], [0], [0], [1], [0, 0, 1, 1], [], []>} : vector<16x4xbf16>, vector<4x256xbf16>, vector<16x256xf32> -> vector<16x256xf32>
    %291 = arith.truncf %290 : vector<16x256xf32> to vector<16x256xbf16>
    %c1_207 = arith.constant 1 : index
    %c0_208 = arith.constant 0 : index
    %c0_209 = arith.constant 0 : index
    %292 = vector.load %arg24[%c1_207, %c0_208, %c0_209] : memref<2x16x4xbf16, #tpu.memory_space<vmem>>, vector<1x16x4xbf16>
    %293 = vector.shape_cast %292 : vector<1x16x4xbf16> to vector<16x4xbf16>
    %cst_210 = arith.constant dense<0.000000e+00> : vector<16x256xf32>
    %294 = tpu.matmul %293, %286, %cst_210 {dimension_numbers = #tpu.dot_dimension_numbers<[1], [0], [0], [1], [0, 0, 1, 1], [], []>} : vector<16x4xbf16>, vector<4x256xbf16>, vector<16x256xf32> -> vector<16x256xf32>
    %295 = arith.truncf %294 : vector<16x256xf32> to vector<16x256xbf16>
    %296 = tpu.concatenate %291, %295 in 1 : vector<16x256xbf16>, vector<16x256xbf16> -> vector<16x512xbf16>
    %cst_211 = arith.constant dense<0.000000e+00> : vector<16x8xf32>
    %297 = tpu.matmul %296, %287, %cst_211 {dimension_numbers = #tpu.dot_dimension_numbers<[1], [0], [0], [1], [0, 0, 1, 1], [], []>} : vector<16x512xbf16>, vector<512x8xbf16>, vector<16x8xf32> -> vector<16x8xf32>
    %298 = arith.addf %74, %228 : vector<16x8xf32>
    %299 = arith.addf %298, %297 : vector<16x8xf32>
    %cst_212 = arith.constant 0.333333343 : f32
    %300 = vector.broadcast %cst_212 : f32 to vector<16x8xf32>
    %301 = arith.mulf %299, %300 : vector<16x8xf32>
    %c0_213 = arith.constant 0 : index
    %c0_214 = arith.constant 0 : index
    %302 = vector.load %arg31[%c0_213, %c0_214] : memref<16x8xf32, #tpu.memory_space<vmem>>, vector<16x8xf32>
    tpu.vector_store %arg31[%c0_213, %c0_214], %301 {strides = array<i32>} : memref<16x8xf32, #tpu.memory_space<vmem>>, vector<16x8xf32>,
    return
  }
}

</mosaic_0001>

<bundles_post_ra>
// kernel: forward.1
= control target key start
LH: loop header
LB: loop body
LE: loop exit
PB: predicated region body
PF: predicated region fallthrough
CT: control target
= control target key end

     0   :  { %s12421_s6 = smov 1   ;;  %s12422_s10 = smov 2   ;;  %s14887_s0 = inlined_call_operand.smem [shape: u32[32], index: -1, kind: input, shape index: {}] }
   0x1   :  { %s12492_s5 = sld [smem:[%s14887_s0]]   ;;  %s12423_s14 = smov 3  }
   0x2   :  { %s12497_s9 = sld [smem:[%s14887_s0 + %s12421_s6]]   ;;  %s12424_s18 = smov 4  }
   0x3   :  { %s12502_s13 = sld [smem:[%s14887_s0 + %s12422_s10]]   ;;  %s12425_s22 = smov 5  }
   0x4   :  { %s12507_s17 = sld [smem:[%s14887_s0 + %s12423_s14]]   ;;  %s12426_s26 = smov 6  }
   0x5   :  { %s12512_s21 = sld [smem:[%s14887_s0 + %s12424_s18]]   ;;  %s12427_s30 = smov 7  }
   0x6   :  { %s12517_s25 = sld [smem:[%s14887_s0 + %s12425_s22]]   ;;  %s12428_s4 = smov 8  }
   0x7   :  { %14924 = sst [smem:[#allocation56_spill]] %s12492_s5  ;;  %s12429_s10 = smov 9  }
   0x8   :  { %s12522_s29 = sld [smem:[%s14887_s0 + %s12426_s26]]   ;;  %s12430_s15 = smov 10  }
   0x9   :  { %s12527_s3 = sld [smem:[%s14887_s0 + %s12427_s30]]   ;;  %s12431_s20 = smov 11  }
   0xa   :  { %s12532_s8 = sld [smem:[%s14887_s0 + %s12428_s4]]   ;;  %s12432_s26 = smov 12  }
   0xb   :  { %s12537_s14 = sld [smem:[%s14887_s0 + %s12429_s10]]   ;;  %s12433_s1 = smov 13  }
   0xc   :  { %14925 = sst [smem:[#allocation57_spill]] %s12517_s25  ;;  %s12434_s7 = smov 14  }
   0xd   :  { %s12542_s19 = sld [smem:[%s14887_s0 + %s12430_s15]]   ;;  %s12435_s15 = smov 15  }
   0xe   :  { %s12547_s24 = sld [smem:[%s14887_s0 + %s12431_s20]]   ;;  %s12436_s22 = smov 16  }
   0xf   :  { %14926 = sst [smem:[#allocation58_spill]] %s12527_s3  ;;  %s12437_s28 = smov 17  }
  0x10   :  { %14927 = sst [smem:[#allocation59_spill]] %s12532_s8 }
  0x11   :  { %14928 = sst [smem:[#allocation60_spill]] %s12537_s14 }
  0x12   :  { %s12552_s30 = sld [smem:[%s14887_s0 + %s12432_s26]]  }
  0x13   :  { %s12557_s6 = sld [smem:[%s14887_s0 + %s12433_s1]]  }
  0x14   :  { %s12562_s12 = sld [smem:[%s14887_s0 + %s12434_s7]]   ;;  %s12438_s7 = smov 18  }
  0x15   :  { %s12567_s20 = sld [smem:[%s14887_s0 + %s12435_s15]]   ;;  %s12439_s15 = smov 19  }
  0x16   :  { %s12572_s27 = sld [smem:[%s14887_s0 + %s12436_s22]]   ;;  %s12440_s22 = smov 20  }
  0x17   :  { %s12577_s4 = sld [smem:[%s14887_s0 + %s12437_s28]]   ;;  %s12441_s28 = smov 21  }
  0x18   :  { %s12592_s8 = sld [smem:[%s14887_s0 + %s12440_s22]]   ;;  %s12444_s22 = smov 24  }
  0x19   :  { %s12612_s14 = sld [smem:[%s14887_s0 + %s12444_s22]]   ;;  %s12448_s22 = smov 28  }
  0x1a   :  { %14929 = sst [smem:[#allocation61_spill]] %s12562_s12 }
  0x1b   :  { %14930 = sst [smem:[#allocation62_spill]] %s12567_s20 }
  0x1c   :  { %s12582_s12 = sld [smem:[%s14887_s0 + %s12438_s7]]   ;;  %s12442_s7 = smov 22  }
  0x1d   :  { %14931 = sst [smem:[#allocation63_spill]] %s12577_s4 }
  0x1e   :  { %s12587_s20 = sld [smem:[%s14887_s0 + %s12439_s15]]   ;;  %s12443_s15 = smov 23  }
  0x1f   :  { %s12597_s4 = sld [smem:[%s14887_s0 + %s12441_s28]]   ;;  %s12445_s28 = smov 25  }
  0x20   :  { %s12607_s3 = sld [smem:[%s14887_s0 + %s12443_s15]]   ;;  %s12447_s15 = smov 27  }
  0x21   :  { %14934 = sst [smem:[#allocation66_spill]] %s12612_s14 }
  0x22   :  { %14932 = sst [smem:[#allocation64_spill]] %s12582_s12 }
  0x23   :  { %s12602_s12 = sld [smem:[%s14887_s0 + %s12442_s7]]   ;;  %s12446_s7 = smov 26  }
  0x24   :  { %s12617_s25 = sld [smem:[%s14887_s0 + %s12445_s28]]   ;;  %s12449_s28 = smov 29  }
  0x25   :  { %s12627_s5 = sld [smem:[%s14887_s0 + %s12447_s15]]   ;;  %s12451_s15 = smov 31  }
  0x26   :  { %s12632_s14 = sld [smem:[%s14887_s0 + %s12448_s22]]  }
  0x29   :  { %14933 = sst [smem:[#allocation65_spill]] %s12602_s12 }
  0x2a   :  { %14935 = sst [smem:[#allocation67_spill]] %s12617_s25 }
  0x2b   :  { %s12622_s12 = sld [smem:[%s14887_s0 + %s12446_s7]]   ;;  %s12450_s7 = smov 30  }
  0x2c   :  { %14937 = sst [smem:[#allocation69_spill]] %s12627_s5 }
  0x2d   :  { %s12637_s25 = sld [smem:[%s14887_s0 + %s12449_s28]]  }
  0x2e   :  { %s12647_s5 = sld [smem:[%s14887_s0 + %s12451_s15]]  }
  0x31   :  { %14936 = sst [smem:[#allocation68_spill]] %s12622_s12 }
  0x32   :  { %s12642_s12 = sld [smem:[%s14887_s0 + %s12450_s7]]  }
  0x33   :  { %68 = vsyncpa [#allocation9], 0 }
  0x34   :  { %69 = vsyncpa [#allocation12], 0 }
  0x35   :  { %70 = vsyncpa [#allocation15], 0 }
  0x36   :  { %71 = vsyncpa [#allocation18], 0 }
  0x37   :  { %72 = vsyncpa [#allocation21], 0 }
  0x38   :  { %73 = vsyncpa [#allocation24], 0 }
  0x39   :  { %74 = vsyncpa [#allocation27], 0 }
  0x3a   :  { %75 = vsyncpa [#allocation30], 0 }
  0x3b   :  { %76 = vsyncpa [#allocation10], 0  ;;  %s12452_s22 = smov [#allocation11]   ;;  %s12041_s26 = scalar_lea.hbm %s12502_s13, 8192 }
  0x3c   :  { %s96_s23 = sshll.u32 %s12452_s22, 4  ;;  %p12042_p0 = scmp.ne.s32.totalorder %s12502_s13, %s12041_s26  ;;  %s97_s23 = int_to_ptr.vmem [resolvable:$true] %s96_s23 }
  0x3d   :  { %p12045_p1 = scmp.lt.u32.totalorder %s12041_s26, %s12502_s13 }
  0x3f   :  { %p12047_p2 = pnand %p12045_p1, %p12042_p0 }
  0x41   :  { %12050 = shalt.err (!%p12047_p2)
}
  0x42   :  { %s12051_s0 = scalar_lea.vmem %s97_s23, 8192  ;;  %p12056_p4 = scmp.lt.s32.totalorder %s97_s23, %s97_s23 }
  0x43   :  { %p12052_p3 = scmp.ne.s32.totalorder %s97_s23, %s12051_s0  ;;  %p12057_p5 = scmp.lt.s32.totalorder %s12051_s0, %s12051_s0 }
  0x45   :  { %p12058_p6 = por %p12057_p5, %p12056_p4 }
  0x47   :  { %p12059_p7 = pnand %p12058_p6, %p12052_p3 }
  0x49   :  { %12062 = shalt.err (!%p12059_p7)
}
  0x4a   :  { %s12453_s28 = smov 128   ;;  %s12454_s1 = smov 8  }
  0x4b   :  { %102 = dma.hbm_to_vmem [thread:$0]  %s12502_s13, 8192, %s97_s23, [#allocation12], %s12453_s28, %s12453_s28, %s12454_s1  }
  0x4c   :  { %s12455_s2 = smov [#allocation14]   ;;  %s12456_s10 = smov [#allocation17]  }
  0x4d   :  { %s120_s7 = sshll.u32 %s12455_s2, 4  ;;  %s152_s11 = sshll.u32 %s12456_s10, 4  ;;  %s121_s7 = int_to_ptr.vmem [resolvable:$true] %s120_s7  ;;  %s153_s11 = int_to_ptr.vmem [resolvable:$true] %s152_s11 }
  0x4e   :  { %s12063_s15 = scalar_lea.hbm %s12512_s21, 384 }
  0x4f   :  { %p12064_p8 = scmp.ne.s32.totalorder %s12512_s21, %s12063_s15  ;;  %p12067_p9 = scmp.lt.u32.totalorder %s12063_s15, %s12512_s21 }
  0x51   :  { %p12069_p10 = pnand %p12067_p9, %p12064_p8 }
  0x53   :  { %12072 = shalt.err (!%p12069_p10)
}
  0x54   :  { %s12073_s16 = scalar_lea.vmem %s121_s7, 384  ;;  %p12078_p12 = scmp.lt.s32.totalorder %s121_s7, %s121_s7 }
  0x55   :  { %p12074_p11 = scmp.ne.s32.totalorder %s121_s7, %s12073_s16  ;;  %p12079_p13 = scmp.lt.s32.totalorder %s12073_s16, %s12073_s16 }
  0x57   :  { %p12080_p0 = por %p12079_p13, %p12078_p12 }
  0x59   :  { %p12081_p1 = pnand %p12080_p0, %p12074_p11 }
  0x5b   :  { %12084 = shalt.err (!%p12081_p1)
}
  0x5c   :  { %s12457_s18 = smov 64   ;;  %s12458_s13 = smov 4  }
  0x5d   :  { %126 = dma.hbm_to_vmem [thread:$0]  %s12512_s21, 384, %s121_s7, [#allocation15], %s12457_s18, %s12457_s18, %s12458_s13  }
  0x5e   :  { %s12085_s22 = scalar_lea.hbm %s12542_s19, 512 }
  0x5f   :  { %p12086_p2 = scmp.ne.s32.totalorder %s12542_s19, %s12085_s22  ;;  %p12089_p3 = scmp.lt.u32.totalorder %s12085_s22, %s12542_s19 }
  0x61   :  { %p12091_p4 = pnand %p12089_p3, %p12086_p2 }
  0x63   :  { %12094 = shalt.err (!%p12091_p4)
}
  0x64   :  { %s12095_s23 = scalar_lea.vmem %s153_s11, 512  ;;  %p12100_p6 = scmp.lt.s32.totalorder %s153_s11, %s153_s11 }
  0x65   :  { %p12096_p5 = scmp.ne.s32.totalorder %s153_s11, %s12095_s23  ;;  %p12101_p7 = scmp.lt.s32.totalorder %s12095_s23, %s12095_s23 }
  0x67   :  { %p12102_p8 = por %p12101_p7, %p12100_p6 }
  0x69   :  { %p12103_p9 = pnand %p12102_p8, %p12096_p5 }
  0x6b   :  { %12106 = shalt.err (!%p12103_p9)
}
  0x6c   :  { %158 = dma.hbm_to_vmem [thread:$0]  %s12542_s19, 512, %s153_s11, [#allocation18], %s12453_s28, %s12453_s28, %s12454_s1  }
  0x6d   :  { %s12459_s21 = smov [#allocation20]   ;;  %s12460_s0 = smov [#allocation23]  }
  0x6e   :  { %s177_s26 = sshll.u32 %s12459_s21, 4  ;;  %s200_s2 = sshll.u32 %s12460_s0, 4  ;;  %s178_s26 = int_to_ptr.vmem [resolvable:$true] %s177_s26  ;;  %s201_s2 = int_to_ptr.vmem [resolvable:$true] %s200_s2 }
  0x6f   :  { %s12107_s7 = scalar_lea.hbm %s12552_s30, 16 }
  0x70   :  { %p12108_p10 = scmp.ne.s32.totalorder %s12552_s30, %s12107_s7  ;;  %p12111_p11 = scmp.lt.u32.totalorder %s12107_s7, %s12552_s30 }
  0x72   :  { %p12113_p12 = pnand %p12111_p11, %p12108_p10 }
  0x74   :  { %12116 = shalt.err (!%p12113_p12)
}
  0x75   :  { %s12117_s10 = scalar_lea.vmem %s178_s26, 16  ;;  %s12121_s15 = scalar_lea.vmem %s178_s26, 32 }
  0x76   :  { %p12118_p13 = scmp.ne.s32.totalorder %s178_s26, %s12117_s10  ;;  %p12122_p0 = scmp.lt.s32.totalorder %s178_s26, %s178_s26 }
  0x77   :  { %p12123_p1 = scmp.lt.s32.totalorder %s12121_s15, %s12117_s10 }
  0x79   :  { %p12124_p2 = por %p12123_p1, %p12122_p0 }
  0x7b   :  { %p12125_p3 = pnand %p12124_p2, %p12118_p13 }
  0x7d   :  { %12128 = shalt.err (!%p12125_p3)
}
  0x7e   :  { %180 = dma.hbm_to_vmem [thread:$0]  %s12552_s30, 16, %s178_s26, [#allocation21]  }
  0x7f   :  { %s12129_s19 = scalar_lea.hbm %s12572_s27, 192 }
  0x80   :  { %p12130_p4 = scmp.ne.s32.totalorder %s12572_s27, %s12129_s19  ;;  %p12133_p5 = scmp.lt.u32.totalorder %s12129_s19, %s12572_s27 }
  0x82   :  { %p12135_p6 = pnand %p12133_p5, %p12130_p4 }
  0x84   :  { %12138 = shalt.err (!%p12135_p6)
}
  0x85   :  { %s12139_s11 = scalar_lea.vmem %s201_s2, 192  ;;  %p12144_p8 = scmp.lt.s32.totalorder %s201_s2, %s201_s2 }
  0x86   :  { %p12140_p7 = scmp.ne.s32.totalorder %s201_s2, %s12139_s11  ;;  %p12145_p9 = scmp.lt.s32.totalorder %s12139_s11, %s12139_s11 }
  0x88   :  { %p12146_p10 = por %p12145_p9, %p12144_p8 }
  0x8a   :  { %p12147_p11 = pnand %p12146_p10, %p12140_p7 }
  0x8c   :  { %12150 = shalt.err (!%p12147_p11)
}
  0x8d   :  { %206 = dma.hbm_to_vmem [thread:$0]  %s12572_s27, 192, %s201_s2, [#allocation24], %s12457_s18, %s12457_s18, %s12458_s13  }
  0x8e   :  { %s12461_s30 = smov [#allocation26]   ;;  %s12462_s22 = smov [#allocation8]  }
  0x8f   :  { %s229_s16 = sshll.u32 %s12461_s30, 4  ;;  %s84_s23 = sshll.u32 %s12462_s22, 4  ;;  %s230_s16 = int_to_ptr.vmem [resolvable:$true] %s229_s16  ;;  %s85_s23 = int_to_ptr.vmem [resolvable:$true] %s84_s23 }
  0x90   :  { %s12151_s21 = scalar_lea.hbm %s12592_s8, 16 }
  0x91   :  { %p12152_p12 = scmp.ne.s32.totalorder %s12592_s8, %s12151_s21  ;;  %p12155_p13 = scmp.lt.u32.totalorder %s12151_s21, %s12592_s8 }
  0x93   :  { %p12157_p0 = pnand %p12155_p13, %p12152_p12 }
  0x95   :  { %12160 = shalt.err (!%p12157_p0)
}
  0x96   :  { %s12161_s26 = scalar_lea.vmem %s230_s16, 16  ;;  %s12165_s0 = scalar_lea.vmem %s230_s16, 32 }
  0x97   :  { %p12162_p1 = scmp.ne.s32.totalorder %s230_s16, %s12161_s26  ;;  %p12166_p2 = scmp.lt.s32.totalorder %s230_s16, %s230_s16 }
  0x98   :  { %p12167_p3 = scmp.lt.s32.totalorder %s12165_s0, %s12161_s26 }
  0x9a   :  { %p12168_p4 = por %p12167_p3, %p12166_p2 }
  0x9c   :  { %p12169_p5 = pnand %p12168_p4, %p12162_p1 }
  0x9e   :  { %12172 = shalt.err (!%p12169_p5)
}
  0x9f   :  { %232 = dma.hbm_to_vmem [thread:$0]  %s12592_s8, 16, %s230_s16, [#allocation27]  }
  0xa0   :  { %s12173_s27 = scalar_lea.hbm %s12497_s9, 1024 }
  0xa1   :  { %p12174_p6 = scmp.ne.s32.totalorder %s12497_s9, %s12173_s27  ;;  %p12177_p7 = scmp.lt.u32.totalorder %s12173_s27, %s12497_s9 }
  0xa3   :  { %p12179_p8 = pnand %p12177_p7, %p12174_p6 }
  0xa5   :  { %12182 = shalt.err (!%p12179_p8)
}
  0xa6   :  { %s12183_s2 = scalar_lea.vmem %s85_s23, 1024  ;;  %p12188_p10 = scmp.lt.s32.totalorder %s85_s23, %s85_s23 }
  0xa7   :  { %p12184_p9 = scmp.ne.s32.totalorder %s85_s23, %s12183_s2  ;;  %p12189_p11 = scmp.lt.s32.totalorder %s12183_s2, %s12183_s2 }
  0xa9   :  { %p12190_p12 = por %p12189_p11, %p12188_p10 }
  0xab   :  { %p12191_p13 = pnand %p12190_p12, %p12184_p9 }
  0xad   :  { %12194 = shalt.err (!%p12191_p13)
}
  0xae   :  { %90 = dma.hbm_to_vmem [thread:$0]  %s12497_s9, 1024, %s85_s23, [#allocation9], %s12457_s18, %s12457_s18, %s12458_s13  }
  0xaf   :  { %s12463_s8 = smov [#allocation13]   ;;  %s12464_s10 = smov [#allocation16]  }
  0xb0   :  { %s108_s7 = sshll.u32 %s12463_s8, 4  ;;  %s134_s15 = sshll.u32 %s12464_s10, 4  ;;  %s109_s7 = int_to_ptr.vmem [resolvable:$true] %s108_s7  ;;  %s135_s15 = int_to_ptr.vmem [resolvable:$true] %s134_s15 }
  0xb1   :  { %s12195_s19 = scalar_lea.hbm %s12507_s17, 768 }
  0xb2   :  { %p12196_p0 = scmp.ne.s32.totalorder %s12507_s17, %s12195_s19  ;;  %p12199_p1 = scmp.lt.u32.totalorder %s12195_s19, %s12507_s17 }
  0xb4   :  { %p12201_p2 = pnand %p12199_p1, %p12196_p0 }
  0xb6   :  { %12204 = shalt.err (!%p12201_p2)
}
  0xb7   :  { %s12205_s11 = scalar_lea.vmem %s109_s7, 768  ;;  %p12210_p4 = scmp.lt.s32.totalorder %s109_s7, %s109_s7 }
  0xb8   :  { %p12206_p3 = scmp.ne.s32.totalorder %s109_s7, %s12205_s11  ;;  %p12211_p5 = scmp.lt.s32.totalorder %s12205_s11, %s12205_s11 }
  0xba   :  { %p12212_p6 = por %p12211_p5, %p12210_p4 }
  0xbc   :  { %p12213_p7 = pnand %p12212_p6, %p12206_p3 }
  0xbe   :  { %12216 = shalt.err (!%p12213_p7)
}
  0xbf   :  { %114 = dma.hbm_to_vmem [thread:$0]  %s12507_s17, 768, %s109_s7, [#allocation12], %s12457_s18, %s12457_s18, %s12458_s13  }
  0xc0   :  { %s12217_s9 = scalar_lea.hbm %s12522_s29, 512 }
  0xc1   :  { %p12218_p8 = scmp.ne.s32.totalorder %s12522_s29, %s12217_s9  ;;  %p12221_p9 = scmp.lt.u32.totalorder %s12217_s9, %s12522_s29 }
  0xc3   :  { %p12223_p10 = pnand %p12221_p9, %p12218_p8 }
  0xc5   :  { %12226 = shalt.err (!%p12223_p10)
}
  0xc6   :  { %s12227_s30 = scalar_lea.vmem %s135_s15, 512  ;;  %p12232_p12 = scmp.lt.s32.totalorder %s135_s15, %s135_s15 }
  0xc7   :  { %p12228_p11 = scmp.ne.s32.totalorder %s135_s15, %s12227_s30  ;;  %p12233_p13 = scmp.lt.s32.totalorder %s12227_s30, %s12227_s30 }
  0xc9   :  { %p12234_p0 = por %p12233_p13, %p12232_p12 }
  0xcb   :  { %p12235_p1 = pnand %p12234_p0, %p12228_p11 }
  0xcd   :  { %12238 = shalt.err (!%p12235_p1)
}
  0xce   :  { %140 = dma.hbm_to_vmem [thread:$0]  %s12522_s29, 512, %s135_s15, [#allocation15], %s12457_s18, %s12457_s18, %s12458_s13  }
  0xcf   :  { %s12465_s17 = smov [#allocation19]   ;;  %s12466_s22 = smov [#allocation22]  }
  0xd0   :  { %s164_s16 = sshll.u32 %s12465_s17, 4  ;;  %s187_s23 = sshll.u32 %s12466_s22, 4  ;;  %s165_s16 = int_to_ptr.vmem [resolvable:$true] %s164_s16  ;;  %s188_s23 = int_to_ptr.vmem [resolvable:$true] %s187_s23 }
  0xd1   :  { %s12239_s21 = scalar_lea.hbm %s12547_s24, 256 }
  0xd2   :  { %p12240_p2 = scmp.ne.s32.totalorder %s12547_s24, %s12239_s21  ;;  %p12243_p3 = scmp.lt.u32.totalorder %s12239_s21, %s12547_s24 }
  0xd4   :  { %p12245_p4 = pnand %p12243_p3, %p12240_p2 }
  0xd6   :  { %12248 = shalt.err (!%p12245_p4)
}
  0xd7   :  { %s12249_s26 = scalar_lea.vmem %s165_s16, 256  ;;  %p12254_p6 = scmp.lt.s32.totalorder %s165_s16, %s165_s16 }
  0xd8   :  { %p12250_p5 = scmp.ne.s32.totalorder %s165_s16, %s12249_s26  ;;  %p12255_p7 = scmp.lt.s32.totalorder %s12249_s26, %s12249_s26 }
  0xda   :  { %p12256_p8 = por %p12255_p7, %p12254_p6 }
  0xdc   :  { %p12257_p9 = pnand %p12256_p8, %p12250_p5 }
  0xde   :  { %12260 = shalt.err (!%p12257_p9)
}
  0xdf   :  { %170 = dma.hbm_to_vmem [thread:$0]  %s12547_s24, 256, %s165_s16, [#allocation18], %s12457_s18, %s12457_s18, %s12458_s13  }
  0xe0   :  { %s12261_s29 = scalar_lea.hbm %s12557_s6, 16 }
  0xe1   :  { %p12262_p10 = scmp.ne.s32.totalorder %s12557_s6, %s12261_s29  ;;  %p12265_p11 = scmp.lt.u32.totalorder %s12261_s29, %s12557_s6 }
  0xe3   :  { %p12267_p12 = pnand %p12265_p11, %p12262_p10 }
  0xe5   :  { %12270 = shalt.err (!%p12267_p12)
}
  0xe6   :  { %s12271_s0 = scalar_lea.vmem %s188_s23, 16  ;;  %s12275_s27 = scalar_lea.vmem %s188_s23, 32 }
  0xe7   :  { %p12272_p13 = scmp.ne.s32.totalorder %s188_s23, %s12271_s0  ;;  %p12276_p0 = scmp.lt.s32.totalorder %s188_s23, %s188_s23 }
  0xe8   :  { %p12277_p1 = scmp.lt.s32.totalorder %s12275_s27, %s12271_s0 }
  0xea   :  { %p12278_p2 = por %p12277_p1, %p12276_p0 }
  0xec   :  { %p12279_p3 = pnand %p12278_p2, %p12272_p13 }
  0xee   :  { %12282 = shalt.err (!%p12279_p3)
}
  0xef   :  { %190 = dma.hbm_to_vmem [thread:$0]  %s12557_s6, 16, %s188_s23, [#allocation21]  }
  0xf0   :  { %s12467_s24 = smov [#allocation25]   ;;  %s12283_s8 = scalar_lea.hbm %s12587_s20, 128 }
  0xf1   :  { %s216_s2 = sshll.u32 %s12467_s24, 4  ;;  %p12284_p4 = scmp.ne.s32.totalorder %s12587_s20, %s12283_s8  ;;  %s217_s2 = int_to_ptr.vmem [resolvable:$true] %s216_s2 }
  0xf2   :  { %p12287_p5 = scmp.lt.u32.totalorder %s12283_s8, %s12587_s20 }
  0xf4   :  { %p12289_p6 = pnand %p12287_p5, %p12284_p4 }
  0xf6   :  { %12292 = shalt.err (!%p12289_p6)
}
  0xf7   :  { %s12293_s7 = scalar_lea.vmem %s217_s2, 128  ;;  %p12298_p8 = scmp.lt.s32.totalorder %s217_s2, %s217_s2 }
  0xf8   :  { %p12294_p7 = scmp.ne.s32.totalorder %s217_s2, %s12293_s7  ;;  %p12299_p9 = scmp.lt.s32.totalorder %s12293_s7, %s12293_s7 }
  0xfa   :  { %p12300_p10 = por %p12299_p9, %p12298_p8 }
  0xfc   :  { %p12301_p11 = pnand %p12300_p10, %p12294_p7 }
  0xfe   :  { %12304 = shalt.err (!%p12301_p11)
}
  0xff   :  { %s12468_s10 = smov 32   ;;  %s12469_s6 = smov 2  }
 0x100   :  { %222 = dma.hbm_to_vmem [thread:$0]  %s12587_s20, 128, %s217_s2, [#allocation24], %s12468_s10, %s12468_s10, %s12469_s6  }
 0x101   :  { %s12470_s15 = smov [#allocation28]   ;;  %s12471_s11 = smov [#allocation29]  }
 0x102   :  { %s239_s19 = sshll.u32 %s12470_s15, 4  ;;  %s250_s9 = sshll.u32 %s12471_s11, 4  ;;  %s240_s19 = int_to_ptr.vmem [resolvable:$true] %s239_s19  ;;  %s12722_s9 = int_to_ptr.vmem [resolvable:$true] %s250_s9 }
 0x103   :  { %s12305_s30 = scalar_lea.hbm %s12597_s4, 16 }
 0x104   :  { %p12306_p12 = scmp.ne.s32.totalorder %s12597_s4, %s12305_s30  ;;  %p12309_p13 = scmp.lt.u32.totalorder %s12305_s30, %s12597_s4 }
 0x106   :  { %p12311_p0 = pnand %p12309_p13, %p12306_p12 }
 0x108   :  { %12314 = shalt.err (!%p12311_p0)
}
 0x109   :  { %s12315_s17 = scalar_lea.vmem %s240_s19, 16  ;;  %s12319_s16 = scalar_lea.vmem %s240_s19, 32 }
 0x10a   :  { %p12316_p1 = scmp.ne.s32.totalorder %s240_s19, %s12315_s17  ;;  %p12320_p2 = scmp.lt.s32.totalorder %s240_s19, %s240_s19 }
 0x10b   :  { %p12321_p3 = scmp.lt.s32.totalorder %s12319_s16, %s12315_s17 }
 0x10d   :  { %p12322_p4 = por %p12321_p3, %p12320_p2 }
 0x10f   :  { %p12323_p5 = pnand %p12322_p4, %p12316_p1 }
 0x111   :  { %12326 = shalt.err (!%p12323_p5)
}
 0x112   :  { %242 = dma.hbm_to_vmem [thread:$0]  %s12597_s4, 16, %s240_s19, [#allocation27]  }
 0x113   :  { %s12327_s20 = scalar_lea.hbm %s12607_s3, 2048 }
 0x114   :  { %p12328_p6 = scmp.ne.s32.totalorder %s12607_s3, %s12327_s20  ;;  %p12331_p7 = scmp.lt.u32.totalorder %s12327_s20, %s12607_s3 }
 0x116   :  { %p12333_p8 = pnand %p12331_p7, %p12328_p6 }
 0x118   :  { %12336 = shalt.err (!%p12333_p8)
}
 0x119   :  { %s12337_s22 = scalar_lea.vmem %s12722_s9, 2048  ;;  %p12342_p10 = scmp.lt.s32.totalorder %s12722_s9, %s12722_s9 }
 0x11a   :  { %p12338_p9 = scmp.ne.s32.totalorder %s12722_s9, %s12337_s22  ;;  %p12343_p11 = scmp.lt.s32.totalorder %s12337_s22, %s12337_s22 }
 0x11c   :  { %p12344_p12 = por %p12343_p11, %p12342_p10 }
 0x11e   :  { %p12345_p13 = pnand %p12344_p12, %p12338_p9 }
 0x120   :  { %12348 = shalt.err (!%p12345_p13)
}
 0x121   :  { %256 = dma.hbm_to_vmem [thread:$0]  %s12607_s3, 2048, %s12722_s9, [#allocation30], %s12453_s28, %s12453_s28, %s12454_s1  }
 0x122   :  { %12393 = dma.done.wait [#allocation9], 1024  }
 0x123   :  { %12394 = vsyncadd [#allocation9], 4294966272 }
 0x124   :  { %12395 = dma.done.wait [#allocation12], 8960  }
 0x125   :  { %12396 = vsyncadd [#allocation12], 4294958336 }
 0x126   :  { %12397 = dma.done.wait [#allocation15], 896  }
 0x127   :  { %12398 = vsyncadd [#allocation15], 4294966400 }
 0x128   :  { %12399 = dma.done.wait [#allocation18], 768  }
 0x129   :  { %12400 = vsyncadd [#allocation18], 4294966528 }
 0x12a   :  { %12401 = dma.done.wait [#allocation21], 32  }
 0x12b   :  { %12402 = vsyncadd [#allocation21], 4294967264 }
 0x12c   :  { %12403 = dma.done.wait [#allocation24], 320  }
 0x12d   :  { %12404 = vsyncadd [#allocation24], 4294966976 }
 0x12e   :  { %12405 = dma.done.wait [#allocation27], 32  }
 0x12f   :  { %12406 = vsyncadd [#allocation27], 4294967264 }
 0x130   :  { %12407 = dma.done.wait [#allocation30], 2048  }
 0x131   :  { %12408 = vsyncadd [#allocation30], 4294965248  ;;  %s14938_s4 = sld [smem:[#allocation68_spill]] }
 0x137   :  { %v321_v0 = vld [vmem:[%s14938_s4] sm:$0xf]  ;;  %v323_v1 = vld [vmem:[%s14938_s4 + $0x10] sm:$0xf]  ;;  %v325_v2 = vld [vmem:[%s14938_s4 + $0x4] sm:$0xf] }
 0x138   :  { %322 = vst [vmem:[#allocation2] sm:$0xf] %v321_v0  ;;  %324 = vst [vmem:[#allocation2 + $0x4] sm:$0xf] %v323_v1  ;;  %v327_v3 = vld [vmem:[%s14938_s4 + $0x14] sm:$0xf] }
 0x139   :  { %326 = vst [vmem:[#allocation2 + $0x8] sm:$0xf] %v325_v2  ;;  %v329_v4 = vld [vmem:[%s14938_s4 + $0x8] sm:$0xf]  ;;  %v331_v5 = vld [vmem:[%s14938_s4 + $0x18] sm:$0xf] }
 0x13a   :  { %328 = vst [vmem:[#allocation2 + $0xc] sm:$0xf] %v327_v3  ;;  %330 = vst [vmem:[#allocation2 + $0x10] sm:$0xf] %v329_v4  ;;  %v333_v6 = vld [vmem:[%s14938_s4 + $0xc] sm:$0xf] }
 0x13b   :  { %332 = vst [vmem:[#allocation2 + $0x14] sm:$0xf] %v331_v5  ;;  %v335_v7 = vld [vmem:[%s14938_s4 + $0x1c] sm:$0xf]  ;;  %v337_v8 = vld [vmem:[%s14938_s4 + $0x20] sm:$0xf] }
 0x13c   :  { %334 = vst [vmem:[#allocation2 + $0x18] sm:$0xf] %v333_v6  ;;  %336 = vst [vmem:[#allocation2 + $0x1c] sm:$0xf] %v335_v7  ;;  %v339_v9 = vld [vmem:[%s14938_s4 + $0x30] sm:$0xf] }
 0x13d   :  { %338 = vst [vmem:[#allocation2 + $0x20] sm:$0xf] %v337_v8  ;;  %v341_v10 = vld [vmem:[%s14938_s4 + $0x24] sm:$0xf]  ;;  %v343_v11 = vld [vmem:[%s14938_s4 + $0x34] sm:$0xf] }
 0x13e   :  { %340 = vst [vmem:[#allocation2 + $0x24] sm:$0xf] %v339_v9  ;;  %342 = vst [vmem:[#allocation2 + $0x28] sm:$0xf] %v341_v10  ;;  %v345_v12 = vld [vmem:[%s14938_s4 + $0x28] sm:$0xf] }
 0x13f   :  { %344 = vst [vmem:[#allocation2 + $0x2c] sm:$0xf] %v343_v11  ;;  %v347_v13 = vld [vmem:[%s14938_s4 + $0x38] sm:$0xf]  ;;  %v349_v14 = vld [vmem:[%s14938_s4 + $0x2c] sm:$0xf] }
 0x140   :  { %346 = vst [vmem:[#allocation2 + $0x30] sm:$0xf] %v345_v12  ;;  %348 = vst [vmem:[#allocation2 + $0x34] sm:$0xf] %v347_v13  ;;  %v351_v15 = vld [vmem:[%s14938_s4 + $0x3c] sm:$0xf] }
 0x141   :  { %350 = vst [vmem:[#allocation2 + $0x38] sm:$0xf] %v349_v14  ;;  %v353_v16 = vld [vmem:[%s14938_s4 + $0x40] sm:$0xf]  ;;  %v355_v17 = vld [vmem:[%s14938_s4 + $0x50] sm:$0xf] }
 0x142   :  { %352 = vst [vmem:[#allocation2 + $0x3c] sm:$0xf] %v351_v15  ;;  %354 = vst [vmem:[#allocation2 + $0x40] sm:$0xf] %v353_v16  ;;  %v357_v18 = vld [vmem:[%s14938_s4 + $0x44] sm:$0xf] }
 0x143   :  { %356 = vst [vmem:[#allocation2 + $0x44] sm:$0xf] %v355_v17  ;;  %v359_v19 = vld [vmem:[%s14938_s4 + $0x54] sm:$0xf]  ;;  %v361_v20 = vld [vmem:[%s14938_s4 + $0x48] sm:$0xf] }
 0x144   :  { %358 = vst [vmem:[#allocation2 + $0x48] sm:$0xf] %v357_v18  ;;  %360 = vst [vmem:[#allocation2 + $0x4c] sm:$0xf] %v359_v19  ;;  %v363_v21 = vld [vmem:[%s14938_s4 + $0x58] sm:$0xf] }
 0x145   :  { %362 = vst [vmem:[#allocation2 + $0x50] sm:$0xf] %v361_v20  ;;  %v365_v22 = vld [vmem:[%s14938_s4 + $0x4c] sm:$0xf]  ;;  %v367_v23 = vld [vmem:[%s14938_s4 + $0x5c] sm:$0xf] }
 0x146   :  { %364 = vst [vmem:[#allocation2 + $0x54] sm:$0xf] %v363_v21  ;;  %366 = vst [vmem:[#allocation2 + $0x58] sm:$0xf] %v365_v22  ;;  %v369_v24 = vld [vmem:[%s14938_s4 + $0x60] sm:$0xf] }
 0x147   :  { %368 = vst [vmem:[#allocation2 + $0x5c] sm:$0xf] %v367_v23  ;;  %v371_v25 = vld [vmem:[%s14938_s4 + $0x70] sm:$0xf]  ;;  %v373_v26 = vld [vmem:[%s14938_s4 + $0x64] sm:$0xf] }
 0x148   :  { %370 = vst [vmem:[#allocation2 + $0x60] sm:$0xf] %v369_v24  ;;  %372 = vst [vmem:[#allocation2 + $0x64] sm:$0xf] %v371_v25  ;;  %v375_v27 = vld [vmem:[%s14938_s4 + $0x74] sm:$0xf] }
 0x149   :  { %374 = vst [vmem:[#allocation2 + $0x68] sm:$0xf] %v373_v26  ;;  %v377_v28 = vld [vmem:[%s14938_s4 + $0x68] sm:$0xf]  ;;  %v379_v29 = vld [vmem:[%s14938_s4 + $0x78] sm:$0xf] }
 0x14a   :  { %376 = vst [vmem:[#allocation2 + $0x6c] sm:$0xf] %v375_v27  ;;  %378 = vst [vmem:[#allocation2 + $0x70] sm:$0xf] %v377_v28  ;;  %v381_v30 = vld [vmem:[%s14938_s4 + $0x6c] sm:$0xf] }
 0x14b   :  { %380 = vst [vmem:[#allocation2 + $0x74] sm:$0xf] %v379_v29  ;;  %v383_v31 = vld [vmem:[%s14938_s4 + $0x7c] sm:$0xf]  ;;  %v385_v32 = vld [vmem:[%s14938_s4 + $0x80] sm:$0xf] }
 0x14c   :  { %382 = vst [vmem:[#allocation2 + $0x78] sm:$0xf] %v381_v30  ;;  %384 = vst [vmem:[#allocation2 + $0x7c] sm:$0xf] %v383_v31  ;;  %v387_v33 = vld [vmem:[%s14938_s4 + $0x90] sm:$0xf] }
 0x14d   :  { %386 = vst [vmem:[#allocation2 + $0x80] sm:$0xf] %v385_v32  ;;  %v389_v34 = vld [vmem:[%s14938_s4 + $0x84] sm:$0xf]  ;;  %v391_v35 = vld [vmem:[%s14938_s4 + $0x94] sm:$0xf] }
 0x14e   :  { %388 = vst [vmem:[#allocation2 + $0x84] sm:$0xf] %v387_v33  ;;  %390 = vst [vmem:[#allocation2 + $0x88] sm:$0xf] %v389_v34  ;;  %v393_v36 = vld [vmem:[%s14938_s4 + $0x88] sm:$0xf] }
 0x14f   :  { %392 = vst [vmem:[#allocation2 + $0x8c] sm:$0xf] %v391_v35  ;;  %v395_v37 = vld [vmem:[%s14938_s4 + $0x98] sm:$0xf]  ;;  %v397_v38 = vld [vmem:[%s14938_s4 + $0x8c] sm:$0xf] }
 0x150   :  { %394 = vst [vmem:[#allocation2 + $0x90] sm:$0xf] %v393_v36  ;;  %396 = vst [vmem:[#allocation2 + $0x94] sm:$0xf] %v395_v37  ;;  %v399_v39 = vld [vmem:[%s14938_s4 + $0x9c] sm:$0xf] }
 0x151   :  { %398 = vst [vmem:[#allocation2 + $0x98] sm:$0xf] %v397_v38  ;;  %v401_v40 = vld [vmem:[%s14938_s4 + $0xa0] sm:$0xf]  ;;  %v403_v41 = vld [vmem:[%s14938_s4 + $0xb0] sm:$0xf] }
 0x152   :  { %400 = vst [vmem:[#allocation2 + $0x9c] sm:$0xf] %v399_v39  ;;  %402 = vst [vmem:[#allocation2 + $0xa0] sm:$0xf] %v401_v40  ;;  %v405_v42 = vld [vmem:[%s14938_s4 + $0xa4] sm:$0xf] }
 0x153   :  { %404 = vst [vmem:[#allocation2 + $0xa4] sm:$0xf] %v403_v41  ;;  %v407_v43 = vld [vmem:[%s14938_s4 + $0xb4] sm:$0xf]  ;;  %v409_v44 = vld [vmem:[%s14938_s4 + $0xa8] sm:$0xf] }
 0x154   :  { %406 = vst [vmem:[#allocation2 + $0xa8] sm:$0xf] %v405_v42  ;;  %408 = vst [vmem:[#allocation2 + $0xac] sm:$0xf] %v407_v43  ;;  %v411_v45 = vld [vmem:[%s14938_s4 + $0xb8] sm:$0xf] }
 0x155   :  { %410 = vst [vmem:[#allocation2 + $0xb0] sm:$0xf] %v409_v44  ;;  %v413_v46 = vld [vmem:[%s14938_s4 + $0xac] sm:$0xf]  ;;  %v415_v47 = vld [vmem:[%s14938_s4 + $0xbc] sm:$0xf] }
 0x156   :  { %412 = vst [vmem:[#allocation2 + $0xb4] sm:$0xf] %v411_v45  ;;  %414 = vst [vmem:[#allocation2 + $0xb8] sm:$0xf] %v413_v46  ;;  %v417_v48 = vld [vmem:[%s14938_s4 + $0xc0] sm:$0xf] }
 0x157   :  { %416 = vst [vmem:[#allocation2 + $0xbc] sm:$0xf] %v415_v47  ;;  %v419_v49 = vld [vmem:[%s14938_s4 + $0xd0] sm:$0xf]  ;;  %v421_v50 = vld [vmem:[%s14938_s4 + $0xc4] sm:$0xf] }
 0x158   :  { %418 = vst [vmem:[#allocation2 + $0xc0] sm:$0xf] %v417_v48  ;;  %420 = vst [vmem:[#allocation2 + $0xc4] sm:$0xf] %v419_v49  ;;  %v423_v51 = vld [vmem:[%s14938_s4 + $0xd4] sm:$0xf] }
 0x159   :  { %422 = vst [vmem:[#allocation2 + $0xc8] sm:$0xf] %v421_v50  ;;  %v425_v52 = vld [vmem:[%s14938_s4 + $0xc8] sm:$0xf]  ;;  %v427_v53 = vld [vmem:[%s14938_s4 + $0xd8] sm:$0xf] }
 0x15a   :  { %424 = vst [vmem:[#allocation2 + $0xcc] sm:$0xf] %v423_v51  ;;  %426 = vst [vmem:[#allocation2 + $0xd0] sm:$0xf] %v425_v52  ;;  %v429_v54 = vld [vmem:[%s14938_s4 + $0xcc] sm:$0xf] }
 0x15b   :  { %428 = vst [vmem:[#allocation2 + $0xd4] sm:$0xf] %v427_v53  ;;  %v431_v55 = vld [vmem:[%s14938_s4 + $0xdc] sm:$0xf]  ;;  %v433_v56 = vld [vmem:[%s14938_s4 + $0xe0] sm:$0xf] }
 0x15c   :  { %430 = vst [vmem:[#allocation2 + $0xd8] sm:$0xf] %v429_v54  ;;  %432 = vst [vmem:[#allocation2 + $0xdc] sm:$0xf] %v431_v55  ;;  %v435_v57 = vld [vmem:[%s14938_s4 + $0xf0] sm:$0xf] }
 0x15d   :  { %434 = vst [vmem:[#allocation2 + $0xe0] sm:$0xf] %v433_v56  ;;  %v437_v58 = vld [vmem:[%s14938_s4 + $0xe4] sm:$0xf]  ;;  %v439_v59 = vld [vmem:[%s14938_s4 + $0xf4] sm:$0xf] }
 0x15e   :  { %436 = vst [vmem:[#allocation2 + $0xe4] sm:$0xf] %v435_v57  ;;  %438 = vst [vmem:[#allocation2 + $0xe8] sm:$0xf] %v437_v58  ;;  %v441_v60 = vld [vmem:[%s14938_s4 + $0xe8] sm:$0xf] }
 0x15f   :  { %440 = vst [vmem:[#allocation2 + $0xec] sm:$0xf] %v439_v59  ;;  %v443_v61 = vld [vmem:[%s14938_s4 + $0xf8] sm:$0xf]  ;;  %v445_v62 = vld [vmem:[%s14938_s4 + $0xec] sm:$0xf] }
 0x160   :  { %442 = vst [vmem:[#allocation2 + $0xf0] sm:$0xf] %v441_v60  ;;  %444 = vst [vmem:[#allocation2 + $0xf4] sm:$0xf] %v443_v61  ;;  %v447_v63 = vld [vmem:[%s14938_s4 + $0xfc] sm:$0xf] }
 0x161   :  { %446 = vst [vmem:[#allocation2 + $0xf8] sm:$0xf] %v445_v62  ;;  %v449_v0 = vld [vmem:[%s14938_s4 + $0x100] sm:$0xf]  ;;  %v451_v1 = vld [vmem:[%s14938_s4 + $0x110] sm:$0xf] }
 0x162   :  { %448 = vst [vmem:[#allocation2 + $0xfc] sm:$0xf] %v447_v63  ;;  %450 = vst [vmem:[#allocation2 + $0x100] sm:$0xf] %v449_v0  ;;  %v453_v2 = vld [vmem:[%s14938_s4 + $0x104] sm:$0xf] }
 0x163   :  { %452 = vst [vmem:[#allocation2 + $0x104] sm:$0xf] %v451_v1  ;;  %v455_v3 = vld [vmem:[%s14938_s4 + $0x114] sm:$0xf]  ;;  %v457_v4 = vld [vmem:[%s14938_s4 + $0x108] sm:$0xf] }
 0x164   :  { %454 = vst [vmem:[#allocation2 + $0x108] sm:$0xf] %v453_v2  ;;  %456 = vst [vmem:[#allocation2 + $0x10c] sm:$0xf] %v455_v3  ;;  %v459_v5 = vld [vmem:[%s14938_s4 + $0x118] sm:$0xf] }
 0x165   :  { %458 = vst [vmem:[#allocation2 + $0x110] sm:$0xf] %v457_v4  ;;  %v461_v6 = vld [vmem:[%s14938_s4 + $0x10c] sm:$0xf]  ;;  %v463_v7 = vld [vmem:[%s14938_s4 + $0x11c] sm:$0xf] }
 0x166   :  { %460 = vst [vmem:[#allocation2 + $0x114] sm:$0xf] %v459_v5  ;;  %462 = vst [vmem:[#allocation2 + $0x118] sm:$0xf] %v461_v6  ;;  %v465_v8 = vld [vmem:[%s14938_s4 + $0x120] sm:$0xf] }
 0x167   :  { %464 = vst [vmem:[#allocation2 + $0x11c] sm:$0xf] %v463_v7  ;;  %v467_v9 = vld [vmem:[%s14938_s4 + $0x130] sm:$0xf]  ;;  %v469_v10 = vld [vmem:[%s14938_s4 + $0x124] sm:$0xf] }
 0x168   :  { %466 = vst [vmem:[#allocation2 + $0x120] sm:$0xf] %v465_v8  ;;  %468 = vst [vmem:[#allocation2 + $0x124] sm:$0xf] %v467_v9  ;;  %v471_v11 = vld [vmem:[%s14938_s4 + $0x134] sm:$0xf] }
 0x169   :  { %470 = vst [vmem:[#allocation2 + $0x128] sm:$0xf] %v469_v10  ;;  %v473_v12 = vld [vmem:[%s14938_s4 + $0x128] sm:$0xf]  ;;  %v475_v13 = vld [vmem:[%s14938_s4 + $0x138] sm:$0xf] }
 0x16a   :  { %472 = vst [vmem:[#allocation2 + $0x12c] sm:$0xf] %v471_v11  ;;  %474 = vst [vmem:[#allocation2 + $0x130] sm:$0xf] %v473_v12  ;;  %v477_v14 = vld [vmem:[%s14938_s4 + $0x12c] sm:$0xf] }
 0x16b   :  { %476 = vst [vmem:[#allocation2 + $0x134] sm:$0xf] %v475_v13  ;;  %v479_v15 = vld [vmem:[%s14938_s4 + $0x13c] sm:$0xf]  ;;  %v481_v16 = vld [vmem:[%s14938_s4 + $0x140] sm:$0xf] }
 0x16c   :  { %478 = vst [vmem:[#allocation2 + $0x138] sm:$0xf] %v477_v14  ;;  %480 = vst [vmem:[#allocation2 + $0x13c] sm:$0xf] %v479_v15  ;;  %v483_v17 = vld [vmem:[%s14938_s4 + $0x150] sm:$0xf] }
 0x16d   :  { %482 = vst [vmem:[#allocation2 + $0x140] sm:$0xf] %v481_v16  ;;  %v485_v18 = vld [vmem:[%s14938_s4 + $0x144] sm:$0xf]  ;;  %v487_v19 = vld [vmem:[%s14938_s4 + $0x154] sm:$0xf] }
 0x16e   :  { %484 = vst [vmem:[#allocation2 + $0x144] sm:$0xf] %v483_v17  ;;  %486 = vst [vmem:[#allocation2 + $0x148] sm:$0xf] %v485_v18  ;;  %v489_v20 = vld [vmem:[%s14938_s4 + $0x148] sm:$0xf] }
 0x16f   :  { %488 = vst [vmem:[#allocation2 + $0x14c] sm:$0xf] %v487_v19  ;;  %v491_v21 = vld [vmem:[%s14938_s4 + $0x158] sm:$0xf]  ;;  %v493_v22 = vld [vmem:[%s14938_s4 + $0x14c] sm:$0xf] }
 0x170   :  { %490 = vst [vmem:[#allocation2 + $0x150] sm:$0xf] %v489_v20  ;;  %492 = vst [vmem:[#allocation2 + $0x154] sm:$0xf] %v491_v21  ;;  %v495_v23 = vld [vmem:[%s14938_s4 + $0x15c] sm:$0xf] }
 0x171   :  { %494 = vst [vmem:[#allocation2 + $0x158] sm:$0xf] %v493_v22  ;;  %v497_v24 = vld [vmem:[%s14938_s4 + $0x160] sm:$0xf]  ;;  %v499_v25 = vld [vmem:[%s14938_s4 + $0x170] sm:$0xf] }
 0x172   :  { %496 = vst [vmem:[#allocation2 + $0x15c] sm:$0xf] %v495_v23  ;;  %498 = vst [vmem:[#allocation2 + $0x160] sm:$0xf] %v497_v24  ;;  %v501_v26 = vld [vmem:[%s14938_s4 + $0x164] sm:$0xf] }
 0x173   :  { %500 = vst [vmem:[#allocation2 + $0x164] sm:$0xf] %v499_v25  ;;  %v503_v27 = vld [vmem:[%s14938_s4 + $0x174] sm:$0xf]  ;;  %v505_v28 = vld [vmem:[%s14938_s4 + $0x168] sm:$0xf] }
 0x174   :  { %502 = vst [vmem:[#allocation2 + $0x168] sm:$0xf] %v501_v26  ;;  %504 = vst [vmem:[#allocation2 + $0x16c] sm:$0xf] %v503_v27  ;;  %v507_v29 = vld [vmem:[%s14938_s4 + $0x178] sm:$0xf] }
 0x175   :  { %506 = vst [vmem:[#allocation2 + $0x170] sm:$0xf] %v505_v28  ;;  %v509_v30 = vld [vmem:[%s14938_s4 + $0x16c] sm:$0xf]  ;;  %v511_v31 = vld [vmem:[%s14938_s4 + $0x17c] sm:$0xf] }
 0x176   :  { %508 = vst [vmem:[#allocation2 + $0x174] sm:$0xf] %v507_v29  ;;  %510 = vst [vmem:[#allocation2 + $0x178] sm:$0xf] %v509_v30  ;;  %v513_v32 = vld [vmem:[%s14938_s4 + $0x180] sm:$0xf] }
 0x177   :  { %512 = vst [vmem:[#allocation2 + $0x17c] sm:$0xf] %v511_v31  ;;  %v515_v33 = vld [vmem:[%s14938_s4 + $0x190] sm:$0xf]  ;;  %v517_v34 = vld [vmem:[%s14938_s4 + $0x184] sm:$0xf] }
 0x178   :  { %514 = vst [vmem:[#allocation2 + $0x180] sm:$0xf] %v513_v32  ;;  %516 = vst [vmem:[#allocation2 + $0x184] sm:$0xf] %v515_v33  ;;  %v519_v35 = vld [vmem:[%s14938_s4 + $0x194] sm:$0xf] }
 0x179   :  { %518 = vst [vmem:[#allocation2 + $0x188] sm:$0xf] %v517_v34  ;;  %v521_v36 = vld [vmem:[%s14938_s4 + $0x188] sm:$0xf]  ;;  %v523_v37 = vld [vmem:[%s14938_s4 + $0x198] sm:$0xf] }
 0x17a   :  { %520 = vst [vmem:[#allocation2 + $0x18c] sm:$0xf] %v519_v35  ;;  %522 = vst [vmem:[#allocation2 + $0x190] sm:$0xf] %v521_v36  ;;  %v525_v38 = vld [vmem:[%s14938_s4 + $0x18c] sm:$0xf] }
 0x17b   :  { %524 = vst [vmem:[#allocation2 + $0x194] sm:$0xf] %v523_v37  ;;  %v527_v39 = vld [vmem:[%s14938_s4 + $0x19c] sm:$0xf]  ;;  %v529_v40 = vld [vmem:[%s14938_s4 + $0x1a0] sm:$0xf] }
 0x17c   :  { %526 = vst [vmem:[#allocation2 + $0x198] sm:$0xf] %v525_v38  ;;  %528 = vst [vmem:[#allocation2 + $0x19c] sm:$0xf] %v527_v39  ;;  %v531_v41 = vld [vmem:[%s14938_s4 + $0x1b0] sm:$0xf] }
 0x17d   :  { %530 = vst [vmem:[#allocation2 + $0x1a0] sm:$0xf] %v529_v40  ;;  %v533_v42 = vld [vmem:[%s14938_s4 + $0x1a4] sm:$0xf]  ;;  %v535_v43 = vld [vmem:[%s14938_s4 + $0x1b4] sm:$0xf] }
 0x17e   :  { %532 = vst [vmem:[#allocation2 + $0x1a4] sm:$0xf] %v531_v41  ;;  %534 = vst [vmem:[#allocation2 + $0x1a8] sm:$0xf] %v533_v42  ;;  %v537_v44 = vld [vmem:[%s14938_s4 + $0x1a8] sm:$0xf] }
 0x17f   :  { %536 = vst [vmem:[#allocation2 + $0x1ac] sm:$0xf] %v535_v43  ;;  %v539_v45 = vld [vmem:[%s14938_s4 + $0x1b8] sm:$0xf]  ;;  %v541_v46 = vld [vmem:[%s14938_s4 + $0x1ac] sm:$0xf] }
 0x180   :  { %538 = vst [vmem:[#allocation2 + $0x1b0] sm:$0xf] %v537_v44  ;;  %540 = vst [vmem:[#allocation2 + $0x1b4] sm:$0xf] %v539_v45  ;;  %v543_v47 = vld [vmem:[%s14938_s4 + $0x1bc] sm:$0xf] }
 0x181   :  { %542 = vst [vmem:[#allocation2 + $0x1b8] sm:$0xf] %v541_v46  ;;  %v545_v48 = vld [vmem:[%s14938_s4 + $0x1c0] sm:$0xf]  ;;  %v547_v49 = vld [vmem:[%s14938_s4 + $0x1d0] sm:$0xf] }
 0x182   :  { %544 = vst [vmem:[#allocation2 + $0x1bc] sm:$0xf] %v543_v47  ;;  %546 = vst [vmem:[#allocation2 + $0x1c0] sm:$0xf] %v545_v48  ;;  %v549_v50 = vld [vmem:[%s14938_s4 + $0x1c4] sm:$0xf] }
 0x183   :  { %548 = vst [vmem:[#allocation2 + $0x1c4] sm:$0xf] %v547_v49  ;;  %v551_v51 = vld [vmem:[%s14938_s4 + $0x1d4] sm:$0xf]  ;;  %v553_v52 = vld [vmem:[%s14938_s4 + $0x1c8] sm:$0xf] }
 0x184   :  { %550 = vst [vmem:[#allocation2 + $0x1c8] sm:$0xf] %v549_v50  ;;  %552 = vst [vmem:[#allocation2 + $0x1cc] sm:$0xf] %v551_v51  ;;  %v555_v53 = vld [vmem:[%s14938_s4 + $0x1d8] sm:$0xf] }
 0x185   :  { %554 = vst [vmem:[#allocation2 + $0x1d0] sm:$0xf] %v553_v52  ;;  %v557_v54 = vld [vmem:[%s14938_s4 + $0x1cc] sm:$0xf]  ;;  %v559_v55 = vld [vmem:[%s14938_s4 + $0x1dc] sm:$0xf] }
 0x186   :  { %556 = vst [vmem:[#allocation2 + $0x1d4] sm:$0xf] %v555_v53  ;;  %558 = vst [vmem:[#allocation2 + $0x1d8] sm:$0xf] %v557_v54  ;;  %v561_v56 = vld [vmem:[%s14938_s4 + $0x1e0] sm:$0xf] }
 0x187   :  { %560 = vst [vmem:[#allocation2 + $0x1dc] sm:$0xf] %v559_v55  ;;  %v563_v57 = vld [vmem:[%s14938_s4 + $0x1f0] sm:$0xf]  ;;  %v565_v58 = vld [vmem:[%s14938_s4 + $0x1e4] sm:$0xf] }
 0x188   :  { %562 = vst [vmem:[#allocation2 + $0x1e0] sm:$0xf] %v561_v56  ;;  %564 = vst [vmem:[#allocation2 + $0x1e4] sm:$0xf] %v563_v57  ;;  %v567_v59 = vld [vmem:[%s14938_s4 + $0x1f4] sm:$0xf] }
 0x189   :  { %566 = vst [vmem:[#allocation2 + $0x1e8] sm:$0xf] %v565_v58  ;;  %v569_v60 = vld [vmem:[%s14938_s4 + $0x1e8] sm:$0xf]  ;;  %v571_v61 = vld [vmem:[%s14938_s4 + $0x1f8] sm:$0xf] }
 0x18a   :  { %568 = vst [vmem:[#allocation2 + $0x1ec] sm:$0xf] %v567_v59  ;;  %570 = vst [vmem:[#allocation2 + $0x1f0] sm:$0xf] %v569_v60  ;;  %v573_v62 = vld [vmem:[%s14938_s4 + $0x1ec] sm:$0xf] }
 0x18b   :  { %572 = vst [vmem:[#allocation2 + $0x1f4] sm:$0xf] %v571_v61  ;;  %v575_v63 = vld [vmem:[%s14938_s4 + $0x1fc] sm:$0xf]  ;;  %v577_v0 = vld [vmem:[%s14938_s4 + $0x200] sm:$0xf] }
 0x18c   :  { %574 = vst [vmem:[#allocation2 + $0x1f8] sm:$0xf] %v573_v62  ;;  %576 = vst [vmem:[#allocation2 + $0x1fc] sm:$0xf] %v575_v63  ;;  %v579_v1 = vld [vmem:[%s14938_s4 + $0x210] sm:$0xf] }
 0x18d   :  { %578 = vst [vmem:[#allocation2 + $0x200] sm:$0xf] %v577_v0  ;;  %v581_v2 = vld [vmem:[%s14938_s4 + $0x204] sm:$0xf]  ;;  %v583_v3 = vld [vmem:[%s14938_s4 + $0x214] sm:$0xf] }
 0x18e   :  { %580 = vst [vmem:[#allocation2 + $0x204] sm:$0xf] %v579_v1  ;;  %582 = vst [vmem:[#allocation2 + $0x208] sm:$0xf] %v581_v2  ;;  %v585_v4 = vld [vmem:[%s14938_s4 + $0x208] sm:$0xf] }
 0x18f   :  { %584 = vst [vmem:[#allocation2 + $0x20c] sm:$0xf] %v583_v3  ;;  %v587_v5 = vld [vmem:[%s14938_s4 + $0x218] sm:$0xf]  ;;  %v589_v6 = vld [vmem:[%s14938_s4 + $0x20c] sm:$0xf] }
 0x190   :  { %586 = vst [vmem:[#allocation2 + $0x210] sm:$0xf] %v585_v4  ;;  %588 = vst [vmem:[#allocation2 + $0x214] sm:$0xf] %v587_v5  ;;  %v591_v7 = vld [vmem:[%s14938_s4 + $0x21c] sm:$0xf] }
 0x191   :  { %590 = vst [vmem:[#allocation2 + $0x218] sm:$0xf] %v589_v6  ;;  %v593_v8 = vld [vmem:[%s14938_s4 + $0x220] sm:$0xf]  ;;  %v595_v9 = vld [vmem:[%s14938_s4 + $0x230] sm:$0xf] }
 0x192   :  { %592 = vst [vmem:[#allocation2 + $0x21c] sm:$0xf] %v591_v7  ;;  %594 = vst [vmem:[#allocation2 + $0x220] sm:$0xf] %v593_v8  ;;  %v597_v10 = vld [vmem:[%s14938_s4 + $0x224] sm:$0xf] }
 0x193   :  { %596 = vst [vmem:[#allocation2 + $0x224] sm:$0xf] %v595_v9  ;;  %v599_v11 = vld [vmem:[%s14938_s4 + $0x234] sm:$0xf]  ;;  %v601_v12 = vld [vmem:[%s14938_s4 + $0x228] sm:$0xf] }
 0x194   :  { %598 = vst [vmem:[#allocation2 + $0x228] sm:$0xf] %v597_v10  ;;  %600 = vst [vmem:[#allocation2 + $0x22c] sm:$0xf] %v599_v11  ;;  %v603_v13 = vld [vmem:[%s14938_s4 + $0x238] sm:$0xf] }
 0x195   :  { %602 = vst [vmem:[#allocation2 + $0x230] sm:$0xf] %v601_v12  ;;  %v605_v14 = vld [vmem:[%s14938_s4 + $0x22c] sm:$0xf]  ;;  %v607_v15 = vld [vmem:[%s14938_s4 + $0x23c] sm:$0xf] }
 0x196   :  { %604 = vst [vmem:[#allocation2 + $0x234] sm:$0xf] %v603_v13  ;;  %606 = vst [vmem:[#allocation2 + $0x238] sm:$0xf] %v605_v14  ;;  %v609_v16 = vld [vmem:[%s14938_s4 + $0x240] sm:$0xf] }
 0x197   :  { %608 = vst [vmem:[#allocation2 + $0x23c] sm:$0xf] %v607_v15  ;;  %v611_v17 = vld [vmem:[%s14938_s4 + $0x250] sm:$0xf]  ;;  %v613_v18 = vld [vmem:[%s14938_s4 + $0x244] sm:$0xf] }
 0x198   :  { %610 = vst [vmem:[#allocation2 + $0x240] sm:$0xf] %v609_v16  ;;  %612 = vst [vmem:[#allocation2 + $0x244] sm:$0xf] %v611_v17  ;;  %v615_v19 = vld [vmem:[%s14938_s4 + $0x254] sm:$0xf] }
 0x199   :  { %614 = vst [vmem:[#allocation2 + $0x248] sm:$0xf] %v613_v18  ;;  %v617_v20 = vld [vmem:[%s14938_s4 + $0x248] sm:$0xf]  ;;  %v619_v21 = vld [vmem:[%s14938_s4 + $0x258] sm:$0xf] }
 0x19a   :  { %616 = vst [vmem:[#allocation2 + $0x24c] sm:$0xf] %v615_v19  ;;  %618 = vst [vmem:[#allocation2 + $0x250] sm:$0xf] %v617_v20  ;;  %v621_v22 = vld [vmem:[%s14938_s4 + $0x24c] sm:$0xf] }
 0x19b   :  { %620 = vst [vmem:[#allocation2 + $0x254] sm:$0xf] %v619_v21  ;;  %v623_v23 = vld [vmem:[%s14938_s4 + $0x25c] sm:$0xf]  ;;  %v625_v24 = vld [vmem:[%s14938_s4 + $0x260] sm:$0xf] }
 0x19c   :  { %622 = vst [vmem:[#allocation2 + $0x258] sm:$0xf] %v621_v22  ;;  %624 = vst [vmem:[#allocation2 + $0x25c] sm:$0xf] %v623_v23  ;;  %v627_v25 = vld [vmem:[%s14938_s4 + $0x270] sm:$0xf] }
 0x19d   :  { %626 = vst [vmem:[#allocation2 + $0x260] sm:$0xf] %v625_v24  ;;  %v629_v26 = vld [vmem:[%s14938_s4 + $0x264] sm:$0xf]  ;;  %v631_v27 = vld [vmem:[%s14938_s4 + $0x274] sm:$0xf] }
 0x19e   :  { %628 = vst [vmem:[#allocation2 + $0x264] sm:$0xf] %v627_v25  ;;  %630 = vst [vmem:[#allocation2 + $0x268] sm:$0xf] %v629_v26  ;;  %v633_v28 = vld [vmem:[%s14938_s4 + $0x268] sm:$0xf] }
 0x19f   :  { %632 = vst [vmem:[#allocation2 + $0x26c] sm:$0xf] %v631_v27  ;;  %v635_v29 = vld [vmem:[%s14938_s4 + $0x278] sm:$0xf]  ;;  %v637_v30 = vld [vmem:[%s14938_s4 + $0x26c] sm:$0xf] }
 0x1a0   :  { %634 = vst [vmem:[#allocation2 + $0x270] sm:$0xf] %v633_v28  ;;  %636 = vst [vmem:[#allocation2 + $0x274] sm:$0xf] %v635_v29  ;;  %v639_v31 = vld [vmem:[%s14938_s4 + $0x27c] sm:$0xf] }
 0x1a1   :  { %638 = vst [vmem:[#allocation2 + $0x278] sm:$0xf] %v637_v30  ;;  %v641_v32 = vld [vmem:[%s14938_s4 + $0x280] sm:$0xf]  ;;  %v643_v33 = vld [vmem:[%s14938_s4 + $0x290] sm:$0xf] }
 0x1a2   :  { %640 = vst [vmem:[#allocation2 + $0x27c] sm:$0xf] %v639_v31  ;;  %642 = vst [vmem:[#allocation2 + $0x280] sm:$0xf] %v641_v32  ;;  %v645_v34 = vld [vmem:[%s14938_s4 + $0x284] sm:$0xf] }
 0x1a3   :  { %644 = vst [vmem:[#allocation2 + $0x284] sm:$0xf] %v643_v33  ;;  %v647_v35 = vld [vmem:[%s14938_s4 + $0x294] sm:$0xf]  ;;  %v649_v36 = vld [vmem:[%s14938_s4 + $0x288] sm:$0xf] }
 0x1a4   :  { %646 = vst [vmem:[#allocation2 + $0x288] sm:$0xf] %v645_v34  ;;  %648 = vst [vmem:[#allocation2 + $0x28c] sm:$0xf] %v647_v35  ;;  %v651_v37 = vld [vmem:[%s14938_s4 + $0x298] sm:$0xf] }
 0x1a5   :  { %650 = vst [vmem:[#allocation2 + $0x290] sm:$0xf] %v649_v36  ;;  %v653_v38 = vld [vmem:[%s14938_s4 + $0x28c] sm:$0xf]  ;;  %v655_v39 = vld [vmem:[%s14938_s4 + $0x29c] sm:$0xf] }
 0x1a6   :  { %652 = vst [vmem:[#allocation2 + $0x294] sm:$0xf] %v651_v37  ;;  %654 = vst [vmem:[#allocation2 + $0x298] sm:$0xf] %v653_v38  ;;  %v657_v40 = vld [vmem:[%s14938_s4 + $0x2a0] sm:$0xf] }
 0x1a7   :  { %656 = vst [vmem:[#allocation2 + $0x29c] sm:$0xf] %v655_v39  ;;  %v659_v41 = vld [vmem:[%s14938_s4 + $0x2b0] sm:$0xf]  ;;  %v661_v42 = vld [vmem:[%s14938_s4 + $0x2a4] sm:$0xf] }
 0x1a8   :  { %658 = vst [vmem:[#allocation2 + $0x2a0] sm:$0xf] %v657_v40  ;;  %660 = vst [vmem:[#allocation2 + $0x2a4] sm:$0xf] %v659_v41  ;;  %v663_v43 = vld [vmem:[%s14938_s4 + $0x2b4] sm:$0xf] }
 0x1a9   :  { %662 = vst [vmem:[#allocation2 + $0x2a8] sm:$0xf] %v661_v42  ;;  %v665_v44 = vld [vmem:[%s14938_s4 + $0x2a8] sm:$0xf]  ;;  %v667_v45 = vld [vmem:[%s14938_s4 + $0x2b8] sm:$0xf] }
 0x1aa   :  { %664 = vst [vmem:[#allocation2 + $0x2ac] sm:$0xf] %v663_v43  ;;  %666 = vst [vmem:[#allocation2 + $0x2b0] sm:$0xf] %v665_v44  ;;  %v669_v46 = vld [vmem:[%s14938_s4 + $0x2ac] sm:$0xf] }
 0x1ab   :  { %668 = vst [vmem:[#allocation2 + $0x2b4] sm:$0xf] %v667_v45  ;;  %v671_v47 = vld [vmem:[%s14938_s4 + $0x2bc] sm:$0xf]  ;;  %v673_v48 = vld [vmem:[%s14938_s4 + $0x2c0] sm:$0xf] }
 0x1ac   :  { %670 = vst [vmem:[#allocation2 + $0x2b8] sm:$0xf] %v669_v46  ;;  %672 = vst [vmem:[#allocation2 + $0x2bc] sm:$0xf] %v671_v47  ;;  %v675_v49 = vld [vmem:[%s14938_s4 + $0x2d0] sm:$0xf] }
 0x1ad   :  { %674 = vst [vmem:[#allocation2 + $0x2c0] sm:$0xf] %v673_v48  ;;  %v677_v50 = vld [vmem:[%s14938_s4 + $0x2c4] sm:$0xf]  ;;  %v679_v51 = vld [vmem:[%s14938_s4 + $0x2d4] sm:$0xf] }
 0x1ae   :  { %676 = vst [vmem:[#allocation2 + $0x2c4] sm:$0xf] %v675_v49  ;;  %678 = vst [vmem:[#allocation2 + $0x2c8] sm:$0xf] %v677_v50  ;;  %v681_v52 = vld [vmem:[%s14938_s4 + $0x2c8] sm:$0xf] }
 0x1af   :  { %680 = vst [vmem:[#allocation2 + $0x2cc] sm:$0xf] %v679_v51  ;;  %v683_v53 = vld [vmem:[%s14938_s4 + $0x2d8] sm:$0xf]  ;;  %v685_v54 = vld [vmem:[%s14938_s4 + $0x2cc] sm:$0xf] }
 0x1b0   :  { %682 = vst [vmem:[#allocation2 + $0x2d0] sm:$0xf] %v681_v52  ;;  %684 = vst [vmem:[#allocation2 + $0x2d4] sm:$0xf] %v683_v53  ;;  %v687_v55 = vld [vmem:[%s14938_s4 + $0x2dc] sm:$0xf] }
 0x1b1   :  { %686 = vst [vmem:[#allocation2 + $0x2d8] sm:$0xf] %v685_v54  ;;  %v689_v56 = vld [vmem:[%s14938_s4 + $0x2e0] sm:$0xf]  ;;  %v691_v57 = vld [vmem:[%s14938_s4 + $0x2f0] sm:$0xf] }
 0x1b2   :  { %688 = vst [vmem:[#allocation2 + $0x2dc] sm:$0xf] %v687_v55  ;;  %690 = vst [vmem:[#allocation2 + $0x2e0] sm:$0xf] %v689_v56  ;;  %v693_v58 = vld [vmem:[%s14938_s4 + $0x2e4] sm:$0xf] }
 0x1b3   :  { %692 = vst [vmem:[#allocation2 + $0x2e4] sm:$0xf] %v691_v57  ;;  %v695_v59 = vld [vmem:[%s14938_s4 + $0x2f4] sm:$0xf]  ;;  %v697_v60 = vld [vmem:[%s14938_s4 + $0x2e8] sm:$0xf] }
 0x1b4   :  { %694 = vst [vmem:[#allocation2 + $0x2e8] sm:$0xf] %v693_v58  ;;  %696 = vst [vmem:[#allocation2 + $0x2ec] sm:$0xf] %v695_v59  ;;  %v699_v61 = vld [vmem:[%s14938_s4 + $0x2f8] sm:$0xf] }
 0x1b5   :  { %698 = vst [vmem:[#allocation2 + $0x2f0] sm:$0xf] %v697_v60  ;;  %v701_v62 = vld [vmem:[%s14938_s4 + $0x2ec] sm:$0xf]  ;;  %v703_v63 = vld [vmem:[%s14938_s4 + $0x2fc] sm:$0xf] }
 0x1b6   :  { %700 = vst [vmem:[#allocation2 + $0x2f4] sm:$0xf] %v699_v61  ;;  %702 = vst [vmem:[#allocation2 + $0x2f8] sm:$0xf] %v701_v62  ;;  %v705_v0 = vld [vmem:[%s14938_s4 + $0x300] sm:$0xf] }
 0x1b7   :  { %704 = vst [vmem:[#allocation2 + $0x2fc] sm:$0xf] %v703_v63  ;;  %v707_v1 = vld [vmem:[%s14938_s4 + $0x310] sm:$0xf]  ;;  %v709_v2 = vld [vmem:[%s14938_s4 + $0x304] sm:$0xf] }
 0x1b8   :  { %706 = vst [vmem:[#allocation2 + $0x300] sm:$0xf] %v705_v0  ;;  %708 = vst [vmem:[#allocation2 + $0x304] sm:$0xf] %v707_v1  ;;  %v711_v3 = vld [vmem:[%s14938_s4 + $0x314] sm:$0xf] }
 0x1b9   :  { %710 = vst [vmem:[#allocation2 + $0x308] sm:$0xf] %v709_v2  ;;  %v713_v4 = vld [vmem:[%s14938_s4 + $0x308] sm:$0xf]  ;;  %v715_v5 = vld [vmem:[%s14938_s4 + $0x318] sm:$0xf] }
 0x1ba   :  { %712 = vst [vmem:[#allocation2 + $0x30c] sm:$0xf] %v711_v3  ;;  %714 = vst [vmem:[#allocation2 + $0x310] sm:$0xf] %v713_v4  ;;  %v717_v6 = vld [vmem:[%s14938_s4 + $0x30c] sm:$0xf] }
 0x1bb   :  { %716 = vst [vmem:[#allocation2 + $0x314] sm:$0xf] %v715_v5  ;;  %v719_v7 = vld [vmem:[%s14938_s4 + $0x31c] sm:$0xf]  ;;  %v721_v8 = vld [vmem:[%s14938_s4 + $0x320] sm:$0xf] }
 0x1bc   :  { %718 = vst [vmem:[#allocation2 + $0x318] sm:$0xf] %v717_v6  ;;  %720 = vst [vmem:[#allocation2 + $0x31c] sm:$0xf] %v719_v7  ;;  %v723_v9 = vld [vmem:[%s14938_s4 + $0x330] sm:$0xf] }
 0x1bd   :  { %722 = vst [vmem:[#allocation2 + $0x320] sm:$0xf] %v721_v8  ;;  %v725_v10 = vld [vmem:[%s14938_s4 + $0x324] sm:$0xf]  ;;  %v727_v11 = vld [vmem:[%s14938_s4 + $0x334] sm:$0xf] }
 0x1be   :  { %724 = vst [vmem:[#allocation2 + $0x324] sm:$0xf] %v723_v9  ;;  %726 = vst [vmem:[#allocation2 + $0x328] sm:$0xf] %v725_v10  ;;  %v729_v12 = vld [vmem:[%s14938_s4 + $0x328] sm:$0xf] }
 0x1bf   :  { %728 = vst [vmem:[#allocation2 + $0x32c] sm:$0xf] %v727_v11  ;;  %v731_v13 = vld [vmem:[%s14938_s4 + $0x338] sm:$0xf]  ;;  %v733_v14 = vld [vmem:[%s14938_s4 + $0x32c] sm:$0xf] }
 0x1c0   :  { %730 = vst [vmem:[#allocation2 + $0x330] sm:$0xf] %v729_v12  ;;  %732 = vst [vmem:[#allocation2 + $0x334] sm:$0xf] %v731_v13  ;;  %v735_v15 = vld [vmem:[%s14938_s4 + $0x33c] sm:$0xf] }
 0x1c1   :  { %734 = vst [vmem:[#allocation2 + $0x338] sm:$0xf] %v733_v14  ;;  %v737_v16 = vld [vmem:[%s14938_s4 + $0x340] sm:$0xf]  ;;  %v739_v17 = vld [vmem:[%s14938_s4 + $0x350] sm:$0xf] }
 0x1c2   :  { %736 = vst [vmem:[#allocation2 + $0x33c] sm:$0xf] %v735_v15  ;;  %738 = vst [vmem:[#allocation2 + $0x340] sm:$0xf] %v737_v16  ;;  %v741_v18 = vld [vmem:[%s14938_s4 + $0x344] sm:$0xf] }
 0x1c3   :  { %740 = vst [vmem:[#allocation2 + $0x344] sm:$0xf] %v739_v17  ;;  %v743_v19 = vld [vmem:[%s14938_s4 + $0x354] sm:$0xf]  ;;  %v745_v20 = vld [vmem:[%s14938_s4 + $0x348] sm:$0xf] }
 0x1c4   :  { %742 = vst [vmem:[#allocation2 + $0x348] sm:$0xf] %v741_v18  ;;  %744 = vst [vmem:[#allocation2 + $0x34c] sm:$0xf] %v743_v19  ;;  %v747_v21 = vld [vmem:[%s14938_s4 + $0x358] sm:$0xf] }
 0x1c5   :  { %746 = vst [vmem:[#allocation2 + $0x350] sm:$0xf] %v745_v20  ;;  %v749_v22 = vld [vmem:[%s14938_s4 + $0x34c] sm:$0xf]  ;;  %v751_v23 = vld [vmem:[%s14938_s4 + $0x35c] sm:$0xf] }
 0x1c6   :  { %748 = vst [vmem:[#allocation2 + $0x354] sm:$0xf] %v747_v21  ;;  %750 = vst [vmem:[#allocation2 + $0x358] sm:$0xf] %v749_v22  ;;  %v753_v24 = vld [vmem:[%s14938_s4 + $0x360] sm:$0xf] }
 0x1c7   :  { %752 = vst [vmem:[#allocation2 + $0x35c] sm:$0xf] %v751_v23  ;;  %v755_v25 = vld [vmem:[%s14938_s4 + $0x370] sm:$0xf]  ;;  %v757_v26 = vld [vmem:[%s14938_s4 + $0x364] sm:$0xf] }
 0x1c8   :  { %754 = vst [vmem:[#allocation2 + $0x360] sm:$0xf] %v753_v24  ;;  %756 = vst [vmem:[#allocation2 + $0x364] sm:$0xf] %v755_v25  ;;  %v759_v27 = vld [vmem:[%s14938_s4 + $0x374] sm:$0xf] }
 0x1c9   :  { %758 = vst [vmem:[#allocation2 + $0x368] sm:$0xf] %v757_v26  ;;  %v761_v28 = vld [vmem:[%s14938_s4 + $0x368] sm:$0xf]  ;;  %v763_v29 = vld [vmem:[%s14938_s4 + $0x378] sm:$0xf] }
 0x1ca   :  { %760 = vst [vmem:[#allocation2 + $0x36c] sm:$0xf] %v759_v27  ;;  %762 = vst [vmem:[#allocation2 + $0x370] sm:$0xf] %v761_v28  ;;  %v765_v30 = vld [vmem:[%s14938_s4 + $0x36c] sm:$0xf] }
 0x1cb   :  { %764 = vst [vmem:[#allocation2 + $0x374] sm:$0xf] %v763_v29  ;;  %v767_v31 = vld [vmem:[%s14938_s4 + $0x37c] sm:$0xf]  ;;  %v769_v32 = vld [vmem:[%s14938_s4 + $0x380] sm:$0xf] }
 0x1cc   :  { %766 = vst [vmem:[#allocation2 + $0x378] sm:$0xf] %v765_v30  ;;  %768 = vst [vmem:[#allocation2 + $0x37c] sm:$0xf] %v767_v31  ;;  %v771_v33 = vld [vmem:[%s14938_s4 + $0x390] sm:$0xf] }
 0x1cd   :  { %770 = vst [vmem:[#allocation2 + $0x380] sm:$0xf] %v769_v32  ;;  %v773_v34 = vld [vmem:[%s14938_s4 + $0x384] sm:$0xf]  ;;  %v775_v35 = vld [vmem:[%s14938_s4 + $0x394] sm:$0xf] }
 0x1ce   :  { %772 = vst [vmem:[#allocation2 + $0x384] sm:$0xf] %v771_v33  ;;  %774 = vst [vmem:[#allocation2 + $0x388] sm:$0xf] %v773_v34  ;;  %v777_v36 = vld [vmem:[%s14938_s4 + $0x388] sm:$0xf] }
 0x1cf   :  { %776 = vst [vmem:[#allocation2 + $0x38c] sm:$0xf] %v775_v35  ;;  %v779_v37 = vld [vmem:[%s14938_s4 + $0x398] sm:$0xf]  ;;  %v781_v38 = vld [vmem:[%s14938_s4 + $0x38c] sm:$0xf] }
 0x1d0   :  { %778 = vst [vmem:[#allocation2 + $0x390] sm:$0xf] %v777_v36  ;;  %780 = vst [vmem:[#allocation2 + $0x394] sm:$0xf] %v779_v37  ;;  %v783_v39 = vld [vmem:[%s14938_s4 + $0x39c] sm:$0xf] }
 0x1d1   :  { %782 = vst [vmem:[#allocation2 + $0x398] sm:$0xf] %v781_v38  ;;  %v785_v40 = vld [vmem:[%s14938_s4 + $0x3a0] sm:$0xf]  ;;  %v787_v41 = vld [vmem:[%s14938_s4 + $0x3b0] sm:$0xf] }
 0x1d2   :  { %784 = vst [vmem:[#allocation2 + $0x39c] sm:$0xf] %v783_v39  ;;  %786 = vst [vmem:[#allocation2 + $0x3a0] sm:$0xf] %v785_v40  ;;  %v789_v42 = vld [vmem:[%s14938_s4 + $0x3a4] sm:$0xf] }
 0x1d3   :  { %788 = vst [vmem:[#allocation2 + $0x3a4] sm:$0xf] %v787_v41  ;;  %v791_v43 = vld [vmem:[%s14938_s4 + $0x3b4] sm:$0xf]  ;;  %v793_v44 = vld [vmem:[%s14938_s4 + $0x3a8] sm:$0xf] }
 0x1d4   :  { %790 = vst [vmem:[#allocation2 + $0x3a8] sm:$0xf] %v789_v42  ;;  %792 = vst [vmem:[#allocation2 + $0x3ac] sm:$0xf] %v791_v43  ;;  %v795_v45 = vld [vmem:[%s14938_s4 + $0x3b8] sm:$0xf] }
 0x1d5   :  { %794 = vst [vmem:[#allocation2 + $0x3b0] sm:$0xf] %v793_v44  ;;  %v797_v46 = vld [vmem:[%s14938_s4 + $0x3ac] sm:$0xf]  ;;  %v799_v47 = vld [vmem:[%s14938_s4 + $0x3bc] sm:$0xf] }
 0x1d6   :  { %796 = vst [vmem:[#allocation2 + $0x3b4] sm:$0xf] %v795_v45  ;;  %798 = vst [vmem:[#allocation2 + $0x3b8] sm:$0xf] %v797_v46  ;;  %v801_v48 = vld [vmem:[%s14938_s4 + $0x3c0] sm:$0xf] }
 0x1d7   :  { %800 = vst [vmem:[#allocation2 + $0x3bc] sm:$0xf] %v799_v47  ;;  %v803_v49 = vld [vmem:[%s14938_s4 + $0x3d0] sm:$0xf]  ;;  %v805_v50 = vld [vmem:[%s14938_s4 + $0x3c4] sm:$0xf] }
 0x1d8   :  { %802 = vst [vmem:[#allocation2 + $0x3c0] sm:$0xf] %v801_v48  ;;  %804 = vst [vmem:[#allocation2 + $0x3c4] sm:$0xf] %v803_v49  ;;  %v807_v51 = vld [vmem:[%s14938_s4 + $0x3d4] sm:$0xf] }
 0x1d9   :  { %806 = vst [vmem:[#allocation2 + $0x3c8] sm:$0xf] %v805_v50  ;;  %v809_v52 = vld [vmem:[%s14938_s4 + $0x3c8] sm:$0xf]  ;;  %v811_v53 = vld [vmem:[%s14938_s4 + $0x3d8] sm:$0xf] }
 0x1da   :  { %808 = vst [vmem:[#allocation2 + $0x3cc] sm:$0xf] %v807_v51  ;;  %810 = vst [vmem:[#allocation2 + $0x3d0] sm:$0xf] %v809_v52  ;;  %v813_v54 = vld [vmem:[%s14938_s4 + $0x3cc] sm:$0xf] }
 0x1db   :  { %812 = vst [vmem:[#allocation2 + $0x3d4] sm:$0xf] %v811_v53  ;;  %v815_v55 = vld [vmem:[%s14938_s4 + $0x3dc] sm:$0xf]  ;;  %v817_v56 = vld [vmem:[%s14938_s4 + $0x3e0] sm:$0xf] }
 0x1dc   :  { %814 = vst [vmem:[#allocation2 + $0x3d8] sm:$0xf] %v813_v54  ;;  %816 = vst [vmem:[#allocation2 + $0x3dc] sm:$0xf] %v815_v55  ;;  %v819_v57 = vld [vmem:[%s14938_s4 + $0x3f0] sm:$0xf] }
 0x1dd   :  { %818 = vst [vmem:[#allocation2 + $0x3e0] sm:$0xf] %v817_v56  ;;  %v821_v58 = vld [vmem:[%s14938_s4 + $0x3e4] sm:$0xf]  ;;  %v823_v59 = vld [vmem:[%s14938_s4 + $0x3f4] sm:$0xf] }
 0x1de   :  { %820 = vst [vmem:[#allocation2 + $0x3e4] sm:$0xf] %v819_v57  ;;  %822 = vst [vmem:[#allocation2 + $0x3e8] sm:$0xf] %v821_v58  ;;  %v825_v60 = vld [vmem:[%s14938_s4 + $0x3e8] sm:$0xf] }
 0x1df   :  { %824 = vst [vmem:[#allocation2 + $0x3ec] sm:$0xf] %v823_v59  ;;  %v827_v61 = vld [vmem:[%s14938_s4 + $0x3f8] sm:$0xf]  ;;  %v829_v62 = vld [vmem:[%s14938_s4 + $0x3ec] sm:$0xf] }
 0x1e0   :  { %826 = vst [vmem:[#allocation2 + $0x3f0] sm:$0xf] %v825_v60  ;;  %828 = vst [vmem:[#allocation2 + $0x3f4] sm:$0xf] %v827_v61  ;;  %v831_v63 = vld [vmem:[%s14938_s4 + $0x3fc] sm:$0xf] }
 0x1e1   :  { %830 = vst [vmem:[#allocation2 + $0x3f8] sm:$0xf] %v829_v62  ;;  %v833_v0 = vld [vmem:[%s14938_s4 + $0x400] sm:$0xf]  ;;  %v835_v1 = vld [vmem:[%s14938_s4 + $0x410] sm:$0xf] }
 0x1e2   :  { %832 = vst [vmem:[#allocation2 + $0x3fc] sm:$0xf] %v831_v63  ;;  %834 = vst [vmem:[#allocation2 + $0x400] sm:$0xf] %v833_v0  ;;  %v837_v2 = vld [vmem:[%s14938_s4 + $0x404] sm:$0xf] }
 0x1e3   :  { %836 = vst [vmem:[#allocation2 + $0x404] sm:$0xf] %v835_v1  ;;  %v839_v3 = vld [vmem:[%s14938_s4 + $0x414] sm:$0xf]  ;;  %v841_v4 = vld [vmem:[%s14938_s4 + $0x408] sm:$0xf] }
 0x1e4   :  { %838 = vst [vmem:[#allocation2 + $0x408] sm:$0xf] %v837_v2  ;;  %840 = vst [vmem:[#allocation2 + $0x40c] sm:$0xf] %v839_v3  ;;  %v843_v5 = vld [vmem:[%s14938_s4 + $0x418] sm:$0xf] }
 0x1e5   :  { %842 = vst [vmem:[#allocation2 + $0x410] sm:$0xf] %v841_v4  ;;  %v845_v6 = vld [vmem:[%s14938_s4 + $0x40c] sm:$0xf]  ;;  %v847_v7 = vld [vmem:[%s14938_s4 + $0x41c] sm:$0xf] }
 0x1e6   :  { %844 = vst [vmem:[#allocation2 + $0x414] sm:$0xf] %v843_v5  ;;  %846 = vst [vmem:[#allocation2 + $0x418] sm:$0xf] %v845_v6  ;;  %v849_v8 = vld [vmem:[%s14938_s4 + $0x420] sm:$0xf] }
 0x1e7   :  { %848 = vst [vmem:[#allocation2 + $0x41c] sm:$0xf] %v847_v7  ;;  %v851_v9 = vld [vmem:[%s14938_s4 + $0x430] sm:$0xf]  ;;  %v853_v10 = vld [vmem:[%s14938_s4 + $0x424] sm:$0xf] }
 0x1e8   :  { %850 = vst [vmem:[#allocation2 + $0x420] sm:$0xf] %v849_v8  ;;  %852 = vst [vmem:[#allocation2 + $0x424] sm:$0xf] %v851_v9  ;;  %v855_v11 = vld [vmem:[%s14938_s4 + $0x434] sm:$0xf] }
 0x1e9   :  { %854 = vst [vmem:[#allocation2 + $0x428] sm:$0xf] %v853_v10  ;;  %v857_v12 = vld [vmem:[%s14938_s4 + $0x428] sm:$0xf]  ;;  %v859_v13 = vld [vmem:[%s14938_s4 + $0x438] sm:$0xf] }
 0x1ea   :  { %856 = vst [vmem:[#allocation2 + $0x42c] sm:$0xf] %v855_v11  ;;  %858 = vst [vmem:[#allocation2 + $0x430] sm:$0xf] %v857_v12  ;;  %v861_v14 = vld [vmem:[%s14938_s4 + $0x42c] sm:$0xf] }
 0x1eb   :  { %860 = vst [vmem:[#allocation2 + $0x434] sm:$0xf] %v859_v13  ;;  %v863_v15 = vld [vmem:[%s14938_s4 + $0x43c] sm:$0xf]  ;;  %v865_v16 = vld [vmem:[%s14938_s4 + $0x440] sm:$0xf] }
 0x1ec   :  { %862 = vst [vmem:[#allocation2 + $0x438] sm:$0xf] %v861_v14  ;;  %864 = vst [vmem:[#allocation2 + $0x43c] sm:$0xf] %v863_v15  ;;  %v867_v17 = vld [vmem:[%s14938_s4 + $0x450] sm:$0xf] }
 0x1ed   :  { %866 = vst [vmem:[#allocation2 + $0x440] sm:$0xf] %v865_v16  ;;  %v869_v18 = vld [vmem:[%s14938_s4 + $0x444] sm:$0xf]  ;;  %v871_v19 = vld [vmem:[%s14938_s4 + $0x454] sm:$0xf] }
 0x1ee   :  { %868 = vst [vmem:[#allocation2 + $0x444] sm:$0xf] %v867_v17  ;;  %870 = vst [vmem:[#allocation2 + $0x448] sm:$0xf] %v869_v18  ;;  %v873_v20 = vld [vmem:[%s14938_s4 + $0x448] sm:$0xf] }
 0x1ef   :  { %872 = vst [vmem:[#allocation2 + $0x44c] sm:$0xf] %v871_v19  ;;  %v875_v21 = vld [vmem:[%s14938_s4 + $0x458] sm:$0xf]  ;;  %v877_v22 = vld [vmem:[%s14938_s4 + $0x44c] sm:$0xf] }
 0x1f0   :  { %874 = vst [vmem:[#allocation2 + $0x450] sm:$0xf] %v873_v20  ;;  %876 = vst [vmem:[#allocation2 + $0x454] sm:$0xf] %v875_v21  ;;  %v879_v23 = vld [vmem:[%s14938_s4 + $0x45c] sm:$0xf] }
 0x1f1   :  { %878 = vst [vmem:[#allocation2 + $0x458] sm:$0xf] %v877_v22  ;;  %v881_v24 = vld [vmem:[%s14938_s4 + $0x460] sm:$0xf]  ;;  %v883_v25 = vld [vmem:[%s14938_s4 + $0x470] sm:$0xf] }
 0x1f2   :  { %880 = vst [vmem:[#allocation2 + $0x45c] sm:$0xf] %v879_v23  ;;  %882 = vst [vmem:[#allocation2 + $0x460] sm:$0xf] %v881_v24  ;;  %v885_v26 = vld [vmem:[%s14938_s4 + $0x464] sm:$0xf] }
 0x1f3   :  { %884 = vst [vmem:[#allocation2 + $0x464] sm:$0xf] %v883_v25  ;;  %v887_v27 = vld [vmem:[%s14938_s4 + $0x474] sm:$0xf]  ;;  %v889_v28 = vld [vmem:[%s14938_s4 + $0x468] sm:$0xf] }
 0x1f4   :  { %886 = vst [vmem:[#allocation2 + $0x468] sm:$0xf] %v885_v26  ;;  %888 = vst [vmem:[#allocation2 + $0x46c] sm:$0xf] %v887_v27  ;;  %v891_v29 = vld [vmem:[%s14938_s4 + $0x478] sm:$0xf] }
 0x1f5   :  { %890 = vst [vmem:[#allocation2 + $0x470] sm:$0xf] %v889_v28  ;;  %v893_v30 = vld [vmem:[%s14938_s4 + $0x46c] sm:$0xf]  ;;  %v895_v31 = vld [vmem:[%s14938_s4 + $0x47c] sm:$0xf] }
 0x1f6   :  { %892 = vst [vmem:[#allocation2 + $0x474] sm:$0xf] %v891_v29  ;;  %894 = vst [vmem:[#allocation2 + $0x478] sm:$0xf] %v893_v30  ;;  %v897_v32 = vld [vmem:[%s14938_s4 + $0x480] sm:$0xf] }
 0x1f7   :  { %896 = vst [vmem:[#allocation2 + $0x47c] sm:$0xf] %v895_v31  ;;  %v899_v33 = vld [vmem:[%s14938_s4 + $0x490] sm:$0xf]  ;;  %v901_v34 = vld [vmem:[%s14938_s4 + $0x484] sm:$0xf] }
 0x1f8   :  { %898 = vst [vmem:[#allocation2 + $0x480] sm:$0xf] %v897_v32  ;;  %900 = vst [vmem:[#allocation2 + $0x484] sm:$0xf] %v899_v33  ;;  %v903_v35 = vld [vmem:[%s14938_s4 + $0x494] sm:$0xf] }
 0x1f9   :  { %902 = vst [vmem:[#allocation2 + $0x488] sm:$0xf] %v901_v34  ;;  %v905_v36 = vld [vmem:[%s14938_s4 + $0x488] sm:$0xf]  ;;  %v907_v37 = vld [vmem:[%s14938_s4 + $0x498] sm:$0xf] }
 0x1fa   :  { %904 = vst [vmem:[#allocation2 + $0x48c] sm:$0xf] %v903_v35  ;;  %906 = vst [vmem:[#allocation2 + $0x490] sm:$0xf] %v905_v36  ;;  %v909_v38 = vld [vmem:[%s14938_s4 + $0x48c] sm:$0xf] }
 0x1fb   :  { %908 = vst [vmem:[#allocation2 + $0x494] sm:$0xf] %v907_v37  ;;  %v911_v39 = vld [vmem:[%s14938_s4 + $0x49c] sm:$0xf]  ;;  %v913_v40 = vld [vmem:[%s14938_s4 + $0x4a0] sm:$0xf] }
 0x1fc   :  { %910 = vst [vmem:[#allocation2 + $0x498] sm:$0xf] %v909_v38  ;;  %912 = vst [vmem:[#allocation2 + $0x49c] sm:$0xf] %v911_v39  ;;  %v915_v41 = vld [vmem:[%s14938_s4 + $0x4b0] sm:$0xf] }
 0x1fd   :  { %914 = vst [vmem:[#allocation2 + $0x4a0] sm:$0xf] %v913_v40  ;;  %v917_v42 = vld [vmem:[%s14938_s4 + $0x4a4] sm:$0xf]  ;;  %v919_v43 = vld [vmem:[%s14938_s4 + $0x4b4] sm:$0xf] }
 0x1fe   :  { %916 = vst [vmem:[#allocation2 + $0x4a4] sm:$0xf] %v915_v41  ;;  %918 = vst [vmem:[#allocation2 + $0x4a8] sm:$0xf] %v917_v42  ;;  %v921_v44 = vld [vmem:[%s14938_s4 + $0x4a8] sm:$0xf] }
 0x1ff   :  { %920 = vst [vmem:[#allocation2 + $0x4ac] sm:$0xf] %v919_v43  ;;  %v923_v45 = vld [vmem:[%s14938_s4 + $0x4b8] sm:$0xf]  ;;  %v925_v46 = vld [vmem:[%s14938_s4 + $0x4ac] sm:$0xf] }
 0x200   :  { %922 = vst [vmem:[#allocation2 + $0x4b0] sm:$0xf] %v921_v44  ;;  %924 = vst [vmem:[#allocation2 + $0x4b4] sm:$0xf] %v923_v45  ;;  %v927_v47 = vld [vmem:[%s14938_s4 + $0x4bc] sm:$0xf] }
 0x201   :  { %926 = vst [vmem:[#allocation2 + $0x4b8] sm:$0xf] %v925_v46  ;;  %v929_v48 = vld [vmem:[%s14938_s4 + $0x4c0] sm:$0xf]  ;;  %v931_v49 = vld [vmem:[%s14938_s4 + $0x4d0] sm:$0xf] }
 0x202   :  { %928 = vst [vmem:[#allocation2 + $0x4bc] sm:$0xf] %v927_v47  ;;  %930 = vst [vmem:[#allocation2 + $0x4c0] sm:$0xf] %v929_v48  ;;  %v933_v50 = vld [vmem:[%s14938_s4 + $0x4c4] sm:$0xf] }
 0x203   :  { %932 = vst [vmem:[#allocation2 + $0x4c4] sm:$0xf] %v931_v49  ;;  %v935_v51 = vld [vmem:[%s14938_s4 + $0x4d4] sm:$0xf]  ;;  %v937_v52 = vld [vmem:[%s14938_s4 + $0x4c8] sm:$0xf] }
 0x204   :  { %934 = vst [vmem:[#allocation2 + $0x4c8] sm:$0xf] %v933_v50  ;;  %936 = vst [vmem:[#allocation2 + $0x4cc] sm:$0xf] %v935_v51  ;;  %v939_v53 = vld [vmem:[%s14938_s4 + $0x4d8] sm:$0xf] }
 0x205   :  { %938 = vst [vmem:[#allocation2 + $0x4d0] sm:$0xf] %v937_v52  ;;  %v941_v54 = vld [vmem:[%s14938_s4 + $0x4cc] sm:$0xf]  ;;  %v943_v55 = vld [vmem:[%s14938_s4 + $0x4dc] sm:$0xf] }
 0x206   :  { %940 = vst [vmem:[#allocation2 + $0x4d4] sm:$0xf] %v939_v53  ;;  %942 = vst [vmem:[#allocation2 + $0x4d8] sm:$0xf] %v941_v54  ;;  %v945_v56 = vld [vmem:[%s14938_s4 + $0x4e0] sm:$0xf] }
 0x207   :  { %944 = vst [vmem:[#allocation2 + $0x4dc] sm:$0xf] %v943_v55  ;;  %v947_v57 = vld [vmem:[%s14938_s4 + $0x4f0] sm:$0xf]  ;;  %v949_v58 = vld [vmem:[%s14938_s4 + $0x4e4] sm:$0xf] }
 0x208   :  { %946 = vst [vmem:[#allocation2 + $0x4e0] sm:$0xf] %v945_v56  ;;  %948 = vst [vmem:[#allocation2 + $0x4e4] sm:$0xf] %v947_v57  ;;  %v951_v59 = vld [vmem:[%s14938_s4 + $0x4f4] sm:$0xf] }
 0x209   :  { %950 = vst [vmem:[#allocation2 + $0x4e8] sm:$0xf] %v949_v58  ;;  %v953_v60 = vld [vmem:[%s14938_s4 + $0x4e8] sm:$0xf]  ;;  %v955_v61 = vld [vmem:[%s14938_s4 + $0x4f8] sm:$0xf] }
 0x20a   :  { %952 = vst [vmem:[#allocation2 + $0x4ec] sm:$0xf] %v951_v59  ;;  %954 = vst [vmem:[#allocation2 + $0x4f0] sm:$0xf] %v953_v60  ;;  %v957_v62 = vld [vmem:[%s14938_s4 + $0x4ec] sm:$0xf] }
 0x20b   :  { %956 = vst [vmem:[#allocation2 + $0x4f4] sm:$0xf] %v955_v61  ;;  %v959_v63 = vld [vmem:[%s14938_s4 + $0x4fc] sm:$0xf]  ;;  %v961_v0 = vld [vmem:[%s14938_s4 + $0x500] sm:$0xf] }
 0x20c   :  { %958 = vst [vmem:[#allocation2 + $0x4f8] sm:$0xf] %v957_v62  ;;  %960 = vst [vmem:[#allocation2 + $0x4fc] sm:$0xf] %v959_v63  ;;  %v963_v1 = vld [vmem:[%s14938_s4 + $0x510] sm:$0xf] }
 0x20d   :  { %962 = vst [vmem:[#allocation2 + $0x500] sm:$0xf] %v961_v0  ;;  %v965_v2 = vld [vmem:[%s14938_s4 + $0x504] sm:$0xf]  ;;  %v967_v3 = vld [vmem:[%s14938_s4 + $0x514] sm:$0xf] }
 0x20e   :  { %964 = vst [vmem:[#allocation2 + $0x504] sm:$0xf] %v963_v1  ;;  %966 = vst [vmem:[#allocation2 + $0x508] sm:$0xf] %v965_v2  ;;  %v969_v4 = vld [vmem:[%s14938_s4 + $0x508] sm:$0xf] }
 0x20f   :  { %968 = vst [vmem:[#allocation2 + $0x50c] sm:$0xf] %v967_v3  ;;  %v971_v5 = vld [vmem:[%s14938_s4 + $0x518] sm:$0xf]  ;;  %v973_v6 = vld [vmem:[%s14938_s4 + $0x50c] sm:$0xf] }
 0x210   :  { %970 = vst [vmem:[#allocation2 + $0x510] sm:$0xf] %v969_v4  ;;  %972 = vst [vmem:[#allocation2 + $0x514] sm:$0xf] %v971_v5  ;;  %v975_v7 = vld [vmem:[%s14938_s4 + $0x51c] sm:$0xf] }
 0x211   :  { %974 = vst [vmem:[#allocation2 + $0x518] sm:$0xf] %v973_v6  ;;  %v977_v8 = vld [vmem:[%s14938_s4 + $0x520] sm:$0xf]  ;;  %v979_v9 = vld [vmem:[%s14938_s4 + $0x530] sm:$0xf] }
 0x212   :  { %976 = vst [vmem:[#allocation2 + $0x51c] sm:$0xf] %v975_v7  ;;  %978 = vst [vmem:[#allocation2 + $0x520] sm:$0xf] %v977_v8  ;;  %v981_v10 = vld [vmem:[%s14938_s4 + $0x524] sm:$0xf] }
 0x213   :  { %980 = vst [vmem:[#allocation2 + $0x524] sm:$0xf] %v979_v9  ;;  %v983_v11 = vld [vmem:[%s14938_s4 + $0x534] sm:$0xf]  ;;  %v985_v12 = vld [vmem:[%s14938_s4 + $0x528] sm:$0xf] }
 0x214   :  { %982 = vst [vmem:[#allocation2 + $0x528] sm:$0xf] %v981_v10  ;;  %984 = vst [vmem:[#allocation2 + $0x52c] sm:$0xf] %v983_v11  ;;  %v987_v13 = vld [vmem:[%s14938_s4 + $0x538] sm:$0xf] }
 0x215   :  { %986 = vst [vmem:[#allocation2 + $0x530] sm:$0xf] %v985_v12  ;;  %v989_v14 = vld [vmem:[%s14938_s4 + $0x52c] sm:$0xf]  ;;  %v991_v15 = vld [vmem:[%s14938_s4 + $0x53c] sm:$0xf] }
 0x216   :  { %988 = vst [vmem:[#allocation2 + $0x534] sm:$0xf] %v987_v13  ;;  %990 = vst [vmem:[#allocation2 + $0x538] sm:$0xf] %v989_v14  ;;  %v993_v16 = vld [vmem:[%s14938_s4 + $0x540] sm:$0xf] }
 0x217   :  { %992 = vst [vmem:[#allocation2 + $0x53c] sm:$0xf] %v991_v15  ;;  %v995_v17 = vld [vmem:[%s14938_s4 + $0x550] sm:$0xf]  ;;  %v997_v18 = vld [vmem:[%s14938_s4 + $0x544] sm:$0xf] }
 0x218   :  { %994 = vst [vmem:[#allocation2 + $0x540] sm:$0xf] %v993_v16  ;;  %996 = vst [vmem:[#allocation2 + $0x544] sm:$0xf] %v995_v17  ;;  %v999_v19 = vld [vmem:[%s14938_s4 + $0x554] sm:$0xf] }
 0x219   :  { %998 = vst [vmem:[#allocation2 + $0x548] sm:$0xf] %v997_v18  ;;  %v1001_v20 = vld [vmem:[%s14938_s4 + $0x548] sm:$0xf]  ;;  %v1003_v21 = vld [vmem:[%s14938_s4 + $0x558] sm:$0xf] }
 0x21a   :  { %1000 = vst [vmem:[#allocation2 + $0x54c] sm:$0xf] %v999_v19  ;;  %1002 = vst [vmem:[#allocation2 + $0x550] sm:$0xf] %v1001_v20  ;;  %v1005_v22 = vld [vmem:[%s14938_s4 + $0x54c] sm:$0xf] }
 0x21b   :  { %1004 = vst [vmem:[#allocation2 + $0x554] sm:$0xf] %v1003_v21  ;;  %v1007_v23 = vld [vmem:[%s14938_s4 + $0x55c] sm:$0xf]  ;;  %v1009_v24 = vld [vmem:[%s14938_s4 + $0x560] sm:$0xf] }
 0x21c   :  { %1006 = vst [vmem:[#allocation2 + $0x558] sm:$0xf] %v1005_v22  ;;  %1008 = vst [vmem:[#allocation2 + $0x55c] sm:$0xf] %v1007_v23  ;;  %v1011_v25 = vld [vmem:[%s14938_s4 + $0x570] sm:$0xf] }
 0x21d   :  { %1010 = vst [vmem:[#allocation2 + $0x560] sm:$0xf] %v1009_v24  ;;  %v1013_v26 = vld [vmem:[%s14938_s4 + $0x564] sm:$0xf]  ;;  %v1015_v27 = vld [vmem:[%s14938_s4 + $0x574] sm:$0xf] }
 0x21e   :  { %1012 = vst [vmem:[#allocation2 + $0x564] sm:$0xf] %v1011_v25  ;;  %1014 = vst [vmem:[#allocation2 + $0x568] sm:$0xf] %v1013_v26  ;;  %v1017_v28 = vld [vmem:[%s14938_s4 + $0x568] sm:$0xf] }
 0x21f   :  { %1016 = vst [vmem:[#allocation2 + $0x56c] sm:$0xf] %v1015_v27  ;;  %v1019_v29 = vld [vmem:[%s14938_s4 + $0x578] sm:$0xf]  ;;  %v1021_v30 = vld [vmem:[%s14938_s4 + $0x56c] sm:$0xf] }
 0x220   :  { %1018 = vst [vmem:[#allocation2 + $0x570] sm:$0xf] %v1017_v28  ;;  %1020 = vst [vmem:[#allocation2 + $0x574] sm:$0xf] %v1019_v29  ;;  %v1023_v31 = vld [vmem:[%s14938_s4 + $0x57c] sm:$0xf] }
 0x221   :  { %1022 = vst [vmem:[#allocation2 + $0x578] sm:$0xf] %v1021_v30  ;;  %v1025_v32 = vld [vmem:[%s14938_s4 + $0x580] sm:$0xf]  ;;  %v1027_v33 = vld [vmem:[%s14938_s4 + $0x590] sm:$0xf] }
 0x222   :  { %1024 = vst [vmem:[#allocation2 + $0x57c] sm:$0xf] %v1023_v31  ;;  %1026 = vst [vmem:[#allocation2 + $0x580] sm:$0xf] %v1025_v32  ;;  %v1029_v34 = vld [vmem:[%s14938_s4 + $0x584] sm:$0xf] }
 0x223   :  { %1028 = vst [vmem:[#allocation2 + $0x584] sm:$0xf] %v1027_v33  ;;  %v1031_v35 = vld [vmem:[%s14938_s4 + $0x594] sm:$0xf]  ;;  %v1033_v36 = vld [vmem:[%s14938_s4 + $0x588] sm:$0xf] }
 0x224   :  { %1030 = vst [vmem:[#allocation2 + $0x588] sm:$0xf] %v1029_v34  ;;  %1032 = vst [vmem:[#allocation2 + $0x58c] sm:$0xf] %v1031_v35  ;;  %v1035_v37 = vld [vmem:[%s14938_s4 + $0x598] sm:$0xf] }
 0x225   :  { %1034 = vst [vmem:[#allocation2 + $0x590] sm:$0xf] %v1033_v36  ;;  %v1037_v38 = vld [vmem:[%s14938_s4 + $0x58c] sm:$0xf]  ;;  %v1039_v39 = vld [vmem:[%s14938_s4 + $0x59c] sm:$0xf] }
 0x226   :  { %1036 = vst [vmem:[#allocation2 + $0x594] sm:$0xf] %v1035_v37  ;;  %1038 = vst [vmem:[#allocation2 + $0x598] sm:$0xf] %v1037_v38  ;;  %v1041_v40 = vld [vmem:[%s14938_s4 + $0x5a0] sm:$0xf] }
 0x227   :  { %1040 = vst [vmem:[#allocation2 + $0x59c] sm:$0xf] %v1039_v39  ;;  %v1043_v41 = vld [vmem:[%s14938_s4 + $0x5b0] sm:$0xf]  ;;  %v1045_v42 = vld [vmem:[%s14938_s4 + $0x5a4] sm:$0xf] }
 0x228   :  { %1042 = vst [vmem:[#allocation2 + $0x5a0] sm:$0xf] %v1041_v40  ;;  %1044 = vst [vmem:[#allocation2 + $0x5a4] sm:$0xf] %v1043_v41  ;;  %v1047_v43 = vld [vmem:[%s14938_s4 + $0x5b4] sm:$0xf] }
 0x229   :  { %1046 = vst [vmem:[#allocation2 + $0x5a8] sm:$0xf] %v1045_v42  ;;  %v1049_v44 = vld [vmem:[%s14938_s4 + $0x5a8] sm:$0xf]  ;;  %v1051_v45 = vld [vmem:[%s14938_s4 + $0x5b8] sm:$0xf] }
 0x22a   :  { %1048 = vst [vmem:[#allocation2 + $0x5ac] sm:$0xf] %v1047_v43  ;;  %1050 = vst [vmem:[#allocation2 + $0x5b0] sm:$0xf] %v1049_v44  ;;  %v1053_v46 = vld [vmem:[%s14938_s4 + $0x5ac] sm:$0xf] }
 0x22b   :  { %1052 = vst [vmem:[#allocation2 + $0x5b4] sm:$0xf] %v1051_v45  ;;  %v1055_v47 = vld [vmem:[%s14938_s4 + $0x5bc] sm:$0xf]  ;;  %v1057_v48 = vld [vmem:[%s14938_s4 + $0x5c0] sm:$0xf] }
 0x22c   :  { %1054 = vst [vmem:[#allocation2 + $0x5b8] sm:$0xf] %v1053_v46  ;;  %1056 = vst [vmem:[#allocation2 + $0x5bc] sm:$0xf] %v1055_v47  ;;  %v1059_v49 = vld [vmem:[%s14938_s4 + $0x5d0] sm:$0xf] }
 0x22d   :  { %1058 = vst [vmem:[#allocation2 + $0x5c0] sm:$0xf] %v1057_v48  ;;  %v1061_v50 = vld [vmem:[%s14938_s4 + $0x5c4] sm:$0xf]  ;;  %v1063_v51 = vld [vmem:[%s14938_s4 + $0x5d4] sm:$0xf] }
 0x22e   :  { %1060 = vst [vmem:[#allocation2 + $0x5c4] sm:$0xf] %v1059_v49  ;;  %1062 = vst [vmem:[#allocation2 + $0x5c8] sm:$0xf] %v1061_v50  ;;  %v1065_v52 = vld [vmem:[%s14938_s4 + $0x5c8] sm:$0xf] }
 0x22f   :  { %1064 = vst [vmem:[#allocation2 + $0x5cc] sm:$0xf] %v1063_v51  ;;  %v1067_v53 = vld [vmem:[%s14938_s4 + $0x5d8] sm:$0xf]  ;;  %v1069_v54 = vld [vmem:[%s14938_s4 + $0x5cc] sm:$0xf] }
 0x230   :  { %1066 = vst [vmem:[#allocation2 + $0x5d0] sm:$0xf] %v1065_v52  ;;  %1068 = vst [vmem:[#allocation2 + $0x5d4] sm:$0xf] %v1067_v53  ;;  %v1071_v55 = vld [vmem:[%s14938_s4 + $0x5dc] sm:$0xf] }
 0x231   :  { %1070 = vst [vmem:[#allocation2 + $0x5d8] sm:$0xf] %v1069_v54  ;;  %v1073_v56 = vld [vmem:[%s14938_s4 + $0x5e0] sm:$0xf]  ;;  %v1075_v57 = vld [vmem:[%s14938_s4 + $0x5f0] sm:$0xf] }
 0x232   :  { %1072 = vst [vmem:[#allocation2 + $0x5dc] sm:$0xf] %v1071_v55  ;;  %1074 = vst [vmem:[#allocation2 + $0x5e0] sm:$0xf] %v1073_v56  ;;  %v1077_v58 = vld [vmem:[%s14938_s4 + $0x5e4] sm:$0xf] }
 0x233   :  { %1076 = vst [vmem:[#allocation2 + $0x5e4] sm:$0xf] %v1075_v57  ;;  %v1079_v59 = vld [vmem:[%s14938_s4 + $0x5f4] sm:$0xf]  ;;  %v1081_v60 = vld [vmem:[%s14938_s4 + $0x5e8] sm:$0xf] }
 0x234   :  { %1078 = vst [vmem:[#allocation2 + $0x5e8] sm:$0xf] %v1077_v58  ;;  %1080 = vst [vmem:[#allocation2 + $0x5ec] sm:$0xf] %v1079_v59  ;;  %v1083_v61 = vld [vmem:[%s14938_s4 + $0x5f8] sm:$0xf] }
 0x235   :  { %1082 = vst [vmem:[#allocation2 + $0x5f0] sm:$0xf] %v1081_v60  ;;  %v1085_v62 = vld [vmem:[%s14938_s4 + $0x5ec] sm:$0xf]  ;;  %v1087_v63 = vld [vmem:[%s14938_s4 + $0x5fc] sm:$0xf] }
 0x236   :  { %1084 = vst [vmem:[#allocation2 + $0x5f4] sm:$0xf] %v1083_v61  ;;  %1086 = vst [vmem:[#allocation2 + $0x5f8] sm:$0xf] %v1085_v62 }
 0x237   :  { %1088 = vst [vmem:[#allocation2 + $0x5fc] sm:$0xf] %v1087_v63 }
 0x238   :  { %1887 = vsyncadd [#allocation7], 24576  ;;  %s14939_s3 = sld [smem:[#allocation69_spill]] }
 0x23e   :  { %v1906_v0 = vld [vmem:[%s14939_s3] sm:$0xf]  ;;  %v1908_v1 = vld [vmem:[%s14939_s3 + $0x8] sm:$0xf]  ;;  %v1910_v2 = vld [vmem:[%s14939_s3 + $0x4] sm:$0xf] }
 0x23f   :  { %1907 = vst [vmem:[#allocation3] sm:$0xf] %v1906_v0  ;;  %1909 = vst [vmem:[#allocation3 + $0x4] sm:$0xf] %v1908_v1  ;;  %v1912_v3 = vld [vmem:[%s14939_s3 + $0xc] sm:$0xf] }
 0x240   :  { %v1914_v4 = vld [vmem:[%s14939_s3 + $0x10] sm:$0xf]  ;;  %1911 = vst [vmem:[#allocation3 + $0x8] sm:$0xf] %v1910_v2  ;;  %1913 = vst [vmem:[#allocation3 + $0xc] sm:$0xf] %v1912_v3 }
 0x241   :  { %1915 = vst [vmem:[#allocation3 + $0x10] sm:$0xf] %v1914_v4  ;;  %v1916_v5 = vld [vmem:[%s14939_s3 + $0x18] sm:$0xf]  ;;  %v1918_v6 = vld [vmem:[%s14939_s3 + $0x14] sm:$0xf] }
 0x242   :  { %v1920_v7 = vld [vmem:[%s14939_s3 + $0x1c] sm:$0xf]  ;;  %1917 = vst [vmem:[#allocation3 + $0x14] sm:$0xf] %v1916_v5  ;;  %1919 = vst [vmem:[#allocation3 + $0x18] sm:$0xf] %v1918_v6 }
 0x243   :  { %1921 = vst [vmem:[#allocation3 + $0x1c] sm:$0xf] %v1920_v7  ;;  %v1922_v8 = vld [vmem:[%s14939_s3 + $0x20] sm:$0xf]  ;;  %v1924_v9 = vld [vmem:[%s14939_s3 + $0x28] sm:$0xf] }
 0x244   :  { %v1926_v10 = vld [vmem:[%s14939_s3 + $0x24] sm:$0xf]  ;;  %1923 = vst [vmem:[#allocation3 + $0x20] sm:$0xf] %v1922_v8  ;;  %1925 = vst [vmem:[#allocation3 + $0x24] sm:$0xf] %v1924_v9 }
 0x245   :  { %1927 = vst [vmem:[#allocation3 + $0x28] sm:$0xf] %v1926_v10  ;;  %v1928_v11 = vld [vmem:[%s14939_s3 + $0x2c] sm:$0xf]  ;;  %v1930_v12 = vld [vmem:[%s14939_s3 + $0x30] sm:$0xf] }
 0x246   :  { %v1932_v13 = vld [vmem:[%s14939_s3 + $0x38] sm:$0xf]  ;;  %1929 = vst [vmem:[#allocation3 + $0x2c] sm:$0xf] %v1928_v11  ;;  %1931 = vst [vmem:[#allocation3 + $0x30] sm:$0xf] %v1930_v12 }
 0x247   :  { %1933 = vst [vmem:[#allocation3 + $0x34] sm:$0xf] %v1932_v13  ;;  %v1934_v14 = vld [vmem:[%s14939_s3 + $0x34] sm:$0xf]  ;;  %v1936_v15 = vld [vmem:[%s14939_s3 + $0x3c] sm:$0xf] }
 0x248   :  { %v1938_v16 = vld [vmem:[%s14939_s3 + $0x40] sm:$0xf]  ;;  %1935 = vst [vmem:[#allocation3 + $0x38] sm:$0xf] %v1934_v14  ;;  %1937 = vst [vmem:[#allocation3 + $0x3c] sm:$0xf] %v1936_v15 }
 0x249   :  { %1939 = vst [vmem:[#allocation3 + $0x40] sm:$0xf] %v1938_v16  ;;  %v1940_v17 = vld [vmem:[%s14939_s3 + $0x48] sm:$0xf]  ;;  %v1942_v18 = vld [vmem:[%s14939_s3 + $0x44] sm:$0xf] }
 0x24a   :  { %v1944_v19 = vld [vmem:[%s14939_s3 + $0x4c] sm:$0xf]  ;;  %1941 = vst [vmem:[#allocation3 + $0x44] sm:$0xf] %v1940_v17  ;;  %1943 = vst [vmem:[#allocation3 + $0x48] sm:$0xf] %v1942_v18 }
 0x24b   :  { %1945 = vst [vmem:[#allocation3 + $0x4c] sm:$0xf] %v1944_v19  ;;  %v1946_v20 = vld [vmem:[%s14939_s3 + $0x50] sm:$0xf]  ;;  %v1948_v21 = vld [vmem:[%s14939_s3 + $0x58] sm:$0xf] }
 0x24c   :  { %v1950_v22 = vld [vmem:[%s14939_s3 + $0x54] sm:$0xf]  ;;  %1947 = vst [vmem:[#allocation3 + $0x50] sm:$0xf] %v1946_v20  ;;  %1949 = vst [vmem:[#allocation3 + $0x54] sm:$0xf] %v1948_v21 }
 0x24d   :  { %1951 = vst [vmem:[#allocation3 + $0x58] sm:$0xf] %v1950_v22  ;;  %v1952_v23 = vld [vmem:[%s14939_s3 + $0x5c] sm:$0xf]  ;;  %v1954_v24 = vld [vmem:[%s14939_s3 + $0x60] sm:$0xf] }
 0x24e   :  { %v1956_v25 = vld [vmem:[%s14939_s3 + $0x68] sm:$0xf]  ;;  %1953 = vst [vmem:[#allocation3 + $0x5c] sm:$0xf] %v1952_v23  ;;  %1955 = vst [vmem:[#allocation3 + $0x60] sm:$0xf] %v1954_v24 }
 0x24f   :  { %1957 = vst [vmem:[#allocation3 + $0x64] sm:$0xf] %v1956_v25  ;;  %v1958_v26 = vld [vmem:[%s14939_s3 + $0x64] sm:$0xf]  ;;  %v1960_v27 = vld [vmem:[%s14939_s3 + $0x6c] sm:$0xf] }
 0x250   :  { %v1962_v28 = vld [vmem:[%s14939_s3 + $0x70] sm:$0xf]  ;;  %1959 = vst [vmem:[#allocation3 + $0x68] sm:$0xf] %v1958_v26  ;;  %1961 = vst [vmem:[#allocation3 + $0x6c] sm:$0xf] %v1960_v27 }
 0x251   :  { %1963 = vst [vmem:[#allocation3 + $0x70] sm:$0xf] %v1962_v28  ;;  %v1964_v29 = vld [vmem:[%s14939_s3 + $0x78] sm:$0xf]  ;;  %v1966_v30 = vld [vmem:[%s14939_s3 + $0x74] sm:$0xf] }
 0x252   :  { %v1968_v31 = vld [vmem:[%s14939_s3 + $0x7c] sm:$0xf]  ;;  %1965 = vst [vmem:[#allocation3 + $0x74] sm:$0xf] %v1964_v29  ;;  %1967 = vst [vmem:[#allocation3 + $0x78] sm:$0xf] %v1966_v30 }
 0x253   :  { %1969 = vst [vmem:[#allocation3 + $0x7c] sm:$0xf] %v1968_v31  ;;  %v1970_v32 = vld [vmem:[%s14939_s3 + $0x80] sm:$0xf]  ;;  %v1972_v33 = vld [vmem:[%s14939_s3 + $0x88] sm:$0xf] }
 0x254   :  { %v1974_v34 = vld [vmem:[%s14939_s3 + $0x84] sm:$0xf]  ;;  %1971 = vst [vmem:[#allocation3 + $0x80] sm:$0xf] %v1970_v32  ;;  %1973 = vst [vmem:[#allocation3 + $0x84] sm:$0xf] %v1972_v33 }
 0x255   :  { %1975 = vst [vmem:[#allocation3 + $0x88] sm:$0xf] %v1974_v34  ;;  %v1976_v35 = vld [vmem:[%s14939_s3 + $0x8c] sm:$0xf]  ;;  %v1978_v36 = vld [vmem:[%s14939_s3 + $0x90] sm:$0xf] }
 0x256   :  { %v1980_v37 = vld [vmem:[%s14939_s3 + $0x98] sm:$0xf]  ;;  %1977 = vst [vmem:[#allocation3 + $0x8c] sm:$0xf] %v1976_v35  ;;  %1979 = vst [vmem:[#allocation3 + $0x90] sm:$0xf] %v1978_v36 }
 0x257   :  { %1981 = vst [vmem:[#allocation3 + $0x94] sm:$0xf] %v1980_v37  ;;  %v1982_v38 = vld [vmem:[%s14939_s3 + $0x94] sm:$0xf]  ;;  %v1984_v39 = vld [vmem:[%s14939_s3 + $0x9c] sm:$0xf] }
 0x258   :  { %v1986_v40 = vld [vmem:[%s14939_s3 + $0xa0] sm:$0xf]  ;;  %1983 = vst [vmem:[#allocation3 + $0x98] sm:$0xf] %v1982_v38  ;;  %1985 = vst [vmem:[#allocation3 + $0x9c] sm:$0xf] %v1984_v39 }
 0x259   :  { %1987 = vst [vmem:[#allocation3 + $0xa0] sm:$0xf] %v1986_v40  ;;  %v1988_v41 = vld [vmem:[%s14939_s3 + $0xa8] sm:$0xf]  ;;  %v1990_v42 = vld [vmem:[%s14939_s3 + $0xa4] sm:$0xf] }
 0x25a   :  { %v1992_v43 = vld [vmem:[%s14939_s3 + $0xac] sm:$0xf]  ;;  %1989 = vst [vmem:[#allocation3 + $0xa4] sm:$0xf] %v1988_v41  ;;  %1991 = vst [vmem:[#allocation3 + $0xa8] sm:$0xf] %v1990_v42 }
 0x25b   :  { %1993 = vst [vmem:[#allocation3 + $0xac] sm:$0xf] %v1992_v43  ;;  %v1994_v44 = vld [vmem:[%s14939_s3 + $0xb0] sm:$0xf]  ;;  %v1996_v45 = vld [vmem:[%s14939_s3 + $0xb8] sm:$0xf] }
 0x25c   :  { %v1998_v46 = vld [vmem:[%s14939_s3 + $0xb4] sm:$0xf]  ;;  %1995 = vst [vmem:[#allocation3 + $0xb0] sm:$0xf] %v1994_v44  ;;  %1997 = vst [vmem:[#allocation3 + $0xb4] sm:$0xf] %v1996_v45 }
 0x25d   :  { %1999 = vst [vmem:[#allocation3 + $0xb8] sm:$0xf] %v1998_v46  ;;  %v2000_v47 = vld [vmem:[%s14939_s3 + $0xbc] sm:$0xf]  ;;  %v2002_v48 = vld [vmem:[%s14939_s3 + $0xc0] sm:$0xf] }
 0x25e   :  { %v2004_v49 = vld [vmem:[%s14939_s3 + $0xc8] sm:$0xf]  ;;  %2001 = vst [vmem:[#allocation3 + $0xbc] sm:$0xf] %v2000_v47  ;;  %2003 = vst [vmem:[#allocation3 + $0xc0] sm:$0xf] %v2002_v48 }
 0x25f   :  { %2005 = vst [vmem:[#allocation3 + $0xc4] sm:$0xf] %v2004_v49  ;;  %v2006_v50 = vld [vmem:[%s14939_s3 + $0xc4] sm:$0xf]  ;;  %v2008_v51 = vld [vmem:[%s14939_s3 + $0xcc] sm:$0xf] }
 0x260   :  { %v2010_v52 = vld [vmem:[%s14939_s3 + $0xd0] sm:$0xf]  ;;  %2007 = vst [vmem:[#allocation3 + $0xc8] sm:$0xf] %v2006_v50  ;;  %2009 = vst [vmem:[#allocation3 + $0xcc] sm:$0xf] %v2008_v51 }
 0x261   :  { %2011 = vst [vmem:[#allocation3 + $0xd0] sm:$0xf] %v2010_v52  ;;  %v2012_v53 = vld [vmem:[%s14939_s3 + $0xd8] sm:$0xf]  ;;  %v2014_v54 = vld [vmem:[%s14939_s3 + $0xd4] sm:$0xf] }
 0x262   :  { %v2016_v55 = vld [vmem:[%s14939_s3 + $0xdc] sm:$0xf]  ;;  %2013 = vst [vmem:[#allocation3 + $0xd4] sm:$0xf] %v2012_v53  ;;  %2015 = vst [vmem:[#allocation3 + $0xd8] sm:$0xf] %v2014_v54 }
 0x263   :  { %2017 = vst [vmem:[#allocation3 + $0xdc] sm:$0xf] %v2016_v55  ;;  %v2018_v56 = vld [vmem:[%s14939_s3 + $0xe0] sm:$0xf]  ;;  %v2020_v57 = vld [vmem:[%s14939_s3 + $0xe8] sm:$0xf] }
 0x264   :  { %v2022_v58 = vld [vmem:[%s14939_s3 + $0xe4] sm:$0xf]  ;;  %2019 = vst [vmem:[#allocation3 + $0xe0] sm:$0xf] %v2018_v56  ;;  %2021 = vst [vmem:[#allocation3 + $0xe4] sm:$0xf] %v2020_v57 }
 0x265   :  { %2023 = vst [vmem:[#allocation3 + $0xe8] sm:$0xf] %v2022_v58  ;;  %v2024_v59 = vld [vmem:[%s14939_s3 + $0xec] sm:$0xf]  ;;  %v2026_v60 = vld [vmem:[%s14939_s3 + $0xf0] sm:$0xf] }
 0x266   :  { %v2028_v61 = vld [vmem:[%s14939_s3 + $0xf8] sm:$0xf]  ;;  %2025 = vst [vmem:[#allocation3 + $0xec] sm:$0xf] %v2024_v59  ;;  %2027 = vst [vmem:[#allocation3 + $0xf0] sm:$0xf] %v2026_v60 }
 0x267   :  { %2029 = vst [vmem:[#allocation3 + $0xf4] sm:$0xf] %v2028_v61  ;;  %v2030_v62 = vld [vmem:[%s14939_s3 + $0xf4] sm:$0xf]  ;;  %v2032_v63 = vld [vmem:[%s14939_s3 + $0xfc] sm:$0xf] }
 0x268   :  { %v2034_v0 = vld [vmem:[%s14939_s3 + $0x100] sm:$0xf]  ;;  %2031 = vst [vmem:[#allocation3 + $0xf8] sm:$0xf] %v2030_v62  ;;  %2033 = vst [vmem:[#allocation3 + $0xfc] sm:$0xf] %v2032_v63 }
 0x269   :  { %2035 = vst [vmem:[#allocation3 + $0x100] sm:$0xf] %v2034_v0  ;;  %v2036_v1 = vld [vmem:[%s14939_s3 + $0x108] sm:$0xf]  ;;  %v2038_v2 = vld [vmem:[%s14939_s3 + $0x104] sm:$0xf] }
 0x26a   :  { %v2040_v3 = vld [vmem:[%s14939_s3 + $0x10c] sm:$0xf]  ;;  %2037 = vst [vmem:[#allocation3 + $0x104] sm:$0xf] %v2036_v1  ;;  %2039 = vst [vmem:[#allocation3 + $0x108] sm:$0xf] %v2038_v2 }
 0x26b   :  { %2041 = vst [vmem:[#allocation3 + $0x10c] sm:$0xf] %v2040_v3  ;;  %v2042_v4 = vld [vmem:[%s14939_s3 + $0x110] sm:$0xf]  ;;  %v2044_v5 = vld [vmem:[%s14939_s3 + $0x118] sm:$0xf] }
 0x26c   :  { %v2046_v6 = vld [vmem:[%s14939_s3 + $0x114] sm:$0xf]  ;;  %2043 = vst [vmem:[#allocation3 + $0x110] sm:$0xf] %v2042_v4  ;;  %2045 = vst [vmem:[#allocation3 + $0x114] sm:$0xf] %v2044_v5 }
 0x26d   :  { %2047 = vst [vmem:[#allocation3 + $0x118] sm:$0xf] %v2046_v6  ;;  %v2048_v7 = vld [vmem:[%s14939_s3 + $0x11c] sm:$0xf]  ;;  %v2050_v8 = vld [vmem:[%s14939_s3 + $0x120] sm:$0xf] }
 0x26e   :  { %v2052_v9 = vld [vmem:[%s14939_s3 + $0x128] sm:$0xf]  ;;  %2049 = vst [vmem:[#allocation3 + $0x11c] sm:$0xf] %v2048_v7  ;;  %2051 = vst [vmem:[#allocation3 + $0x120] sm:$0xf] %v2050_v8 }
 0x26f   :  { %2053 = vst [vmem:[#allocation3 + $0x124] sm:$0xf] %v2052_v9  ;;  %v2054_v10 = vld [vmem:[%s14939_s3 + $0x124] sm:$0xf]  ;;  %v2056_v11 = vld [vmem:[%s14939_s3 + $0x12c] sm:$0xf] }
 0x270   :  { %v2058_v12 = vld [vmem:[%s14939_s3 + $0x130] sm:$0xf]  ;;  %2055 = vst [vmem:[#allocation3 + $0x128] sm:$0xf] %v2054_v10  ;;  %2057 = vst [vmem:[#allocation3 + $0x12c] sm:$0xf] %v2056_v11 }
 0x271   :  { %2059 = vst [vmem:[#allocation3 + $0x130] sm:$0xf] %v2058_v12  ;;  %v2060_v13 = vld [vmem:[%s14939_s3 + $0x138] sm:$0xf]  ;;  %v2062_v14 = vld [vmem:[%s14939_s3 + $0x134] sm:$0xf] }
 0x272   :  { %v2064_v15 = vld [vmem:[%s14939_s3 + $0x13c] sm:$0xf]  ;;  %2061 = vst [vmem:[#allocation3 + $0x134] sm:$0xf] %v2060_v13  ;;  %2063 = vst [vmem:[#allocation3 + $0x138] sm:$0xf] %v2062_v14 }
 0x273   :  { %2065 = vst [vmem:[#allocation3 + $0x13c] sm:$0xf] %v2064_v15  ;;  %v2066_v16 = vld [vmem:[%s14939_s3 + $0x140] sm:$0xf]  ;;  %v2068_v17 = vld [vmem:[%s14939_s3 + $0x148] sm:$0xf] }
 0x274   :  { %v2070_v18 = vld [vmem:[%s14939_s3 + $0x144] sm:$0xf]  ;;  %2067 = vst [vmem:[#allocation3 + $0x140] sm:$0xf] %v2066_v16  ;;  %2069 = vst [vmem:[#allocation3 + $0x144] sm:$0xf] %v2068_v17 }
 0x275   :  { %2071 = vst [vmem:[#allocation3 + $0x148] sm:$0xf] %v2070_v18  ;;  %v2072_v19 = vld [vmem:[%s14939_s3 + $0x14c] sm:$0xf]  ;;  %v2074_v20 = vld [vmem:[%s14939_s3 + $0x150] sm:$0xf] }
 0x276   :  { %v2076_v21 = vld [vmem:[%s14939_s3 + $0x158] sm:$0xf]  ;;  %2073 = vst [vmem:[#allocation3 + $0x14c] sm:$0xf] %v2072_v19  ;;  %2075 = vst [vmem:[#allocation3 + $0x150] sm:$0xf] %v2074_v20 }
 0x277   :  { %2077 = vst [vmem:[#allocation3 + $0x154] sm:$0xf] %v2076_v21  ;;  %v2078_v22 = vld [vmem:[%s14939_s3 + $0x154] sm:$0xf]  ;;  %v2080_v23 = vld [vmem:[%s14939_s3 + $0x15c] sm:$0xf] }
 0x278   :  { %v2082_v24 = vld [vmem:[%s14939_s3 + $0x160] sm:$0xf]  ;;  %2079 = vst [vmem:[#allocation3 + $0x158] sm:$0xf] %v2078_v22  ;;  %2081 = vst [vmem:[#allocation3 + $0x15c] sm:$0xf] %v2080_v23 }
 0x279   :  { %2083 = vst [vmem:[#allocation3 + $0x160] sm:$0xf] %v2082_v24  ;;  %v2084_v25 = vld [vmem:[%s14939_s3 + $0x168] sm:$0xf]  ;;  %v2086_v26 = vld [vmem:[%s14939_s3 + $0x164] sm:$0xf] }
 0x27a   :  { %v2088_v27 = vld [vmem:[%s14939_s3 + $0x16c] sm:$0xf]  ;;  %2085 = vst [vmem:[#allocation3 + $0x164] sm:$0xf] %v2084_v25  ;;  %2087 = vst [vmem:[#allocation3 + $0x168] sm:$0xf] %v2086_v26 }
 0x27b   :  { %2089 = vst [vmem:[#allocation3 + $0x16c] sm:$0xf] %v2088_v27  ;;  %v2090_v28 = vld [vmem:[%s14939_s3 + $0x170] sm:$0xf]  ;;  %v2092_v29 = vld [vmem:[%s14939_s3 + $0x178] sm:$0xf] }
 0x27c   :  { %v2094_v30 = vld [vmem:[%s14939_s3 + $0x174] sm:$0xf]  ;;  %2091 = vst [vmem:[#allocation3 + $0x170] sm:$0xf] %v2090_v28  ;;  %2093 = vst [vmem:[#allocation3 + $0x174] sm:$0xf] %v2092_v29 }
 0x27d   :  { %2095 = vst [vmem:[#allocation3 + $0x178] sm:$0xf] %v2094_v30  ;;  %v2096_v31 = vld [vmem:[%s14939_s3 + $0x17c] sm:$0xf]  ;;  %v2098_v32 = vld [vmem:[%s14939_s3 + $0x180] sm:$0xf] }
 0x27e   :  { %v2100_v33 = vld [vmem:[%s14939_s3 + $0x188] sm:$0xf]  ;;  %2097 = vst [vmem:[#allocation3 + $0x17c] sm:$0xf] %v2096_v31  ;;  %2099 = vst [vmem:[#allocation3 + $0x180] sm:$0xf] %v2098_v32 }
 0x27f   :  { %2101 = vst [vmem:[#allocation3 + $0x184] sm:$0xf] %v2100_v33  ;;  %v2102_v34 = vld [vmem:[%s14939_s3 + $0x184] sm:$0xf]  ;;  %v2104_v35 = vld [vmem:[%s14939_s3 + $0x18c] sm:$0xf] }
 0x280   :  { %v2106_v36 = vld [vmem:[%s14939_s3 + $0x190] sm:$0xf]  ;;  %2103 = vst [vmem:[#allocation3 + $0x188] sm:$0xf] %v2102_v34  ;;  %2105 = vst [vmem:[#allocation3 + $0x18c] sm:$0xf] %v2104_v35 }
 0x281   :  { %2107 = vst [vmem:[#allocation3 + $0x190] sm:$0xf] %v2106_v36  ;;  %v2108_v37 = vld [vmem:[%s14939_s3 + $0x198] sm:$0xf]  ;;  %v2110_v38 = vld [vmem:[%s14939_s3 + $0x194] sm:$0xf] }
 0x282   :  { %v2112_v39 = vld [vmem:[%s14939_s3 + $0x19c] sm:$0xf]  ;;  %2109 = vst [vmem:[#allocation3 + $0x194] sm:$0xf] %v2108_v37  ;;  %2111 = vst [vmem:[#allocation3 + $0x198] sm:$0xf] %v2110_v38 }
 0x283   :  { %2113 = vst [vmem:[#allocation3 + $0x19c] sm:$0xf] %v2112_v39  ;;  %v2114_v40 = vld [vmem:[%s14939_s3 + $0x1a0] sm:$0xf]  ;;  %v2116_v41 = vld [vmem:[%s14939_s3 + $0x1a8] sm:$0xf] }
 0x284   :  { %v2118_v42 = vld [vmem:[%s14939_s3 + $0x1a4] sm:$0xf]  ;;  %2115 = vst [vmem:[#allocation3 + $0x1a0] sm:$0xf] %v2114_v40  ;;  %2117 = vst [vmem:[#allocation3 + $0x1a4] sm:$0xf] %v2116_v41 }
 0x285   :  { %2119 = vst [vmem:[#allocation3 + $0x1a8] sm:$0xf] %v2118_v42  ;;  %v2120_v43 = vld [vmem:[%s14939_s3 + $0x1ac] sm:$0xf]  ;;  %v2122_v44 = vld [vmem:[%s14939_s3 + $0x1b0] sm:$0xf] }
 0x286   :  { %v2124_v45 = vld [vmem:[%s14939_s3 + $0x1b8] sm:$0xf]  ;;  %2121 = vst [vmem:[#allocation3 + $0x1ac] sm:$0xf] %v2120_v43  ;;  %2123 = vst [vmem:[#allocation3 + $0x1b0] sm:$0xf] %v2122_v44 }
 0x287   :  { %2125 = vst [vmem:[#allocation3 + $0x1b4] sm:$0xf] %v2124_v45  ;;  %v2126_v46 = vld [vmem:[%s14939_s3 + $0x1b4] sm:$0xf]  ;;  %v2128_v47 = vld [vmem:[%s14939_s3 + $0x1bc] sm:$0xf] }
 0x288   :  { %v2130_v48 = vld [vmem:[%s14939_s3 + $0x1c0] sm:$0xf]  ;;  %2127 = vst [vmem:[#allocation3 + $0x1b8] sm:$0xf] %v2126_v46  ;;  %2129 = vst [vmem:[#allocation3 + $0x1bc] sm:$0xf] %v2128_v47 }
 0x289   :  { %2131 = vst [vmem:[#allocation3 + $0x1c0] sm:$0xf] %v2130_v48  ;;  %v2132_v49 = vld [vmem:[%s14939_s3 + $0x1c8] sm:$0xf]  ;;  %v2134_v50 = vld [vmem:[%s14939_s3 + $0x1c4] sm:$0xf] }
 0x28a   :  { %v2136_v51 = vld [vmem:[%s14939_s3 + $0x1cc] sm:$0xf]  ;;  %2133 = vst [vmem:[#allocation3 + $0x1c4] sm:$0xf] %v2132_v49  ;;  %2135 = vst [vmem:[#allocation3 + $0x1c8] sm:$0xf] %v2134_v50 }
 0x28b   :  { %2137 = vst [vmem:[#allocation3 + $0x1cc] sm:$0xf] %v2136_v51  ;;  %v2138_v52 = vld [vmem:[%s14939_s3 + $0x1d0] sm:$0xf]  ;;  %v2140_v53 = vld [vmem:[%s14939_s3 + $0x1d8] sm:$0xf] }
 0x28c   :  { %v2142_v54 = vld [vmem:[%s14939_s3 + $0x1d4] sm:$0xf]  ;;  %2139 = vst [vmem:[#allocation3 + $0x1d0] sm:$0xf] %v2138_v52  ;;  %2141 = vst [vmem:[#allocation3 + $0x1d4] sm:$0xf] %v2140_v53 }
 0x28d   :  { %2143 = vst [vmem:[#allocation3 + $0x1d8] sm:$0xf] %v2142_v54  ;;  %v2144_v55 = vld [vmem:[%s14939_s3 + $0x1dc] sm:$0xf]  ;;  %v2146_v56 = vld [vmem:[%s14939_s3 + $0x1e0] sm:$0xf] }
 0x28e   :  { %v2148_v57 = vld [vmem:[%s14939_s3 + $0x1e8] sm:$0xf]  ;;  %2145 = vst [vmem:[#allocation3 + $0x1dc] sm:$0xf] %v2144_v55  ;;  %2147 = vst [vmem:[#allocation3 + $0x1e0] sm:$0xf] %v2146_v56 }
 0x28f   :  { %2149 = vst [vmem:[#allocation3 + $0x1e4] sm:$0xf] %v2148_v57  ;;  %v2150_v58 = vld [vmem:[%s14939_s3 + $0x1e4] sm:$0xf]  ;;  %v2152_v59 = vld [vmem:[%s14939_s3 + $0x1ec] sm:$0xf] }
 0x290   :  { %v2154_v60 = vld [vmem:[%s14939_s3 + $0x1f0] sm:$0xf]  ;;  %2151 = vst [vmem:[#allocation3 + $0x1e8] sm:$0xf] %v2150_v58  ;;  %2153 = vst [vmem:[#allocation3 + $0x1ec] sm:$0xf] %v2152_v59 }
 0x291   :  { %2155 = vst [vmem:[#allocation3 + $0x1f0] sm:$0xf] %v2154_v60  ;;  %v2156_v61 = vld [vmem:[%s14939_s3 + $0x1f8] sm:$0xf]  ;;  %v2158_v62 = vld [vmem:[%s14939_s3 + $0x1f4] sm:$0xf] }
 0x292   :  { %v2160_v63 = vld [vmem:[%s14939_s3 + $0x1fc] sm:$0xf]  ;;  %2157 = vst [vmem:[#allocation3 + $0x1f4] sm:$0xf] %v2156_v61  ;;  %2159 = vst [vmem:[#allocation3 + $0x1f8] sm:$0xf] %v2158_v62 }
 0x293   :  { %2161 = vst [vmem:[#allocation3 + $0x1fc] sm:$0xf] %v2160_v63  ;;  %v2162_v0 = vld [vmem:[%s14939_s3 + $0x200] sm:$0xf]  ;;  %v2164_v1 = vld [vmem:[%s14939_s3 + $0x208] sm:$0xf] }
 0x294   :  { %v2166_v2 = vld [vmem:[%s14939_s3 + $0x204] sm:$0xf]  ;;  %2163 = vst [vmem:[#allocation3 + $0x200] sm:$0xf] %v2162_v0  ;;  %2165 = vst [vmem:[#allocation3 + $0x204] sm:$0xf] %v2164_v1 }
 0x295   :  { %2167 = vst [vmem:[#allocation3 + $0x208] sm:$0xf] %v2166_v2  ;;  %v2168_v3 = vld [vmem:[%s14939_s3 + $0x20c] sm:$0xf]  ;;  %v2170_v4 = vld [vmem:[%s14939_s3 + $0x210] sm:$0xf] }
 0x296   :  { %v2172_v5 = vld [vmem:[%s14939_s3 + $0x218] sm:$0xf]  ;;  %2169 = vst [vmem:[#allocation3 + $0x20c] sm:$0xf] %v2168_v3  ;;  %2171 = vst [vmem:[#allocation3 + $0x210] sm:$0xf] %v2170_v4 }
 0x297   :  { %2173 = vst [vmem:[#allocation3 + $0x214] sm:$0xf] %v2172_v5  ;;  %v2174_v6 = vld [vmem:[%s14939_s3 + $0x214] sm:$0xf]  ;;  %v2176_v7 = vld [vmem:[%s14939_s3 + $0x21c] sm:$0xf] }
 0x298   :  { %v2178_v8 = vld [vmem:[%s14939_s3 + $0x220] sm:$0xf]  ;;  %2175 = vst [vmem:[#allocation3 + $0x218] sm:$0xf] %v2174_v6  ;;  %2177 = vst [vmem:[#allocation3 + $0x21c] sm:$0xf] %v2176_v7 }
 0x299   :  { %2179 = vst [vmem:[#allocation3 + $0x220] sm:$0xf] %v2178_v8  ;;  %v2180_v9 = vld [vmem:[%s14939_s3 + $0x228] sm:$0xf]  ;;  %v2182_v10 = vld [vmem:[%s14939_s3 + $0x224] sm:$0xf] }
 0x29a   :  { %v2184_v11 = vld [vmem:[%s14939_s3 + $0x22c] sm:$0xf]  ;;  %2181 = vst [vmem:[#allocation3 + $0x224] sm:$0xf] %v2180_v9  ;;  %2183 = vst [vmem:[#allocation3 + $0x228] sm:$0xf] %v2182_v10 }
 0x29b   :  { %2185 = vst [vmem:[#allocation3 + $0x22c] sm:$0xf] %v2184_v11  ;;  %v2186_v12 = vld [vmem:[%s14939_s3 + $0x230] sm:$0xf]  ;;  %v2188_v13 = vld [vmem:[%s14939_s3 + $0x238] sm:$0xf] }
 0x29c   :  { %v2190_v14 = vld [vmem:[%s14939_s3 + $0x234] sm:$0xf]  ;;  %2187 = vst [vmem:[#allocation3 + $0x230] sm:$0xf] %v2186_v12  ;;  %2189 = vst [vmem:[#allocation3 + $0x234] sm:$0xf] %v2188_v13 }
 0x29d   :  { %2191 = vst [vmem:[#allocation3 + $0x238] sm:$0xf] %v2190_v14  ;;  %v2192_v15 = vld [vmem:[%s14939_s3 + $0x23c] sm:$0xf]  ;;  %v2194_v16 = vld [vmem:[%s14939_s3 + $0x240] sm:$0xf] }
 0x29e   :  { %v2196_v17 = vld [vmem:[%s14939_s3 + $0x248] sm:$0xf]  ;;  %2193 = vst [vmem:[#allocation3 + $0x23c] sm:$0xf] %v2192_v15  ;;  %2195 = vst [vmem:[#allocation3 + $0x240] sm:$0xf] %v2194_v16 }
 0x29f   :  { %2197 = vst [vmem:[#allocation3 + $0x244] sm:$0xf] %v2196_v17  ;;  %v2198_v18 = vld [vmem:[%s14939_s3 + $0x244] sm:$0xf]  ;;  %v2200_v19 = vld [vmem:[%s14939_s3 + $0x24c] sm:$0xf] }
 0x2a0   :  { %v2202_v20 = vld [vmem:[%s14939_s3 + $0x250] sm:$0xf]  ;;  %2199 = vst [vmem:[#allocation3 + $0x248] sm:$0xf] %v2198_v18  ;;  %2201 = vst [vmem:[#allocation3 + $0x24c] sm:$0xf] %v2200_v19 }
 0x2a1   :  { %2203 = vst [vmem:[#allocation3 + $0x250] sm:$0xf] %v2202_v20  ;;  %v2204_v21 = vld [vmem:[%s14939_s3 + $0x258] sm:$0xf]  ;;  %v2206_v22 = vld [vmem:[%s14939_s3 + $0x254] sm:$0xf] }
 0x2a2   :  { %v2208_v23 = vld [vmem:[%s14939_s3 + $0x25c] sm:$0xf]  ;;  %2205 = vst [vmem:[#allocation3 + $0x254] sm:$0xf] %v2204_v21  ;;  %2207 = vst [vmem:[#allocation3 + $0x258] sm:$0xf] %v2206_v22 }
 0x2a3   :  { %2209 = vst [vmem:[#allocation3 + $0x25c] sm:$0xf] %v2208_v23  ;;  %v2210_v24 = vld [vmem:[%s14939_s3 + $0x260] sm:$0xf]  ;;  %v2212_v25 = vld [vmem:[%s14939_s3 + $0x268] sm:$0xf] }
 0x2a4   :  { %v2214_v26 = vld [vmem:[%s14939_s3 + $0x264] sm:$0xf]  ;;  %2211 = vst [vmem:[#allocation3 + $0x260] sm:$0xf] %v2210_v24  ;;  %2213 = vst [vmem:[#allocation3 + $0x264] sm:$0xf] %v2212_v25 }
 0x2a5   :  { %2215 = vst [vmem:[#allocation3 + $0x268] sm:$0xf] %v2214_v26  ;;  %v2216_v27 = vld [vmem:[%s14939_s3 + $0x26c] sm:$0xf]  ;;  %v2218_v28 = vld [vmem:[%s14939_s3 + $0x270] sm:$0xf] }
 0x2a6   :  { %v2220_v29 = vld [vmem:[%s14939_s3 + $0x278] sm:$0xf]  ;;  %2217 = vst [vmem:[#allocation3 + $0x26c] sm:$0xf] %v2216_v27  ;;  %2219 = vst [vmem:[#allocation3 + $0x270] sm:$0xf] %v2218_v28 }
 0x2a7   :  { %2221 = vst [vmem:[#allocation3 + $0x274] sm:$0xf] %v2220_v29  ;;  %v2222_v30 = vld [vmem:[%s14939_s3 + $0x274] sm:$0xf]  ;;  %v2224_v31 = vld [vmem:[%s14939_s3 + $0x27c] sm:$0xf] }
 0x2a8   :  { %v2226_v32 = vld [vmem:[%s14939_s3 + $0x280] sm:$0xf]  ;;  %2223 = vst [vmem:[#allocation3 + $0x278] sm:$0xf] %v2222_v30  ;;  %2225 = vst [vmem:[#allocation3 + $0x27c] sm:$0xf] %v2224_v31 }
 0x2a9   :  { %2227 = vst [vmem:[#allocation3 + $0x280] sm:$0xf] %v2226_v32  ;;  %v2228_v33 = vld [vmem:[%s14939_s3 + $0x288] sm:$0xf]  ;;  %v2230_v34 = vld [vmem:[%s14939_s3 + $0x284] sm:$0xf] }
 0x2aa   :  { %v2232_v35 = vld [vmem:[%s14939_s3 + $0x28c] sm:$0xf]  ;;  %2229 = vst [vmem:[#allocation3 + $0x284] sm:$0xf] %v2228_v33  ;;  %2231 = vst [vmem:[#allocation3 + $0x288] sm:$0xf] %v2230_v34 }
 0x2ab   :  { %2233 = vst [vmem:[#allocation3 + $0x28c] sm:$0xf] %v2232_v35  ;;  %v2234_v36 = vld [vmem:[%s14939_s3 + $0x290] sm:$0xf]  ;;  %v2236_v37 = vld [vmem:[%s14939_s3 + $0x298] sm:$0xf] }
 0x2ac   :  { %v2238_v38 = vld [vmem:[%s14939_s3 + $0x294] sm:$0xf]  ;;  %2235 = vst [vmem:[#allocation3 + $0x290] sm:$0xf] %v2234_v36  ;;  %2237 = vst [vmem:[#allocation3 + $0x294] sm:$0xf] %v2236_v37 }
 0x2ad   :  { %2239 = vst [vmem:[#allocation3 + $0x298] sm:$0xf] %v2238_v38  ;;  %v2240_v39 = vld [vmem:[%s14939_s3 + $0x29c] sm:$0xf]  ;;  %v2242_v40 = vld [vmem:[%s14939_s3 + $0x2a0] sm:$0xf] }
 0x2ae   :  { %v2244_v41 = vld [vmem:[%s14939_s3 + $0x2a8] sm:$0xf]  ;;  %2241 = vst [vmem:[#allocation3 + $0x29c] sm:$0xf] %v2240_v39  ;;  %2243 = vst [vmem:[#allocation3 + $0x2a0] sm:$0xf] %v2242_v40 }
 0x2af   :  { %2245 = vst [vmem:[#allocation3 + $0x2a4] sm:$0xf] %v2244_v41  ;;  %v2246_v42 = vld [vmem:[%s14939_s3 + $0x2a4] sm:$0xf]  ;;  %v2248_v43 = vld [vmem:[%s14939_s3 + $0x2ac] sm:$0xf] }
 0x2b0   :  { %v2250_v44 = vld [vmem:[%s14939_s3 + $0x2b0] sm:$0xf]  ;;  %2247 = vst [vmem:[#allocation3 + $0x2a8] sm:$0xf] %v2246_v42  ;;  %2249 = vst [vmem:[#allocation3 + $0x2ac] sm:$0xf] %v2248_v43 }
 0x2b1   :  { %2251 = vst [vmem:[#allocation3 + $0x2b0] sm:$0xf] %v2250_v44  ;;  %v2252_v45 = vld [vmem:[%s14939_s3 + $0x2b8] sm:$0xf]  ;;  %v2254_v46 = vld [vmem:[%s14939_s3 + $0x2b4] sm:$0xf] }
 0x2b2   :  { %v2256_v47 = vld [vmem:[%s14939_s3 + $0x2bc] sm:$0xf]  ;;  %2253 = vst [vmem:[#allocation3 + $0x2b4] sm:$0xf] %v2252_v45  ;;  %2255 = vst [vmem:[#allocation3 + $0x2b8] sm:$0xf] %v2254_v46 }
 0x2b3   :  { %2257 = vst [vmem:[#allocation3 + $0x2bc] sm:$0xf] %v2256_v47  ;;  %v2258_v48 = vld [vmem:[%s14939_s3 + $0x2c0] sm:$0xf]  ;;  %v2260_v49 = vld [vmem:[%s14939_s3 + $0x2c8] sm:$0xf] }
 0x2b4   :  { %v2262_v50 = vld [vmem:[%s14939_s3 + $0x2c4] sm:$0xf]  ;;  %2259 = vst [vmem:[#allocation3 + $0x2c0] sm:$0xf] %v2258_v48  ;;  %2261 = vst [vmem:[#allocation3 + $0x2c4] sm:$0xf] %v2260_v49 }
 0x2b5   :  { %2263 = vst [vmem:[#allocation3 + $0x2c8] sm:$0xf] %v2262_v50  ;;  %v2264_v51 = vld [vmem:[%s14939_s3 + $0x2cc] sm:$0xf]  ;;  %v2266_v52 = vld [vmem:[%s14939_s3 + $0x2d0] sm:$0xf] }
 0x2b6   :  { %v2268_v53 = vld [vmem:[%s14939_s3 + $0x2d8] sm:$0xf]  ;;  %2265 = vst [vmem:[#allocation3 + $0x2cc] sm:$0xf] %v2264_v51  ;;  %2267 = vst [vmem:[#allocation3 + $0x2d0] sm:$0xf] %v2266_v52 }
 0x2b7   :  { %2269 = vst [vmem:[#allocation3 + $0x2d4] sm:$0xf] %v2268_v53  ;;  %v2270_v54 = vld [vmem:[%s14939_s3 + $0x2d4] sm:$0xf]  ;;  %v2272_v55 = vld [vmem:[%s14939_s3 + $0x2dc] sm:$0xf] }
 0x2b8   :  { %v2274_v56 = vld [vmem:[%s14939_s3 + $0x2e0] sm:$0xf]  ;;  %2271 = vst [vmem:[#allocation3 + $0x2d8] sm:$0xf] %v2270_v54  ;;  %2273 = vst [vmem:[#allocation3 + $0x2dc] sm:$0xf] %v2272_v55 }
 0x2b9   :  { %2275 = vst [vmem:[#allocation3 + $0x2e0] sm:$0xf] %v2274_v56  ;;  %v2276_v57 = vld [vmem:[%s14939_s3 + $0x2e8] sm:$0xf]  ;;  %v2278_v58 = vld [vmem:[%s14939_s3 + $0x2e4] sm:$0xf] }
 0x2ba   :  { %v2280_v59 = vld [vmem:[%s14939_s3 + $0x2ec] sm:$0xf]  ;;  %2277 = vst [vmem:[#allocation3 + $0x2e4] sm:$0xf] %v2276_v57  ;;  %2279 = vst [vmem:[#allocation3 + $0x2e8] sm:$0xf] %v2278_v58 }
 0x2bb   :  { %2281 = vst [vmem:[#allocation3 + $0x2ec] sm:$0xf] %v2280_v59  ;;  %v2282_v60 = vld [vmem:[%s14939_s3 + $0x2f0] sm:$0xf]  ;;  %v2284_v61 = vld [vmem:[%s14939_s3 + $0x2f8] sm:$0xf] }
 0x2bc   :  { %v2286_v62 = vld [vmem:[%s14939_s3 + $0x2f4] sm:$0xf]  ;;  %2283 = vst [vmem:[#allocation3 + $0x2f0] sm:$0xf] %v2282_v60  ;;  %2285 = vst [vmem:[#allocation3 + $0x2f4] sm:$0xf] %v2284_v61 }
 0x2bd   :  { %2287 = vst [vmem:[#allocation3 + $0x2f8] sm:$0xf] %v2286_v62  ;;  %v2288_v63 = vld [vmem:[%s14939_s3 + $0x2fc] sm:$0xf]  ;;  %v2290_v0 = vld [vmem:[%s14939_s3 + $0x300] sm:$0xf] }
 0x2be   :  { %v2292_v1 = vld [vmem:[%s14939_s3 + $0x308] sm:$0xf]  ;;  %2289 = vst [vmem:[#allocation3 + $0x2fc] sm:$0xf] %v2288_v63  ;;  %2291 = vst [vmem:[#allocation3 + $0x300] sm:$0xf] %v2290_v0 }
 0x2bf   :  { %2293 = vst [vmem:[#allocation3 + $0x304] sm:$0xf] %v2292_v1  ;;  %v2294_v2 = vld [vmem:[%s14939_s3 + $0x304] sm:$0xf]  ;;  %v2296_v3 = vld [vmem:[%s14939_s3 + $0x30c] sm:$0xf] }
 0x2c0   :  { %v2298_v4 = vld [vmem:[%s14939_s3 + $0x310] sm:$0xf]  ;;  %2295 = vst [vmem:[#allocation3 + $0x308] sm:$0xf] %v2294_v2  ;;  %2297 = vst [vmem:[#allocation3 + $0x30c] sm:$0xf] %v2296_v3 }
 0x2c1   :  { %2299 = vst [vmem:[#allocation3 + $0x310] sm:$0xf] %v2298_v4  ;;  %v2300_v5 = vld [vmem:[%s14939_s3 + $0x318] sm:$0xf]  ;;  %v2302_v6 = vld [vmem:[%s14939_s3 + $0x314] sm:$0xf] }
 0x2c2   :  { %v2304_v7 = vld [vmem:[%s14939_s3 + $0x31c] sm:$0xf]  ;;  %2301 = vst [vmem:[#allocation3 + $0x314] sm:$0xf] %v2300_v5  ;;  %2303 = vst [vmem:[#allocation3 + $0x318] sm:$0xf] %v2302_v6 }
 0x2c3   :  { %2305 = vst [vmem:[#allocation3 + $0x31c] sm:$0xf] %v2304_v7  ;;  %v2306_v8 = vld [vmem:[%s14939_s3 + $0x320] sm:$0xf]  ;;  %v2308_v9 = vld [vmem:[%s14939_s3 + $0x328] sm:$0xf] }
 0x2c4   :  { %v2310_v10 = vld [vmem:[%s14939_s3 + $0x324] sm:$0xf]  ;;  %2307 = vst [vmem:[#allocation3 + $0x320] sm:$0xf] %v2306_v8  ;;  %2309 = vst [vmem:[#allocation3 + $0x324] sm:$0xf] %v2308_v9 }
 0x2c5   :  { %2311 = vst [vmem:[#allocation3 + $0x328] sm:$0xf] %v2310_v10  ;;  %v2312_v11 = vld [vmem:[%s14939_s3 + $0x32c] sm:$0xf]  ;;  %v2314_v12 = vld [vmem:[%s14939_s3 + $0x330] sm:$0xf] }
 0x2c6   :  { %v2316_v13 = vld [vmem:[%s14939_s3 + $0x338] sm:$0xf]  ;;  %2313 = vst [vmem:[#allocation3 + $0x32c] sm:$0xf] %v2312_v11  ;;  %2315 = vst [vmem:[#allocation3 + $0x330] sm:$0xf] %v2314_v12 }
 0x2c7   :  { %2317 = vst [vmem:[#allocation3 + $0x334] sm:$0xf] %v2316_v13  ;;  %v2318_v14 = vld [vmem:[%s14939_s3 + $0x334] sm:$0xf]  ;;  %v2320_v15 = vld [vmem:[%s14939_s3 + $0x33c] sm:$0xf] }
 0x2c8   :  { %v2322_v16 = vld [vmem:[%s14939_s3 + $0x340] sm:$0xf]  ;;  %2319 = vst [vmem:[#allocation3 + $0x338] sm:$0xf] %v2318_v14  ;;  %2321 = vst [vmem:[#allocation3 + $0x33c] sm:$0xf] %v2320_v15 }
 0x2c9   :  { %2323 = vst [vmem:[#allocation3 + $0x340] sm:$0xf] %v2322_v16  ;;  %v2324_v17 = vld [vmem:[%s14939_s3 + $0x348] sm:$0xf]  ;;  %v2326_v18 = vld [vmem:[%s14939_s3 + $0x344] sm:$0xf] }
 0x2ca   :  { %v2328_v19 = vld [vmem:[%s14939_s3 + $0x34c] sm:$0xf]  ;;  %2325 = vst [vmem:[#allocation3 + $0x344] sm:$0xf] %v2324_v17  ;;  %2327 = vst [vmem:[#allocation3 + $0x348] sm:$0xf] %v2326_v18 }
 0x2cb   :  { %2329 = vst [vmem:[#allocation3 + $0x34c] sm:$0xf] %v2328_v19  ;;  %v2330_v20 = vld [vmem:[%s14939_s3 + $0x350] sm:$0xf]  ;;  %v2332_v21 = vld [vmem:[%s14939_s3 + $0x358] sm:$0xf] }
 0x2cc   :  { %v2334_v22 = vld [vmem:[%s14939_s3 + $0x354] sm:$0xf]  ;;  %2331 = vst [vmem:[#allocation3 + $0x350] sm:$0xf] %v2330_v20  ;;  %2333 = vst [vmem:[#allocation3 + $0x354] sm:$0xf] %v2332_v21 }
 0x2cd   :  { %2335 = vst [vmem:[#allocation3 + $0x358] sm:$0xf] %v2334_v22  ;;  %v2336_v23 = vld [vmem:[%s14939_s3 + $0x35c] sm:$0xf]  ;;  %v2338_v24 = vld [vmem:[%s14939_s3 + $0x360] sm:$0xf] }
 0x2ce   :  { %v2340_v25 = vld [vmem:[%s14939_s3 + $0x368] sm:$0xf]  ;;  %2337 = vst [vmem:[#allocation3 + $0x35c] sm:$0xf] %v2336_v23  ;;  %2339 = vst [vmem:[#allocation3 + $0x360] sm:$0xf] %v2338_v24 }
 0x2cf   :  { %2341 = vst [vmem:[#allocation3 + $0x364] sm:$0xf] %v2340_v25  ;;  %v2342_v26 = vld [vmem:[%s14939_s3 + $0x364] sm:$0xf]  ;;  %v2344_v27 = vld [vmem:[%s14939_s3 + $0x36c] sm:$0xf] }
 0x2d0   :  { %v2346_v28 = vld [vmem:[%s14939_s3 + $0x370] sm:$0xf]  ;;  %2343 = vst [vmem:[#allocation3 + $0x368] sm:$0xf] %v2342_v26  ;;  %2345 = vst [vmem:[#allocation3 + $0x36c] sm:$0xf] %v2344_v27 }
 0x2d1   :  { %2347 = vst [vmem:[#allocation3 + $0x370] sm:$0xf] %v2346_v28  ;;  %v2348_v29 = vld [vmem:[%s14939_s3 + $0x378] sm:$0xf]  ;;  %v2350_v30 = vld [vmem:[%s14939_s3 + $0x374] sm:$0xf] }
 0x2d2   :  { %v2352_v31 = vld [vmem:[%s14939_s3 + $0x37c] sm:$0xf]  ;;  %2349 = vst [vmem:[#allocation3 + $0x374] sm:$0xf] %v2348_v29  ;;  %2351 = vst [vmem:[#allocation3 + $0x378] sm:$0xf] %v2350_v30 }
 0x2d3   :  { %2353 = vst [vmem:[#allocation3 + $0x37c] sm:$0xf] %v2352_v31  ;;  %v2354_v32 = vld [vmem:[%s14939_s3 + $0x380] sm:$0xf]  ;;  %v2356_v33 = vld [vmem:[%s14939_s3 + $0x388] sm:$0xf] }
 0x2d4   :  { %v2358_v34 = vld [vmem:[%s14939_s3 + $0x384] sm:$0xf]  ;;  %2355 = vst [vmem:[#allocation3 + $0x380] sm:$0xf] %v2354_v32  ;;  %2357 = vst [vmem:[#allocation3 + $0x384] sm:$0xf] %v2356_v33 }
 0x2d5   :  { %2359 = vst [vmem:[#allocation3 + $0x388] sm:$0xf] %v2358_v34  ;;  %v2360_v35 = vld [vmem:[%s14939_s3 + $0x38c] sm:$0xf]  ;;  %v2362_v36 = vld [vmem:[%s14939_s3 + $0x390] sm:$0xf] }
 0x2d6   :  { %v2364_v37 = vld [vmem:[%s14939_s3 + $0x398] sm:$0xf]  ;;  %2361 = vst [vmem:[#allocation3 + $0x38c] sm:$0xf] %v2360_v35  ;;  %2363 = vst [vmem:[#allocation3 + $0x390] sm:$0xf] %v2362_v36 }
 0x2d7   :  { %2365 = vst [vmem:[#allocation3 + $0x394] sm:$0xf] %v2364_v37  ;;  %v2366_v38 = vld [vmem:[%s14939_s3 + $0x394] sm:$0xf]  ;;  %v2368_v39 = vld [vmem:[%s14939_s3 + $0x39c] sm:$0xf] }
 0x2d8   :  { %v2370_v40 = vld [vmem:[%s14939_s3 + $0x3a0] sm:$0xf]  ;;  %2367 = vst [vmem:[#allocation3 + $0x398] sm:$0xf] %v2366_v38  ;;  %2369 = vst [vmem:[#allocation3 + $0x39c] sm:$0xf] %v2368_v39 }
 0x2d9   :  { %2371 = vst [vmem:[#allocation3 + $0x3a0] sm:$0xf] %v2370_v40  ;;  %v2372_v41 = vld [vmem:[%s14939_s3 + $0x3a8] sm:$0xf]  ;;  %v2374_v42 = vld [vmem:[%s14939_s3 + $0x3a4] sm:$0xf] }
 0x2da   :  { %v2376_v43 = vld [vmem:[%s14939_s3 + $0x3ac] sm:$0xf]  ;;  %2373 = vst [vmem:[#allocation3 + $0x3a4] sm:$0xf] %v2372_v41  ;;  %2375 = vst [vmem:[#allocation3 + $0x3a8] sm:$0xf] %v2374_v42 }
 0x2db   :  { %2377 = vst [vmem:[#allocation3 + $0x3ac] sm:$0xf] %v2376_v43  ;;  %v2378_v44 = vld [vmem:[%s14939_s3 + $0x3b0] sm:$0xf]  ;;  %v2380_v45 = vld [vmem:[%s14939_s3 + $0x3b8] sm:$0xf] }
 0x2dc   :  { %v2382_v46 = vld [vmem:[%s14939_s3 + $0x3b4] sm:$0xf]  ;;  %2379 = vst [vmem:[#allocation3 + $0x3b0] sm:$0xf] %v2378_v44  ;;  %2381 = vst [vmem:[#allocation3 + $0x3b4] sm:$0xf] %v2380_v45 }
 0x2dd   :  { %2383 = vst [vmem:[#allocation3 + $0x3b8] sm:$0xf] %v2382_v46  ;;  %v2384_v47 = vld [vmem:[%s14939_s3 + $0x3bc] sm:$0xf]  ;;  %v2386_v48 = vld [vmem:[%s14939_s3 + $0x3c0] sm:$0xf] }
 0x2de   :  { %v2388_v49 = vld [vmem:[%s14939_s3 + $0x3c8] sm:$0xf]  ;;  %2385 = vst [vmem:[#allocation3 + $0x3bc] sm:$0xf] %v2384_v47  ;;  %2387 = vst [vmem:[#allocation3 + $0x3c0] sm:$0xf] %v2386_v48 }
 0x2df   :  { %2389 = vst [vmem:[#allocation3 + $0x3c4] sm:$0xf] %v2388_v49  ;;  %v2390_v50 = vld [vmem:[%s14939_s3 + $0x3c4] sm:$0xf]  ;;  %v2392_v51 = vld [vmem:[%s14939_s3 + $0x3cc] sm:$0xf] }
 0x2e0   :  { %v2394_v52 = vld [vmem:[%s14939_s3 + $0x3d0] sm:$0xf]  ;;  %2391 = vst [vmem:[#allocation3 + $0x3c8] sm:$0xf] %v2390_v50  ;;  %2393 = vst [vmem:[#allocation3 + $0x3cc] sm:$0xf] %v2392_v51 }
 0x2e1   :  { %2395 = vst [vmem:[#allocation3 + $0x3d0] sm:$0xf] %v2394_v52  ;;  %v2396_v53 = vld [vmem:[%s14939_s3 + $0x3d8] sm:$0xf]  ;;  %v2398_v54 = vld [vmem:[%s14939_s3 + $0x3d4] sm:$0xf] }
 0x2e2   :  { %v2400_v55 = vld [vmem:[%s14939_s3 + $0x3dc] sm:$0xf]  ;;  %2397 = vst [vmem:[#allocation3 + $0x3d4] sm:$0xf] %v2396_v53  ;;  %2399 = vst [vmem:[#allocation3 + $0x3d8] sm:$0xf] %v2398_v54 }
 0x2e3   :  { %2401 = vst [vmem:[#allocation3 + $0x3dc] sm:$0xf] %v2400_v55  ;;  %v2402_v56 = vld [vmem:[%s14939_s3 + $0x3e0] sm:$0xf]  ;;  %v2404_v57 = vld [vmem:[%s14939_s3 + $0x3e8] sm:$0xf] }
 0x2e4   :  { %v2406_v58 = vld [vmem:[%s14939_s3 + $0x3e4] sm:$0xf]  ;;  %2403 = vst [vmem:[#allocation3 + $0x3e0] sm:$0xf] %v2402_v56  ;;  %2405 = vst [vmem:[#allocation3 + $0x3e4] sm:$0xf] %v2404_v57 }
 0x2e5   :  { %2407 = vst [vmem:[#allocation3 + $0x3e8] sm:$0xf] %v2406_v58  ;;  %v2408_v59 = vld [vmem:[%s14939_s3 + $0x3ec] sm:$0xf]  ;;  %v2410_v60 = vld [vmem:[%s14939_s3 + $0x3f0] sm:$0xf] }
 0x2e6   :  { %v2412_v61 = vld [vmem:[%s14939_s3 + $0x3f8] sm:$0xf]  ;;  %2409 = vst [vmem:[#allocation3 + $0x3ec] sm:$0xf] %v2408_v59  ;;  %2411 = vst [vmem:[#allocation3 + $0x3f0] sm:$0xf] %v2410_v60 }
 0x2e7   :  { %2413 = vst [vmem:[#allocation3 + $0x3f4] sm:$0xf] %v2412_v61  ;;  %v2414_v62 = vld [vmem:[%s14939_s3 + $0x3f4] sm:$0xf]  ;;  %v2416_v63 = vld [vmem:[%s14939_s3 + $0x3fc] sm:$0xf] }
 0x2e8   :  { %2415 = vst [vmem:[#allocation3 + $0x3f8] sm:$0xf] %v2414_v62  ;;  %2417 = vst [vmem:[#allocation3 + $0x3fc] sm:$0xf] %v2416_v63 }
 0x2e9   :  { %2960 = vsyncadd [#allocation7 + $0x1], 16384  ;;  %s2966_s23 = sld [smem:[#allocation0]]   ;;  %s12472_s21 = smov [#allocation4]  }
 0x2ea   :  { %s2974_s26 = sshll.u32 %s12472_s21, 4  ;;  %s12473_s29 = smov 256   ;;  %s2975_s26 = int_to_ptr.vmem [resolvable:$true] %s2974_s26 }
 0x2eb   :  { %2978 = sst [smem:[#allocation35]] %s12473_s29  ;;  %s12474_s24 = smov [#allocation7 + $0x2]  }
 0x2ec   :  { %2980 = sst [smem:[#allocation35 + $0x1]] %s12473_s29  ;;  %s12475_s2 = smov [#allocation34]  }
 0x2ed   :  { %2982 = sst [smem:[#allocation35 + $0x2]] %s12469_s6  ;;  %s12476_s8 = smov [#allocation5]  }
 0x2ee   :  { %2984 = sst [smem:[#allocation35 + $0x3]] %s12457_s18  ;;  %s3005_s7 = sshll.u32 %s12476_s8, 4  ;;  %s3006_s7 = int_to_ptr.vmem [resolvable:$true] %s3005_s7 }
 0x2ef   :  { %s10170_s0 = sshll.u32 %s2966_s23, 26  ;;  %2986 = sst [smem:[#allocation35 + $0x4]] %s12453_s28 }
 0x2f0   :  { %2988 = sst [smem:[#allocation35 + $0x5]] %s12469_s6  ;;  %s13384_s27 = sadd.s32 134217728, %s10170_s0 }
 0x2f1   :  { %2990 = sst [smem:[#allocation35 + $0x6]] %s12453_s28  ;;  %s12477_s10 = smov [#allocation6]  }
 0x2f2   :  { %2992 = sst [smem:[#allocation35 + $0x7]] %s12457_s18  ;;  %s3021_s15 = sshll.u32 %s12477_s10, 4  ;;  %s3022_s15 = int_to_ptr.vmem [resolvable:$true] %s3021_s15 }
 0x2f3   :  { %2994 = sst [smem:[#allocation35 + $0x8]] %s12458_s13 }
 0x2f4   :  { %2996 = dma.general %s12632_s14, 16384, %s2975_s26, %s12474_s24, %s12475_s2, [#allocation35], %s13384_s27, 0  }
 0x2f5   :  { %3025 = sst [smem:[#allocation41]] %s12473_s29  ;;  %s12349_s14 = scalar_lea.hbm %s12637_s25, 6144 }
 0x2f6   :  { %3027 = sst [smem:[#allocation41 + $0x1]] %s12473_s29  ;;  %p12350_p0 = scmp.ne.s32.totalorder %s12637_s25, %s12349_s14 }
 0x2f7   :  { %3029 = sst [smem:[#allocation41 + $0x2]] %s12469_s6  ;;  %p12353_p1 = scmp.lt.u32.totalorder %s12349_s14, %s12637_s25 }
 0x2f8   :  { %3031 = sst [smem:[#allocation41 + $0x3]] %s12457_s18 }
 0x2f9   :  { %3033 = sst [smem:[#allocation41 + $0x4]] %s12453_s28  ;;  %p12355_p2 = pnand %p12353_p1, %p12350_p0 }
 0x2fa   :  { %3035 = sst [smem:[#allocation41 + $0x5]] %s12469_s6 }
 0x2fb   :  { %3037 = sst [smem:[#allocation41 + $0x6]] %s12453_s28 }
 0x2fc   :  { %3039 = sst [smem:[#allocation41 + $0x7]] %s12457_s18 }
 0x2fd   :  { %3041 = sst [smem:[#allocation41 + $0x8]] %s12458_s13 }
 0x2fe   :  { %12358 = shalt.err (!%p12355_p2)  }
 0x2ff   :  { %s12359_s19 = scalar_lea.vmem %s3006_s7, 6144  ;;  %p12364_p4 = scmp.lt.s32.totalorder %s3006_s7, %s3006_s7 }
 0x300   :  { %p12360_p3 = scmp.ne.s32.totalorder %s3006_s7, %s12359_s19  ;;  %p12365_p5 = scmp.lt.s32.totalorder %s12359_s19, %s12359_s19 }
 0x302   :  { %p12366_p6 = por %p12365_p5, %p12364_p4 }
 0x304   :  { %p12367_p7 = pnand %p12366_p6, %p12360_p3 }
 0x306   :  { %12370 = shalt.err (!%p12367_p7)  }
 0x307   :  { %s14940_s6 = sld [smem:[#allocation56_spill]]  ;;  %s12478_s18 = smov [#allocation7 + $0x4]   ;;  %vm3134_vm0 = vcmask 523264  }
 0x308   :  { %3008 = dma.hbm_to_vmem [thread:$0]  %s12637_s25, 6144, %s3006_s7, [#allocation7 + $0x3] }
 0x309   :  { %s12479_s13 = smov [#allocation40]  }
 0x30a   :  { %3043 = dma.general %s12642_s12, 16384, %s3022_s15, %s12478_s18, %s12479_s13, [#allocation41], %s13384_s27, 0  }
 0x30b   :  { %v11815_v8 = vld [vmem:[#allocation8] sm:$0xff]   ;;  %v11816_v9 = vld [vmem:[#allocation8 + $0x10] sm:$0xff]   ;;  %v11817_v14 = vld [vmem:[#allocation8 + $0x8] sm:$0xff]  }
 0x30c   :  { %11238 = vmatprep.mubr.msk.bf16.mxu0 %vm3134_vm0, %v11815_v8  ;;  %11250 = vmatprep.mubr.msk.bf16.mxu1 %vm3134_vm0, %v11816_v9  ;;  %v11818_v15 = vld [vmem:[#allocation8 + $0x18] sm:$0xff]   ;;  %v11819_v16 = vld [vmem:[#allocation8 + $0x30] sm:$0xff]   ;;  %v11820_v17 = vld [vmem:[#allocation8 + $0x20] sm:$0xff]  }
 0x30d   :  { %v3044_v0 = vld [vmem:[%s14940_s6] sm:$0xff]  ;;  %v3045_v1 = vld [vmem:[%s14940_s6 + $0x8] sm:$0xff]  ;;  %v3046_v2 = vld [vmem:[%s14940_s6 + $0x10] sm:$0xff] }
 0x30e   :  { %v3052_v3 = vpack.c.bf16 %v3045_v1, %v3044_v0  ;;  %v3047_v4 = vld [vmem:[%s14940_s6 + $0x18] sm:$0xff]  ;;  %v3048_v6 = vld [vmem:[%s14940_s6 + $0x20] sm:$0xff]  ;;  %v3049_v7 = vld [vmem:[%s14940_s6 + $0x28] sm:$0xff] }
 0x30f   :  { %v3053_v5 = vpack.c.bf16 %v3047_v4, %v3046_v2  ;;  %v3054_v10 = vpack.c.bf16 %v3049_v7, %v3048_v6  ;;  %v3050_v11 = vld [vmem:[%s14940_s6 + $0x30] sm:$0xff]  ;;  %v3051_v12 = vld [vmem:[%s14940_s6 + $0x38] sm:$0xff]  ;;  %v11825_v19 = vld [vmem:[#allocation11 + $0x4] ss:$8 sps:$4 sm:$0xff]  }
 0x310   :  { %11230 = vmatprep.subr.bf16.mxu0 %v3052_v3  ;;  %11242 = vmatprep.subr.bf16.mxu1 %v3052_v3  ;;  %v3055_v13 = vpack.c.bf16 %v3051_v12, %v3050_v11  ;;  %v11821_v18 = vld [vmem:[#allocation8 + $0x38] sm:$0xff]   ;;  %v11822_v20 = vld [vmem:[#allocation8 + $0x28] sm:$0xff]  }
 0x311   :  { %11231 = vmatpush3.bf16.msra.mxu0 %v3052_v3  ;;  %11243 = vmatpush3.bf16.msra.mxu1 %v3052_v3  ;;  %v11823_v21 = vld [vmem:[#allocation11] ss:$8 sps:$4 sm:$0xff]   ;;  %v11828_v22 = vld [vmem:[#allocation11 + $0x14] ss:$8 sps:$4 sm:$0xff]   ;;  %v11826_v23 = vld [vmem:[#allocation11 + $0x10] ss:$8 sps:$4 sm:$0xff]  }
 0x312   :  { %11232 = vmatprep.subr.bf16.mxu0 %v3053_v5  ;;  %11244 = vmatprep.subr.bf16.mxu1 %v3053_v5  ;;  %v11831_v24 = vld [vmem:[#allocation11 + $0x24] ss:$8 sps:$4 sm:$0xff]   ;;  %v11829_v25 = vld [vmem:[#allocation11 + $0x20] ss:$8 sps:$4 sm:$0xff]   ;;  %v11834_v26 = vld [vmem:[#allocation11 + $0x34] ss:$8 sps:$4 sm:$0xff]  }
 0x313   :  { %v11832_v27 = vld [vmem:[#allocation11 + $0x30] ss:$8 sps:$4 sm:$0xff]   ;;  %v11837_v28 = vld [vmem:[#allocation11 + $0x44] ss:$8 sps:$4 sm:$0xff]   ;;  %v11835_v29 = vld [vmem:[#allocation11 + $0x40] ss:$8 sps:$4 sm:$0xff]  }
 0x314   :  { %v11840_v30 = vld [vmem:[#allocation11 + $0x54] ss:$8 sps:$4 sm:$0xff]   ;;  %v11838_v31 = vld [vmem:[#allocation11 + $0x50] ss:$8 sps:$4 sm:$0xff]   ;;  %v11843_v32 = vld [vmem:[#allocation11 + $0x64] ss:$8 sps:$4 sm:$0xff]  }
 0x315   :  { %11233 = vmatpush3.bf16.msra.mxu0 %v3053_v5  ;;  %11245 = vmatpush3.bf16.msra.mxu1 %v3053_v5  ;;  %v11841_v33 = vld [vmem:[#allocation11 + $0x60] ss:$8 sps:$4 sm:$0xff]   ;;  %v11846_v34 = vld [vmem:[#allocation11 + $0x74] ss:$8 sps:$4 sm:$0xff]   ;;  %v11844_v35 = vld [vmem:[#allocation11 + $0x70] ss:$8 sps:$4 sm:$0xff]  }
 0x316   :  { %11234 = vmatprep.subr.bf16.mxu0 %v3054_v10  ;;  %11246 = vmatprep.subr.bf16.mxu1 %v3054_v10  ;;  %v11849_v36 = vld [vmem:[#allocation11 + $0x84] ss:$8 sps:$4 sm:$0xff]   ;;  %v11847_v37 = vld [vmem:[#allocation11 + $0x80] ss:$8 sps:$4 sm:$0xff]   ;;  %v11852_v38 = vld [vmem:[#allocation11 + $0x94] ss:$8 sps:$4 sm:$0xff]  }
 0x317   :  { %v11850_v39 = vld [vmem:[#allocation11 + $0x90] ss:$8 sps:$4 sm:$0xff]   ;;  %v11855_v40 = vld [vmem:[#allocation11 + $0xa4] ss:$8 sps:$4 sm:$0xff]   ;;  %v11853_v41 = vld [vmem:[#allocation11 + $0xa0] ss:$8 sps:$4 sm:$0xff]  }
 0x318   :  { %v11858_v42 = vld [vmem:[#allocation11 + $0xb4] ss:$8 sps:$4 sm:$0xff]   ;;  %v11856_v43 = vld [vmem:[#allocation11 + $0xb0] ss:$8 sps:$4 sm:$0xff]   ;;  %v11861_v44 = vld [vmem:[#allocation11 + $0xc4] ss:$8 sps:$4 sm:$0xff]  }
 0x319   :  { %11235 = vmatpush3.bf16.msra.mxu0 %v3054_v10  ;;  %11247 = vmatpush3.bf16.msra.mxu1 %v3054_v10  ;;  %v11859_v45 = vld [vmem:[#allocation11 + $0xc0] ss:$8 sps:$4 sm:$0xff]   ;;  %v11864_v46 = vld [vmem:[#allocation11 + $0xd4] ss:$8 sps:$4 sm:$0xff]   ;;  %v11862_v47 = vld [vmem:[#allocation11 + $0xd0] ss:$8 sps:$4 sm:$0xff]  }
 0x31a   :  { %11236 = vmatprep.subr.bf16.mxu0 %v3055_v13  ;;  %11248 = vmatprep.subr.bf16.mxu1 %v3055_v13  ;;  %v11867_v48 = vld [vmem:[#allocation11 + $0xe4] ss:$8 sps:$4 sm:$0xff]   ;;  %v11865_v49 = vld [vmem:[#allocation11 + $0xe0] ss:$8 sps:$4 sm:$0xff]   ;;  %v11870_v50 = vld [vmem:[#allocation11 + $0xf4] ss:$8 sps:$4 sm:$0xff]  }
 0x31b   :  { %v11868_v51 = vld [vmem:[#allocation11 + $0xf0] ss:$8 sps:$4 sm:$0xff]   ;;  %v11873_v52 = vld [vmem:[#allocation11 + $0x104] ss:$8 sps:$4 sm:$0xff]   ;;  %v11871_v1 = vld [vmem:[#allocation11 + $0x100] ss:$8 sps:$4 sm:$0xff]  }
 0x31c   :  { %v11876_v2 = vld [vmem:[#allocation11 + $0x114] ss:$8 sps:$4 sm:$0xff]   ;;  %v11879_v4 = vld [vmem:[#allocation11 + $0x124] ss:$8 sps:$4 sm:$0xff]   ;;  %v11880_v7 = vld [vmem:[#allocation11 + $0x130] ss:$8 sps:$4 sm:$0xff]  }
 0x31d   :  { %11237 = vmatpush3.bf16.msra.mxu0 %v3055_v13  ;;  %11249 = vmatpush3.bf16.msra.mxu1 %v3055_v13  ;;  %v11882_v6 = vld [vmem:[#allocation11 + $0x134] ss:$8 sps:$4 sm:$0xff]  }
 0x31e   :  { %11266 = vmatprep.subr.bf16.mxu1 %v3052_v3  ;;  %11254 = vmatprep.subr.bf16.mxu0 %v3052_v3 }
 0x320   :  { %11239 = vmatmul.mubr.msk.bf16.vlgmr.msra.gmra.mrb[0].mxu0 %vm3134_vm0, %v11817_v14  ;;  %11251 = vmatmul.mubr.msk.bf16.vlgmr.msra.gmra.mrb[0].mxu1 %vm3134_vm0, %v11818_v15 }
 0x321   :  { %11267 = vmatpush3.bf16.msra.mxu1 %v3052_v3  ;;  %11255 = vmatpush3.bf16.msra.mxu0 %v3052_v3  ;;  %v11874_v3 = vld [vmem:[#allocation11 + $0x110] ss:$8 sps:$4 sm:$0xff]  }
 0x322   :  { %11268 = vmatprep.subr.bf16.mxu1 %v3053_v5  ;;  %11256 = vmatprep.subr.bf16.mxu0 %v3053_v5 }
 0x323   :  { %11274 = vmatprep.mubr.msk.bf16.mxu1 %vm3134_vm0, %v11819_v16  ;;  %11262 = vmatprep.mubr.msk.bf16.mxu0 %vm3134_vm0, %v11820_v17 }
 0x325   :  { %11269 = vmatpush3.bf16.msra.mxu1 %v3053_v5  ;;  %11257 = vmatpush3.bf16.msra.mxu0 %v3053_v5  ;;  %v11877_v5 = vld [vmem:[#allocation11 + $0x120] ss:$8 sps:$4 sm:$0xff]  }
 0x326   :  { %11270 = vmatprep.subr.bf16.mxu1 %v3054_v10  ;;  %11258 = vmatprep.subr.bf16.mxu0 %v3054_v10 }
 0x329   :  { %11271 = vmatpush3.bf16.msra.mxu1 %v3054_v10  ;;  %11259 = vmatpush3.bf16.msra.mxu0 %v3054_v10  ;;  %v11885_v10 = vld [vmem:[#allocation11 + $0x144] ss:$8 sps:$4 sm:$0xff]  }
 0x32a   :  { %11272 = vmatprep.subr.bf16.mxu1 %v3055_v13  ;;  %11260 = vmatprep.subr.bf16.mxu0 %v3055_v13 }
 0x32d   :  { %11273 = vmatpush3.bf16.msra.mxu1 %v3055_v13  ;;  %11261 = vmatpush3.bf16.msra.mxu0 %v3055_v13 }
 0x32e   :  { %3728 = vmatprep.subr.bf16.mxu0 %v11825_v19  ;;  %v11883_v19 = vld [vmem:[#allocation11 + $0x140] ss:$8 sps:$4 sm:$0xff]  }
 0x330   :  { %11275 = vmatmul.mubr.msk.bf16.vlgmr.msra.gmra.mrb[4].mxu1 %vm3134_vm0, %v11821_v18  ;;  %11263 = vmatmul.mubr.msk.bf16.vlgmr.msra.gmra.mrb[4].mxu0 %vm3134_vm0, %v11822_v20 }
 0x331   :  { %3729 = vmatpush1.bf16.msra.mxu0 %v11823_v21 }
 0x332   :  { %3730 = vmatprep.subr.bf16.mxu0 %v11828_v22  ;;  %v11888_v22 = vld [vmem:[#allocation11 + $0x154] ss:$8 sps:$4 sm:$0xff]  }
 0x335   :  { %3731 = vmatpush1.bf16.msra.mxu0 %v11826_v23  ;;  %v11886_v23 = vld [vmem:[#allocation11 + $0x150] ss:$8 sps:$4 sm:$0xff]  }
 0x336   :  { %3732 = vmatprep.subr.bf16.mxu0 %v11831_v24  ;;  %v11891_v24 = vld [vmem:[#allocation11 + $0x164] ss:$8 sps:$4 sm:$0xff]  }
 0x339   :  { %3733 = vmatpush1.bf16.msra.mxu0 %v11829_v25  ;;  %v11889_v25 = vld [vmem:[#allocation11 + $0x160] ss:$8 sps:$4 sm:$0xff]  }
 0x33a   :  { %3734 = vmatprep.subr.bf16.mxu0 %v11834_v26  ;;  %v11894_v26 = vld [vmem:[#allocation11 + $0x174] ss:$8 sps:$4 sm:$0xff]  }
 0x33d   :  { %3735 = vmatpush1.bf16.msra.mxu0 %v11832_v27  ;;  %v11892_v27 = vld [vmem:[#allocation11 + $0x170] ss:$8 sps:$4 sm:$0xff]  }
 0x33e   :  { %3736 = vmatprep.subr.bf16.mxu0 %v11837_v28  ;;  %v11897_v28 = vld [vmem:[#allocation11 + $0x184] ss:$8 sps:$4 sm:$0xff]  }
 0x341   :  { %3737 = vmatpush1.bf16.msra.mxu0 %v11835_v29  ;;  %v11895_v29 = vld [vmem:[#allocation11 + $0x180] ss:$8 sps:$4 sm:$0xff]  }
 0x342   :  { %3738 = vmatprep.subr.bf16.mxu0 %v11840_v30  ;;  %v11900_v30 = vld [vmem:[#allocation11 + $0x194] ss:$8 sps:$4 sm:$0xff]  }
 0x345   :  { %3739 = vmatpush1.bf16.msra.mxu0 %v11838_v31  ;;  %v11898_v31 = vld [vmem:[#allocation11 + $0x190] ss:$8 sps:$4 sm:$0xff]  }
 0x346   :  { %3740 = vmatprep.subr.bf16.mxu0 %v11843_v32  ;;  %v11903_v32 = vld [vmem:[#allocation11 + $0x1a4] ss:$8 sps:$4 sm:$0xff]  }
 0x349   :  { %3741 = vmatpush1.bf16.msra.mxu0 %v11841_v33  ;;  %v11901_v33 = vld [vmem:[#allocation11 + $0x1a0] ss:$8 sps:$4 sm:$0xff]  }
 0x34a   :  { %3742 = vmatprep.subr.bf16.mxu0 %v11846_v34  ;;  %v11906_v34 = vld [vmem:[#allocation11 + $0x1b4] ss:$8 sps:$4 sm:$0xff]  }
 0x34d   :  { %3743 = vmatpush1.bf16.msra.mxu0 %v11844_v35  ;;  %v11904_v35 = vld [vmem:[#allocation11 + $0x1b0] ss:$8 sps:$4 sm:$0xff]  }
 0x34e   :  { %3744 = vmatprep.subr.bf16.mxu0 %v11849_v36  ;;  %v11909_v36 = vld [vmem:[#allocation11 + $0x1c4] ss:$8 sps:$4 sm:$0xff]  }
 0x351   :  { %3745 = vmatpush1.bf16.msra.mxu0 %v11847_v37  ;;  %v11907_v37 = vld [vmem:[#allocation11 + $0x1c0] ss:$8 sps:$4 sm:$0xff]  }
 0x352   :  { %3746 = vmatprep.subr.bf16.mxu0 %v11852_v38  ;;  %v11912_v38 = vld [vmem:[#allocation11 + $0x1d4] ss:$8 sps:$4 sm:$0xff]  }
 0x355   :  { %3747 = vmatpush1.bf16.msra.mxu0 %v11850_v39  ;;  %v11910_v39 = vld [vmem:[#allocation11 + $0x1d0] ss:$8 sps:$4 sm:$0xff]  }
 0x356   :  { %3748 = vmatprep.subr.bf16.mxu0 %v11855_v40  ;;  %v11915_v40 = vld [vmem:[#allocation11 + $0x1e4] ss:$8 sps:$4 sm:$0xff]  }
 0x359   :  { %3749 = vmatpush1.bf16.msra.mxu0 %v11853_v41  ;;  %v11913_v41 = vld [vmem:[#allocation11 + $0x1e0] ss:$8 sps:$4 sm:$0xff]  }
 0x35a   :  { %3750 = vmatprep.subr.bf16.mxu0 %v11858_v42  ;;  %v11918_v42 = vld [vmem:[#allocation11 + $0x1f4] ss:$8 sps:$4 sm:$0xff]  }
 0x35d   :  { %3751 = vmatpush1.bf16.msra.mxu0 %v11856_v43  ;;  %v11916_v43 = vld [vmem:[#allocation11 + $0x1f0] ss:$8 sps:$4 sm:$0xff]  }
 0x35e   :  { %3752 = vmatprep.subr.bf16.mxu0 %v11861_v44 }
 0x361   :  { %3753 = vmatpush1.bf16.msra.mxu0 %v11859_v45 }
 0x362   :  { %3754 = vmatprep.subr.bf16.mxu0 %v11864_v46 }
 0x365   :  { %3755 = vmatpush1.bf16.msra.mxu0 %v11862_v47 }
 0x366   :  { %3756 = vmatprep.subr.bf16.mxu0 %v11867_v48 }
 0x369   :  { %3757 = vmatpush1.bf16.msra.mxu0 %v11865_v49 }
 0x36a   :  { %3758 = vmatprep.subr.bf16.mxu0 %v11870_v50 }
 0x36d   :  { %3759 = vmatpush1.bf16.msra.mxu0 %v11868_v51 }
 0x36e   :  { %3781 = vmatprep.subr.bf16.mxu0 %v11873_v52 }
 0x3f3   :  { %v11240_v53 = vpop.f32.mrb[0].mxu0  ;;  %v11252_v54 = vpop.f32.mrb[0].mxu1 }
 0x3f4   :  { %v3175_v55 = vpop.f32.mrb[1].mxu0  ;;  %v3247_v56 = vpop.f32.mrb[1].mxu1 }
 0x3f5   :  { %v11241_v57 = vpop.f32.mrb[2].mxu0  ;;  %v11253_v58 = vpop.f32.mrb[2].mxu1 }
 0x3f6   :  { %v3191_v59 = vpack.c.bf16 %v11241_v57, %v11240_v53  ;;  %v3263_v60 = vpack.c.bf16 %v11253_v58, %v11252_v54  ;;  %v3178_v61 = vpop.f32.mrb[3].mxu0  ;;  %v3250_v62 = vpop.f32.mrb[3].mxu1 }
 0x3f7   :  { %v3190_v63 = vpack.c.bf16 %v3178_v61, %v3175_v55  ;;  %v3262_v0 = vpack.c.bf16 %v3250_v62, %v3247_v56 }
 0x3f9   :  { %3760 = vmatprep.mubr.bf16.mxu0 %v3262_v0 }
 0x3fa   :  { %3761 = vmatmul.mubr.bf16.vlgmr.msra.gmra.mrb[8].mxu0 %v3190_v63 }
 0x3fb   :  { %3782 = vmatpush1.bf16.msra.mxu0 %v11871_v1  ;;  %3770 = vmatprep.mubr.bf16.mxu0 %v3263_v60 }
 0x3fc   :  { %3783 = vmatprep.subr.bf16.mxu0 %v11876_v2 }
 0x3ff   :  { %3784 = vmatpush1.bf16.msra.mxu0 %v11874_v3 }
 0x400   :  { %3785 = vmatprep.subr.bf16.mxu0 %v11879_v4 }
 0x402   :  { %3771 = vmatmul.mubr.bf16.gmra.mrb[12].mxu0 %v3191_v59 }
 0x403   :  { %3786 = vmatpush1.bf16.msra.mxu0 %v11877_v5  ;;  %v13420_v8 = vpop.f32.mrb[4].mxu1  ;;  %v13422_v9 = vpop.f32.mrb[4].mxu0 }
 0x404   :  { %3787 = vmatprep.subr.bf16.mxu0 %v11882_v6  ;;  %v3391_v11 = vpop.f32.mrb[5].mxu1  ;;  %v3319_v12 = vpop.f32.mrb[5].mxu0 }
 0x405   :  { %v11277_v13 = vpop.f32.mrb[6].mxu1  ;;  %v11265_v14 = vpop.f32.mrb[6].mxu0 }
 0x406   :  { %v3407_v15 = vpack.c.bf16 %v11277_v13, %v13420_v8  ;;  %v3335_v16 = vpack.c.bf16 %v11265_v14, %v13422_v9  ;;  %v3394_v17 = vpop.f32.mrb[7].mxu1  ;;  %v3322_v18 = vpop.f32.mrb[7].mxu0 }
 0x407   :  { %3788 = vmatpush1.bf16.msra.mxu0 %v11880_v7  ;;  %v3406_v20 = vpack.c.bf16 %v3394_v17, %v3391_v11  ;;  %v3334_v21 = vpack.c.bf16 %v3322_v18, %v3319_v12 }
 0x408   :  { %3789 = vmatprep.subr.bf16.mxu0 %v11885_v10 }
 0x409   :  { %3813 = vmatprep.mubr.bf16.mxu0 %v3406_v20 }
 0x40b   :  { %3790 = vmatpush1.bf16.msra.mxu0 %v11883_v19 }
 0x40c   :  { %3791 = vmatprep.subr.bf16.mxu0 %v11888_v22 }
 0x40f   :  { %3792 = vmatpush1.bf16.msra.mxu0 %v11886_v23 }
 0x410   :  { %3793 = vmatprep.subr.bf16.mxu0 %v11891_v24 }
 0x413   :  { %3794 = vmatpush1.bf16.msra.mxu0 %v11889_v25 }
 0x414   :  { %3795 = vmatprep.subr.bf16.mxu0 %v11894_v26 }
 0x417   :  { %3796 = vmatpush1.bf16.msra.mxu0 %v11892_v27 }
 0x418   :  { %3797 = vmatprep.subr.bf16.mxu0 %v11897_v28 }
 0x41b   :  { %3798 = vmatpush1.bf16.msra.mxu0 %v11895_v29 }
 0x41c   :  { %3799 = vmatprep.subr.bf16.mxu0 %v11900_v30 }
 0x41f   :  { %3800 = vmatpush1.bf16.msra.mxu0 %v11898_v31 }
 0x420   :  { %3801 = vmatprep.subr.bf16.mxu0 %v11903_v32 }
 0x423   :  { %3802 = vmatpush1.bf16.msra.mxu0 %v11901_v33 }
 0x424   :  { %3803 = vmatprep.subr.bf16.mxu0 %v11906_v34 }
 0x427   :  { %3804 = vmatpush1.bf16.msra.mxu0 %v11904_v35 }
 0x428   :  { %3805 = vmatprep.subr.bf16.mxu0 %v11909_v36 }
 0x42b   :  { %3806 = vmatpush1.bf16.msra.mxu0 %v11907_v37 }
 0x42c   :  { %3807 = vmatprep.subr.bf16.mxu0 %v11912_v38 }
 0x42f   :  { %3808 = vmatpush1.bf16.msra.mxu0 %v11910_v39 }
 0x430   :  { %3809 = vmatprep.subr.bf16.mxu0 %v11915_v40 }
 0x433   :  { %3810 = vmatpush1.bf16.msra.mxu0 %v11913_v41 }
 0x434   :  { %3811 = vmatprep.subr.bf16.mxu0 %v11918_v42 }
 0x437   :  { %3812 = vmatpush1.bf16.msra.mxu0 %v11916_v43 }
 0x43a   :  { %3814 = vmatmul.mubr.bf16.vlgmr.msra.gmra.mrb[8].mxu0 %v3334_v21 }
 0x43b   :  { %3823 = vmatprep.mubr.bf16.mxu0 %v3407_v15 }
 0x442   :  { %3824 = vmatmul.mubr.bf16.gmra.mrb[12].mxu0 %v3335_v16 }
 0x50d   :  { %v3815_v44 = vpop.f32.mrb[8].mxu0 }
 0x50e   :  { %v3842_v45 = vmul.f32 0.2, %v3815_v44  ;;  %v3817_v46 = vpop.f32.mrb[9].mxu0  ;;  %vm3834_vm1 = vcmp.ge.f32.partialorder %v3815_v44, 0.0 }
 0x50f   :  { %v3843_v47 = vmul.f32 0.2, %v3817_v46  ;;  %v3819_v48 = vpop.f32.mrb[10].mxu0  ;;  %vm3835_vm2 = vcmp.ge.f32.partialorder %v3817_v46, 0.0 }
 0x510   :  { %vm3836_vm3 = vcmp.ge.f32.partialorder %v3819_v48, 0.0  ;;  %v3844_v49 = vmul.f32 0.2, %v3819_v48  ;;  %v3821_v50 = vpop.f32.mrb[11].mxu0  ;;  %v3850_v52 = vsel %vm3834_vm1, %v3815_v44, %v3842_v45 }
 0x511   :  { %vm3837_vm4 = vcmp.ge.f32.partialorder %v3821_v50, 0.0  ;;  %v3845_v51 = vmul.f32 0.2, %v3821_v50  ;;  %v3851_v54 = vsel %vm3835_vm2, %v3817_v46, %v3843_v47 }
 0x512   :  { %v3852_v53 = vsel %vm3836_vm3, %v3819_v48, %v3844_v49 }
 0x513   :  { %v13426_v55 = vpack.c.bf16 %v3852_v53, %v3850_v52  ;;  %v3853_v56 = vsel %vm3837_vm4, %v3821_v50, %v3845_v51 }
 0x514   :  { %v13428_v57 = vpack.c.bf16 %v3853_v56, %v3851_v54 }
 0x515   :  { %v3825_v58 = vpop.f32.mrb[12].mxu0 }
 0x516   :  { %v3846_v59 = vmul.f32 0.2, %v3825_v58  ;;  %v3827_v60 = vpop.f32.mrb[13].mxu0  ;;  %vm3838_vm5 = vcmp.ge.f32.partialorder %v3825_v58, 0.0 }
 0x517   :  { %v3847_v61 = vmul.f32 0.2, %v3827_v60  ;;  %v3829_v62 = vpop.f32.mrb[14].mxu0  ;;  %vm3839_vm6 = vcmp.ge.f32.partialorder %v3827_v60, 0.0 }
 0x518   :  { %vm3840_vm7 = vcmp.ge.f32.partialorder %v3829_v62, 0.0  ;;  %v3848_v63 = vmul.f32 0.2, %v3829_v62  ;;  %v3831_v0 = vpop.f32.mrb[15].mxu0  ;;  %v3854_v2 = vsel %vm3838_vm5, %v3825_v58, %v3846_v59 }
 0x519   :  { %vm3841_vm8 = vcmp.ge.f32.partialorder %v3831_v0, 0.0  ;;  %v3849_v1 = vmul.f32 0.2, %v3831_v0  ;;  %v3855_v4 = vsel %vm3839_vm6, %v3827_v60, %v3847_v61 }
 0x51a   :  { %v3856_v3 = vsel %vm3840_vm7, %v3829_v62, %v3848_v63 }
 0x51b   :  { %v13430_v5 = vpack.c.bf16 %v3856_v3, %v3854_v2  ;;  %v3857_v6 = vsel %vm3841_vm8, %v3831_v0, %v3849_v1 }
 0x51c   :  { %v13432_v7 = vpack.c.bf16 %v3857_v6, %v3855_v4 }
 0x51d   :  { %12409 = dma.done.wait [#allocation7], 24576 }
 0x51e   :  { %12410 = vsyncadd [#allocation7], 4294942720  ;;  %s14941_s25 = sld [smem:[#allocation57_spill]]  ;;  %4079 = vmatprep.subr.bf16.mxu1 %v13428_v57  ;;  %v14900_v8 = vmov 0   ;;  %vm4072_vm9 = vcmask 261120  }
 0x51f   :  { %4080 = vmatpush1.bf16.msra.mxu1 %v13426_v55  ;;  %4111 = vmatprep.mubr.bf16.mxu1 %v14900_v8 }
 0x520   :  { %4081 = vmatprep.subr.bf16.mxu1 %v13432_v7 }
 0x523   :  { %4082 = vmatpush1.bf16.msra.mxu1 %v13430_v5 }
 0x524   :  { %4157 = vmatprep.subr.bf16.mxu1 %v13428_v57  ;;  %v13441_v9 = vld [vmem:[%s14941_s25] sm:$0xf]  ;;  %v13444_v10 = vld [vmem:[%s14941_s25 + $0x4] sm:$0xf]  ;;  %v13447_v11 = vld [vmem:[%s14941_s25 + $0x8] sm:$0xf] }
 0x525   :  { %14942 = vst [vmem:[#allocation70_spill] sm:$0xff] %v13441_v9  ;;  %14943 = vst [vmem:[#allocation71_spill] sm:$0xff] %v13444_v10  ;;  %v13450_v12 = vld [vmem:[%s14941_s25 + $0xc] sm:$0xf]  ;;  %v13453_v13 = vld [vmem:[%s14941_s25 + $0x10] sm:$0xf] }
 0x526   :  { %14944 = vst [vmem:[#allocation72_spill] sm:$0xff] %v13447_v11  ;;  %14945 = vst [vmem:[#allocation73_spill] sm:$0xff] %v13450_v12  ;;  %v13456_v14 = vld [vmem:[%s14941_s25 + $0x14] sm:$0xf]  ;;  %v13459_v15 = vld [vmem:[%s14941_s25 + $0x18] sm:$0xf] }
 0x527   :  { %14946 = vst [vmem:[#allocation74_spill] sm:$0xff] %v13453_v13  ;;  %14947 = vst [vmem:[#allocation75_spill] sm:$0xff] %v13456_v14  ;;  %v13462_v16 = vld [vmem:[%s14941_s25 + $0x1c] sm:$0xf]  ;;  %v13465_v17 = vld [vmem:[%s14941_s25 + $0x20] sm:$0xf] }
 0x528   :  { %14948 = vst [vmem:[#allocation76_spill] sm:$0xff] %v13459_v15  ;;  %14949 = vst [vmem:[#allocation77_spill] sm:$0xff] %v13462_v16  ;;  %v13468_v18 = vld [vmem:[%s14941_s25 + $0x24] sm:$0xf]  ;;  %v13471_v19 = vld [vmem:[%s14941_s25 + $0x28] sm:$0xf] }
 0x529   :  { %14950 = vst [vmem:[#allocation78_spill] sm:$0xff] %v13465_v17  ;;  %14951 = vst [vmem:[#allocation79_spill] sm:$0xff] %v13468_v18  ;;  %v13474_v20 = vld [vmem:[%s14941_s25 + $0x2c] sm:$0xf]  ;;  %v13477_v21 = vld [vmem:[%s14941_s25 + $0x30] sm:$0xf] }
 0x52a   :  { %14952 = vst [vmem:[#allocation80_spill] sm:$0xff] %v13471_v19  ;;  %14953 = vst [vmem:[#allocation81_spill] sm:$0xff] %v13474_v20  ;;  %v13480_v22 = vld [vmem:[%s14941_s25 + $0x34] sm:$0xf]  ;;  %v13483_v23 = vld [vmem:[%s14941_s25 + $0x38] sm:$0xf] }
 0x52b   :  { %14954 = vst [vmem:[#allocation82_spill] sm:$0xff] %v13477_v21  ;;  %14955 = vst [vmem:[#allocation83_spill] sm:$0xff] %v13480_v22  ;;  %v13486_v24 = vld [vmem:[%s14941_s25 + $0x3c] sm:$0xf]  ;;  %v13489_v25 = vld [vmem:[%s14941_s25 + $0x40] sm:$0xf] }
 0x52c   :  { %14956 = vst [vmem:[#allocation84_spill] sm:$0xff] %v13483_v23  ;;  %14957 = vst [vmem:[#allocation85_spill] sm:$0xff] %v13486_v24  ;;  %v13492_v26 = vld [vmem:[%s14941_s25 + $0x44] sm:$0xf]  ;;  %v13495_v27 = vld [vmem:[%s14941_s25 + $0x48] sm:$0xf] }
 0x52d   :  { %14958 = vst [vmem:[#allocation86_spill] sm:$0xff] %v13489_v25  ;;  %14959 = vst [vmem:[#allocation87_spill] sm:$0xff] %v13492_v26  ;;  %v13498_v28 = vld [vmem:[%s14941_s25 + $0x4c] sm:$0xf]  ;;  %v13501_v29 = vld [vmem:[%s14941_s25 + $0x50] sm:$0xf] }
 0x52e   :  { %14960 = vst [vmem:[#allocation88_spill] sm:$0xff] %v13495_v27  ;;  %14961 = vst [vmem:[#allocation89_spill] sm:$0xff] %v13498_v28  ;;  %v13504_v30 = vld [vmem:[%s14941_s25 + $0x54] sm:$0xf]  ;;  %v13507_v31 = vld [vmem:[%s14941_s25 + $0x58] sm:$0xf] }
 0x52f   :  { %14962 = vst [vmem:[#allocation90_spill] sm:$0xff] %v13501_v29  ;;  %14963 = vst [vmem:[#allocation91_spill] sm:$0xff] %v13504_v30  ;;  %v13510_v32 = vld [vmem:[%s14941_s25 + $0x5c] sm:$0xf]  ;;  %v13513_v33 = vld [vmem:[%s14941_s25 + $0x60] sm:$0xf] }
 0x530   :  { %14964 = vst [vmem:[#allocation92_spill] sm:$0xff] %v13507_v31  ;;  %14965 = vst [vmem:[#allocation93_spill] sm:$0xff] %v13510_v32  ;;  %v13516_v34 = vld [vmem:[%s14941_s25 + $0x64] sm:$0xf]  ;;  %v13519_v35 = vld [vmem:[%s14941_s25 + $0x68] sm:$0xf] }
 0x531   :  { %14966 = vst [vmem:[#allocation94_spill] sm:$0xff] %v13513_v33  ;;  %14967 = vst [vmem:[#allocation95_spill] sm:$0xff] %v13516_v34  ;;  %v13522_v36 = vld [vmem:[%s14941_s25 + $0x6c] sm:$0xf]  ;;  %v13525_v37 = vld [vmem:[%s14941_s25 + $0x70] sm:$0xf] }
 0x532   :  { %14968 = vst [vmem:[#allocation96_spill] sm:$0xff] %v13519_v35  ;;  %14969 = vst [vmem:[#allocation97_spill] sm:$0xff] %v13522_v36  ;;  %v13528_v38 = vld [vmem:[%s14941_s25 + $0x74] sm:$0xf]  ;;  %v13531_v39 = vld [vmem:[%s14941_s25 + $0x78] sm:$0xf] }
 0x533   :  { %14970 = vst [vmem:[#allocation98_spill] sm:$0xff] %v13525_v37  ;;  %14971 = vst [vmem:[#allocation99_spill] sm:$0xff] %v13528_v38  ;;  %v13534_v40 = vld [vmem:[%s14941_s25 + $0x7c] sm:$0xf]  ;;  %v13537_v41 = vld [vmem:[%s14941_s25 + $0x80] sm:$0xf] }
 0x534   :  { %14972 = vst [vmem:[#allocation100_spill] sm:$0xff] %v13531_v39  ;;  %14973 = vst [vmem:[#allocation101_spill] sm:$0xff] %v13534_v40  ;;  %v13540_v42 = vld [vmem:[%s14941_s25 + $0x84] sm:$0xf]  ;;  %v13543_v43 = vld [vmem:[%s14941_s25 + $0x88] sm:$0xf] }
 0x535   :  { %14974 = vst [vmem:[#allocation102_spill] sm:$0xff] %v13537_v41  ;;  %14975 = vst [vmem:[#allocation103_spill] sm:$0xff] %v13540_v42  ;;  %v13546_v44 = vld [vmem:[%s14941_s25 + $0x8c] sm:$0xf]  ;;  %v13549_v45 = vld [vmem:[%s14941_s25 + $0x90] sm:$0xf] }
 0x536   :  { %14976 = vst [vmem:[#allocation104_spill] sm:$0xff] %v13543_v43  ;;  %14977 = vst [vmem:[#allocation105_spill] sm:$0xff] %v13546_v44  ;;  %v13552_v46 = vld [vmem:[%s14941_s25 + $0x94] sm:$0xf]  ;;  %v13555_v47 = vld [vmem:[%s14941_s25 + $0x98] sm:$0xf] }
 0x537   :  { %14978 = vst [vmem:[#allocation106_spill] sm:$0xff] %v13549_v45  ;;  %14979 = vst [vmem:[#allocation107_spill] sm:$0xff] %v13552_v46  ;;  %v13558_v48 = vld [vmem:[%s14941_s25 + $0x9c] sm:$0xf]  ;;  %v13561_v49 = vld [vmem:[%s14941_s25 + $0xa0] sm:$0xf] }
 0x538   :  { %14980 = vst [vmem:[#allocation108_spill] sm:$0xff] %v13555_v47  ;;  %14981 = vst [vmem:[#allocation109_spill] sm:$0xff] %v13558_v48  ;;  %v13564_v50 = vld [vmem:[%s14941_s25 + $0xa4] sm:$0xf]  ;;  %v13567_v51 = vld [vmem:[%s14941_s25 + $0xa8] sm:$0xf] }
 0x539   :  { %14982 = vst [vmem:[#allocation110_spill] sm:$0xff] %v13561_v49  ;;  %14983 = vst [vmem:[#allocation111_spill] sm:$0xff] %v13564_v50  ;;  %v13570_v52 = vld [vmem:[%s14941_s25 + $0xac] sm:$0xf]  ;;  %v13573_v53 = vld [vmem:[%s14941_s25 + $0xb0] sm:$0xf] }
 0x53a   :  { %14984 = vst [vmem:[#allocation112_spill] sm:$0xff] %v13567_v51  ;;  %14985 = vst [vmem:[#allocation113_spill] sm:$0xff] %v13570_v52  ;;  %v13576_v54 = vld [vmem:[%s14941_s25 + $0xb4] sm:$0xf]  ;;  %v13579_v56 = vld [vmem:[%s14941_s25 + $0xb8] sm:$0xf] }
 0x53b   :  { %14986 = vst [vmem:[#allocation114_spill] sm:$0xff] %v13573_v53  ;;  %14987 = vst [vmem:[#allocation115_spill] sm:$0xff] %v13576_v54  ;;  %v13582_v58 = vld [vmem:[%s14941_s25 + $0xbc] sm:$0xf]  ;;  %v13585_v59 = vld [vmem:[%s14941_s25 + $0xc0] sm:$0xf] }
 0x53c   :  { %14988 = vst [vmem:[#allocation116_spill] sm:$0xff] %v13579_v56  ;;  %14989 = vst [vmem:[#allocation117_spill] sm:$0xff] %v13582_v58  ;;  %v13588_v60 = vld [vmem:[%s14941_s25 + $0xc4] sm:$0xf]  ;;  %v13591_v61 = vld [vmem:[%s14941_s25 + $0xc8] sm:$0xf] }
 0x53d   :  { %14990 = vst [vmem:[#allocation118_spill] sm:$0xff] %v13585_v59  ;;  %14991 = vst [vmem:[#allocation119_spill] sm:$0xff] %v13588_v60  ;;  %v13594_v62 = vld [vmem:[%s14941_s25 + $0xcc] sm:$0xf]  ;;  %v13597_v63 = vld [vmem:[%s14941_s25 + $0xd0] sm:$0xf] }
 0x53e   :  { %14992 = vst [vmem:[#allocation120_spill] sm:$0xff] %v13591_v61  ;;  %14993 = vst [vmem:[#allocation121_spill] sm:$0xff] %v13594_v62  ;;  %v13600_v0 = vld [vmem:[%s14941_s25 + $0xd4] sm:$0xf]  ;;  %v13603_v1 = vld [vmem:[%s14941_s25 + $0xd8] sm:$0xf] }
 0x53f   :  { %14994 = vst [vmem:[#allocation122_spill] sm:$0xff] %v13597_v63  ;;  %14995 = vst [vmem:[#allocation123_spill] sm:$0xff] %v13600_v0  ;;  %v13606_v2 = vld [vmem:[%s14941_s25 + $0xdc] sm:$0xf]  ;;  %v13609_v3 = vld [vmem:[%s14941_s25 + $0xe0] sm:$0xf] }
 0x540   :  { %14996 = vst [vmem:[#allocation124_spill] sm:$0xff] %v13603_v1  ;;  %14997 = vst [vmem:[#allocation125_spill] sm:$0xff] %v13606_v2  ;;  %v13612_v4 = vld [vmem:[%s14941_s25 + $0xe4] sm:$0xf]  ;;  %v13615_v6 = vld [vmem:[%s14941_s25 + $0xe8] sm:$0xf] }
 0x541   :  { %14998 = vst [vmem:[#allocation126_spill] sm:$0xff] %v13609_v3  ;;  %14999 = vst [vmem:[#allocation127_spill] sm:$0xff] %v13612_v4  ;;  %v13618_v8 = vld [vmem:[%s14941_s25 + $0xec] sm:$0xf]  ;;  %v13621_v56 = vld [vmem:[%s14941_s25 + $0xf0] sm:$0xf] }
 0x542   :  { %15000 = vst [vmem:[#allocation128_spill] sm:$0xff] %v13615_v6  ;;  %15001 = vst [vmem:[#allocation129_spill] sm:$0xff] %v13618_v8  ;;  %v13624_v58 = vld [vmem:[%s14941_s25 + $0xf4] sm:$0xf]  ;;  %v13627_v53 = vld [vmem:[%s14941_s25 + $0xf8] sm:$0xf] }
 0x543   :  { %15002 = vst [vmem:[#allocation130_spill] sm:$0xff] %v13621_v56  ;;  %15003 = vst [vmem:[#allocation131_spill] sm:$0xff] %v13624_v58  ;;  %v13630_v54 = vld [vmem:[%s14941_s25 + $0xfc] sm:$0xf]  ;;  %v13633_v51 = vld [vmem:[%s14941_s25 + $0x100] sm:$0xf] }
 0x544   :  { %15004 = vst [vmem:[#allocation132_spill] sm:$0xff] %v13627_v53  ;;  %15005 = vst [vmem:[#allocation133_spill] sm:$0xff] %v13630_v54  ;;  %v13636_v52 = vld [vmem:[%s14941_s25 + $0x104] sm:$0xf]  ;;  %v13639_v6 = vld [vmem:[%s14941_s25 + $0x108] sm:$0xf] }
 0x545   :  { %v13642_v56 = vld [vmem:[%s14941_s25 + $0x10c] sm:$0xf]  ;;  %v13645_v58 = vld [vmem:[%s14941_s25 + $0x110] sm:$0xf]  ;;  %v13648_v53 = vld [vmem:[%s14941_s25 + $0x114] sm:$0xf] }
 0x546   :  { %v13651_v54 = vld [vmem:[%s14941_s25 + $0x118] sm:$0xf]  ;;  %v13654_v8 = vld [vmem:[%s14941_s25 + $0x11c] sm:$0xf]  ;;  %v13657_v49 = vld [vmem:[%s14941_s25 + $0x120] sm:$0xf] }
 0x547   :  { %15006 = vst [vmem:[#allocation134_spill] sm:$0xff] %v13657_v49  ;;  %v13660_v50 = vld [vmem:[%s14941_s25 + $0x124] sm:$0xf]  ;;  %v13663_v3 = vld [vmem:[%s14941_s25 + $0x128] sm:$0xf] }
 0x548   :  { %15007 = vst [vmem:[#allocation135_spill] sm:$0xff] %v13660_v50  ;;  %15008 = vst [vmem:[#allocation136_spill] sm:$0xff] %v13663_v3  ;;  %v13666_v4 = vld [vmem:[%s14941_s25 + $0x12c] sm:$0xf]  ;;  %v13669_v47 = vld [vmem:[%s14941_s25 + $0x130] sm:$0xf] }
 0x549   :  { %15009 = vst [vmem:[#allocation137_spill] sm:$0xff] %v13666_v4  ;;  %15010 = vst [vmem:[#allocation138_spill] sm:$0xff] %v13669_v47  ;;  %v13672_v48 = vld [vmem:[%s14941_s25 + $0x134] sm:$0xf]  ;;  %v13675_v1 = vld [vmem:[%s14941_s25 + $0x138] sm:$0xf] }
 0x54a   :  { %15011 = vst [vmem:[#allocation139_spill] sm:$0xff] %v13672_v48  ;;  %15012 = vst [vmem:[#allocation140_spill] sm:$0xff] %v13675_v1  ;;  %v13678_v2 = vld [vmem:[%s14941_s25 + $0x13c] sm:$0xf]  ;;  %v13681_v45 = vld [vmem:[%s14941_s25 + $0x140] sm:$0xf] }
 0x54b   :  { %15013 = vst [vmem:[#allocation141_spill] sm:$0xff] %v13678_v2  ;;  %v13684_v46 = vld [vmem:[%s14941_s25 + $0x144] sm:$0xf]  ;;  %v13687_v63 = vld [vmem:[%s14941_s25 + $0x148] sm:$0xf] }
 0x54c   :  { %v13690_v0 = vld [vmem:[%s14941_s25 + $0x14c] sm:$0xf]  ;;  %v13693_v43 = vld [vmem:[%s14941_s25 + $0x150] sm:$0xf]  ;;  %v13696_v44 = vld [vmem:[%s14941_s25 + $0x154] sm:$0xf] }
 0x54d   :  { %v13699_v61 = vld [vmem:[%s14941_s25 + $0x158] sm:$0xf]  ;;  %v13702_v62 = vld [vmem:[%s14941_s25 + $0x15c] sm:$0xf]  ;;  %v13705_v41 = vld [vmem:[%s14941_s25 + $0x160] sm:$0xf] }
 0x54e   :  { %15014 = vst [vmem:[#allocation142_spill] sm:$0xff] %v13705_v41  ;;  %v13708_v42 = vld [vmem:[%s14941_s25 + $0x164] sm:$0xf]  ;;  %v13711_v59 = vld [vmem:[%s14941_s25 + $0x168] sm:$0xf] }
 0x54f   :  { %15015 = vst [vmem:[#allocation143_spill] sm:$0xff] %v13708_v42  ;;  %15016 = vst [vmem:[#allocation144_spill] sm:$0xff] %v13711_v59  ;;  %v13714_v60 = vld [vmem:[%s14941_s25 + $0x16c] sm:$0xf]  ;;  %v13717_v23 = vld [vmem:[%s14941_s25 + $0x170] sm:$0xf] }
 0x550   :  { %15017 = vst [vmem:[#allocation145_spill] sm:$0xff] %v13714_v60  ;;  %15018 = vst [vmem:[#allocation146_spill] sm:$0xff] %v13717_v23  ;;  %v13720_v24 = vld [vmem:[%s14941_s25 + $0x174] sm:$0xf]  ;;  %v13723_v39 = vld [vmem:[%s14941_s25 + $0x178] sm:$0xf] }
 0x551   :  { %15019 = vst [vmem:[#allocation147_spill] sm:$0xff] %v13720_v24  ;;  %15020 = vst [vmem:[#allocation148_spill] sm:$0xff] %v13723_v39  ;;  %v13726_v40 = vld [vmem:[%s14941_s25 + $0x17c] sm:$0xf]  ;;  %v13729_v21 = vld [vmem:[%s14941_s25 + $0x180] sm:$0xf] }
 0x552   :  { %15021 = vst [vmem:[#allocation149_spill] sm:$0xff] %v13726_v40  ;;  %15022 = vst [vmem:[#allocation150_spill] sm:$0xff] %v13729_v21  ;;  %v13732_v22 = vld [vmem:[%s14941_s25 + $0x184] sm:$0xf]  ;;  %v13735_v37 = vld [vmem:[%s14941_s25 + $0x188] sm:$0xf] }
 0x553   :  { %15023 = vst [vmem:[#allocation151_spill] sm:$0xff] %v13732_v22  ;;  %15024 = vst [vmem:[#allocation152_spill] sm:$0xff] %v13735_v37  ;;  %v13738_v38 = vld [vmem:[%s14941_s25 + $0x18c] sm:$0xf]  ;;  %v13741_v19 = vld [vmem:[%s14941_s25 + $0x190] sm:$0xf] }
 0x554   :  { %15025 = vst [vmem:[#allocation153_spill] sm:$0xff] %v13738_v38  ;;  %15026 = vst [vmem:[#allocation154_spill] sm:$0xff] %v13741_v19  ;;  %v13744_v20 = vld [vmem:[%s14941_s25 + $0x194] sm:$0xf]  ;;  %v13747_v35 = vld [vmem:[%s14941_s25 + $0x198] sm:$0xf] }
 0x555   :  { %15027 = vst [vmem:[#allocation155_spill] sm:$0xff] %v13744_v20  ;;  %15028 = vst [vmem:[#allocation156_spill] sm:$0xff] %v13747_v35  ;;  %v13750_v21 = vld [vmem:[%s14941_s25 + $0x19c] sm:$0xf]  ;;  %v13753_v22 = vld [vmem:[%s14941_s25 + $0x1a0] sm:$0xf] }
 0x556   :  { %15029 = vst [vmem:[#allocation157_spill] sm:$0xff] %v13750_v21  ;;  %15030 = vst [vmem:[#allocation158_spill] sm:$0xff] %v13753_v22  ;;  %v13756_v37 = vld [vmem:[%s14941_s25 + $0x1a4] sm:$0xf]  ;;  %v13759_v38 = vld [vmem:[%s14941_s25 + $0x1a8] sm:$0xf] }
 0x557   :  { %15031 = vst [vmem:[#allocation159_spill] sm:$0xff] %v13756_v37  ;;  %15032 = vst [vmem:[#allocation160_spill] sm:$0xff] %v13759_v38  ;;  %v13762_v19 = vld [vmem:[%s14941_s25 + $0x1ac] sm:$0xf]  ;;  %v13765_v20 = vld [vmem:[%s14941_s25 + $0x1b0] sm:$0xf] }
 0x558   :  { %15033 = vst [vmem:[#allocation161_spill] sm:$0xff] %v13762_v19  ;;  %15034 = vst [vmem:[#allocation162_spill] sm:$0xff] %v13765_v20  ;;  %v13768_v35 = vld [vmem:[%s14941_s25 + $0x1b4] sm:$0xf]  ;;  %v13771_v21 = vld [vmem:[%s14941_s25 + $0x1b8] sm:$0xf] }
 0x559   :  { %15035 = vst [vmem:[#allocation163_spill] sm:$0xff] %v13768_v35  ;;  %15036 = vst [vmem:[#allocation164_spill] sm:$0xff] %v13771_v21  ;;  %v13774_v22 = vld [vmem:[%s14941_s25 + $0x1bc] sm:$0xf]  ;;  %v13777_v37 = vld [vmem:[%s14941_s25 + $0x1c0] sm:$0xf] }
 0x55a   :  { %15037 = vst [vmem:[#allocation165_spill] sm:$0xff] %v13774_v22  ;;  %15038 = vst [vmem:[#allocation166_spill] sm:$0xff] %v13777_v37  ;;  %v13780_v38 = vld [vmem:[%s14941_s25 + $0x1c4] sm:$0xf]  ;;  %v13783_v19 = vld [vmem:[%s14941_s25 + $0x1c8] sm:$0xf] }
 0x55b   :  { %15039 = vst [vmem:[#allocation167_spill] sm:$0xff] %v13780_v38  ;;  %15040 = vst [vmem:[#allocation168_spill] sm:$0xff] %v13783_v19  ;;  %v13786_v20 = vld [vmem:[%s14941_s25 + $0x1cc] sm:$0xf]  ;;  %v13789_v35 = vld [vmem:[%s14941_s25 + $0x1d0] sm:$0xf] }
 0x55c   :  { %15041 = vst [vmem:[#allocation169_spill] sm:$0xff] %v13786_v20  ;;  %15042 = vst [vmem:[#allocation170_spill] sm:$0xff] %v13789_v35  ;;  %v13792_v21 = vld [vmem:[%s14941_s25 + $0x1d4] sm:$0xf]  ;;  %v13795_v22 = vld [vmem:[%s14941_s25 + $0x1d8] sm:$0xf] }
 0x55d   :  { %15043 = vst [vmem:[#allocation171_spill] sm:$0xff] %v13792_v21  ;;  %15044 = vst [vmem:[#allocation172_spill] sm:$0xff] %v13795_v22  ;;  %v13798_v37 = vld [vmem:[%s14941_s25 + $0x1dc] sm:$0xf]  ;;  %v13801_v38 = vld [vmem:[%s14941_s25 + $0x1e0] sm:$0xf] }
 0x55e   :  { %15045 = vst [vmem:[#allocation173_spill] sm:$0xff] %v13798_v37  ;;  %15046 = vst [vmem:[#allocation174_spill] sm:$0xff] %v13801_v38  ;;  %v13804_v19 = vld [vmem:[%s14941_s25 + $0x1e4] sm:$0xf]  ;;  %v13807_v20 = vld [vmem:[%s14941_s25 + $0x1e8] sm:$0xf] }
 0x55f   :  { %15047 = vst [vmem:[#allocation175_spill] sm:$0xff] %v13804_v19  ;;  %15048 = vst [vmem:[#allocation176_spill] sm:$0xff] %v13807_v20  ;;  %v13810_v35 = vld [vmem:[%s14941_s25 + $0x1ec] sm:$0xf]  ;;  %v13813_v21 = vld [vmem:[%s14941_s25 + $0x1f0] sm:$0xf] }
 0x560   :  { %15049 = vst [vmem:[#allocation177_spill] sm:$0xff] %v13810_v35  ;;  %15050 = vst [vmem:[#allocation178_spill] sm:$0xff] %v13813_v21  ;;  %v13816_v22 = vld [vmem:[%s14941_s25 + $0x1f4] sm:$0xf]  ;;  %v13819_v37 = vld [vmem:[%s14941_s25 + $0x1f8] sm:$0xf] }
 0x561   :  { %15051 = vst [vmem:[#allocation179_spill] sm:$0xff] %v13816_v22  ;;  %15052 = vst [vmem:[#allocation180_spill] sm:$0xff] %v13819_v37  ;;  %v13822_v38 = vld [vmem:[%s14941_s25 + $0x1fc] sm:$0xf]  ;;  %v13825_v19 = vld [vmem:[%s14941_s25 + $0x200] sm:$0xf] }
 0x562   :  { %15053 = vst [vmem:[#allocation181_spill] sm:$0xff] %v13822_v38  ;;  %15054 = vst [vmem:[#allocation182_spill] sm:$0xff] %v13825_v19  ;;  %v13828_v20 = vld [vmem:[%s14941_s25 + $0x204] sm:$0xf]  ;;  %v13831_v35 = vld [vmem:[%s14941_s25 + $0x208] sm:$0xf] }
 0x563   :  { %15055 = vst [vmem:[#allocation183_spill] sm:$0xff] %v13828_v20  ;;  %15056 = vst [vmem:[#allocation184_spill] sm:$0xff] %v13831_v35  ;;  %v13834_v21 = vld [vmem:[%s14941_s25 + $0x20c] sm:$0xf]  ;;  %v13837_v22 = vld [vmem:[%s14941_s25 + $0x210] sm:$0xf] }
 0x564   :  { %15057 = vst [vmem:[#allocation185_spill] sm:$0xff] %v13834_v21  ;;  %15058 = vst [vmem:[#allocation186_spill] sm:$0xff] %v13837_v22  ;;  %v13840_v37 = vld [vmem:[%s14941_s25 + $0x214] sm:$0xf]  ;;  %v13843_v38 = vld [vmem:[%s14941_s25 + $0x218] sm:$0xf] }
 0x565   :  { %15059 = vst [vmem:[#allocation187_spill] sm:$0xff] %v13840_v37  ;;  %15060 = vst [vmem:[#allocation188_spill] sm:$0xff] %v13843_v38  ;;  %v13846_v36 = vld [vmem:[%s14941_s25 + $0x21c] sm:$0xf]  ;;  %v13849_v17 = vld [vmem:[%s14941_s25 + $0x220] sm:$0xf] }
 0x566   :  { %15061 = vst [vmem:[#allocation189_spill] sm:$0xff] %v13846_v36  ;;  %15062 = vst [vmem:[#allocation190_spill] sm:$0xff] %v13849_v17  ;;  %v13852_v18 = vld [vmem:[%s14941_s25 + $0x224] sm:$0xf]  ;;  %v13855_v33 = vld [vmem:[%s14941_s25 + $0x228] sm:$0xf] }
 0x567   :  { %15063 = vst [vmem:[#allocation191_spill] sm:$0xff] %v13852_v18  ;;  %15064 = vst [vmem:[#allocation192_spill] sm:$0xff] %v13855_v33  ;;  %v13858_v34 = vld [vmem:[%s14941_s25 + $0x22c] sm:$0xf]  ;;  %v13861_v15 = vld [vmem:[%s14941_s25 + $0x230] sm:$0xf] }
 0x568   :  { %15065 = vst [vmem:[#allocation193_spill] sm:$0xff] %v13858_v34  ;;  %15066 = vst [vmem:[#allocation194_spill] sm:$0xff] %v13861_v15  ;;  %v13864_v16 = vld [vmem:[%s14941_s25 + $0x234] sm:$0xf]  ;;  %v13867_v31 = vld [vmem:[%s14941_s25 + $0x238] sm:$0xf] }
 0x569   :  { %15067 = vst [vmem:[#allocation195_spill] sm:$0xff] %v13864_v16  ;;  %15068 = vst [vmem:[#allocation196_spill] sm:$0xff] %v13867_v31  ;;  %v13870_v32 = vld [vmem:[%s14941_s25 + $0x23c] sm:$0xf]  ;;  %v13873_v13 = vld [vmem:[%s14941_s25 + $0x240] sm:$0xf] }
 0x56a   :  { %15069 = vst [vmem:[#allocation197_spill] sm:$0xff] %v13870_v32  ;;  %15070 = vst [vmem:[#allocation198_spill] sm:$0xff] %v13873_v13  ;;  %v13876_v14 = vld [vmem:[%s14941_s25 + $0x244] sm:$0xf]  ;;  %v13879_v29 = vld [vmem:[%s14941_s25 + $0x248] sm:$0xf] }
 0x56b   :  { %15071 = vst [vmem:[#allocation199_spill] sm:$0xff] %v13876_v14  ;;  %15072 = vst [vmem:[#allocation200_spill] sm:$0xff] %v13879_v29  ;;  %v13882_v30 = vld [vmem:[%s14941_s25 + $0x24c] sm:$0xf]  ;;  %v13885_v11 = vld [vmem:[%s14941_s25 + $0x250] sm:$0xf] }
 0x56c   :  { %15073 = vst [vmem:[#allocation201_spill] sm:$0xff] %v13882_v30  ;;  %15074 = vst [vmem:[#allocation202_spill] sm:$0xff] %v13885_v11  ;;  %v13888_v12 = vld [vmem:[%s14941_s25 + $0x254] sm:$0xf]  ;;  %v13891_v27 = vld [vmem:[%s14941_s25 + $0x258] sm:$0xf] }
 0x56d   :  { %15075 = vst [vmem:[#allocation203_spill] sm:$0xff] %v13888_v12  ;;  %15076 = vst [vmem:[#allocation204_spill] sm:$0xff] %v13891_v27  ;;  %v13894_v28 = vld [vmem:[%s14941_s25 + $0x25c] sm:$0xf]  ;;  %v13897_v9 = vld [vmem:[%s14941_s25 + $0x260] sm:$0xf] }
 0x56e   :  { %15077 = vst [vmem:[#allocation205_spill] sm:$0xff] %v13894_v28  ;;  %15078 = vst [vmem:[#allocation206_spill] sm:$0xff] %v13897_v9  ;;  %v13900_v10 = vld [vmem:[%s14941_s25 + $0x264] sm:$0xf]  ;;  %v13903_v25 = vld [vmem:[%s14941_s25 + $0x268] sm:$0xf] }
 0x56f   :  { %15079 = vst [vmem:[#allocation207_spill] sm:$0xff] %v13900_v10  ;;  %15080 = vst [vmem:[#allocation208_spill] sm:$0xff] %v13903_v25  ;;  %v13906_v26 = vld [vmem:[%s14941_s25 + $0x26c] sm:$0xf]  ;;  %v13909_v31 = vld [vmem:[%s14941_s25 + $0x270] sm:$0xf] }
 0x570   :  { %15081 = vst [vmem:[#allocation209_spill] sm:$0xff] %v13906_v26  ;;  %15082 = vst [vmem:[#allocation210_spill] sm:$0xff] %v13909_v31  ;;  %v13912_v32 = vld [vmem:[%s14941_s25 + $0x274] sm:$0xf]  ;;  %v13915_v15 = vld [vmem:[%s14941_s25 + $0x278] sm:$0xf] }
 0x571   :  { %15083 = vst [vmem:[#allocation211_spill] sm:$0xff] %v13912_v32  ;;  %15084 = vst [vmem:[#allocation212_spill] sm:$0xff] %v13915_v15  ;;  %v13918_v16 = vld [vmem:[%s14941_s25 + $0x27c] sm:$0xf]  ;;  %v13921_v33 = vld [vmem:[%s14941_s25 + $0x280] sm:$0xf] }
 0x572   :  { %15085 = vst [vmem:[#allocation213_spill] sm:$0xff] %v13918_v16  ;;  %15086 = vst [vmem:[#allocation214_spill] sm:$0xff] %v13921_v33  ;;  %v13924_v34 = vld [vmem:[%s14941_s25 + $0x284] sm:$0xf]  ;;  %v13927_v25 = vld [vmem:[%s14941_s25 + $0x288] sm:$0xf] }
 0x573   :  { %15087 = vst [vmem:[#allocation215_spill] sm:$0xff] %v13924_v34  ;;  %15088 = vst [vmem:[#allocation216_spill] sm:$0xff] %v13927_v25  ;;  %v13930_v31 = vld [vmem:[%s14941_s25 + $0x28c] sm:$0xf]  ;;  %v13933_v32 = vld [vmem:[%s14941_s25 + $0x290] sm:$0xf] }
 0x574   :  { %15089 = vst [vmem:[#allocation217_spill] sm:$0xff] %v13930_v31  ;;  %15090 = vst [vmem:[#allocation218_spill] sm:$0xff] %v13933_v32  ;;  %v13936_v15 = vld [vmem:[%s14941_s25 + $0x294] sm:$0xf]  ;;  %v13939_v16 = vld [vmem:[%s14941_s25 + $0x298] sm:$0xf] }
 0x575   :  { %15091 = vst [vmem:[#allocation219_spill] sm:$0xff] %v13936_v15  ;;  %15092 = vst [vmem:[#allocation220_spill] sm:$0xff] %v13939_v16  ;;  %v13942_v33 = vld [vmem:[%s14941_s25 + $0x29c] sm:$0xf]  ;;  %v13945_v34 = vld [vmem:[%s14941_s25 + $0x2a0] sm:$0xf] }
 0x576   :  { %15093 = vst [vmem:[#allocation221_spill] sm:$0xff] %v13942_v33  ;;  %15094 = vst [vmem:[#allocation222_spill] sm:$0xff] %v13945_v34  ;;  %v13948_v25 = vld [vmem:[%s14941_s25 + $0x2a4] sm:$0xf]  ;;  %v13951_v31 = vld [vmem:[%s14941_s25 + $0x2a8] sm:$0xf] }
 0x577   :  { %15095 = vst [vmem:[#allocation223_spill] sm:$0xff] %v13948_v25  ;;  %15096 = vst [vmem:[#allocation224_spill] sm:$0xff] %v13951_v31  ;;  %v13954_v32 = vld [vmem:[%s14941_s25 + $0x2ac] sm:$0xf]  ;;  %v13957_v15 = vld [vmem:[%s14941_s25 + $0x2b0] sm:$0xf] }
 0x578   :  { %15097 = vst [vmem:[#allocation225_spill] sm:$0xff] %v13954_v32  ;;  %15098 = vst [vmem:[#allocation226_spill] sm:$0xff] %v13957_v15  ;;  %v13960_v16 = vld [vmem:[%s14941_s25 + $0x2b4] sm:$0xf]  ;;  %v13963_v33 = vld [vmem:[%s14941_s25 + $0x2b8] sm:$0xf] }
 0x579   :  { %15099 = vst [vmem:[#allocation227_spill] sm:$0xff] %v13960_v16  ;;  %15100 = vst [vmem:[#allocation228_spill] sm:$0xff] %v13963_v33  ;;  %v13966_v34 = vld [vmem:[%s14941_s25 + $0x2bc] sm:$0xf]  ;;  %v13969_v25 = vld [vmem:[%s14941_s25 + $0x2c0] sm:$0xf] }
 0x57a   :  { %15101 = vst [vmem:[#allocation229_spill] sm:$0xff] %v13966_v34  ;;  %15102 = vst [vmem:[#allocation230_spill] sm:$0xff] %v13969_v25  ;;  %v13972_v26 = vld [vmem:[%s14941_s25 + $0x2c4] sm:$0xf]  ;;  %v13975_v31 = vld [vmem:[%s14941_s25 + $0x2c8] sm:$0xf] }
 0x57b   :  { %15103 = vst [vmem:[#allocation231_spill] sm:$0xff] %v13972_v26  ;;  %15104 = vst [vmem:[#allocation232_spill] sm:$0xff] %v13975_v31  ;;  %v13978_v32 = vld [vmem:[%s14941_s25 + $0x2cc] sm:$0xf]  ;;  %v13981_v17 = vld [vmem:[%s14941_s25 + $0x2d0] sm:$0xf] }
 0x57c   :  { %15105 = vst [vmem:[#allocation233_spill] sm:$0xff] %v13978_v32  ;;  %15106 = vst [vmem:[#allocation234_spill] sm:$0xff] %v13981_v17  ;;  %v13984_v15 = vld [vmem:[%s14941_s25 + $0x2d4] sm:$0xf]  ;;  %v13987_v16 = vld [vmem:[%s14941_s25 + $0x2d8] sm:$0xf] }
 0x57d   :  { %15107 = vst [vmem:[#allocation235_spill] sm:$0xff] %v13984_v15  ;;  %15108 = vst [vmem:[#allocation236_spill] sm:$0xff] %v13987_v16  ;;  %v13990_v18 = vld [vmem:[%s14941_s25 + $0x2dc] sm:$0xf]  ;;  %v13993_v33 = vld [vmem:[%s14941_s25 + $0x2e0] sm:$0xf] }
 0x57e   :  { %15109 = vst [vmem:[#allocation237_spill] sm:$0xff] %v13990_v18  ;;  %15110 = vst [vmem:[#allocation238_spill] sm:$0xff] %v13993_v33  ;;  %v13996_v34 = vld [vmem:[%s14941_s25 + $0x2e4] sm:$0xf]  ;;  %v13999_v9 = vld [vmem:[%s14941_s25 + $0x2e8] sm:$0xf] }
 0x57f   :  { %15111 = vst [vmem:[#allocation239_spill] sm:$0xff] %v13996_v34  ;;  %15112 = vst [vmem:[#allocation240_spill] sm:$0xff] %v13999_v9  ;;  %v14002_v25 = vld [vmem:[%s14941_s25 + $0x2ec] sm:$0xf]  ;;  %v14005_v26 = vld [vmem:[%s14941_s25 + $0x2f0] sm:$0xf] }
 0x580   :  { %15113 = vst [vmem:[#allocation241_spill] sm:$0xff] %v14002_v25  ;;  %15114 = vst [vmem:[#allocation242_spill] sm:$0xff] %v14005_v26  ;;  %v14008_v31 = vld [vmem:[%s14941_s25 + $0x2f4] sm:$0xf]  ;;  %v14011_v32 = vld [vmem:[%s14941_s25 + $0x2f8] sm:$0xf] }
 0x581   :  { %15115 = vst [vmem:[#allocation243_spill] sm:$0xff] %v14008_v31  ;;  %15116 = vst [vmem:[#allocation244_spill] sm:$0xff] %v14011_v32  ;;  %v14014_v17 = vld [vmem:[%s14941_s25 + $0x2fc] sm:$0xf]  ;;  %v11919_v15 = vld [vmem:[#allocation13] sm:$0xff]   ;;  %v15118_v16 = vmov 0  }
 0x582   :  { %15117 = vst [vmem:[#allocation245_spill] sm:$0xff] %v14014_v17  ;;  %10256 = vmatmul.mubr.msk.bf16.vlgmr.msra.gmra.mrb[8].mxu1 %vm4072_vm9, %v11919_v15  ;;  %v11920_v9 = vld [vmem:[#allocation13 + $0x8] sm:$0xff]   ;;  %v3869_v33 = vld [vmem:[#allocation2 + $0x18] sm:$0xff]  ;;  %v3868_v26 = vld [vmem:[#allocation2 + $0x10] sm:$0xff] }
 0x583   :  { %4121 = vmatprep.mubr.bf16.mxu1 %v15118_v16  ;;  %4158 = vmatpush1.bf16.msra.mxu1 %v13426_v55  ;;  %v3873_v31 = vld [vmem:[#allocation2 + $0x38] sm:$0xff]  ;;  %v3872_v32 = vld [vmem:[#allocation2 + $0x30] sm:$0xff]  ;;  %v3871_v10 = vld [vmem:[#allocation2 + $0x28] sm:$0xff] }
 0x584   :  { %4159 = vmatprep.subr.bf16.mxu1 %v13432_v7  ;;  %4451 = vmatprep.subr.bf16.mxu0 %v3869_v33  ;;  %v3877_v15 = vld [vmem:[#allocation2 + $0x58] sm:$0xff]  ;;  %v3876_v17 = vld [vmem:[#allocation2 + $0x50] sm:$0xff]  ;;  %v3938_v22 = vld [vmem:[#allocation2 + $0x240] sm:$0xff] }
 0x585   :  { %4452 = vmatpush1.bf16.msra.mxu0 %v3868_v26  ;;  %v11921_v25 = vld [vmem:[#allocation13 + $0x10] sm:$0xff]   ;;  %v3881_v34 = vld [vmem:[#allocation2 + $0x78] sm:$0xff]  ;;  %v3955_v37 = vld [vmem:[#allocation2 + $0x2c8] sm:$0xff] }
 0x586   :  { %4453 = vmatprep.subr.bf16.mxu0 %v3873_v31  ;;  %v3880_v33 = vld [vmem:[#allocation2 + $0x70] sm:$0xff]  ;;  %v3885_v18 = vld [vmem:[#allocation2 + $0x98] sm:$0xff]  ;;  %v3979_v29 = vld [vmem:[#allocation2 + $0x388] sm:$0xff] }
 0x587   :  { %4160 = vmatpush1.bf16.msra.mxu1 %v13430_v5  ;;  %v3884_v26 = vld [vmem:[#allocation2 + $0x90] sm:$0xff]  ;;  %v11922_v31 = vld [vmem:[#allocation13 + $0x18] sm:$0xff]  }
 0x588   :  { %4235 = vmatprep.subr.bf16.mxu1 %v13428_v57  ;;  %v3896_v38 = vld [vmem:[#allocation2 + $0xf0] sm:$0xff]  ;;  %v3965_v12 = vld [vmem:[#allocation2 + $0x318] sm:$0xff] }
 0x589   :  { %4454 = vmatpush1.bf16.msra.mxu0 %v3872_v32  ;;  %v3889_v32 = vld [vmem:[#allocation2 + $0xb8] sm:$0xff]  ;;  %v3904_v36 = vld [vmem:[#allocation2 + $0x130] sm:$0xff] }
 0x58a   :  { %10257 = vmatmul.mubr.msk.bf16.gmra.mrb[12].mxu1 %vm4072_vm9, %v11920_v9  ;;  %4455 = vmatprep.subr.bf16.mxu0 %v3877_v15  ;;  %v3867_v9 = vld [vmem:[#allocation2 + $0x8] sm:$0xff]  ;;  %v11923_v15 = vld [vmem:[#allocation13 + $0x20] sm:$0xff]   ;;  %v3932_v28 = vld [vmem:[#allocation2 + $0x210] sm:$0xff] }
 0x58b   :  { %4189 = vmatprep.mubr.bf16.mxu1 %v15118_v16  ;;  %v3960_v11 = vld [vmem:[#allocation2 + $0x2f0] sm:$0xff]  ;;  %v3973_v21 = vld [vmem:[#allocation2 + $0x358] sm:$0xff] }
 0x58c   :  { %v3968_v35 = vld [vmem:[#allocation2 + $0x330] sm:$0xff] }
 0x58d   :  { %4456 = vmatpush1.bf16.msra.mxu0 %v3876_v17  ;;  %v3888_v17 = vld [vmem:[#allocation2 + $0xb0] sm:$0xff] }
 0x58e   :  { %4457 = vmatprep.subr.bf16.mxu0 %v3881_v34  ;;  %v3892_v34 = vld [vmem:[#allocation2 + $0xd0] sm:$0xff] }
 0x591   :  { %4458 = vmatpush1.bf16.msra.mxu0 %v3880_v33  ;;  %v3897_v33 = vld [vmem:[#allocation2 + $0xf8] sm:$0xff] }
 0x592   :  { %10260 = vmatmul.mubr.msk.bf16.vlgmr.msra.gmra.mrb[16].mxu1 %vm4072_vm9, %v11921_v25  ;;  %4459 = vmatprep.subr.bf16.mxu0 %v3885_v18  ;;  %v3893_v25 = vld [vmem:[#allocation2 + $0xd8] sm:$0xff]  ;;  %v3866_v18 = vld [vmem:[#allocation2] sm:$0xff] }
 0x593   :  { %4199 = vmatprep.mubr.bf16.mxu1 %v15118_v16  ;;  %4236 = vmatpush1.bf16.msra.mxu1 %v13426_v55 }
 0x594   :  { %4237 = vmatprep.subr.bf16.mxu1 %v13432_v7 }
 0x595   :  { %4460 = vmatpush1.bf16.msra.mxu0 %v3884_v26  ;;  %v3870_v26 = vld [vmem:[#allocation2 + $0x20] sm:$0xff] }
 0x596   :  { %4461 = vmatprep.subr.bf16.mxu0 %v3889_v32  ;;  %v3900_v32 = vld [vmem:[#allocation2 + $0x110] sm:$0xff] }
 0x597   :  { %4238 = vmatpush1.bf16.msra.mxu1 %v13430_v5 }
 0x598   :  { %4292 = vmatprep.subr.bf16.mxu1 %v3867_v9  ;;  %v3901_v9 = vld [vmem:[#allocation2 + $0x118] sm:$0xff] }
 0x599   :  { %4462 = vmatpush1.bf16.msra.mxu0 %v3888_v17  ;;  %v11924_v17 = vld [vmem:[#allocation13 + $0x28] sm:$0xff]  }
 0x59a   :  { %10261 = vmatmul.mubr.msk.bf16.gmra.mrb[20].mxu1 %vm4072_vm9, %v11922_v31  ;;  %4463 = vmatprep.subr.bf16.mxu0 %v3893_v25  ;;  %v3875_v31 = vld [vmem:[#allocation2 + $0x48] sm:$0xff]  ;;  %v3905_v25 = vld [vmem:[#allocation2 + $0x138] sm:$0xff] }
 0x59b   :  { %4267 = vmatprep.mubr.bf16.mxu1 %v15118_v16 }
 0x59d   :  { %4464 = vmatpush1.bf16.msra.mxu0 %v3892_v34  ;;  %v3874_v34 = vld [vmem:[#allocation2 + $0x40] sm:$0xff] }
 0x59e   :  { %4465 = vmatprep.subr.bf16.mxu0 %v3897_v33  ;;  %v3879_v33 = vld [vmem:[#allocation2 + $0x68] sm:$0xff] }
 0x5a1   :  { %4466 = vmatpush1.bf16.msra.mxu0 %v3896_v38  ;;  %v3883_v38 = vld [vmem:[#allocation2 + $0x88] sm:$0xff] }
 0x5a2   :  { %10264 = vmatmul.mubr.msk.bf16.vlgmr.msra.gmra.mrb[24].mxu1 %vm4072_vm9, %v11923_v15  ;;  %4467 = vmatprep.subr.bf16.mxu0 %v3901_v9  ;;  %v3909_v15 = vld [vmem:[#allocation2 + $0x158] sm:$0xff] }
 0x5a3   :  { %4277 = vmatprep.mubr.bf16.mxu1 %v15118_v16  ;;  %4293 = vmatpush1.bf16.msra.mxu1 %v3866_v18  ;;  %v3908_v18 = vld [vmem:[#allocation2 + $0x150] sm:$0xff]  ;;  %v3913_v9 = vld [vmem:[#allocation2 + $0x178] sm:$0xff] }
 0x5a4   :  { %4294 = vmatprep.subr.bf16.mxu1 %v3871_v10  ;;  %v3878_v10 = vld [vmem:[#allocation2 + $0x60] sm:$0xff] }
 0x5a5   :  { %4468 = vmatpush1.bf16.msra.mxu0 %v3900_v32  ;;  %v3912_v32 = vld [vmem:[#allocation2 + $0x170] sm:$0xff] }
 0x5a6   :  { %4469 = vmatprep.subr.bf16.mxu0 %v3905_v25  ;;  %v3917_v25 = vld [vmem:[#allocation2 + $0x198] sm:$0xff] }
 0x5a7   :  { %4295 = vmatpush1.bf16.msra.mxu1 %v3870_v26  ;;  %v3882_v26 = vld [vmem:[#allocation2 + $0x80] sm:$0xff] }
 0x5a8   :  { %4296 = vmatprep.subr.bf16.mxu1 %v3875_v31  ;;  %v3887_v31 = vld [vmem:[#allocation2 + $0xa8] sm:$0xff] }
 0x5a9   :  { %4470 = vmatpush1.bf16.msra.mxu0 %v3904_v36  ;;  %v3921_v36 = vld [vmem:[#allocation2 + $0x1b8] sm:$0xff] }
 0x5aa   :  { %10265 = vmatmul.mubr.msk.bf16.gmra.mrb[28].mxu1 %vm4072_vm9, %v11924_v17  ;;  %4471 = vmatprep.subr.bf16.mxu0 %v3909_v15  ;;  %v3886_v17 = vld [vmem:[#allocation2 + $0xa0] sm:$0xff] }
 0x5ab   :  { %4297 = vmatpush1.bf16.msra.mxu1 %v3874_v34  ;;  %v3891_v34 = vld [vmem:[#allocation2 + $0xc8] sm:$0xff]  ;;  %v3890_v15 = vld [vmem:[#allocation2 + $0xc0] sm:$0xff] }
 0x5ac   :  { %4298 = vmatprep.subr.bf16.mxu1 %v3879_v33  ;;  %v3916_v33 = vld [vmem:[#allocation2 + $0x190] sm:$0xff] }
 0x5ad   :  { %4472 = vmatpush1.bf16.msra.mxu0 %v3908_v18  ;;  %v3925_v18 = vld [vmem:[#allocation2 + $0x1d8] sm:$0xff] }
 0x5ae   :  { %4473 = vmatprep.subr.bf16.mxu0 %v3913_v9  ;;  %v3894_v9 = vld [vmem:[#allocation2 + $0xe0] sm:$0xff] }
 0x5af   :  { %4299 = vmatpush1.bf16.msra.mxu1 %v3878_v10  ;;  %v3895_v10 = vld [vmem:[#allocation2 + $0xe8] sm:$0xff] }
 0x5b0   :  { %4300 = vmatprep.subr.bf16.mxu1 %v3883_v38  ;;  %v3920_v38 = vld [vmem:[#allocation2 + $0x1b0] sm:$0xff] }
 0x5b1   :  { %4474 = vmatpush1.bf16.msra.mxu0 %v3912_v32  ;;  %v3898_v32 = vld [vmem:[#allocation2 + $0x100] sm:$0xff] }
 0x5b2   :  { %4475 = vmatprep.subr.bf16.mxu0 %v3917_v25  ;;  %v3903_v25 = vld [vmem:[#allocation2 + $0x128] sm:$0xff] }
 0x5b3   :  { %4301 = vmatpush1.bf16.msra.mxu1 %v3882_v26  ;;  %v3899_v26 = vld [vmem:[#allocation2 + $0x108] sm:$0xff] }
 0x5b4   :  { %4302 = vmatprep.subr.bf16.mxu1 %v3887_v31  ;;  %v3924_v31 = vld [vmem:[#allocation2 + $0x1d0] sm:$0xff] }
 0x5b5   :  { %4476 = vmatpush1.bf16.msra.mxu0 %v3916_v33  ;;  %v3906_v33 = vld [vmem:[#allocation2 + $0x140] sm:$0xff] }
 0x5b6   :  { %4477 = vmatprep.subr.bf16.mxu0 %v3921_v36  ;;  %v3911_v36 = vld [vmem:[#allocation2 + $0x168] sm:$0xff] }
 0x5b7   :  { %4303 = vmatpush1.bf16.msra.mxu1 %v3886_v17  ;;  %v3902_v17 = vld [vmem:[#allocation2 + $0x120] sm:$0xff] }
 0x5b8   :  { %4304 = vmatprep.subr.bf16.mxu1 %v3891_v34  ;;  %v3907_v34 = vld [vmem:[#allocation2 + $0x148] sm:$0xff] }
 0x5b9   :  { %4478 = vmatpush1.bf16.msra.mxu0 %v3920_v38  ;;  %v3914_v38 = vld [vmem:[#allocation2 + $0x180] sm:$0xff] }
 0x5ba   :  { %4479 = vmatprep.subr.bf16.mxu0 %v3925_v18  ;;  %v3919_v18 = vld [vmem:[#allocation2 + $0x1a8] sm:$0xff] }
 0x5bb   :  { %4305 = vmatpush1.bf16.msra.mxu1 %v3890_v15  ;;  %v3910_v15 = vld [vmem:[#allocation2 + $0x160] sm:$0xff] }
 0x5bc   :  { %4306 = vmatprep.subr.bf16.mxu1 %v3895_v10  ;;  %v3915_v10 = vld [vmem:[#allocation2 + $0x188] sm:$0xff] }
 0x5bd   :  { %4480 = vmatpush1.bf16.msra.mxu0 %v3924_v31  ;;  %v3929_v31 = vld [vmem:[#allocation2 + $0x1f8] sm:$0xff] }
 0x5be   :  { %4481 = vmatprep.subr.bf16.mxu0 %v3929_v31  ;;  %v3930_v31 = vld [vmem:[#allocation2 + $0x200] sm:$0xff] }
 0x5bf   :  { %4307 = vmatpush1.bf16.msra.mxu1 %v3894_v9  ;;  %v3918_v9 = vld [vmem:[#allocation2 + $0x1a0] sm:$0xff] }
 0x5c0   :  { %4308 = vmatprep.subr.bf16.mxu1 %v3899_v26  ;;  %v3923_v26 = vld [vmem:[#allocation2 + $0x1c8] sm:$0xff] }
 0x5c3   :  { %4309 = vmatpush1.bf16.msra.mxu1 %v3898_v32  ;;  %v3928_v32 = vld [vmem:[#allocation2 + $0x1f0] sm:$0xff] }
 0x5c4   :  { %4310 = vmatprep.subr.bf16.mxu1 %v3903_v25  ;;  %v3922_v25 = vld [vmem:[#allocation2 + $0x1c0] sm:$0xff]  ;;  %4482 = vmatpush1.bf16.msra.mxu0 %v3928_v32  ;;  %v3937_v32 = vld [vmem:[#allocation2 + $0x238] sm:$0xff] }
 0x5c7   :  { %4311 = vmatpush1.bf16.msra.mxu1 %v3902_v17  ;;  %v3927_v17 = vld [vmem:[#allocation2 + $0x1e8] sm:$0xff] }
 0x5c8   :  { %4312 = vmatprep.subr.bf16.mxu1 %v3907_v34  ;;  %v3933_v34 = vld [vmem:[#allocation2 + $0x218] sm:$0xff] }
 0x5c9   :  { %4504 = vmatprep.subr.bf16.mxu0 %v3933_v34  ;;  %v3936_v34 = vld [vmem:[#allocation2 + $0x230] sm:$0xff] }
 0x5cb   :  { %4313 = vmatpush1.bf16.msra.mxu1 %v3906_v33  ;;  %v3926_v33 = vld [vmem:[#allocation2 + $0x1e0] sm:$0xff] }
 0x5cc   :  { %4314 = vmatprep.subr.bf16.mxu1 %v3911_v36  ;;  %v3931_v36 = vld [vmem:[#allocation2 + $0x208] sm:$0xff] }
 0x5cf   :  { %4315 = vmatpush1.bf16.msra.mxu1 %v3910_v15 }
 0x5d0   :  { %4316 = vmatprep.subr.bf16.mxu1 %v3915_v10 }
 0x5d3   :  { %4317 = vmatpush1.bf16.msra.mxu1 %v3914_v38 }
 0x5d4   :  { %4318 = vmatprep.subr.bf16.mxu1 %v3919_v18 }
 0x5d7   :  { %4319 = vmatpush1.bf16.msra.mxu1 %v3918_v9 }
 0x5d8   :  { %4320 = vmatprep.subr.bf16.mxu1 %v3923_v26  ;;  %v3935_v26 = vld [vmem:[#allocation2 + $0x228] sm:$0xff] }
 0x5db   :  { %4321 = vmatpush1.bf16.msra.mxu1 %v3922_v25 }
 0x5dc   :  { %4322 = vmatprep.subr.bf16.mxu1 %v3927_v17  ;;  %v3934_v17 = vld [vmem:[#allocation2 + $0x220] sm:$0xff] }
 0x5df   :  { %4323 = vmatpush1.bf16.msra.mxu1 %v3926_v33 }
 0x5e0   :  { %4345 = vmatprep.subr.bf16.mxu1 %v3931_v36  ;;  %v3939_v36 = vld [vmem:[#allocation2 + $0x248] sm:$0xff] }
 0x655   :  { %v4113_v15 = vpop.f32.mrb[8].mxu1 }
 0x656   :  { %v4115_v10 = vpop.f32.mrb[9].mxu1 }
 0x657   :  { %v4117_v38 = vpop.f32.mrb[10].mxu1 }
 0x658   :  { %v4132_v18 = vpack.c.bf16 %v4117_v38, %v4113_v15  ;;  %v4119_v27 = vpop.f32.mrb[11].mxu1  ;;  %v3941_v15 = vld [vmem:[#allocation2 + $0x258] sm:$0xff] }
 0x659   :  { %v4133_v9 = vpack.c.bf16 %v4119_v27, %v4115_v10 }
 0x65b   :  { %4324 = vmatprep.mubr.bf16.mxu1 %v4133_v9  ;;  %4483 = vmatprep.mubr.bf16.mxu0 %v4133_v9 }
 0x65c   :  { %4325 = vmatmul.mubr.bf16.vlgmr.msra.gmra.mrb[32].mxu1 %v4132_v18  ;;  %4484 = vmatmul.mubr.bf16.vlgmr.msra.gmra.mrb[16].mxu0 %v4132_v18  ;;  %v3940_v18 = vld [vmem:[#allocation2 + $0x250] sm:$0xff] }
 0x65d   :  { %4346 = vmatpush1.bf16.msra.mxu1 %v3930_v31  ;;  %4505 = vmatpush1.bf16.msra.mxu0 %v3932_v28  ;;  %v4123_v25 = vpop.f32.mrb[12].mxu1  ;;  %v3943_v31 = vld [vmem:[#allocation2 + $0x268] sm:$0xff]  ;;  %v3945_v28 = vld [vmem:[#allocation2 + $0x278] sm:$0xff] }
 0x65e   :  { %4347 = vmatprep.subr.bf16.mxu1 %v3935_v26  ;;  %4506 = vmatprep.subr.bf16.mxu0 %v3937_v32  ;;  %v4125_v33 = vpop.f32.mrb[13].mxu1  ;;  %v3942_v32 = vld [vmem:[#allocation2 + $0x260] sm:$0xff] }
 0x65f   :  { %v4127_v38 = vpop.f32.mrb[14].mxu1 }
 0x660   :  { %v4134_v27 = vpack.c.bf16 %v4127_v38, %v4123_v25  ;;  %v4129_v10 = vpop.f32.mrb[15].mxu1  ;;  %v3944_v25 = vld [vmem:[#allocation2 + $0x270] sm:$0xff] }
 0x661   :  { %4348 = vmatpush1.bf16.msra.mxu1 %v3934_v17  ;;  %4507 = vmatpush1.bf16.msra.mxu0 %v3936_v34  ;;  %v4135_v9 = vpack.c.bf16 %v4129_v10, %v4125_v33  ;;  %v3947_v34 = vld [vmem:[#allocation2 + $0x288] sm:$0xff]  ;;  %v3949_v33 = vld [vmem:[#allocation2 + $0x298] sm:$0xff] }
 0x662   :  { %4349 = vmatprep.subr.bf16.mxu1 %v3939_v36  ;;  %4508 = vmatprep.subr.bf16.mxu0 %v3941_v15 }
 0x663   :  { %4334 = vmatprep.mubr.bf16.mxu1 %v4135_v9  ;;  %4493 = vmatprep.mubr.bf16.mxu0 %v4135_v9  ;;  %v3951_v9 = vld [vmem:[#allocation2 + $0x2a8] sm:$0xff] }
 0x664   :  { %4335 = vmatmul.mubr.bf16.gmra.mrb[36].mxu1 %v4134_v27  ;;  %4494 = vmatmul.mubr.bf16.gmra.mrb[20].mxu0 %v4134_v27  ;;  %v3946_v27 = vld [vmem:[#allocation2 + $0x280] sm:$0xff] }
 0x665   :  { %4350 = vmatpush1.bf16.msra.mxu1 %v3938_v22  ;;  %4509 = vmatpush1.bf16.msra.mxu0 %v3940_v18  ;;  %v4191_v26 = vpop.f32.mrb[16].mxu1  ;;  %v3948_v22 = vld [vmem:[#allocation2 + $0x290] sm:$0xff]  ;;  %v3953_v18 = vld [vmem:[#allocation2 + $0x2b8] sm:$0xff] }
 0x666   :  { %4351 = vmatprep.subr.bf16.mxu1 %v3943_v31  ;;  %4510 = vmatprep.subr.bf16.mxu0 %v3945_v28  ;;  %v4193_v17 = vpop.f32.mrb[17].mxu1  ;;  %v3950_v28 = vld [vmem:[#allocation2 + $0x2a0] sm:$0xff] }
 0x667   :  { %v4195_v36 = vpop.f32.mrb[18].mxu1 }
 0x668   :  { %v14034_v15 = vpack.c.bf16 %v4195_v36, %v4191_v26  ;;  %v4197_v38 = vpop.f32.mrb[19].mxu1  ;;  %v3952_v26 = vld [vmem:[#allocation2 + $0x2b0] sm:$0xff] }
 0x669   :  { %4352 = vmatpush1.bf16.msra.mxu1 %v3942_v32  ;;  %4511 = vmatpush1.bf16.msra.mxu0 %v3944_v25  ;;  %v4211_v10 = vpack.c.bf16 %v4197_v38, %v4193_v17  ;;  %v3957_v32 = vld [vmem:[#allocation2 + $0x2d8] sm:$0xff]  ;;  %v3954_v38 = vld [vmem:[#allocation2 + $0x2c0] sm:$0xff] }
 0x66a   :  { %4353 = vmatprep.subr.bf16.mxu1 %v3947_v34  ;;  %4512 = vmatprep.subr.bf16.mxu0 %v3949_v33 }
 0x66b   :  { %4377 = vmatprep.mubr.bf16.mxu1 %v4211_v10  ;;  %4536 = vmatprep.mubr.bf16.mxu0 %v4211_v10  ;;  %v3956_v10 = vld [vmem:[#allocation2 + $0x2d0] sm:$0xff] }
 0x66d   :  { %4354 = vmatpush1.bf16.msra.mxu1 %v3946_v27  ;;  %4513 = vmatpush1.bf16.msra.mxu0 %v3948_v22  ;;  %v4201_v31 = vpop.f32.mrb[20].mxu1  ;;  %v3959_v27 = vld [vmem:[#allocation2 + $0x2e8] sm:$0xff]  ;;  %v3961_v22 = vld [vmem:[#allocation2 + $0x2f8] sm:$0xff] }
 0x66e   :  { %4355 = vmatprep.subr.bf16.mxu1 %v3951_v9  ;;  %4514 = vmatprep.subr.bf16.mxu0 %v3953_v18  ;;  %v4203_v36 = vpop.f32.mrb[21].mxu1  ;;  %v3958_v18 = vld [vmem:[#allocation2 + $0x2e0] sm:$0xff] }
 0x66f   :  { %v4205_v25 = vpop.f32.mrb[22].mxu1 }
 0x670   :  { %v14036_v17 = vpack.c.bf16 %v4205_v25, %v4201_v31  ;;  %v4207_v34 = vpop.f32.mrb[23].mxu1  ;;  %v3963_v25 = vld [vmem:[#allocation2 + $0x308] sm:$0xff] }
 0x671   :  { %4356 = vmatpush1.bf16.msra.mxu1 %v3950_v28  ;;  %4515 = vmatpush1.bf16.msra.mxu0 %v3952_v26  ;;  %v14038_v33 = vpack.c.bf16 %v4207_v34, %v4203_v36  ;;  %v3964_v34 = vld [vmem:[#allocation2 + $0x310] sm:$0xff] }
 0x672   :  { %4357 = vmatprep.subr.bf16.mxu1 %v3955_v37  ;;  %4516 = vmatprep.subr.bf16.mxu0 %v3957_v32  ;;  %v3962_v32 = vld [vmem:[#allocation2 + $0x300] sm:$0xff] }
 0x675   :  { %4358 = vmatpush1.bf16.msra.mxu1 %v3954_v38  ;;  %4517 = vmatpush1.bf16.msra.mxu0 %v3956_v10  ;;  %v4269_v9 = vpop.f32.mrb[24].mxu1  ;;  %v3967_v38 = vld [vmem:[#allocation2 + $0x328] sm:$0xff]  ;;  %v3969_v10 = vld [vmem:[#allocation2 + $0x338] sm:$0xff] }
 0x676   :  { %4359 = vmatprep.subr.bf16.mxu1 %v3959_v27  ;;  %4518 = vmatprep.subr.bf16.mxu0 %v3961_v22  ;;  %v4271_v31 = vpop.f32.mrb[25].mxu1  ;;  %v3966_v22 = vld [vmem:[#allocation2 + $0x320] sm:$0xff] }
 0x677   :  { %v4273_v28 = vpop.f32.mrb[26].mxu1 }
 0x678   :  { %v14040_v26 = vpack.c.bf16 %v4273_v28, %v4269_v9  ;;  %v4275_v36 = vpop.f32.mrb[27].mxu1  ;;  %v3971_v28 = vld [vmem:[#allocation2 + $0x348] sm:$0xff] }
 0x679   :  { %4360 = vmatpush1.bf16.msra.mxu1 %v3958_v18  ;;  %4519 = vmatpush1.bf16.msra.mxu0 %v3960_v11  ;;  %v14042_v37 = vpack.c.bf16 %v4275_v36, %v4271_v31  ;;  %v3972_v36 = vld [vmem:[#allocation2 + $0x350] sm:$0xff] }
 0x67a   :  { %4361 = vmatprep.subr.bf16.mxu1 %v3963_v25  ;;  %4520 = vmatprep.subr.bf16.mxu0 %v3965_v12  ;;  %v3970_v25 = vld [vmem:[#allocation2 + $0x340] sm:$0xff] }
 0x67d   :  { %4362 = vmatpush1.bf16.msra.mxu1 %v3962_v32  ;;  %4521 = vmatpush1.bf16.msra.mxu0 %v3964_v34  ;;  %v4279_v27 = vpop.f32.mrb[28].mxu1  ;;  %v3975_v32 = vld [vmem:[#allocation2 + $0x368] sm:$0xff]  ;;  %v3977_v34 = vld [vmem:[#allocation2 + $0x378] sm:$0xff] }
 0x67e   :  { %4363 = vmatprep.subr.bf16.mxu1 %v3967_v38  ;;  %4522 = vmatprep.subr.bf16.mxu0 %v3969_v10  ;;  %v4281_v9 = vpop.f32.mrb[29].mxu1  ;;  %v3974_v38 = vld [vmem:[#allocation2 + $0x360] sm:$0xff]  ;;  %v3976_v10 = vld [vmem:[#allocation2 + $0x370] sm:$0xff] }
 0x67f   :  { %v4283_v18 = vpop.f32.mrb[30].mxu1 }
 0x680   :  { %v14044_v11 = vpack.c.bf16 %v4283_v18, %v4279_v27  ;;  %v4285_v31 = vpop.f32.mrb[31].mxu1  ;;  %v3981_v27 = vld [vmem:[#allocation2 + $0x398] sm:$0xff]  ;;  %v3984_v18 = vld [vmem:[#allocation2 + $0x3b0] sm:$0xff] }
 0x681   :  { %4364 = vmatpush1.bf16.msra.mxu1 %v3966_v22  ;;  %4523 = vmatpush1.bf16.msra.mxu0 %v3968_v35  ;;  %v14046_v12 = vpack.c.bf16 %v4285_v31, %v4281_v9  ;;  %v3978_v35 = vld [vmem:[#allocation2 + $0x380] sm:$0xff]  ;;  %v3980_v22 = vld [vmem:[#allocation2 + $0x390] sm:$0xff]  ;;  %v3983_v9 = vld [vmem:[#allocation2 + $0x3a8] sm:$0xff] }
 0x682   :  { %4365 = vmatprep.subr.bf16.mxu1 %v3971_v28  ;;  %4524 = vmatprep.subr.bf16.mxu0 %v3973_v21  ;;  %v3985_v21 = vld [vmem:[#allocation2 + $0x3b8] sm:$0xff]  ;;  %v3982_v28 = vld [vmem:[#allocation2 + $0x3a0] sm:$0xff]  ;;  %v3987_v31 = vld [vmem:[#allocation2 + $0x3c8] sm:$0xff] }
 0x685   :  { %4366 = vmatpush1.bf16.msra.mxu1 %v3970_v25  ;;  %4525 = vmatpush1.bf16.msra.mxu0 %v3972_v36  ;;  %v3989_v25 = vld [vmem:[#allocation2 + $0x3d8] sm:$0xff]  ;;  %v3986_v36 = vld [vmem:[#allocation2 + $0x3c0] sm:$0xff] }
 0x686   :  { %4367 = vmatprep.subr.bf16.mxu1 %v3975_v32  ;;  %4526 = vmatprep.subr.bf16.mxu0 %v3977_v34  ;;  %v3988_v32 = vld [vmem:[#allocation2 + $0x3d0] sm:$0xff]  ;;  %v3993_v34 = vld [vmem:[#allocation2 + $0x3f8] sm:$0xff] }
 0x689   :  { %4368 = vmatpush1.bf16.msra.mxu1 %v3974_v38  ;;  %4527 = vmatpush1.bf16.msra.mxu0 %v3976_v10  ;;  %v3990_v38 = vld [vmem:[#allocation2 + $0x3e0] sm:$0xff]  ;;  %v3992_v10 = vld [vmem:[#allocation2 + $0x3f0] sm:$0xff] }
 0x68a   :  { %4369 = vmatprep.subr.bf16.mxu1 %v3979_v29  ;;  %4528 = vmatprep.subr.bf16.mxu0 %v3981_v27  ;;  %v3991_v29 = vld [vmem:[#allocation2 + $0x3e8] sm:$0xff] }
 0x68b   :  { %v3995_v27 = vld [vmem:[#allocation2 + $0x408] sm:$0xff] }
 0x68d   :  { %4370 = vmatpush1.bf16.msra.mxu1 %v3978_v35  ;;  %4529 = vmatpush1.bf16.msra.mxu0 %v3980_v22  ;;  %v3997_v35 = vld [vmem:[#allocation2 + $0x418] sm:$0xff]  ;;  %v3994_v22 = vld [vmem:[#allocation2 + $0x400] sm:$0xff] }
 0x68e   :  { %4371 = vmatprep.subr.bf16.mxu1 %v3983_v9  ;;  %4530 = vmatprep.subr.bf16.mxu0 %v3985_v21  ;;  %v3996_v9 = vld [vmem:[#allocation2 + $0x410] sm:$0xff]  ;;  %v3999_v21 = vld [vmem:[#allocation2 + $0x428] sm:$0xff] }
 0x691   :  { %4372 = vmatpush1.bf16.msra.mxu1 %v3982_v28  ;;  %4531 = vmatpush1.bf16.msra.mxu0 %v3984_v18  ;;  %v4001_v28 = vld [vmem:[#allocation2 + $0x438] sm:$0xff]  ;;  %v3998_v18 = vld [vmem:[#allocation2 + $0x420] sm:$0xff] }
 0x692   :  { %4373 = vmatprep.subr.bf16.mxu1 %v3987_v31  ;;  %4532 = vmatprep.subr.bf16.mxu0 %v3989_v25  ;;  %v4000_v31 = vld [vmem:[#allocation2 + $0x430] sm:$0xff]  ;;  %v4003_v25 = vld [vmem:[#allocation2 + $0x448] sm:$0xff] }
 0x695   :  { %4374 = vmatpush1.bf16.msra.mxu1 %v3986_v36  ;;  %4533 = vmatpush1.bf16.msra.mxu0 %v3988_v32  ;;  %v4005_v36 = vld [vmem:[#allocation2 + $0x458] sm:$0xff]  ;;  %v4002_v32 = vld [vmem:[#allocation2 + $0x440] sm:$0xff] }
 0x696   :  { %4375 = vmatprep.subr.bf16.mxu1 %v3991_v29  ;;  %4534 = vmatprep.subr.bf16.mxu0 %v3993_v34  ;;  %v4004_v29 = vld [vmem:[#allocation2 + $0x450] sm:$0xff]  ;;  %v4007_v34 = vld [vmem:[#allocation2 + $0x468] sm:$0xff] }
 0x699   :  { %4376 = vmatpush1.bf16.msra.mxu1 %v3990_v38  ;;  %4535 = vmatpush1.bf16.msra.mxu0 %v3992_v10  ;;  %v4006_v38 = vld [vmem:[#allocation2 + $0x460] sm:$0xff]  ;;  %v4008_v10 = vld [vmem:[#allocation2 + $0x470] sm:$0xff] }
 0x69a   :  { %4398 = vmatprep.subr.bf16.mxu1 %v3995_v27  ;;  %4557 = vmatprep.subr.bf16.mxu0 %v3997_v35  ;;  %v4011_v27 = vld [vmem:[#allocation2 + $0x488] sm:$0xff]  ;;  %v4010_v35 = vld [vmem:[#allocation2 + $0x480] sm:$0xff] }
 0x69c   :  { %4378 = vmatmul.mubr.bf16.vlgmr.msra.gmra.mrb[32].mxu1 %v14034_v15  ;;  %4537 = vmatmul.mubr.bf16.vlgmr.msra.gmra.mrb[16].mxu0 %v14034_v15  ;;  %v4009_v15 = vld [vmem:[#allocation2 + $0x478] sm:$0xff] }
 0x69d   :  { %4399 = vmatpush1.bf16.msra.mxu1 %v3994_v22  ;;  %4558 = vmatpush1.bf16.msra.mxu0 %v3996_v9  ;;  %v4012_v22 = vld [vmem:[#allocation2 + $0x490] sm:$0xff]  ;;  %v4015_v9 = vld [vmem:[#allocation2 + $0x4a8] sm:$0xff] }
 0x69e   :  { %4400 = vmatprep.subr.bf16.mxu1 %v3999_v21  ;;  %4559 = vmatprep.subr.bf16.mxu0 %v4001_v28  ;;  %v4014_v21 = vld [vmem:[#allocation2 + $0x4a0] sm:$0xff]  ;;  %v4016_v28 = vld [vmem:[#allocation2 + $0x4b0] sm:$0xff] }
 0x69f   :  { %4387 = vmatprep.mubr.bf16.mxu1 %v14038_v33  ;;  %4546 = vmatprep.mubr.bf16.mxu0 %v14038_v33  ;;  %v4013_v33 = vld [vmem:[#allocation2 + $0x498] sm:$0xff] }
 0x6a1   :  { %4401 = vmatpush1.bf16.msra.mxu1 %v3998_v18  ;;  %4560 = vmatpush1.bf16.msra.mxu0 %v4000_v31  ;;  %v4019_v18 = vld [vmem:[#allocation2 + $0x4c8] sm:$0xff]  ;;  %v4021_v31 = vld [vmem:[#allocation2 + $0x4d8] sm:$0xff] }
 0x6a2   :  { %4402 = vmatprep.subr.bf16.mxu1 %v4003_v25  ;;  %4561 = vmatprep.subr.bf16.mxu0 %v4005_v36  ;;  %v4020_v25 = vld [vmem:[#allocation2 + $0x4d0] sm:$0xff]  ;;  %v4023_v36 = vld [vmem:[#allocation2 + $0x4e8] sm:$0xff] }
 0x6a4   :  { %4388 = vmatmul.mubr.bf16.gmra.mrb[36].mxu1 %v14036_v17  ;;  %4547 = vmatmul.mubr.bf16.gmra.mrb[20].mxu0 %v14036_v17  ;;  %v4017_v17 = vld [vmem:[#allocation2 + $0x4b8] sm:$0xff] }
 0x6a5   :  { %4403 = vmatpush1.bf16.msra.mxu1 %v4002_v32  ;;  %4562 = vmatpush1.bf16.msra.mxu0 %v4004_v29  ;;  %v4025_v32 = vld [vmem:[#allocation2 + $0x4f8] sm:$0xff]  ;;  %v4022_v29 = vld [vmem:[#allocation2 + $0x4e0] sm:$0xff] }
 0x6a6   :  { %4404 = vmatprep.subr.bf16.mxu1 %v4007_v34  ;;  %4563 = vmatprep.subr.bf16.mxu0 %v4009_v15  ;;  %v4024_v34 = vld [vmem:[#allocation2 + $0x4f0] sm:$0xff]  ;;  %v4027_v15 = vld [vmem:[#allocation2 + $0x508] sm:$0xff] }
 0x6a7   :  { %4430 = vmatprep.mubr.bf16.mxu1 %v14042_v37  ;;  %4589 = vmatprep.mubr.bf16.mxu0 %v14042_v37  ;;  %v4018_v37 = vld [vmem:[#allocation2 + $0x4c0] sm:$0xff] }
 0x6a9   :  { %4405 = vmatpush1.bf16.msra.mxu1 %v4006_v38  ;;  %4564 = vmatpush1.bf16.msra.mxu0 %v4008_v10  ;;  %v4029_v38 = vld [vmem:[#allocation2 + $0x518] sm:$0xff]  ;;  %v4026_v10 = vld [vmem:[#allocation2 + $0x500] sm:$0xff] }
 0x6aa   :  { %4406 = vmatprep.subr.bf16.mxu1 %v4011_v27  ;;  %4565 = vmatprep.subr.bf16.mxu0 %v4013_v33  ;;  %v4028_v27 = vld [vmem:[#allocation2 + $0x510] sm:$0xff]  ;;  %v4031_v33 = vld [vmem:[#allocation2 + $0x528] sm:$0xff] }
 0x6ad   :  { %4407 = vmatpush1.bf16.msra.mxu1 %v4010_v35  ;;  %4566 = vmatpush1.bf16.msra.mxu0 %v4012_v22  ;;  %v4033_v35 = vld [vmem:[#allocation2 + $0x538] sm:$0xff]  ;;  %v4030_v22 = vld [vmem:[#allocation2 + $0x520] sm:$0xff] }
 0x6ae   :  { %4408 = vmatprep.subr.bf16.mxu1 %v4015_v9  ;;  %4567 = vmatprep.subr.bf16.mxu0 %v4017_v17  ;;  %v4032_v9 = vld [vmem:[#allocation2 + $0x530] sm:$0xff]  ;;  %v4035_v17 = vld [vmem:[#allocation2 + $0x548] sm:$0xff] }
 0x6b1   :  { %4409 = vmatpush1.bf16.msra.mxu1 %v4014_v21  ;;  %4568 = vmatpush1.bf16.msra.mxu0 %v4016_v28  ;;  %v4037_v21 = vld [vmem:[#allocation2 + $0x558] sm:$0xff]  ;;  %v4034_v28 = vld [vmem:[#allocation2 + $0x540] sm:$0xff] }
 0x6b2   :  { %4410 = vmatprep.subr.bf16.mxu1 %v4019_v18  ;;  %4569 = vmatprep.subr.bf16.mxu0 %v4021_v31  ;;  %v4036_v18 = vld [vmem:[#allocation2 + $0x550] sm:$0xff]  ;;  %v4039_v31 = vld [vmem:[#allocation2 + $0x568] sm:$0xff] }
 0x6b5   :  { %4411 = vmatpush1.bf16.msra.mxu1 %v4018_v37  ;;  %4570 = vmatpush1.bf16.msra.mxu0 %v4020_v25  ;;  %v4041_v37 = vld [vmem:[#allocation2 + $0x578] sm:$0xff]  ;;  %v4038_v25 = vld [vmem:[#allocation2 + $0x560] sm:$0xff] }
 0x6b6   :  { %4412 = vmatprep.subr.bf16.mxu1 %v4023_v36  ;;  %4571 = vmatprep.subr.bf16.mxu0 %v4025_v32  ;;  %v4040_v36 = vld [vmem:[#allocation2 + $0x570] sm:$0xff]  ;;  %v4043_v32 = vld [vmem:[#allocation2 + $0x588] sm:$0xff] }
 0x6b9   :  { %4413 = vmatpush1.bf16.msra.mxu1 %v4022_v29  ;;  %4572 = vmatpush1.bf16.msra.mxu0 %v4024_v34  ;;  %v4045_v29 = vld [vmem:[#allocation2 + $0x598] sm:$0xff]  ;;  %v4042_v34 = vld [vmem:[#allocation2 + $0x580] sm:$0xff] }
 0x6ba   :  { %4414 = vmatprep.subr.bf16.mxu1 %v4027_v15  ;;  %4573 = vmatprep.subr.bf16.mxu0 %v4029_v38  ;;  %v4044_v15 = vld [vmem:[#allocation2 + $0x590] sm:$0xff]  ;;  %v4047_v38 = vld [vmem:[#allocation2 + $0x5a8] sm:$0xff] }
 0x6bd   :  { %4415 = vmatpush1.bf16.msra.mxu1 %v4026_v10  ;;  %4574 = vmatpush1.bf16.msra.mxu0 %v4028_v27  ;;  %v4049_v10 = vld [vmem:[#allocation2 + $0x5b8] sm:$0xff]  ;;  %v4046_v27 = vld [vmem:[#allocation2 + $0x5a0] sm:$0xff] }
 0x6be   :  { %4416 = vmatprep.subr.bf16.mxu1 %v4031_v33  ;;  %4575 = vmatprep.subr.bf16.mxu0 %v4033_v35  ;;  %v4048_v33 = vld [vmem:[#allocation2 + $0x5b0] sm:$0xff]  ;;  %v4051_v35 = vld [vmem:[#allocation2 + $0x5c8] sm:$0xff] }
 0x6c1   :  { %4417 = vmatpush1.bf16.msra.mxu1 %v4030_v22  ;;  %4576 = vmatpush1.bf16.msra.mxu0 %v4032_v9  ;;  %v4053_v22 = vld [vmem:[#allocation2 + $0x5d8] sm:$0xff]  ;;  %v4050_v9 = vld [vmem:[#allocation2 + $0x5c0] sm:$0xff] }
 0x6c2   :  { %4418 = vmatprep.subr.bf16.mxu1 %v4035_v17  ;;  %4577 = vmatprep.subr.bf16.mxu0 %v4037_v21  ;;  %v4052_v17 = vld [vmem:[#allocation2 + $0x5d0] sm:$0xff]  ;;  %v4055_v21 = vld [vmem:[#allocation2 + $0x5e8] sm:$0xff] }
 0x6c5   :  { %4419 = vmatpush1.bf16.msra.mxu1 %v4034_v28  ;;  %4578 = vmatpush1.bf16.msra.mxu0 %v4036_v18  ;;  %v4057_v28 = vld [vmem:[#allocation2 + $0x5f8] sm:$0xff]  ;;  %v4054_v18 = vld [vmem:[#allocation2 + $0x5e0] sm:$0xff] }
 0x6c6   :  { %4420 = vmatprep.subr.bf16.mxu1 %v4039_v31  ;;  %4579 = vmatprep.subr.bf16.mxu0 %v4041_v37  ;;  %v4056_v31 = vld [vmem:[#allocation2 + $0x5f0] sm:$0xff] }
 0x6c9   :  { %4421 = vmatpush1.bf16.msra.mxu1 %v4038_v25  ;;  %4580 = vmatpush1.bf16.msra.mxu0 %v4040_v36 }
 0x6ca   :  { %4422 = vmatprep.subr.bf16.mxu1 %v4043_v32  ;;  %4581 = vmatprep.subr.bf16.mxu0 %v4045_v29 }
 0x6cd   :  { %4423 = vmatpush1.bf16.msra.mxu1 %v4042_v34  ;;  %4582 = vmatpush1.bf16.msra.mxu0 %v4044_v15 }
 0x6ce   :  { %4424 = vmatprep.subr.bf16.mxu1 %v4047_v38  ;;  %4583 = vmatprep.subr.bf16.mxu0 %v4049_v10 }
 0x6d1   :  { %4425 = vmatpush1.bf16.msra.mxu1 %v4046_v27  ;;  %4584 = vmatpush1.bf16.msra.mxu0 %v4048_v33 }
 0x6d2   :  { %4426 = vmatprep.subr.bf16.mxu1 %v4051_v35  ;;  %4585 = vmatprep.subr.bf16.mxu0 %v4053_v22 }
 0x6d5   :  { %4427 = vmatpush1.bf16.msra.mxu1 %v4050_v9  ;;  %4586 = vmatpush1.bf16.msra.mxu0 %v4052_v17 }
 0x6d6   :  { %4428 = vmatprep.subr.bf16.mxu1 %v4055_v21  ;;  %4587 = vmatprep.subr.bf16.mxu0 %v4057_v28 }
 0x6d9   :  { %4429 = vmatpush1.bf16.msra.mxu1 %v4054_v18  ;;  %4588 = vmatpush1.bf16.msra.mxu0 %v4056_v31 }
 0x6dc   :  { %4431 = vmatmul.mubr.bf16.vlgmr.msra.gmra.mrb[32].mxu1 %v14040_v26  ;;  %4590 = vmatmul.mubr.bf16.vlgmr.msra.gmra.mrb[16].mxu0 %v14040_v26 }
 0x6dd   :  { %4440 = vmatprep.mubr.bf16.mxu1 %v14046_v12  ;;  %4599 = vmatprep.mubr.bf16.mxu0 %v14046_v12 }
 0x6e4   :  { %4441 = vmatmul.mubr.bf16.gmra.mrb[36].mxu1 %v14044_v11  ;;  %4600 = vmatmul.mubr.bf16.gmra.mrb[20].mxu0 %v14044_v11 }
 0x6e5   :  { %4900 = vmatprep.mubr.bf16.mxu1 %v15118_v16 }
 0x7af   :  { %v4432_v37 = vpop.f32.mrb[32].mxu1  ;;  %v4591_v25 = vpop.f32.mrb[16].mxu0 }
 0x7b0   :  { %vm4610_vm10 = vcmp.ge.f32.partialorder %v4432_v37, 0.0  ;;  %v4626_v36 = vmul.f32 0.2, %v4432_v37  ;;  %v4628_v32 = vmul.f32 0.2, %v4591_v25  ;;  %vm4612_vm11 = vcmp.ge.f32.partialorder %v4591_v25, 0.0 }
 0x7b1   :  { %v4434_v29 = vpop.f32.mrb[33].mxu1  ;;  %v4593_v34 = vpop.f32.mrb[17].mxu0 }
 0x7b2   :  { %v4627_v15 = vmul.f32 0.2, %v4434_v29  ;;  %v4436_v26 = vpop.f32.mrb[34].mxu1  ;;  %v4595_v38 = vpop.f32.mrb[18].mxu0  ;;  %v4642_v10 = vsel %vm4610_vm10, %v4432_v37, %v4626_v36  ;;  %v4629_v27 = vmul.f32 0.2, %v4593_v34  ;;  %v4644_v33 = vsel %vm4612_vm11, %v4591_v25, %v4628_v32 }
 0x7b3   :  { %vm4614_vm12 = vcmp.ge.f32.partialorder %v4436_v26, 0.0  ;;  %v4630_v12 = vmul.f32 0.2, %v4436_v26  ;;  %vm4611_vm13 = vcmp.ge.f32.partialorder %v4434_v29, 0.0  ;;  %vm4616_vm14 = vcmp.ge.f32.partialorder %v4595_v38, 0.0  ;;  %v4438_v35 = vpop.f32.mrb[35].mxu1 }
 0x7b4   :  { %v4632_v11 = vmul.f32 0.2, %v4595_v38  ;;  %v4597_v22 = vpop.f32.mrb[19].mxu0  ;;  %vm4613_vm15 = vcmp.ge.f32.partialorder %v4593_v34, 0.0  ;;  %vm4615_vm1 = vcmp.ge.f32.partialorder %v4438_v35, 0.0  ;;  %v4643_v25 = vsel %vm4611_vm13, %v4434_v29, %v4627_v15 }
 0x7b5   :  { %v4646_v9 = vsel %vm4614_vm12, %v4436_v26, %v4630_v12  ;;  %v4631_v17 = vmul.f32 0.2, %v4438_v35  ;;  %vm4617_vm2 = vcmp.ge.f32.partialorder %v4597_v22, 0.0  ;;  %v4633_v18 = vmul.f32 0.2, %v4597_v22 }
 0x7b6   :  { %v14063_v21 = vpack.c.bf16 %v4646_v9, %v4642_v10  ;;  %v4648_v28 = vsel %vm4616_vm14, %v4595_v38, %v4632_v11  ;;  %v4645_v32 = vsel %vm4613_vm15, %v4593_v34, %v4629_v27 }
 0x7b7   :  { %v14065_v31 = vpack.c.bf16 %v4648_v28, %v4644_v33  ;;  %v4647_v37 = vsel %vm4615_vm1, %v4438_v35, %v4631_v17  ;;  %v4442_v36 = vpop.f32.mrb[36].mxu1  ;;  %v4601_v30 = vpop.f32.mrb[20].mxu0  ;;  %v4649_v19 = vsel %vm4617_vm2, %v4597_v22, %v4633_v18 }
 0x7b8   :  { %v4634_v20 = vmul.f32 0.2, %v4442_v36  ;;  %v4444_v13 = vpop.f32.mrb[37].mxu1  ;;  %v4603_v14 = vpop.f32.mrb[21].mxu0  ;;  %vm4618_vm3 = vcmp.ge.f32.partialorder %v4442_v36, 0.0  ;;  %vm4620_vm4 = vcmp.ge.f32.partialorder %v4601_v30, 0.0  ;;  %v4659_v12 = vpack.c.bf16 %v4647_v37, %v4643_v25 }
 0x7b9   :  { %v4636_v26 = vmul.f32 0.2, %v4601_v30  ;;  %vm4619_vm5 = vcmp.ge.f32.partialorder %v4444_v13, 0.0  ;;  %v4635_v10 = vmul.f32 0.2, %v4444_v13  ;;  %v4446_v11 = vpop.f32.mrb[38].mxu1  ;;  %v4661_v9 = vpack.c.bf16 %v4649_v19, %v4645_v32 }
 0x7ba   :  { %v4637_v38 = vmul.f32 0.2, %v4603_v14  ;;  %v4605_v33 = vpop.f32.mrb[22].mxu0  ;;  %vm4621_vm6 = vcmp.ge.f32.partialorder %v4603_v14, 0.0  ;;  %vm4622_vm7 = vcmp.ge.f32.partialorder %v4446_v11, 0.0  ;;  %v4448_v17 = vpop.f32.mrb[39].mxu1  ;;  %v4650_v34 = vsel %vm4618_vm3, %v4442_v36, %v4634_v20  ;;  %4868 = vmatprep.subr.bf16.mxu1 %v4659_v12 }
 0x7bb   :  { %v4638_v35 = vmul.f32 0.2, %v4446_v11  ;;  %v4607_v29 = vpop.f32.mrb[23].mxu0  ;;  %vm4624_vm8 = vcmp.ge.f32.partialorder %v4605_v33, 0.0  ;;  %v4640_v15 = vmul.f32 0.2, %v4605_v33  ;;  %4869 = vmatpush1.bf16.msra.mxu1 %v14063_v21  ;;  %v4652_v18 = vsel %vm4620_vm4, %v4601_v30, %v4636_v26 }
 0x7bc   :  { %vm4623_vm10 = vcmp.ge.f32.partialorder %v4448_v17, 0.0  ;;  %v4639_v22 = vmul.f32 0.2, %v4448_v17  ;;  %vm4625_vm11 = vcmp.ge.f32.partialorder %v4607_v29, 0.0  ;;  %v4641_v28 = vmul.f32 0.2, %v4607_v29 }
 0x7bd   :  { %v4654_v27 = vsel %vm4622_vm7, %v4446_v11, %v4638_v35  ;;  %v4651_v19 = vsel %vm4619_vm5, %v4444_v13, %v4635_v10  ;;  %v4656_v25 = vsel %vm4624_vm8, %v4605_v33, %v4640_v15  ;;  %v4653_v32 = vsel %vm4621_vm6, %v4603_v14, %v4637_v38  ;;  %v11925_v11 = vld [vmem:[#allocation14] sm:$0xff]   ;;  %v11926_v13 = vld [vmem:[#allocation14 + $0x8] sm:$0xff]   ;;  %v11927_v14 = vld [vmem:[#allocation14 + $0x10] sm:$0xff]  }
 0x7be   :  { %v4662_v37 = vpack.c.bf16 %v4654_v27, %v4650_v34  ;;  %v4664_v1 = vpack.c.bf16 %v4656_v25, %v4652_v18  ;;  %v4655_v20 = vsel %vm4623_vm10, %v4448_v17, %v4639_v22  ;;  %v4657_v36 = vsel %vm4625_vm11, %v4607_v29, %v4641_v28 }
 0x7bf   :  { %v4665_v2 = vpack.c.bf16 %v4657_v36, %v4653_v32  ;;  %v4663_v39 = vpack.c.bf16 %v4655_v20, %v4651_v19 }
 0x7c1   :  { %4870 = vmatprep.subr.bf16.mxu1 %v4663_v39 }
 0x7c2   :  { %4871 = vmatpush1.bf16.msra.mxu1 %v4662_v37 }
 0x7c3   :  { %4911 = vmatprep.subr.bf16.mxu1 %v4661_v9 }
 0x7c5   :  { %10267 = vmatmul.mubr.msk.bf16.vlgmr.msra.gmra.mrb[40].mxu1 %vm4072_vm9, %v11925_v11 }
 0x7c6   :  { %4912 = vmatpush1.bf16.msra.mxu1 %v14065_v31  ;;  %4943 = vmatprep.mubr.bf16.mxu1 %v15118_v16 }
 0x7c7   :  { %4913 = vmatprep.subr.bf16.mxu1 %v4665_v2 }
 0x7ca   :  { %4914 = vmatpush1.bf16.msra.mxu1 %v4664_v1 }
 0x7cb   :  { %4969 = vmatprep.subr.bf16.mxu1 %v4659_v12 }
 0x7cd   :  { %10268 = vmatmul.mubr.msk.bf16.vlgmr.msra.gmra.mrb[44].mxu1 %vm4072_vm9, %v11925_v11 }
 0x7ce   :  { %4970 = vmatpush1.bf16.msra.mxu1 %v14063_v21  ;;  %5001 = vmatprep.mubr.bf16.mxu1 %v15118_v16 }
 0x7cf   :  { %4971 = vmatprep.subr.bf16.mxu1 %v4663_v39 }
 0x7d2   :  { %4972 = vmatpush1.bf16.msra.mxu1 %v4662_v37 }
 0x7d3   :  { %5012 = vmatprep.subr.bf16.mxu1 %v4661_v9 }
 0x7d5   :  { %10270 = vmatmul.mubr.msk.bf16.vlgmr.msra.gmra.mrb[48].mxu1 %vm4072_vm9, %v11926_v13 }
 0x7d6   :  { %5013 = vmatpush1.bf16.msra.mxu1 %v14065_v31  ;;  %5044 = vmatprep.mubr.bf16.mxu1 %v15118_v16 }
 0x7d7   :  { %5014 = vmatprep.subr.bf16.mxu1 %v4665_v2 }
 0x7da   :  { %5015 = vmatpush1.bf16.msra.mxu1 %v4664_v1 }
 0x7db   :  { %5070 = vmatprep.subr.bf16.mxu1 %v4659_v12 }
 0x7dd   :  { %10271 = vmatmul.mubr.msk.bf16.vlgmr.msra.gmra.mrb[52].mxu1 %vm4072_vm9, %v11926_v13 }
 0x7de   :  { %5071 = vmatpush1.bf16.msra.mxu1 %v14063_v21  ;;  %5102 = vmatprep.mubr.bf16.mxu1 %v15118_v16 }
 0x7df   :  { %5072 = vmatprep.subr.bf16.mxu1 %v4663_v39 }
 0x7e2   :  { %5073 = vmatpush1.bf16.msra.mxu1 %v4662_v37 }
 0x7e3   :  { %5113 = vmatprep.subr.bf16.mxu1 %v4661_v9 }
 0x7e5   :  { %10273 = vmatmul.mubr.msk.bf16.vlgmr.msra.gmra.mrb[56].mxu1 %vm4072_vm9, %v11927_v14 }
 0x7e6   :  { %5114 = vmatpush1.bf16.msra.mxu1 %v14065_v31  ;;  %5145 = vmatprep.mubr.bf16.mxu1 %v15118_v16 }
 0x7e7   :  { %5115 = vmatprep.subr.bf16.mxu1 %v4665_v2 }
 0x7ea   :  { %5116 = vmatpush1.bf16.msra.mxu1 %v4664_v1 }
 0x7ed   :  { %10274 = vmatmul.mubr.msk.bf16.vlgmr.msra.gmra.mrb[60].mxu1 %vm4072_vm9, %v11927_v14 }
 0x898   :  { %v14088_v30 = vpop.f32.mrb[40].mxu1 }
 0x899   :  { %15119 = vst [vmem:[#allocation246_spill] sm:$0xff] %v14088_v30  ;;  %v14090_v26 = vpop.f32.mrb[41].mxu1 }
 0x89a   :  { %15120 = vst [vmem:[#allocation247_spill] sm:$0xff] %v14090_v26  ;;  %v14092_v21 = vpop.f32.mrb[42].mxu1 }
 0x89b   :  { %15121 = vst [vmem:[#allocation248_spill] sm:$0xff] %v14092_v21  ;;  %v14096_v10 = vpop.f32.mrb[43].mxu1 }
 0x89c   :  { %15122 = vst [vmem:[#allocation249_spill] sm:$0xff] %v14096_v10 }
 0x8a0   :  { %v14100_v38 = vpop.f32.mrb[44].mxu1 }
 0x8a1   :  { %15123 = vst [vmem:[#allocation250_spill] sm:$0xff] %v14100_v38  ;;  %v14102_v2 = vpop.f32.mrb[45].mxu1 }
 0x8a2   :  { %15124 = vst [vmem:[#allocation251_spill] sm:$0xff] %v14102_v2  ;;  %v14104_v1 = vpop.f32.mrb[46].mxu1 }
 0x8a3   :  { %15125 = vst [vmem:[#allocation252_spill] sm:$0xff] %v14104_v1  ;;  %v14108_v33 = vpop.f32.mrb[47].mxu1 }
 0x8a4   :  { %15126 = vst [vmem:[#allocation253_spill] sm:$0xff] %v14108_v33 }
 0x8a8   :  { %v14112_v35 = vpop.f32.mrb[48].mxu1 }
 0x8a9   :  { %15127 = vst [vmem:[#allocation254_spill] sm:$0xff] %v14112_v35  ;;  %v14114_v17 = vpop.f32.mrb[49].mxu1 }
 0x8aa   :  { %v14116_v29 = vpop.f32.mrb[50].mxu1 }
 0x8ab   :  { %15128 = vst [vmem:[#allocation255_spill] sm:$0xff] %v14116_v29  ;;  %v14120_v15 = vpop.f32.mrb[51].mxu1 }
 0x8b0   :  { %v14124_v22 = vpop.f32.mrb[52].mxu1 }
 0x8b1   :  { %15129 = vst [vmem:[#allocation256_spill] sm:$0xff] %v14124_v22  ;;  %v14126_v28 = vpop.f32.mrb[53].mxu1 }
 0x8b2   :  { %15130 = vst [vmem:[#allocation257_spill] sm:$0xff] %v14126_v28  ;;  %v14128_v18 = vpop.f32.mrb[54].mxu1 }
 0x8b3   :  { %15131 = vst [vmem:[#allocation258_spill] sm:$0xff] %v14128_v18  ;;  %v14132_v37 = vpop.f32.mrb[55].mxu1 }
 0x8b4   :  { %15132 = vst [vmem:[#allocation259_spill] sm:$0xff] %v14132_v37 }
 0x8b8   :  { %v14136_v32 = vpop.f32.mrb[56].mxu1 }
 0x8b9   :  { %15133 = vst [vmem:[#allocation260_spill] sm:$0xff] %v14136_v32  ;;  %v14138_v20 = vpop.f32.mrb[57].mxu1 }
 0x8ba   :  { %15134 = vst [vmem:[#allocation261_spill] sm:$0xff] %v14138_v20  ;;  %v14140_v36 = vpop.f32.mrb[58].mxu1 }
 0x8bb   :  { %15135 = vst [vmem:[#allocation262_spill] sm:$0xff] %v14140_v36  ;;  %v14144_v13 = vpop.f32.mrb[59].mxu1 }
 0x8bc   :  { %15136 = vst [vmem:[#allocation263_spill] sm:$0xff] %v14144_v13 }
 0x8c0   :  { %v14148_v19 = vpop.f32.mrb[60].mxu1 }
 0x8c1   :  { %15137 = vst [vmem:[#allocation264_spill] sm:$0xff] %v14148_v19  ;;  %v14150_v12 = vpop.f32.mrb[61].mxu1 }
 0x8c2   :  { %15138 = vst [vmem:[#allocation265_spill] sm:$0xff] %v14150_v12  ;;  %v14152_v9 = vpop.f32.mrb[62].mxu1 }
 0x8c3   :  { %15139 = vst [vmem:[#allocation266_spill] sm:$0xff] %v14152_v9  ;;  %v14156_v39 = vpop.f32.mrb[63].mxu1 }
 0x8c4   :  { %15140 = vst [vmem:[#allocation267_spill] sm:$0xff] %v14156_v39 }
 0x8c5   :  { %12411 = dma.done.wait [#allocation7 + $0x1], 16384 }
 0x8c6   :  { %12412 = vsyncadd [#allocation7 + $0x1], 4294950912  ;;  %5302 = vmatprep.subr.bf16.mxu1 %v13428_v57  ;;  %5334 = vmatprep.mubr.bf16.mxu1 %v15118_v16  ;;  %v11928_v25 = vld [vmem:[#allocation16] sm:$0xff]   ;;  %v5164_v11 = vld [vmem:[#allocation3] sm:$0xff]  ;;  %s15141_s12 = sld [smem:[#allocation60_spill]]  ;;  %s15146_s11 = sld [smem:[#allocation58_spill]] }
 0x8c7   :  { %5303 = vmatpush1.bf16.msra.mxu1 %v13426_v55  ;;  %v5165_v31 = vld [vmem:[#allocation3 + $0x8] sm:$0xff]  ;;  %v5167_v14 = vld [vmem:[#allocation3 + $0x18] sm:$0xff]  ;;  %v11929_v34 = vld [vmem:[#allocation16 + $0x8] sm:$0xff]   ;;  %s15147_s9 = sld [smem:[#allocation59_spill]] }
 0x8c8   :  { %5304 = vmatprep.subr.bf16.mxu1 %v13432_v7  ;;  %5515 = vmatprep.subr.bf16.mxu0 %v5165_v31  ;;  %v5166_v27 = vld [vmem:[#allocation3 + $0x10] sm:$0xff]  ;;  %v5169_v19 = vld [vmem:[#allocation3 + $0x28] sm:$0xff]  ;;  %v5171_v9 = vld [vmem:[#allocation3 + $0x38] sm:$0xff] }
 0x8c9   :  { %5516 = vmatpush1.bf16.msra.mxu0 %v5164_v11  ;;  %v11930_v31 = vld [vmem:[#allocation16 + $0x10] sm:$0xff]   ;;  %v5170_v11 = vld [vmem:[#allocation3 + $0x30] sm:$0xff]  ;;  %v5213_v28 = vld [vmem:[#allocation3 + $0x188] sm:$0xff] }
 0x8ca   :  { %5517 = vmatprep.subr.bf16.mxu0 %v5167_v14  ;;  %v5173_v14 = vld [vmem:[#allocation3 + $0x48] sm:$0xff]  ;;  %v5215_v37 = vld [vmem:[#allocation3 + $0x198] sm:$0xff]  ;;  %v5242_v30 = vld [vmem:[#allocation3 + $0x270] sm:$0xff] }
 0x8cb   :  { %5305 = vmatpush1.bf16.msra.mxu1 %v13430_v5  ;;  %v5239_v1 = vld [vmem:[#allocation3 + $0x258] sm:$0xff]  ;;  %v5241_v2 = vld [vmem:[#allocation3 + $0x268] sm:$0xff]  ;;  %v5246_v26 = vld [vmem:[#allocation3 + $0x290] sm:$0xff] }
 0x8cc   :  { %5358 = vmatprep.subr.bf16.mxu1 %v13428_v57  ;;  %v14221_v38 = vld [vmem:[%s15141_s12] sm:$0xff]   ;;  %v5243_v33 = vld [vmem:[#allocation3 + $0x278] sm:$0xff]  ;;  %v5245_v21 = vld [vmem:[#allocation3 + $0x288] sm:$0xff] }
 0x8cd   :  { %5518 = vmatpush1.bf16.msra.mxu0 %v5166_v27  ;;  %v5175_v27 = vld [vmem:[#allocation3 + $0x58] sm:$0xff]  ;;  %v5249_v10 = vld [vmem:[#allocation3 + $0x2a8] sm:$0xff] }
 0x8ce   :  { %10276 = vmatmul.mubr.msk.bf16.vlgmr.msra.gmra.mrb[64].mxu1 %vm4072_vm9, %v11928_v25  ;;  %5519 = vmatprep.subr.bf16.mxu0 %v5169_v19  ;;  %v5168_v25 = vld [vmem:[#allocation3 + $0x20] sm:$0xff] }
 0x8cf   :  { %5359 = vmatpush1.bf16.msra.mxu1 %v13426_v55  ;;  %5390 = vmatprep.mubr.bf16.mxu1 %v15118_v16  ;;  %v11931_v19 = vld [vmem:[#allocation16 + $0x18] sm:$0xff]  }
 0x8d0   :  { %5360 = vmatprep.subr.bf16.mxu1 %v13432_v7 }
 0x8d1   :  { %5520 = vmatpush1.bf16.msra.mxu0 %v5168_v25  ;;  %v5177_v25 = vld [vmem:[#allocation3 + $0x68] sm:$0xff] }
 0x8d2   :  { %5521 = vmatprep.subr.bf16.mxu0 %v5171_v9  ;;  %v5174_v9 = vld [vmem:[#allocation3 + $0x50] sm:$0xff] }
 0x8d3   :  { %5361 = vmatpush1.bf16.msra.mxu1 %v13430_v5 }
 0x8d4   :  { %5414 = vmatprep.subr.bf16.mxu1 %v13428_v57 }
 0x8d5   :  { %5522 = vmatpush1.bf16.msra.mxu0 %v5170_v11  ;;  %v5181_v11 = vld [vmem:[#allocation3 + $0x88] sm:$0xff] }
 0x8d6   :  { %10278 = vmatmul.mubr.msk.bf16.vlgmr.msra.gmra.mrb[68].mxu1 %vm4072_vm9, %v11929_v34  ;;  %5523 = vmatprep.subr.bf16.mxu0 %v5173_v14  ;;  %v5172_v34 = vld [vmem:[#allocation3 + $0x40] sm:$0xff]  ;;  %v5183_v14 = vld [vmem:[#allocation3 + $0x98] sm:$0xff] }
 0x8d7   :  { %5415 = vmatpush1.bf16.msra.mxu1 %v13426_v55  ;;  %5446 = vmatprep.mubr.bf16.mxu1 %v15118_v16 }
 0x8d8   :  { %5416 = vmatprep.subr.bf16.mxu1 %v13432_v7 }
 0x8d9   :  { %5524 = vmatpush1.bf16.msra.mxu0 %v5172_v34  ;;  %v5182_v34 = vld [vmem:[#allocation3 + $0x90] sm:$0xff] }
 0x8da   :  { %5525 = vmatprep.subr.bf16.mxu0 %v5175_v27  ;;  %v5185_v27 = vld [vmem:[#allocation3 + $0xa8] sm:$0xff] }
 0x8db   :  { %5417 = vmatpush1.bf16.msra.mxu1 %v13430_v5 }
 0x8dc   :  { %5470 = vmatprep.subr.bf16.mxu1 %v13428_v57  ;;  %v5176_v57 = vld [vmem:[#allocation3 + $0x60] sm:$0xff] }
 0x8dd   :  { %5526 = vmatpush1.bf16.msra.mxu0 %v5174_v9  ;;  %v5187_v9 = vld [vmem:[#allocation3 + $0xb8] sm:$0xff] }
 0x8de   :  { %10280 = vmatmul.mubr.msk.bf16.vlgmr.msra.gmra.mrb[72].mxu1 %vm4072_vm9, %v11930_v31  ;;  %5527 = vmatprep.subr.bf16.mxu0 %v5177_v25  ;;  %v5179_v31 = vld [vmem:[#allocation3 + $0x78] sm:$0xff]  ;;  %v5189_v25 = vld [vmem:[#allocation3 + $0xc8] sm:$0xff] }
 0x8df   :  { %5471 = vmatpush1.bf16.msra.mxu1 %v13426_v55  ;;  %5502 = vmatprep.mubr.bf16.mxu1 %v15118_v16  ;;  %v5178_v55 = vld [vmem:[#allocation3 + $0x70] sm:$0xff] }
 0x8e0   :  { %5472 = vmatprep.subr.bf16.mxu1 %v13432_v7  ;;  %v5180_v7 = vld [vmem:[#allocation3 + $0x80] sm:$0xff] }
 0x8e1   :  { %5528 = vmatpush1.bf16.msra.mxu0 %v5176_v57  ;;  %v5188_v57 = vld [vmem:[#allocation3 + $0xc0] sm:$0xff] }
 0x8e2   :  { %5529 = vmatprep.subr.bf16.mxu0 %v5179_v31  ;;  %v5191_v31 = vld [vmem:[#allocation3 + $0xd8] sm:$0xff] }
 0x8e3   :  { %5473 = vmatpush1.bf16.msra.mxu1 %v13430_v5  ;;  %v5184_v5 = vld [vmem:[#allocation3 + $0xa0] sm:$0xff] }
 0x8e5   :  { %5530 = vmatpush1.bf16.msra.mxu0 %v5178_v55  ;;  %v5190_v55 = vld [vmem:[#allocation3 + $0xd0] sm:$0xff] }
 0x8e6   :  { %10282 = vmatmul.mubr.msk.bf16.vlgmr.msra.gmra.mrb[76].mxu1 %vm4072_vm9, %v11931_v19  ;;  %5531 = vmatprep.subr.bf16.mxu0 %v5181_v11  ;;  %v5186_v19 = vld [vmem:[#allocation3 + $0xb0] sm:$0xff]  ;;  %v5193_v11 = vld [vmem:[#allocation3 + $0xe8] sm:$0xff] }
 0x8e9   :  { %5532 = vmatpush1.bf16.msra.mxu0 %v5180_v7  ;;  %v5192_v7 = vld [vmem:[#allocation3 + $0xe0] sm:$0xff] }
 0x8ea   :  { %5533 = vmatprep.subr.bf16.mxu0 %v5183_v14  ;;  %v5195_v14 = vld [vmem:[#allocation3 + $0xf8] sm:$0xff] }
 0x8ed   :  { %5534 = vmatpush1.bf16.msra.mxu0 %v5182_v34  ;;  %v5194_v34 = vld [vmem:[#allocation3 + $0xf0] sm:$0xff] }
 0x8ee   :  { %5535 = vmatprep.subr.bf16.mxu0 %v5185_v27  ;;  %v5197_v27 = vld [vmem:[#allocation3 + $0x108] sm:$0xff] }
 0x8f1   :  { %5536 = vmatpush1.bf16.msra.mxu0 %v5184_v5 }
 0x8f2   :  { %5537 = vmatprep.subr.bf16.mxu0 %v5187_v9 }
 0x8f5   :  { %5538 = vmatpush1.bf16.msra.mxu0 %v5186_v19 }
 0x8f6   :  { %5539 = vmatprep.subr.bf16.mxu0 %v5189_v25 }
 0x8f9   :  { %5540 = vmatpush1.bf16.msra.mxu0 %v5188_v57  ;;  %v5196_v57 = vld [vmem:[#allocation3 + $0x100] sm:$0xff] }
 0x8fa   :  { %5541 = vmatprep.subr.bf16.mxu0 %v5191_v31  ;;  %v5199_v31 = vld [vmem:[#allocation3 + $0x118] sm:$0xff] }
 0x8fd   :  { %5542 = vmatpush1.bf16.msra.mxu0 %v5190_v55 }
 0x8fe   :  { %5543 = vmatprep.subr.bf16.mxu0 %v5193_v11  ;;  %v5198_v11 = vld [vmem:[#allocation3 + $0x110] sm:$0xff] }
 0x901   :  { %5544 = vmatpush1.bf16.msra.mxu0 %v5192_v7 }
 0x902   :  { %5545 = vmatprep.subr.bf16.mxu0 %v5195_v14  ;;  %v5201_v14 = vld [vmem:[#allocation3 + $0x128] sm:$0xff] }
 0x905   :  { %5546 = vmatpush1.bf16.msra.mxu0 %v5194_v34 }
 0x906   :  { %5558 = vmatprep.subr.bf16.mxu0 %v5197_v27  ;;  %v5210_v27 = vld [vmem:[#allocation3 + $0x170] sm:$0xff] }
 0x9a1   :  { %v5336_v5 = vpop.f32.mrb[64].mxu1 }
 0x9a2   :  { %v5338_v9 = vpop.f32.mrb[65].mxu1 }
 0x9a3   :  { %v5340_v19 = vpop.f32.mrb[66].mxu1 }
 0x9a4   :  { %v5345_v25 = vpack.c.bf16 %v5340_v19, %v5336_v5  ;;  %v5342_v12 = vpop.f32.mrb[67].mxu1  ;;  %v5202_v19 = vld [vmem:[#allocation3 + $0x130] sm:$0xff] }
 0x9a5   :  { %v5346_v39 = vpack.c.bf16 %v5342_v12, %v5338_v9  ;;  %v5200_v12 = vld [vmem:[#allocation3 + $0x120] sm:$0xff] }
 0x9a7   :  { %5547 = vmatprep.mubr.bf16.mxu0 %v5346_v39  ;;  %v5203_v39 = vld [vmem:[#allocation3 + $0x138] sm:$0xff] }
 0x9a8   :  { %5548 = vmatmul.mubr.bf16.vlgmr.msra.gmra.mrb[24].mxu0 %v5345_v25 }
 0x9a9   :  { %5559 = vmatpush1.bf16.msra.mxu0 %v5196_v57  ;;  %v14184_v55 = vpop.f32.mrb[68].mxu1  ;;  %v5205_v57 = vld [vmem:[#allocation3 + $0x148] sm:$0xff] }
 0x9aa   :  { %5560 = vmatprep.subr.bf16.mxu0 %v5199_v31  ;;  %v5394_v7 = vpop.f32.mrb[69].mxu1 }
 0x9ab   :  { %v14186_v34 = vpop.f32.mrb[70].mxu1 }
 0x9ac   :  { %v5398_v22 = vpop.f32.mrb[71].mxu1 }
 0x9ad   :  { %5561 = vmatpush1.bf16.msra.mxu0 %v5198_v11  ;;  %v5402_v5 = vpack.c.bf16 %v5398_v22, %v5394_v7  ;;  %v5204_v11 = vld [vmem:[#allocation3 + $0x140] sm:$0xff]  ;;  %v5207_v7 = vld [vmem:[#allocation3 + $0x158] sm:$0xff] }
 0x9ae   :  { %5562 = vmatprep.subr.bf16.mxu0 %v5201_v14  ;;  %v5206_v14 = vld [vmem:[#allocation3 + $0x150] sm:$0xff] }
 0x9af   :  { %5590 = vmatprep.mubr.bf16.mxu0 %v5402_v5  ;;  %v5209_v5 = vld [vmem:[#allocation3 + $0x168] sm:$0xff] }
 0x9b1   :  { %5563 = vmatpush1.bf16.msra.mxu0 %v5200_v12  ;;  %v14190_v9 = vpop.f32.mrb[72].mxu1  ;;  %v5208_v12 = vld [vmem:[#allocation3 + $0x160] sm:$0xff] }
 0x9b2   :  { %5564 = vmatprep.subr.bf16.mxu0 %v5203_v39  ;;  %v14192_v25 = vpop.f32.mrb[73].mxu1  ;;  %v5211_v39 = vld [vmem:[#allocation3 + $0x178] sm:$0xff] }
 0x9b3   :  { %v14194_v31 = vpop.f32.mrb[74].mxu1 }
 0x9b4   :  { %v14198_v18 = vpop.f32.mrb[75].mxu1 }
 0x9b5   :  { %5565 = vmatpush1.bf16.msra.mxu0 %v5202_v19  ;;  %v5458_v22 = vpack.c.bf16 %v14198_v18, %v14192_v25  ;;  %v5212_v19 = vld [vmem:[#allocation3 + $0x180] sm:$0xff]  ;;  %v5214_v18 = vld [vmem:[#allocation3 + $0x190] sm:$0xff]  ;;  %v5217_v25 = vld [vmem:[#allocation3 + $0x1a8] sm:$0xff] }
 0x9b6   :  { %5566 = vmatprep.subr.bf16.mxu0 %v5205_v57  ;;  %v5216_v57 = vld [vmem:[#allocation3 + $0x1a0] sm:$0xff] }
 0x9b9   :  { %5567 = vmatpush1.bf16.msra.mxu0 %v5204_v11  ;;  %v5219_v11 = vld [vmem:[#allocation3 + $0x1b8] sm:$0xff] }
 0x9ba   :  { %5568 = vmatprep.subr.bf16.mxu0 %v5207_v7  ;;  %v5218_v7 = vld [vmem:[#allocation3 + $0x1b0] sm:$0xff] }
 0x9bd   :  { %5569 = vmatpush1.bf16.msra.mxu0 %v5206_v14  ;;  %v5221_v14 = vld [vmem:[#allocation3 + $0x1c8] sm:$0xff] }
 0x9be   :  { %5570 = vmatprep.subr.bf16.mxu0 %v5209_v5  ;;  %v5220_v5 = vld [vmem:[#allocation3 + $0x1c0] sm:$0xff] }
 0x9c1   :  { %5571 = vmatpush1.bf16.msra.mxu0 %v5208_v12  ;;  %v5223_v12 = vld [vmem:[#allocation3 + $0x1d8] sm:$0xff] }
 0x9c2   :  { %5572 = vmatprep.subr.bf16.mxu0 %v5211_v39  ;;  %v5224_v39 = vld [vmem:[#allocation3 + $0x1e0] sm:$0xff] }
 0x9c5   :  { %5573 = vmatpush1.bf16.msra.mxu0 %v5210_v27  ;;  %v5225_v27 = vld [vmem:[#allocation3 + $0x1e8] sm:$0xff] }
 0x9c6   :  { %5574 = vmatprep.subr.bf16.mxu0 %v5213_v28  ;;  %v5222_v28 = vld [vmem:[#allocation3 + $0x1d0] sm:$0xff] }
 0x9c9   :  { %5575 = vmatpush1.bf16.msra.mxu0 %v5212_v19 }
 0x9ca   :  { %5576 = vmatprep.subr.bf16.mxu0 %v5215_v37  ;;  %v14202_v37 = vpop.f32.mrb[76].mxu1 }
 0x9cb   :  { %v14204_v19 = vpop.f32.mrb[77].mxu1 }
 0x9cd   :  { %5577 = vmatpush1.bf16.msra.mxu0 %v5214_v18  ;;  %v5227_v18 = vld [vmem:[#allocation3 + $0x1f8] sm:$0xff] }
 0x9ce   :  { %5578 = vmatprep.subr.bf16.mxu0 %v5217_v25  ;;  %v14206_v25 = vpop.f32.mrb[78].mxu1 }
 0x9d1   :  { %5579 = vmatpush1.bf16.msra.mxu0 %v5216_v57  ;;  %v14218_v57 = vld [vmem:[%s15141_s12 + $0x40] sm:$0xff]  }
 0x9d2   :  { %5580 = vmatprep.subr.bf16.mxu0 %v5219_v11  ;;  %v14210_v11 = vpop.f32.mrb[79].mxu1  ;;  %11317 = vmatprep.subr.bf16.mxu1 %v14218_v57 }
 0x9d3   :  { %11319 = vmatpush3.bf16.msra.mxu1 %v14221_v38 }
 0x9d5   :  { %5581 = vmatpush1.bf16.msra.mxu0 %v5218_v7  ;;  %v5237_v7 = vld [vmem:[#allocation3 + $0x248] sm:$0xff] }
 0x9d6   :  { %5582 = vmatprep.subr.bf16.mxu0 %v5221_v14  ;;  %v5226_v14 = vld [vmem:[#allocation3 + $0x1f0] sm:$0xff] }
 0x9d9   :  { %5583 = vmatpush1.bf16.msra.mxu0 %v5220_v5  ;;  %v5229_v5 = vld [vmem:[#allocation3 + $0x208] sm:$0xff] }
 0x9da   :  { %5584 = vmatprep.subr.bf16.mxu0 %v5223_v12  ;;  %v5228_v12 = vld [vmem:[#allocation3 + $0x200] sm:$0xff] }
 0x9dd   :  { %5585 = vmatpush1.bf16.msra.mxu0 %v5222_v28  ;;  %v5231_v28 = vld [vmem:[#allocation3 + $0x218] sm:$0xff] }
 0x9de   :  { %5586 = vmatprep.subr.bf16.mxu0 %v5225_v27  ;;  %v15142_v27 = vpack.c.bf16 %v14186_v34, %v14184_v55  ;;  %v14230_v55 = vld [vmem:[%s15141_s12 + $0x8] sm:$0xff]   ;;  %v14233_v34 = vld [vmem:[%s15141_s12 + $0x50] sm:$0xff]  }
 0x9e1   :  { %5587 = vmatpush1.bf16.msra.mxu0 %v5224_v39  ;;  %v14224_v39 = vld [vmem:[%s15141_s12 + $0x48] sm:$0xff]  }
 0x9e2   :  { %5588 = vmatprep.subr.bf16.mxu0 %v5227_v18  ;;  %v5230_v18 = vld [vmem:[#allocation3 + $0x210] sm:$0xff]  ;;  %11321 = vmatprep.subr.bf16.mxu1 %v14224_v39 }
 0x9e3   :  { %11323 = vmatpush3.bf16.msra.mxu1 %v14230_v55 }
 0x9e4   :  { %11325 = vmatprep.subr.bf16.mxu1 %v14233_v34 }
 0x9e5   :  { %5589 = vmatpush1.bf16.msra.mxu0 %v5226_v14  ;;  %v5233_v14 = vld [vmem:[#allocation3 + $0x228] sm:$0xff] }
 0x9e6   :  { %5601 = vmatprep.subr.bf16.mxu0 %v5229_v5  ;;  %v5235_v5 = vld [vmem:[#allocation3 + $0x238] sm:$0xff] }
 0x9e8   :  { %5591 = vmatmul.mubr.bf16.vlgmr.msra.gmra.mrb[24].mxu0 %v15142_v27  ;;  %v5234_v27 = vld [vmem:[#allocation3 + $0x230] sm:$0xff] }
 0x9e9   :  { %5602 = vmatpush1.bf16.msra.mxu0 %v5228_v12  ;;  %5633 = vmatprep.mubr.bf16.mxu0 %v5458_v22  ;;  %v5232_v22 = vld [vmem:[#allocation3 + $0x220] sm:$0xff]  ;;  %v14238_v12 = vld [vmem:[%s15141_s12 + $0x10] sm:$0xff]  }
 0x9ea   :  { %5603 = vmatprep.subr.bf16.mxu0 %v5231_v28  ;;  %v14241_v28 = vld [vmem:[%s15141_s12 + $0x58] sm:$0xff]   ;;  %11327 = vmatpush3.bf16.msra.mxu1 %v14238_v12 }
 0x9eb   :  { %11329 = vmatprep.subr.bf16.mxu1 %v14241_v28 }
 0x9ed   :  { %5604 = vmatpush1.bf16.msra.mxu0 %v5230_v18  ;;  %v14246_v18 = vld [vmem:[%s15141_s12 + $0x18] sm:$0xff]  }
 0x9ee   :  { %5605 = vmatprep.subr.bf16.mxu0 %v5233_v14  ;;  %v5236_v14 = vld [vmem:[#allocation3 + $0x240] sm:$0xff]  ;;  %11331 = vmatpush3.bf16.msra.mxu1 %v14246_v18 }
 0x9f1   :  { %5606 = vmatpush1.bf16.msra.mxu0 %v5232_v22  ;;  %v5238_v22 = vld [vmem:[#allocation3 + $0x250] sm:$0xff] }
 0x9f2   :  { %5607 = vmatprep.subr.bf16.mxu0 %v5235_v5  ;;  %v5240_v5 = vld [vmem:[#allocation3 + $0x260] sm:$0xff] }
 0x9f5   :  { %5608 = vmatpush1.bf16.msra.mxu0 %v5234_v27  ;;  %v5244_v27 = vld [vmem:[#allocation3 + $0x280] sm:$0xff] }
 0x9f6   :  { %5609 = vmatprep.subr.bf16.mxu0 %v5237_v7  ;;  %v5247_v7 = vld [vmem:[#allocation3 + $0x298] sm:$0xff] }
 0x9f9   :  { %5610 = vmatpush1.bf16.msra.mxu0 %v5236_v14  ;;  %v5251_v14 = vld [vmem:[#allocation3 + $0x2b8] sm:$0xff] }
 0x9fa   :  { %5611 = vmatprep.subr.bf16.mxu0 %v5239_v1  ;;  %v5248_v1 = vld [vmem:[#allocation3 + $0x2a0] sm:$0xff] }
 0x9fd   :  { %5612 = vmatpush1.bf16.msra.mxu0 %v5238_v22  ;;  %v5253_v22 = vld [vmem:[#allocation3 + $0x2c8] sm:$0xff] }
 0x9fe   :  { %5613 = vmatprep.subr.bf16.mxu0 %v5241_v2  ;;  %v5250_v2 = vld [vmem:[#allocation3 + $0x2b0] sm:$0xff] }
 0xa01   :  { %5614 = vmatpush1.bf16.msra.mxu0 %v5240_v5  ;;  %v5255_v5 = vld [vmem:[#allocation3 + $0x2d8] sm:$0xff] }
 0xa02   :  { %5615 = vmatprep.subr.bf16.mxu0 %v5243_v33  ;;  %v5252_v33 = vld [vmem:[#allocation3 + $0x2c0] sm:$0xff] }
 0xa05   :  { %5616 = vmatpush1.bf16.msra.mxu0 %v5242_v30  ;;  %v5254_v30 = vld [vmem:[#allocation3 + $0x2d0] sm:$0xff] }
 0xa06   :  { %5617 = vmatprep.subr.bf16.mxu0 %v5245_v21  ;;  %v5257_v21 = vld [vmem:[#allocation3 + $0x2e8] sm:$0xff] }
 0xa09   :  { %5618 = vmatpush1.bf16.msra.mxu0 %v5244_v27  ;;  %v5256_v27 = vld [vmem:[#allocation3 + $0x2e0] sm:$0xff] }
 0xa0a   :  { %5619 = vmatprep.subr.bf16.mxu0 %v5247_v7  ;;  %v5259_v7 = vld [vmem:[#allocation3 + $0x2f8] sm:$0xff] }
 0xa0d   :  { %5620 = vmatpush1.bf16.msra.mxu0 %v5246_v26  ;;  %v5258_v26 = vld [vmem:[#allocation3 + $0x2f0] sm:$0xff] }
 0xa0e   :  { %5621 = vmatprep.subr.bf16.mxu0 %v5249_v10  ;;  %v5261_v10 = vld [vmem:[#allocation3 + $0x308] sm:$0xff] }
 0xa11   :  { %5622 = vmatpush1.bf16.msra.mxu0 %v5248_v1  ;;  %v5260_v1 = vld [vmem:[#allocation3 + $0x300] sm:$0xff] }
 0xa12   :  { %5623 = vmatprep.subr.bf16.mxu0 %v5251_v14  ;;  %v5263_v14 = vld [vmem:[#allocation3 + $0x318] sm:$0xff] }
 0xa15   :  { %5624 = vmatpush1.bf16.msra.mxu0 %v5250_v2  ;;  %v15143_v2 = vpack.c.bf16 %v14194_v31, %v14190_v9  ;;  %v5268_v9 = vld [vmem:[#allocation3 + $0x340] sm:$0xff]  ;;  %v5271_v31 = vld [vmem:[#allocation3 + $0x358] sm:$0xff] }
 0xa16   :  { %5625 = vmatprep.subr.bf16.mxu0 %v5253_v22  ;;  %v15144_v22 = vpack.c.bf16 %v14210_v11, %v14204_v19  ;;  %v5273_v19 = vld [vmem:[#allocation3 + $0x368] sm:$0xff]  ;;  %v5272_v11 = vld [vmem:[#allocation3 + $0x360] sm:$0xff] }
 0xa19   :  { %5626 = vmatpush1.bf16.msra.mxu0 %v5252_v33  ;;  %v5262_v33 = vld [vmem:[#allocation3 + $0x310] sm:$0xff] }
 0xa1a   :  { %5627 = vmatprep.subr.bf16.mxu0 %v5255_v5  ;;  %v5265_v5 = vld [vmem:[#allocation3 + $0x328] sm:$0xff] }
 0xa1d   :  { %5628 = vmatpush1.bf16.msra.mxu0 %v5254_v30  ;;  %v5264_v30 = vld [vmem:[#allocation3 + $0x320] sm:$0xff] }
 0xa1e   :  { %5629 = vmatprep.subr.bf16.mxu0 %v5257_v21  ;;  %v5267_v21 = vld [vmem:[#allocation3 + $0x338] sm:$0xff] }
 0xa21   :  { %5630 = vmatpush1.bf16.msra.mxu0 %v5256_v27  ;;  %v5266_v27 = vld [vmem:[#allocation3 + $0x330] sm:$0xff] }
 0xa22   :  { %5631 = vmatprep.subr.bf16.mxu0 %v5259_v7  ;;  %v5269_v7 = vld [vmem:[#allocation3 + $0x348] sm:$0xff] }
 0xa25   :  { %5632 = vmatpush1.bf16.msra.mxu0 %v5258_v26  ;;  %v5270_v26 = vld [vmem:[#allocation3 + $0x350] sm:$0xff] }
 0xa26   :  { %5644 = vmatprep.subr.bf16.mxu0 %v5261_v10  ;;  %v5275_v10 = vld [vmem:[#allocation3 + $0x378] sm:$0xff] }
 0xa28   :  { %5634 = vmatmul.mubr.bf16.vlgmr.msra.gmra.mrb[24].mxu0 %v15143_v2  ;;  %v5276_v2 = vld [vmem:[#allocation3 + $0x380] sm:$0xff] }
 0xa29   :  { %5645 = vmatpush1.bf16.msra.mxu0 %v5260_v1  ;;  %5676 = vmatprep.mubr.bf16.mxu0 %v15144_v22  ;;  %v5274_v1 = vld [vmem:[#allocation3 + $0x370] sm:$0xff]  ;;  %v5279_v22 = vld [vmem:[#allocation3 + $0x398] sm:$0xff] }
 0xa2a   :  { %5646 = vmatprep.subr.bf16.mxu0 %v5263_v14  ;;  %v5277_v14 = vld [vmem:[#allocation3 + $0x388] sm:$0xff] }
 0xa2d   :  { %5647 = vmatpush1.bf16.msra.mxu0 %v5262_v33  ;;  %v5278_v33 = vld [vmem:[#allocation3 + $0x390] sm:$0xff] }
 0xa2e   :  { %5648 = vmatprep.subr.bf16.mxu0 %v5265_v5  ;;  %v5281_v5 = vld [vmem:[#allocation3 + $0x3a8] sm:$0xff] }
 0xa31   :  { %5649 = vmatpush1.bf16.msra.mxu0 %v5264_v30  ;;  %v5280_v30 = vld [vmem:[#allocation3 + $0x3a0] sm:$0xff] }
 0xa32   :  { %5650 = vmatprep.subr.bf16.mxu0 %v5267_v21  ;;  %v5283_v21 = vld [vmem:[#allocation3 + $0x3b8] sm:$0xff] }
 0xa35   :  { %5651 = vmatpush1.bf16.msra.mxu0 %v5266_v27  ;;  %v5282_v27 = vld [vmem:[#allocation3 + $0x3b0] sm:$0xff] }
 0xa36   :  { %5652 = vmatprep.subr.bf16.mxu0 %v5269_v7  ;;  %v5285_v7 = vld [vmem:[#allocation3 + $0x3c8] sm:$0xff] }
 0xa39   :  { %5653 = vmatpush1.bf16.msra.mxu0 %v5268_v9  ;;  %v5284_v9 = vld [vmem:[#allocation3 + $0x3c0] sm:$0xff] }
 0xa3a   :  { %5654 = vmatprep.subr.bf16.mxu0 %v5271_v31  ;;  %v5287_v31 = vld [vmem:[#allocation3 + $0x3d8] sm:$0xff] }
 0xa3d   :  { %5655 = vmatpush1.bf16.msra.mxu0 %v5270_v26  ;;  %v5286_v26 = vld [vmem:[#allocation3 + $0x3d0] sm:$0xff] }
 0xa3e   :  { %5656 = vmatprep.subr.bf16.mxu0 %v5273_v19  ;;  %v5289_v19 = vld [vmem:[#allocation3 + $0x3e8] sm:$0xff] }
 0xa41   :  { %5657 = vmatpush1.bf16.msra.mxu0 %v5272_v11  ;;  %v5288_v11 = vld [vmem:[#allocation3 + $0x3e0] sm:$0xff] }
 0xa42   :  { %5658 = vmatprep.subr.bf16.mxu0 %v5275_v10  ;;  %v5291_v10 = vld [vmem:[#allocation3 + $0x3f8] sm:$0xff] }
 0xa45   :  { %5659 = vmatpush1.bf16.msra.mxu0 %v5274_v1  ;;  %v5290_v1 = vld [vmem:[#allocation3 + $0x3f0] sm:$0xff] }
 0xa46   :  { %5660 = vmatprep.subr.bf16.mxu0 %v5277_v14  ;;  %v15145_v14 = vpack.c.bf16 %v14206_v25, %v14202_v37 }
 0xa49   :  { %5661 = vmatpush1.bf16.msra.mxu0 %v5276_v2  ;;  %v10683_v2 = vld [vmem:[%s15141_s12 + $0x60] sm:$0xff]  }
 0xa4a   :  { %5662 = vmatprep.subr.bf16.mxu0 %v5279_v22  ;;  %11333 = vmatprep.subr.bf16.mxu1 %v10683_v2  ;;  %v10675_v22 = vld [vmem:[%s15141_s12 + $0x20] sm:$0xff]  }
 0xa4b   :  { %11335 = vmatpush3.bf16.msra.mxu1 %v10675_v22 }
 0xa4d   :  { %5663 = vmatpush1.bf16.msra.mxu0 %v5278_v33  ;;  %v10684_v33 = vld [vmem:[%s15141_s12 + $0x68] sm:$0xff]  }
 0xa4e   :  { %5664 = vmatprep.subr.bf16.mxu0 %v5281_v5  ;;  %11337 = vmatprep.subr.bf16.mxu1 %v10684_v33  ;;  %v10676_v5 = vld [vmem:[%s15141_s12 + $0x28] sm:$0xff]  }
 0xa4f   :  { %11339 = vmatpush3.bf16.msra.mxu1 %v10676_v5 }
 0xa51   :  { %5665 = vmatpush1.bf16.msra.mxu0 %v5280_v30  ;;  %v10685_v30 = vld [vmem:[%s15141_s12 + $0x70] sm:$0xff]  }
 0xa52   :  { %5666 = vmatprep.subr.bf16.mxu0 %v5283_v21  ;;  %11341 = vmatprep.subr.bf16.mxu1 %v10685_v30  ;;  %v10677_v21 = vld [vmem:[%s15141_s12 + $0x30] sm:$0xff]  }
 0xa53   :  { %11343 = vmatpush3.bf16.msra.mxu1 %v10677_v21 }
 0xa55   :  { %5667 = vmatpush1.bf16.msra.mxu0 %v5282_v27  ;;  %v10686_v27 = vld [vmem:[%s15141_s12 + $0x78] sm:$0xff]  }
 0xa56   :  { %5668 = vmatprep.subr.bf16.mxu0 %v5285_v7  ;;  %11345 = vmatprep.subr.bf16.mxu1 %v10686_v27  ;;  %v10678_v7 = vld [vmem:[%s15141_s12 + $0x38] sm:$0xff]  }
 0xa57   :  { %11347 = vmatpush3.bf16.msra.mxu1 %v10678_v7 }
 0xa58   :  { %11349 = vmatprep.subr.bf16.mxu1 %v14218_v57 }
 0xa59   :  { %5669 = vmatpush1.bf16.msra.mxu0 %v5284_v9 }
 0xa5a   :  { %5670 = vmatprep.subr.bf16.mxu0 %v5287_v31 }
 0xa5d   :  { %5671 = vmatpush1.bf16.msra.mxu0 %v5286_v26 }
 0xa5e   :  { %5672 = vmatprep.subr.bf16.mxu0 %v5289_v19 }
 0xa61   :  { %5673 = vmatpush1.bf16.msra.mxu0 %v5288_v11 }
 0xa62   :  { %5674 = vmatprep.subr.bf16.mxu0 %v5291_v10 }
 0xa65   :  { %5675 = vmatpush1.bf16.msra.mxu0 %v5290_v1 }
 0xa68   :  { %5677 = vmatmul.mubr.bf16.vlgmr.msra.gmra.mrb[24].mxu0 %v15145_v14 }
 0xb3b   :  { %v14267_v37 = vpop.f32.mrb[24].mxu0 }
 0xb3c   :  { %v14269_v25 = vpop.f32.mrb[25].mxu0  ;;  %v5701_v31 = vmul.f32 %v14267_v37, %v14267_v37 }
 0xb3d   :  { %v14271_v9 = vpop.f32.mrb[26].mxu0  ;;  %v5702_v57 = vmul.f32 %v14269_v25, %v14269_v25 }
 0xb3e   :  { %v5687_v26 = vadd.f32 %v14271_v9, %v14267_v37  ;;  %v5703_v19 = vmul.f32 %v14271_v9, %v14271_v9  ;;  %v14279_v11 = vpop.f32.mrb[27].mxu0 }
 0xb3f   :  { %v5694_v10 = vadd.f32 %v14279_v11, %v14269_v25  ;;  %v5704_v1 = vmul.f32 %v14279_v11, %v14279_v11 }
 0xb40   :  { %v5688_v14 = vrot.slane %v5687_v26, 4  ;;  %v5705_v32 = vadd.f32 %v5703_v19, %v5701_v31 }
 0xb41   :  { %v5695_v36 = vrot.slane %v5694_v10, 4  ;;  %v5712_v20 = vadd.f32 %v5704_v1, %v5702_v57 }
 0xb42   :  { %v5689_v13 = vadd.f32 %v5688_v14, %v5687_v26 }
 0xb43   :  { %v5696_v35 = vadd.f32 %v5695_v36, %v5694_v10  ;;  %v5713_v29 = vrot.slane %v5712_v20, 4 }
 0xb44   :  { %v5690_v40 = vrot.slane %v5689_v13, 2 }
 0xb45   :  { %v5697_v47 = vrot.slane %v5696_v35, 2  ;;  %v5714_v48 = vadd.f32 %v5713_v29, %v5712_v20 }
 0xb46   :  { %v5691_v23 = vadd.f32 %v5690_v40, %v5689_v13  ;;  %v5706_v40 = vrot.slane %v5705_v32, 4 }
 0xb47   :  { %v5698_v24 = vadd.f32 %v5697_v47, %v5696_v35  ;;  %v5715_v3 = vrot.slane %v5714_v48, 2 }
 0xb48   :  { %v5692_v4 = vrot.slane %v5691_v23, 1 }
 0xb49   :  { %v5699_v59 = vrot.slane %v5698_v24, 1  ;;  %v5716_v60 = vadd.f32 %v5715_v3, %v5714_v48  ;;  %v11932_v48 = vld [vmem:[#allocation17 + $0x4] ss:$8 sps:$4 sm:$0xff]  }
 0xb4a   :  { %v5693_v41 = vadd.f32 %v5692_v4, %v5691_v23  ;;  %v5707_v23 = vadd.f32 %v5706_v40, %v5705_v32  ;;  %11381 = vmatprep.subr.bf16.mxu0 %v11932_v48 }
 0xb4b   :  { %v5700_v49 = vadd.f32 %v5699_v59, %v5698_v24  ;;  %v5717_v50 = vrot.slane %v5716_v60, 1  ;;  %v11937_v59 = vld [vmem:[#allocation17 + $0x10] ss:$8 sps:$4 sm:$0xff]  }
 0xb4c   :  { %v5708_v24 = vrot.slane %v5707_v23, 2 }
 0xb4d   :  { %5847 = vmatprep.mubr.f32.mxu1 %v5700_v49  ;;  %v5718_v42 = vadd.f32 %v5717_v50, %v5716_v60  ;;  %v11934_v49 = vld [vmem:[#allocation17] ss:$8 sps:$4 sm:$0xff]   ;;  %v11935_v50 = vld [vmem:[#allocation17 + $0x14] ss:$8 sps:$4 sm:$0xff]   ;;  %v12481_v60 = vmov 0.0  }
 0xb4e   :  { %5848 = vmatmul.mubr.f32.vlgmr.msra.gmra.mrb[80].mxu1 %v5693_v41  ;;  %v5709_v41 = vadd.f32 %v5708_v24, %v5707_v23  ;;  %11383 = vmatpush1.bf16.msra.mxu0 %v11934_v49 }
 0xb4f   :  { %11351 = vmatpush3.bf16.msra.mxu1 %v14221_v38  ;;  %5918 = vmatprep.mubr.f32.mxu1 %v5718_v42 }
 0xb50   :  { %11353 = vmatprep.subr.bf16.mxu1 %v14224_v39  ;;  %v5710_v42 = vrot.slane %v5709_v41, 1  ;;  %11385 = vmatprep.subr.bf16.mxu0 %v11935_v50 }
 0xb51   :  { %6013 = vmatprep.mubr.f32.mxu0 %v12481_v60 }
 0xb52   :  { %v5711_v47 = vadd.f32 %v5710_v42, %v5709_v41  ;;  %11387 = vmatpush1.bf16.msra.mxu0 %v11937_v59 }
 0xb53   :  { %11355 = vmatpush3.bf16.msra.mxu1 %v14230_v55 }
 0xb54   :  { %11357 = vmatprep.subr.bf16.mxu1 %v14233_v34  ;;  %v5927_v34 = vld [vmem:[%s15146_s11] sm:$0x1] }
 0xb57   :  { %11359 = vmatpush3.bf16.msra.mxu1 %v14238_v12 }
 0xb58   :  { %11361 = vmatprep.subr.bf16.mxu1 %v14241_v28 }
 0xb5b   :  { %11363 = vmatpush3.bf16.msra.mxu1 %v14246_v18  ;;  %v5931_v18 = vld [vmem:[%s15147_s9] sm:$0x1] }
 0xb5c   :  { %11365 = vmatprep.subr.bf16.mxu1 %v10683_v2 }
 0xb5f   :  { %11367 = vmatpush3.bf16.msra.mxu1 %v10675_v22 }
 0xb60   :  { %11369 = vmatprep.subr.bf16.mxu1 %v10684_v33  ;;  %v6020_v33 = vlaneseq }
 0xb63   :  { %11371 = vmatpush3.bf16.msra.mxu1 %v10676_v5  ;;  %v6021_v5 = vshrl.u32 %v6020_v33, 7 }
 0xb64   :  { %11373 = vmatprep.subr.bf16.mxu1 %v10685_v30 }
 0xb65   :  { %v14300_v30 = vsub.s32 0, %v6021_v5 }
 0xb67   :  { %11375 = vmatpush3.bf16.msra.mxu1 %v10677_v21 }
 0xb68   :  { %11377 = vmatprep.subr.bf16.mxu1 %v10686_v27 }
 0xb6b   :  { %11379 = vmatpush3.bf16.msra.mxu1 %v10678_v7 }
 0xb6c   :  { %11389 = vmatprep.subr.bf16.mxu1 %v11932_v48 }
 0xb6e   :  { %5919 = vmatmul.mubr.f32.vlgmr.msra.gmra.mrb[82].mxu1 %v5711_v47 }
 0xb6f   :  { %11391 = vmatpush1.bf16.msra.mxu1 %v11934_v49  ;;  %6099 = vmatprep.mubr.f32.mxu1 %v12481_v60 }
 0xb70   :  { %11393 = vmatprep.subr.bf16.mxu1 %v11935_v50 }
 0xb73   :  { %11395 = vmatpush1.bf16.msra.mxu1 %v11937_v59 }
 0xc21   :  { %v10773_v3 = vpop.f32.mrb[80].mxu1 }
 0xc22   :  { %v10774_v4 = vpop.f32.mrb[81].mxu1 }
 0xc23   :  { %v10775_v38 = vadd.f32 %v10774_v4, %v10773_v3 }
 0xc25   :  { %v5853_v35 = vmul.f32 0.0078125, %v10775_v38 }
 0xc27   :  { %v5925_v36 = vmul.f32 %v5853_v35, %v5853_v35 }
 0xc41   :  { %v10808_v29 = vpop.f32.mrb[82].mxu1 }
 0xc42   :  { %v10809_v32 = vpop.f32.mrb[83].mxu1 }
 0xc43   :  { %v10810_v20 = vadd.f32 %v10809_v32, %v10808_v29 }
 0xc45   :  { %v5924_v13 = vmul.f32 0.0078125, %v10810_v20 }
 0xc47   :  { %v5926_v39 = vsub.f32 %v5924_v13, %v5925_v36 }
 0xc49   :  { %v5928_v55 = vadd.f32 1e-05, %v5926_v39 }
 0xc4b   :  { %11938 = vrsqrt.f32 %v5928_v55 }
 0xc55   :  { %v11939_v12 = vpop.eup %11938 }
 0xc56   :  { %v5930_v28 = vmul.f32 %v11939_v12, %v5927_v34 }
 0xc58   :  { %10283 = vmatmul.mubr.msk.f32.vlgmr.msra.gmra.mrb[28].mxu0 %vm4072_vm9, %v5930_v28  ;;  %v5932_v2 = vmul.f32 %v5930_v28, %v5853_v35 }
 0xc5a   :  { %v5933_v22 = vsub.f32 %v5931_v18, %v5932_v2 }
 0xc5c   :  { %10284 = vmatmul.mubr.msk.f32.vlgmr.msra.gmra.mrb[84].mxu1 %vm4072_vm9, %v5933_v22 }
 0xd2b   :  { %v6015_v21 = vpop.f32.mrb[28].mxu0 }
 0xd2c   :  { %v6023_v27 = vrot.slane %v6015_v21, %v14300_v30  ;;  %v6017_v7 = vpop.f32.mrb[29].mxu0 }
 0xd2d   :  { %v6027_v31 = vrot.slane %v6017_v7, %v14300_v30 }
 0xd2e   :  { %v6028_v26 = vmul.f32 %v6023_v27, %v14267_v37  ;;  %v6030_v19 = vmul.f32 %v6023_v27, %v14271_v9 }
 0xd2f   :  { %v6029_v57 = vmul.f32 %v6027_v31, %v14269_v25  ;;  %v6031_v10 = vmul.f32 %v6027_v31, %v14279_v11  ;;  %v6101_v1 = vpop.f32.mrb[84].mxu1 }
 0xd30   :  { %v6109_v14 = vrot.slane %v6101_v1, %v14300_v30  ;;  %v6103_v40 = vpop.f32.mrb[85].mxu1 }
 0xd31   :  { %v6113_v23 = vrot.slane %v6103_v40, %v14300_v30 }
 0xd32   :  { %v6114_v24 = vadd.f32 %v6109_v14, %v6028_v26  ;;  %v6116_v41 = vadd.f32 %v6109_v14, %v6030_v19 }
 0xd33   :  { %v6115_v42 = vadd.f32 %v6113_v23, %v6029_v57  ;;  %v6117_v47 = vadd.f32 %v6113_v23, %v6031_v10 }
 0xd34   :  { %vm6118_vm9 = vcmp.ge.f32.partialorder %v6114_v24, 0.0  ;;  %vm6120_vm12 = vcmp.ge.f32.partialorder %v6116_v41, 0.0  ;;  %v6122_v48 = vmul.f32 0.2, %v6114_v24  ;;  %v6124_v37 = vmul.f32 0.2, %v6116_v41 }
 0xd35   :  { %vm6119_vm13 = vcmp.ge.f32.partialorder %v6115_v42, 0.0  ;;  %vm6121_vm14 = vcmp.ge.f32.partialorder %v6117_v47, 0.0  ;;  %v6123_v9 = vmul.f32 0.2, %v6115_v42  ;;  %v6125_v25 = vmul.f32 0.2, %v6117_v47 }
 0xd36   :  { %v6126_v49 = vsel %vm6118_vm9, %v6114_v24, %v6122_v48  ;;  %v6128_v11 = vsel %vm6120_vm12, %v6116_v41, %v6124_v37 }
 0xd37   :  { %v6127_v50 = vsel %vm6119_vm13, %v6115_v42, %v6123_v9  ;;  %v6129_v59 = vsel %vm6121_vm14, %v6117_v47, %v6125_v25 }
 0xd38   :  { %12413 = dma.done.wait [#allocation7 + $0x2], 16384 }
 0xd39   :  { %12414 = vsyncadd [#allocation7 + $0x2], 4294950912  ;;  %v6133_v3 = vpack.c.bf16 %v6129_v59, %v6127_v50  ;;  %v6132_v4 = vpack.c.bf16 %v6128_v11, %v6126_v49  ;;  %6299 = vmatprep.mubr.bf16.mxu1 %v15118_v16  ;;  %vm6263_vm15 = vcmask 130048   ;;  %v6262_v38 = vld [vmem:[#allocation19] sm:$0xf]  ;;  %v6134_v36 = vld [vmem:[#allocation4] sm:$0xff] }
 0xd3a   :  { %v6311_v35 = vld [vmem:[#allocation19 + $0x4] sm:$0xf]  ;;  %v6359_v29 = vld [vmem:[#allocation19 + $0x8] sm:$0xf]  ;;  %v6407_v20 = vld [vmem:[#allocation19 + $0xc] sm:$0xf] }
 0xd3b   :  { %6267 = vmatprep.subr.bf16.mxu1 %v6133_v3  ;;  %v6135_v32 = vld [vmem:[#allocation4 + $0x8] sm:$0xff]  ;;  %v6137_v13 = vld [vmem:[#allocation4 + $0x18] sm:$0xff]  ;;  %v6136_v39 = vld [vmem:[#allocation4 + $0x10] sm:$0xff]  ;;  %s15148_s30 = sld [smem:[#allocation61_spill]]  ;;  %s15149_s17 = sld [smem:[#allocation62_spill]] }
 0xd3c   :  { %6268 = vmatpush1.bf16.msra.mxu1 %v6132_v4  ;;  %v6139_v55 = vld [vmem:[#allocation4 + $0x28] sm:$0xff]  ;;  %v6138_v34 = vld [vmem:[#allocation4 + $0x20] sm:$0xff]  ;;  %v6141_v12 = vld [vmem:[#allocation4 + $0x38] sm:$0xff] }
 0xd3d   :  { %6315 = vmatprep.subr.bf16.mxu1 %v6133_v3  ;;  %v6140_v28 = vld [vmem:[#allocation4 + $0x30] sm:$0xff]  ;;  %v6143_v18 = vld [vmem:[#allocation4 + $0x48] sm:$0xff]  ;;  %v6142_v2 = vld [vmem:[#allocation4 + $0x40] sm:$0xff] }
 0xd3e   :  { %v6145_v22 = vld [vmem:[#allocation4 + $0x58] sm:$0xff]  ;;  %v6144_v33 = vld [vmem:[#allocation4 + $0x50] sm:$0xff]  ;;  %v6147_v5 = vld [vmem:[#allocation4 + $0x68] sm:$0xff] }
 0xd3f   :  { %10285 = vmatmul.mubr.msk.bf16.vlgmr.msra.gmra.mrb[88].mxu1 %vm6263_vm15, %v6262_v38  ;;  %v6146_v21 = vld [vmem:[#allocation4 + $0x60] sm:$0xff]  ;;  %v6149_v27 = vld [vmem:[#allocation4 + $0x78] sm:$0xff]  ;;  %v6148_v7 = vld [vmem:[#allocation4 + $0x70] sm:$0xff] }
 0xd40   :  { %6316 = vmatpush1.bf16.msra.mxu1 %v6132_v4  ;;  %6347 = vmatprep.mubr.bf16.mxu1 %v15118_v16  ;;  %v6151_v31 = vld [vmem:[#allocation4 + $0x88] sm:$0xff]  ;;  %v6150_v26 = vld [vmem:[#allocation4 + $0x80] sm:$0xff]  ;;  %v6153_v19 = vld [vmem:[#allocation4 + $0x98] sm:$0xff] }
 0xd41   :  { %6363 = vmatprep.subr.bf16.mxu1 %v6133_v3  ;;  %v6152_v57 = vld [vmem:[#allocation4 + $0x90] sm:$0xff]  ;;  %v6155_v10 = vld [vmem:[#allocation4 + $0xa8] sm:$0xff]  ;;  %v6154_v1 = vld [vmem:[#allocation4 + $0xa0] sm:$0xff] }
 0xd42   :  { %v6157_v14 = vld [vmem:[#allocation4 + $0xb8] sm:$0xff]  ;;  %v6156_v40 = vld [vmem:[#allocation4 + $0xb0] sm:$0xff]  ;;  %v6159_v23 = vld [vmem:[#allocation4 + $0xc8] sm:$0xff] }
 0xd43   :  { %v6158_v24 = vld [vmem:[#allocation4 + $0xc0] sm:$0xff]  ;;  %v6161_v41 = vld [vmem:[#allocation4 + $0xd8] sm:$0xff]  ;;  %v6160_v42 = vld [vmem:[#allocation4 + $0xd0] sm:$0xff] }
 0xd44   :  { %v6163_v47 = vld [vmem:[#allocation4 + $0xe8] sm:$0xff]  ;;  %v6162_v48 = vld [vmem:[#allocation4 + $0xe0] sm:$0xff]  ;;  %v6165_v37 = vld [vmem:[#allocation4 + $0xf8] sm:$0xff] }
 0xd45   :  { %v6164_v9 = vld [vmem:[#allocation4 + $0xf0] sm:$0xff]  ;;  %v6167_v25 = vld [vmem:[#allocation4 + $0x108] sm:$0xff]  ;;  %v6166_v38 = vld [vmem:[#allocation4 + $0x100] sm:$0xff] }
 0xd47   :  { %10286 = vmatmul.mubr.msk.bf16.vlgmr.msra.gmra.mrb[92].mxu1 %vm6263_vm15, %v6311_v35  ;;  %v6169_v35 = vld [vmem:[#allocation4 + $0x118] sm:$0xff] }
 0xd48   :  { %6364 = vmatpush1.bf16.msra.mxu1 %v6132_v4  ;;  %6395 = vmatprep.mubr.bf16.mxu1 %v15118_v16 }
 0xd49   :  { %6411 = vmatprep.subr.bf16.mxu1 %v6133_v3 }
 0xd4f   :  { %10287 = vmatmul.mubr.msk.bf16.vlgmr.msra.gmra.mrb[96].mxu1 %vm6263_vm15, %v6359_v29  ;;  %v6168_v29 = vld [vmem:[#allocation4 + $0x110] sm:$0xff] }
 0xd50   :  { %6412 = vmatpush1.bf16.msra.mxu1 %v6132_v4  ;;  %6443 = vmatprep.mubr.bf16.mxu1 %v15118_v16 }
 0xd51   :  { %6454 = vmatprep.subr.bf16.mxu1 %v6135_v32  ;;  %v6171_v32 = vld [vmem:[#allocation4 + $0x128] sm:$0xff] }
 0xd57   :  { %10288 = vmatmul.mubr.msk.bf16.vlgmr.msra.gmra.mrb[100].mxu1 %vm6263_vm15, %v6407_v20 }
 0xd58   :  { %6455 = vmatpush1.bf16.msra.mxu1 %v6134_v36 }
 0xd59   :  { %6456 = vmatprep.subr.bf16.mxu1 %v6137_v13 }
 0xd5c   :  { %6457 = vmatpush1.bf16.msra.mxu1 %v6136_v39 }
 0xd5d   :  { %6458 = vmatprep.subr.bf16.mxu1 %v6139_v55  ;;  %v6170_v55 = vld [vmem:[#allocation4 + $0x120] sm:$0xff] }
 0xd60   :  { %6459 = vmatpush1.bf16.msra.mxu1 %v6138_v34 }
 0xd61   :  { %6460 = vmatprep.subr.bf16.mxu1 %v6141_v12  ;;  %v6173_v12 = vld [vmem:[#allocation4 + $0x138] sm:$0xff] }
 0xd64   :  { %6461 = vmatpush1.bf16.msra.mxu1 %v6140_v28  ;;  %v6172_v28 = vld [vmem:[#allocation4 + $0x130] sm:$0xff] }
 0xd65   :  { %6462 = vmatprep.subr.bf16.mxu1 %v6143_v18  ;;  %v6175_v18 = vld [vmem:[#allocation4 + $0x148] sm:$0xff] }
 0xd68   :  { %6463 = vmatpush1.bf16.msra.mxu1 %v6142_v2 }
 0xd69   :  { %6464 = vmatprep.subr.bf16.mxu1 %v6145_v22 }
 0xd6c   :  { %6465 = vmatpush1.bf16.msra.mxu1 %v6144_v33 }
 0xd6d   :  { %6466 = vmatprep.subr.bf16.mxu1 %v6147_v5  ;;  %v6174_v5 = vld [vmem:[#allocation4 + $0x140] sm:$0xff] }
 0xd70   :  { %6467 = vmatpush1.bf16.msra.mxu1 %v6146_v21 }
 0xd71   :  { %6468 = vmatprep.subr.bf16.mxu1 %v6149_v27  ;;  %v6177_v27 = vld [vmem:[#allocation4 + $0x158] sm:$0xff] }
 0xd74   :  { %6469 = vmatpush1.bf16.msra.mxu1 %v6148_v7  ;;  %v6176_v7 = vld [vmem:[#allocation4 + $0x150] sm:$0xff] }
 0xd75   :  { %6470 = vmatprep.subr.bf16.mxu1 %v6151_v31  ;;  %v6179_v31 = vld [vmem:[#allocation4 + $0x168] sm:$0xff] }
 0xd78   :  { %6471 = vmatpush1.bf16.msra.mxu1 %v6150_v26 }
 0xd79   :  { %6472 = vmatprep.subr.bf16.mxu1 %v6153_v19 }
 0xd7c   :  { %6473 = vmatpush1.bf16.msra.mxu1 %v6152_v57 }
 0xd7d   :  { %6474 = vmatprep.subr.bf16.mxu1 %v6155_v10  ;;  %v6178_v10 = vld [vmem:[#allocation4 + $0x160] sm:$0xff] }
 0xd80   :  { %6475 = vmatpush1.bf16.msra.mxu1 %v6154_v1 }
 0xd81   :  { %6476 = vmatprep.subr.bf16.mxu1 %v6157_v14  ;;  %v6181_v14 = vld [vmem:[#allocation4 + $0x178] sm:$0xff] }
 0xd84   :  { %6477 = vmatpush1.bf16.msra.mxu1 %v6156_v40  ;;  %v6180_v40 = vld [vmem:[#allocation4 + $0x170] sm:$0xff] }
 0xd85   :  { %6478 = vmatprep.subr.bf16.mxu1 %v6159_v23  ;;  %v6183_v23 = vld [vmem:[#allocation4 + $0x188] sm:$0xff] }
 0xd88   :  { %6479 = vmatpush1.bf16.msra.mxu1 %v6158_v24  ;;  %v6182_v24 = vld [vmem:[#allocation4 + $0x180] sm:$0xff] }
 0xd89   :  { %6480 = vmatprep.subr.bf16.mxu1 %v6161_v41  ;;  %v6185_v41 = vld [vmem:[#allocation4 + $0x198] sm:$0xff] }
 0xd8c   :  { %6481 = vmatpush1.bf16.msra.mxu1 %v6160_v42  ;;  %v6184_v42 = vld [vmem:[#allocation4 + $0x190] sm:$0xff] }
 0xd8d   :  { %6482 = vmatprep.subr.bf16.mxu1 %v6163_v47  ;;  %v6187_v47 = vld [vmem:[#allocation4 + $0x1a8] sm:$0xff] }
 0xd90   :  { %6483 = vmatpush1.bf16.msra.mxu1 %v6162_v48  ;;  %v6186_v48 = vld [vmem:[#allocation4 + $0x1a0] sm:$0xff] }
 0xd91   :  { %6484 = vmatprep.subr.bf16.mxu1 %v6165_v37  ;;  %v6189_v37 = vld [vmem:[#allocation4 + $0x1b8] sm:$0xff] }
 0xd94   :  { %6485 = vmatpush1.bf16.msra.mxu1 %v6164_v9  ;;  %v6188_v9 = vld [vmem:[#allocation4 + $0x1b0] sm:$0xff] }
 0xd95   :  { %6495 = vmatprep.subr.bf16.mxu1 %v6167_v25  ;;  %v6191_v25 = vld [vmem:[#allocation4 + $0x1c8] sm:$0xff] }
 0xe12   :  { %v6301_v49 = vpop.f32.mrb[88].mxu1 }
 0xe13   :  { %v6303_v11 = vpop.f32.mrb[89].mxu1  ;;  %v6308_v3 = vpack.c.bf16 %v6301_v49, %v6301_v49  ;;  %v6190_v49 = vld [vmem:[#allocation4 + $0x1c0] sm:$0xff] }
 0xe14   :  { %v6309_v50 = vpack.c.bf16 %v6303_v11, %v6303_v11  ;;  %v6305_v59 = vpop.f32.mrb[90].mxu1  ;;  %v6193_v11 = vld [vmem:[#allocation4 + $0x1d8] sm:$0xff] }
 0xe15   :  { %v6306_v4 = vpop.f32.mrb[91].mxu1  ;;  %v6195_v59 = vld [vmem:[#allocation4 + $0x1e8] sm:$0xff] }
 0xe16   :  { %6486 = vmatprep.mubr.bf16.mxu1 %v6309_v50  ;;  %v6192_v50 = vld [vmem:[#allocation4 + $0x1d0] sm:$0xff]  ;;  %v6197_v4 = vld [vmem:[#allocation4 + $0x1f8] sm:$0xff] }
 0xe17   :  { %6487 = vmatmul.mubr.bf16.vlgmr.msra.gmra.mrb[104].mxu1 %v6308_v3  ;;  %v6194_v3 = vld [vmem:[#allocation4 + $0x1e0] sm:$0xff] }
 0xe18   :  { %6496 = vmatpush1.bf16.msra.mxu1 %v6166_v38  ;;  %v6196_v38 = vld [vmem:[#allocation4 + $0x1f0] sm:$0xff] }
 0xe19   :  { %6497 = vmatprep.subr.bf16.mxu1 %v6169_v35  ;;  %v6199_v35 = vld [vmem:[#allocation4 + $0x208] sm:$0xff] }
 0xe1a   :  { %v14318_v20 = vpop.f32.mrb[92].mxu1 }
 0xe1b   :  { %v6351_v36 = vpop.f32.mrb[93].mxu1 }
 0xe1c   :  { %6498 = vmatpush1.bf16.msra.mxu1 %v6168_v29  ;;  %v6357_v13 = vpack.c.bf16 %v6351_v36, %v6351_v36  ;;  %v6353_v39 = vpop.f32.mrb[94].mxu1  ;;  %v6356_v29 = vpack.c.bf16 %v14318_v20, %v14318_v20  ;;  %v6198_v36 = vld [vmem:[#allocation4 + $0x200] sm:$0xff]  ;;  %v6200_v20 = vld [vmem:[#allocation4 + $0x210] sm:$0xff] }
 0xe1d   :  { %6499 = vmatprep.subr.bf16.mxu1 %v6171_v32  ;;  %v6354_v34 = vpop.f32.mrb[95].mxu1  ;;  %v14333_v39 = vld [vmem:[%s15148_s30 + $0x40] sm:$0xff]  }
 0xe1e   :  { %6527 = vmatprep.mubr.bf16.mxu1 %v6357_v13  ;;  %v6201_v13 = vld [vmem:[#allocation4 + $0x218] sm:$0xff]  ;;  %v14339_v34 = vld [vmem:[%s15148_s30 + $0x48] sm:$0xff]   ;;  %11397 = vmatprep.subr.bf16.mxu0 %v14333_v39 }
 0xe20   :  { %6500 = vmatpush1.bf16.msra.mxu1 %v6170_v55  ;;  %v14336_v55 = vld [vmem:[%s15148_s30] sm:$0xff]  }
 0xe21   :  { %6501 = vmatprep.subr.bf16.mxu1 %v6173_v12  ;;  %v6203_v12 = vld [vmem:[#allocation4 + $0x228] sm:$0xff]  ;;  %11399 = vmatpush3.bf16.msra.mxu0 %v14336_v55 }
 0xe22   :  { %v14320_v2 = vpop.f32.mrb[96].mxu1  ;;  %11401 = vmatprep.subr.bf16.mxu0 %v14339_v34 }
 0xe23   :  { %v14322_v22 = vpop.f32.mrb[97].mxu1 }
 0xe24   :  { %6502 = vmatpush1.bf16.msra.mxu1 %v6172_v28  ;;  %v6401_v33 = vpop.f32.mrb[98].mxu1  ;;  %v6405_v32 = vpack.c.bf16 %v14322_v22, %v14322_v22  ;;  %v14345_v28 = vld [vmem:[%s15148_s30 + $0x8] sm:$0xff]   ;;  %v6202_v22 = vld [vmem:[#allocation4 + $0x220] sm:$0xff] }
 0xe25   :  { %6503 = vmatprep.subr.bf16.mxu1 %v6175_v18  ;;  %v6402_v21 = vpop.f32.mrb[99].mxu1  ;;  %v14348_v18 = vld [vmem:[%s15148_s30 + $0x50] sm:$0xff]   ;;  %v6205_v33 = vld [vmem:[#allocation4 + $0x238] sm:$0xff]  ;;  %11403 = vmatpush3.bf16.msra.mxu0 %v14345_v28 }
 0xe26   :  { %11405 = vmatprep.subr.bf16.mxu0 %v14348_v18  ;;  %v14356_v21 = vld [vmem:[%s15148_s30 + $0x58] sm:$0xff]  }
 0xe28   :  { %6504 = vmatpush1.bf16.msra.mxu1 %v6174_v5  ;;  %v14353_v5 = vld [vmem:[%s15148_s30 + $0x10] sm:$0xff]  }
 0xe29   :  { %6505 = vmatprep.subr.bf16.mxu1 %v6177_v27  ;;  %v6204_v27 = vld [vmem:[#allocation4 + $0x230] sm:$0xff]  ;;  %11407 = vmatpush3.bf16.msra.mxu0 %v14353_v5 }
 0xe2a   :  { %v14324_v26 = vpop.f32.mrb[100].mxu1  ;;  %11409 = vmatprep.subr.bf16.mxu0 %v14356_v21 }
 0xe2b   :  { %v14326_v19 = vpop.f32.mrb[101].mxu1 }
 0xe2c   :  { %6506 = vmatpush1.bf16.msra.mxu1 %v6176_v7  ;;  %v6449_v57 = vpop.f32.mrb[102].mxu1  ;;  %v6207_v7 = vld [vmem:[#allocation4 + $0x248] sm:$0xff] }
 0xe2d   :  { %6507 = vmatprep.subr.bf16.mxu1 %v6179_v31  ;;  %v6450_v1 = vpop.f32.mrb[103].mxu1  ;;  %v14361_v31 = vld [vmem:[%s15148_s30 + $0x18] sm:$0xff]   ;;  %v14364_v57 = vld [vmem:[%s15148_s30 + $0x60] sm:$0xff]  }
 0xe2e   :  { %v6209_v1 = vld [vmem:[#allocation4 + $0x258] sm:$0xff]  ;;  %11411 = vmatpush3.bf16.msra.mxu0 %v14361_v31 }
 0xe2f   :  { %11413 = vmatprep.subr.bf16.mxu0 %v14364_v57 }
 0xe30   :  { %6508 = vmatpush1.bf16.msra.mxu1 %v6178_v10  ;;  %v6206_v10 = vld [vmem:[#allocation4 + $0x240] sm:$0xff] }
 0xe31   :  { %6509 = vmatprep.subr.bf16.mxu1 %v6181_v14  ;;  %v14369_v14 = vld [vmem:[%s15148_s30 + $0x20] sm:$0xff]  }
 0xe32   :  { %11415 = vmatpush3.bf16.msra.mxu0 %v14369_v14 }
 0xe34   :  { %6510 = vmatpush1.bf16.msra.mxu1 %v6180_v40  ;;  %v6208_v40 = vld [vmem:[#allocation4 + $0x250] sm:$0xff] }
 0xe35   :  { %6511 = vmatprep.subr.bf16.mxu1 %v6183_v23  ;;  %v6211_v23 = vld [vmem:[#allocation4 + $0x268] sm:$0xff] }
 0xe38   :  { %6512 = vmatpush1.bf16.msra.mxu1 %v6182_v24  ;;  %v6210_v24 = vld [vmem:[#allocation4 + $0x260] sm:$0xff] }
 0xe39   :  { %6513 = vmatprep.subr.bf16.mxu1 %v6185_v41  ;;  %v6213_v41 = vld [vmem:[#allocation4 + $0x278] sm:$0xff] }
 0xe3c   :  { %6514 = vmatpush1.bf16.msra.mxu1 %v6184_v42  ;;  %v6212_v42 = vld [vmem:[#allocation4 + $0x270] sm:$0xff] }
 0xe3d   :  { %6515 = vmatprep.subr.bf16.mxu1 %v6187_v47  ;;  %v6215_v47 = vld [vmem:[#allocation4 + $0x288] sm:$0xff] }
 0xe40   :  { %6516 = vmatpush1.bf16.msra.mxu1 %v6186_v48  ;;  %v6214_v48 = vld [vmem:[#allocation4 + $0x280] sm:$0xff] }
 0xe41   :  { %6517 = vmatprep.subr.bf16.mxu1 %v6189_v37  ;;  %v6217_v37 = vld [vmem:[#allocation4 + $0x298] sm:$0xff] }
 0xe44   :  { %6518 = vmatpush1.bf16.msra.mxu1 %v6188_v9  ;;  %v6216_v9 = vld [vmem:[#allocation4 + $0x290] sm:$0xff] }
 0xe45   :  { %6519 = vmatprep.subr.bf16.mxu1 %v6191_v25  ;;  %v6219_v25 = vld [vmem:[#allocation4 + $0x2a8] sm:$0xff] }
 0xe48   :  { %6520 = vmatpush1.bf16.msra.mxu1 %v6190_v49  ;;  %v6218_v49 = vld [vmem:[#allocation4 + $0x2a0] sm:$0xff] }
 0xe49   :  { %6521 = vmatprep.subr.bf16.mxu1 %v6193_v11  ;;  %v6221_v11 = vld [vmem:[#allocation4 + $0x2b8] sm:$0xff] }
 0xe4c   :  { %6522 = vmatpush1.bf16.msra.mxu1 %v6192_v50  ;;  %v6220_v50 = vld [vmem:[#allocation4 + $0x2b0] sm:$0xff] }
 0xe4d   :  { %6523 = vmatprep.subr.bf16.mxu1 %v6195_v59  ;;  %v6223_v59 = vld [vmem:[#allocation4 + $0x2c8] sm:$0xff] }
 0xe50   :  { %6524 = vmatpush1.bf16.msra.mxu1 %v6194_v3  ;;  %v6222_v3 = vld [vmem:[#allocation4 + $0x2c0] sm:$0xff] }
 0xe51   :  { %6525 = vmatprep.subr.bf16.mxu1 %v6197_v4  ;;  %v6225_v4 = vld [vmem:[#allocation4 + $0x2d8] sm:$0xff] }
 0xe54   :  { %6526 = vmatpush1.bf16.msra.mxu1 %v6196_v38  ;;  %v6224_v38 = vld [vmem:[#allocation4 + $0x2d0] sm:$0xff] }
 0xe55   :  { %6536 = vmatprep.subr.bf16.mxu1 %v6199_v35  ;;  %v6227_v35 = vld [vmem:[#allocation4 + $0x2e8] sm:$0xff] }
 0xe57   :  { %6528 = vmatmul.mubr.bf16.vlgmr.msra.gmra.mrb[104].mxu1 %v6356_v29  ;;  %v6226_v29 = vld [vmem:[#allocation4 + $0x2e0] sm:$0xff] }
 0xe58   :  { %6537 = vmatpush1.bf16.msra.mxu1 %v6198_v36  ;;  %6568 = vmatprep.mubr.bf16.mxu1 %v6405_v32  ;;  %v6229_v32 = vld [vmem:[#allocation4 + $0x2f8] sm:$0xff]  ;;  %v6228_v36 = vld [vmem:[#allocation4 + $0x2f0] sm:$0xff] }
 0xe59   :  { %6538 = vmatprep.subr.bf16.mxu1 %v6201_v13  ;;  %v6231_v13 = vld [vmem:[#allocation4 + $0x308] sm:$0xff] }
 0xe5c   :  { %6539 = vmatpush1.bf16.msra.mxu1 %v6200_v20  ;;  %v6404_v20 = vpack.c.bf16 %v14320_v2, %v14320_v2  ;;  %v6236_v2 = vld [vmem:[#allocation4 + $0x330] sm:$0xff] }
 0xe5d   :  { %6540 = vmatprep.subr.bf16.mxu1 %v6203_v12  ;;  %v6453_v12 = vpack.c.bf16 %v14326_v19, %v14326_v19  ;;  %v6238_v19 = vld [vmem:[#allocation4 + $0x340] sm:$0xff] }
 0xe60   :  { %6541 = vmatpush1.bf16.msra.mxu1 %v6202_v22  ;;  %v6230_v22 = vld [vmem:[#allocation4 + $0x300] sm:$0xff] }
 0xe61   :  { %6542 = vmatprep.subr.bf16.mxu1 %v6205_v33  ;;  %v6233_v33 = vld [vmem:[#allocation4 + $0x318] sm:$0xff] }
 0xe64   :  { %6543 = vmatpush1.bf16.msra.mxu1 %v6204_v27  ;;  %v6232_v27 = vld [vmem:[#allocation4 + $0x310] sm:$0xff] }
 0xe65   :  { %6544 = vmatprep.subr.bf16.mxu1 %v6207_v7  ;;  %v6235_v7 = vld [vmem:[#allocation4 + $0x328] sm:$0xff] }
 0xe68   :  { %6545 = vmatpush1.bf16.msra.mxu1 %v6206_v10  ;;  %v6234_v10 = vld [vmem:[#allocation4 + $0x320] sm:$0xff] }
 0xe69   :  { %6546 = vmatprep.subr.bf16.mxu1 %v6209_v1  ;;  %v6237_v1 = vld [vmem:[#allocation4 + $0x338] sm:$0xff] }
 0xe6c   :  { %6547 = vmatpush1.bf16.msra.mxu1 %v6208_v40  ;;  %v6239_v40 = vld [vmem:[#allocation4 + $0x348] sm:$0xff] }
 0xe6d   :  { %6548 = vmatprep.subr.bf16.mxu1 %v6211_v23  ;;  %v6241_v23 = vld [vmem:[#allocation4 + $0x358] sm:$0xff] }
 0xe70   :  { %6549 = vmatpush1.bf16.msra.mxu1 %v6210_v24  ;;  %v6240_v24 = vld [vmem:[#allocation4 + $0x350] sm:$0xff] }
 0xe71   :  { %6550 = vmatprep.subr.bf16.mxu1 %v6213_v41  ;;  %v6243_v41 = vld [vmem:[#allocation4 + $0x368] sm:$0xff] }
 0xe74   :  { %6551 = vmatpush1.bf16.msra.mxu1 %v6212_v42  ;;  %v6242_v42 = vld [vmem:[#allocation4 + $0x360] sm:$0xff] }
 0xe75   :  { %6552 = vmatprep.subr.bf16.mxu1 %v6215_v47  ;;  %v6245_v47 = vld [vmem:[#allocation4 + $0x378] sm:$0xff] }
 0xe78   :  { %6553 = vmatpush1.bf16.msra.mxu1 %v6214_v48  ;;  %v6244_v48 = vld [vmem:[#allocation4 + $0x370] sm:$0xff] }
 0xe79   :  { %6554 = vmatprep.subr.bf16.mxu1 %v6217_v37  ;;  %v6247_v37 = vld [vmem:[#allocation4 + $0x388] sm:$0xff] }
 0xe7c   :  { %6555 = vmatpush1.bf16.msra.mxu1 %v6216_v9  ;;  %v6246_v9 = vld [vmem:[#allocation4 + $0x380] sm:$0xff] }
 0xe7d   :  { %6556 = vmatprep.subr.bf16.mxu1 %v6219_v25  ;;  %v6249_v25 = vld [vmem:[#allocation4 + $0x398] sm:$0xff] }
 0xe80   :  { %6557 = vmatpush1.bf16.msra.mxu1 %v6218_v49  ;;  %v6248_v49 = vld [vmem:[#allocation4 + $0x390] sm:$0xff] }
 0xe81   :  { %6558 = vmatprep.subr.bf16.mxu1 %v6221_v11  ;;  %v6251_v11 = vld [vmem:[#allocation4 + $0x3a8] sm:$0xff] }
 0xe84   :  { %6559 = vmatpush1.bf16.msra.mxu1 %v6220_v50  ;;  %v6250_v50 = vld [vmem:[#allocation4 + $0x3a0] sm:$0xff] }
 0xe85   :  { %6560 = vmatprep.subr.bf16.mxu1 %v6223_v59  ;;  %v6253_v59 = vld [vmem:[#allocation4 + $0x3b8] sm:$0xff] }
 0xe88   :  { %6561 = vmatpush1.bf16.msra.mxu1 %v6222_v3  ;;  %v6252_v3 = vld [vmem:[#allocation4 + $0x3b0] sm:$0xff] }
 0xe89   :  { %6562 = vmatprep.subr.bf16.mxu1 %v6225_v4  ;;  %v6255_v4 = vld [vmem:[#allocation4 + $0x3c8] sm:$0xff] }
 0xe8c   :  { %6563 = vmatpush1.bf16.msra.mxu1 %v6224_v38  ;;  %v6254_v38 = vld [vmem:[#allocation4 + $0x3c0] sm:$0xff] }
 0xe8d   :  { %6564 = vmatprep.subr.bf16.mxu1 %v6227_v35  ;;  %v6257_v35 = vld [vmem:[#allocation4 + $0x3d8] sm:$0xff] }
 0xe90   :  { %6565 = vmatpush1.bf16.msra.mxu1 %v6226_v29  ;;  %v6256_v29 = vld [vmem:[#allocation4 + $0x3d0] sm:$0xff] }
 0xe91   :  { %6566 = vmatprep.subr.bf16.mxu1 %v6229_v32  ;;  %v6259_v32 = vld [vmem:[#allocation4 + $0x3e8] sm:$0xff] }
 0xe94   :  { %6567 = vmatpush1.bf16.msra.mxu1 %v6228_v36  ;;  %v6258_v36 = vld [vmem:[#allocation4 + $0x3e0] sm:$0xff] }
 0xe95   :  { %6577 = vmatprep.subr.bf16.mxu1 %v6231_v13  ;;  %v6261_v13 = vld [vmem:[#allocation4 + $0x3f8] sm:$0xff] }
 0xe97   :  { %6569 = vmatmul.mubr.bf16.vlgmr.msra.gmra.mrb[104].mxu1 %v6404_v20  ;;  %v6260_v20 = vld [vmem:[#allocation4 + $0x3f0] sm:$0xff] }
 0xe98   :  { %6578 = vmatpush1.bf16.msra.mxu1 %v6230_v22  ;;  %6609 = vmatprep.mubr.bf16.mxu1 %v6453_v12  ;;  %v6452_v12 = vpack.c.bf16 %v14324_v26, %v14324_v26  ;;  %v10699_v22 = vld [vmem:[%s15148_s30 + $0x68] sm:$0xff]  }
 0xe99   :  { %6579 = vmatprep.subr.bf16.mxu1 %v6233_v33  ;;  %11417 = vmatprep.subr.bf16.mxu0 %v10699_v22  ;;  %v10691_v33 = vld [vmem:[%s15148_s30 + $0x28] sm:$0xff]  }
 0xe9a   :  { %11419 = vmatpush3.bf16.msra.mxu0 %v10691_v33 }
 0xe9c   :  { %6580 = vmatpush1.bf16.msra.mxu1 %v6232_v27  ;;  %v10700_v27 = vld [vmem:[%s15148_s30 + $0x70] sm:$0xff]  }
 0xe9d   :  { %6581 = vmatprep.subr.bf16.mxu1 %v6235_v7  ;;  %11421 = vmatprep.subr.bf16.mxu0 %v10700_v27  ;;  %v10692_v7 = vld [vmem:[%s15148_s30 + $0x30] sm:$0xff]  }
 0xe9e   :  { %11423 = vmatpush3.bf16.msra.mxu0 %v10692_v7 }
 0xea0   :  { %6582 = vmatpush1.bf16.msra.mxu1 %v6234_v10  ;;  %v10701_v10 = vld [vmem:[%s15148_s30 + $0x78] sm:$0xff]  }
 0xea1   :  { %6583 = vmatprep.subr.bf16.mxu1 %v6237_v1  ;;  %11425 = vmatprep.subr.bf16.mxu0 %v10701_v10  ;;  %v10693_v1 = vld [vmem:[%s15148_s30 + $0x38] sm:$0xff]  }
 0xea2   :  { %11427 = vmatpush3.bf16.msra.mxu0 %v10693_v1 }
 0xea3   :  { %11429 = vmatprep.subr.bf16.mxu0 %v14333_v39 }
 0xea4   :  { %6584 = vmatpush1.bf16.msra.mxu1 %v6236_v2 }
 0xea5   :  { %6585 = vmatprep.subr.bf16.mxu1 %v6239_v40 }
 0xea8   :  { %6586 = vmatpush1.bf16.msra.mxu1 %v6238_v19 }
 0xea9   :  { %6587 = vmatprep.subr.bf16.mxu1 %v6241_v23 }
 0xeac   :  { %6588 = vmatpush1.bf16.msra.mxu1 %v6240_v24 }
 0xead   :  { %6589 = vmatprep.subr.bf16.mxu1 %v6243_v41 }
 0xeb0   :  { %6590 = vmatpush1.bf16.msra.mxu1 %v6242_v42 }
 0xeb1   :  { %6591 = vmatprep.subr.bf16.mxu1 %v6245_v47 }
 0xeb4   :  { %6592 = vmatpush1.bf16.msra.mxu1 %v6244_v48 }
 0xeb5   :  { %6593 = vmatprep.subr.bf16.mxu1 %v6247_v37 }
 0xeb8   :  { %6594 = vmatpush1.bf16.msra.mxu1 %v6246_v9 }
 0xeb9   :  { %6595 = vmatprep.subr.bf16.mxu1 %v6249_v25 }
 0xebc   :  { %6596 = vmatpush1.bf16.msra.mxu1 %v6248_v49 }
 0xebd   :  { %6597 = vmatprep.subr.bf16.mxu1 %v6251_v11 }
 0xec0   :  { %6598 = vmatpush1.bf16.msra.mxu1 %v6250_v50 }
 0xec1   :  { %6599 = vmatprep.subr.bf16.mxu1 %v6253_v59 }
 0xec4   :  { %6600 = vmatpush1.bf16.msra.mxu1 %v6252_v3 }
 0xec5   :  { %6601 = vmatprep.subr.bf16.mxu1 %v6255_v4 }
 0xec8   :  { %6602 = vmatpush1.bf16.msra.mxu1 %v6254_v38 }
 0xec9   :  { %6603 = vmatprep.subr.bf16.mxu1 %v6257_v35 }
 0xecc   :  { %6604 = vmatpush1.bf16.msra.mxu1 %v6256_v29 }
 0xecd   :  { %6605 = vmatprep.subr.bf16.mxu1 %v6259_v32 }
 0xed0   :  { %6606 = vmatpush1.bf16.msra.mxu1 %v6258_v36 }
 0xed1   :  { %6607 = vmatprep.subr.bf16.mxu1 %v6261_v13 }
 0xed4   :  { %6608 = vmatpush1.bf16.msra.mxu1 %v6260_v20  ;;  %v11948_v20 = vld [vmem:[%s15149_s17 + $0x20] ss:$8 sps:$4 sm:$0xff]  }
 0xed7   :  { %6610 = vmatmul.mubr.bf16.vlgmr.msra.gmra.mrb[104].mxu1 %v6452_v12  ;;  %v11949_v12 = vld [vmem:[%s15149_s17 + $0x34] ss:$8 sps:$4 sm:$0xff]  }
 0xfaa   :  { %v14385_v2 = vpop.f32.mrb[104].mxu1 }
 0xfab   :  { %v6618_v40 = vrot.slane %v14385_v2, 4  ;;  %v14388_v26 = vpop.f32.mrb[105].mxu1  ;;  %v6630_v32 = vmul.f32 %v14385_v2, %v14385_v2 }
 0xfac   :  { %v6624_v19 = vrot.slane %v14388_v26, 4  ;;  %v6631_v23 = vmul.f32 %v14388_v26, %v14388_v26  ;;  %v6615_v24 = vpop.f32.mrb[106].mxu1 }
 0xfad   :  { %v6619_v41 = vadd.f32 %v6618_v40, %v14385_v2  ;;  %v6616_v42 = vpop.f32.mrb[107].mxu1  ;;  %v6632_v36 = vrot.slane %v6630_v32, 4 }
 0xfae   :  { %v6638_v47 = vrot.slane %v6631_v23, 4  ;;  %v6625_v48 = vadd.f32 %v6624_v19, %v14388_v26 }
 0xfaf   :  { %v6620_v37 = vrot.slane %v6619_v41, 2  ;;  %v6633_v13 = vadd.f32 %v6632_v36, %v6630_v32 }
 0xfb0   :  { %v6639_v39 = vadd.f32 %v6638_v47, %v6631_v23  ;;  %v6626_v9 = vrot.slane %v6625_v48, 2  ;;  %v6852_v47 = vld [vmem:[#allocation20] sm:$0x1] }
 0xfb1   :  { %v6621_v25 = vadd.f32 %v6620_v37, %v6619_v41 }
 0xfb2   :  { %v6627_v49 = vadd.f32 %v6626_v9, %v6625_v48  ;;  %v6640_v11 = vrot.slane %v6639_v39, 2  ;;  %v6856_v9 = vld [vmem:[#allocation22] sm:$0x1] }
 0xfb3   :  { %v6622_v50 = vrot.slane %v6621_v25, 1 }
 0xfb4   :  { %v6628_v59 = vrot.slane %v6627_v49, 1  ;;  %v6641_v3 = vadd.f32 %v6640_v11, %v6639_v39 }
 0xfb5   :  { %v6623_v35 = vadd.f32 %v6622_v50, %v6621_v25 }
 0xfb6   :  { %v6629_v4 = vadd.f32 %v6628_v59, %v6627_v49  ;;  %v6642_v38 = vrot.slane %v6641_v3, 1 }
 0xfb8   :  { %6772 = vmatprep.mubr.f32.mxu0 %v6629_v4  ;;  %v6643_v29 = vadd.f32 %v6642_v38, %v6641_v3 }
 0xfb9   :  { %6773 = vmatmul.mubr.f32.vlgmr.msra.gmra.mrb[30].mxu0 %v6623_v35 }
 0xfba   :  { %11431 = vmatpush3.bf16.msra.mxu0 %v14336_v55  ;;  %6843 = vmatprep.mubr.f32.mxu0 %v6643_v29  ;;  %v6634_v55 = vrot.slane %v6633_v13, 2 }
 0xfbb   :  { %11433 = vmatprep.subr.bf16.mxu0 %v14339_v34 }
 0xfbc   :  { %v6635_v34 = vadd.f32 %v6634_v55, %v6633_v13 }
 0xfbe   :  { %11435 = vmatpush3.bf16.msra.mxu0 %v14345_v28  ;;  %v6636_v28 = vrot.slane %v6635_v34, 1 }
 0xfbf   :  { %11437 = vmatprep.subr.bf16.mxu0 %v14348_v18 }
 0xfc0   :  { %v6637_v18 = vadd.f32 %v6636_v28, %v6635_v34 }
 0xfc2   :  { %11439 = vmatpush3.bf16.msra.mxu0 %v14353_v5  ;;  %v11940_v5 = vld [vmem:[%s15149_s17 + $0x4] ss:$8 sps:$4 sm:$0xff]  }
 0xfc3   :  { %11441 = vmatprep.subr.bf16.mxu0 %v14356_v21  ;;  %v11942_v21 = vld [vmem:[%s15149_s17] ss:$8 sps:$4 sm:$0xff]  }
 0xfc6   :  { %11443 = vmatpush3.bf16.msra.mxu0 %v14361_v31  ;;  %v11943_v31 = vld [vmem:[%s15149_s17 + $0x14] ss:$8 sps:$4 sm:$0xff]  }
 0xfc7   :  { %11445 = vmatprep.subr.bf16.mxu0 %v14364_v57  ;;  %v11945_v57 = vld [vmem:[%s15149_s17 + $0x10] ss:$8 sps:$4 sm:$0xff]  }
 0xfca   :  { %11447 = vmatpush3.bf16.msra.mxu0 %v14369_v14  ;;  %v11946_v14 = vld [vmem:[%s15149_s17 + $0x24] ss:$8 sps:$4 sm:$0xff]  }
 0xfcb   :  { %11449 = vmatprep.subr.bf16.mxu0 %v10699_v22  ;;  %v11951_v22 = vld [vmem:[%s15149_s17 + $0x30] ss:$8 sps:$4 sm:$0xff]  }
 0xfce   :  { %11451 = vmatpush3.bf16.msra.mxu0 %v10691_v33 }
 0xfcf   :  { %11453 = vmatprep.subr.bf16.mxu0 %v10700_v27 }
 0xfd2   :  { %11455 = vmatpush3.bf16.msra.mxu0 %v10692_v7 }
 0xfd3   :  { %11457 = vmatprep.subr.bf16.mxu0 %v10701_v10 }
 0xfd6   :  { %11459 = vmatpush3.bf16.msra.mxu0 %v10693_v1 }
 0xfd7   :  { %11461 = vmatprep.subr.bf16.mxu0 %v11940_v5 }
 0xfd9   :  { %6844 = vmatmul.mubr.f32.vlgmr.msra.gmra.mrb[32].mxu0 %v6637_v18 }
 0xfda   :  { %6950 = vmatprep.mubr.f32.mxu0 %v12481_v60  ;;  %11463 = vmatpush1.bf16.msra.mxu0 %v11942_v21 }
 0xfdb   :  { %11465 = vmatprep.subr.bf16.mxu0 %v11943_v31 }
 0xfde   :  { %11467 = vmatpush1.bf16.msra.mxu0 %v11945_v57 }
 0xfdf   :  { %11469 = vmatprep.subr.bf16.mxu0 %v11946_v14 }
 0xfe2   :  { %11471 = vmatpush1.bf16.msra.mxu0 %v11948_v20 }
 0xfe3   :  { %11473 = vmatprep.subr.bf16.mxu0 %v11949_v12 }
 0xfe6   :  { %11475 = vmatpush1.bf16.msra.mxu0 %v11951_v22 }
 0xfe7   :  { %11477 = vmatprep.subr.bf16.mxu0 %v11940_v5 }
0x108c   :  { %v10843_v33 = vpop.f32.mrb[30].mxu0 }
0x108d   :  { %v10844_v27 = vpop.f32.mrb[31].mxu0 }
0x108e   :  { %v10845_v7 = vadd.f32 %v10844_v27, %v10843_v33 }
0x1090   :  { %v6778_v10 = vmul.f32 0.03125, %v10845_v7 }
0x1092   :  { %v6850_v23 = vmul.f32 %v6778_v10, %v6778_v10 }
0x10ac   :  { %v10878_v1 = vpop.f32.mrb[32].mxu0 }
0x10ad   :  { %v10879_v40 = vpop.f32.mrb[33].mxu0 }
0x10ae   :  { %v10880_v19 = vadd.f32 %v10879_v40, %v10878_v1 }
0x10b0   :  { %v6849_v24 = vmul.f32 0.03125, %v10880_v19 }
0x10b2   :  { %v6851_v41 = vsub.f32 %v6849_v24, %v6850_v23 }
0x10b4   :  { %v6853_v42 = vadd.f32 1e-05, %v6851_v41 }
0x10b6   :  { %11952 = vrsqrt.f32 %v6853_v42 }
0x10c0   :  { %v11953_v48 = vpop.eup %11952 }
0x10c1   :  { %v6855_v37 = vmul.f32 %v11953_v48, %v6852_v47 }
0x10c3   :  { %10289 = vmatmul.mubr.msk.f32.vlgmr.msra.gmra.mrb[34].mxu0 %vm3134_vm0, %v6855_v37  ;;  %v6857_v39 = vmul.f32 %v6855_v37, %v6778_v10 }
0x10c4   :  { %11479 = vmatpush1.bf16.msra.mxu0 %v11942_v21  ;;  %7034 = vmatprep.mubr.f32.mxu0 %v12481_v60 }
0x10c5   :  { %11481 = vmatprep.subr.bf16.mxu0 %v11943_v31  ;;  %v6858_v25 = vsub.f32 %v6856_v9, %v6857_v39 }
0x10c8   :  { %11483 = vmatpush1.bf16.msra.mxu0 %v11945_v57 }
0x10c9   :  { %11485 = vmatprep.subr.bf16.mxu0 %v11946_v14 }
0x10cc   :  { %11487 = vmatpush1.bf16.msra.mxu0 %v11948_v20 }
0x10cd   :  { %11489 = vmatprep.subr.bf16.mxu0 %v11949_v12 }
0x10d0   :  { %11491 = vmatpush1.bf16.msra.mxu0 %v11951_v22 }
0x10d3   :  { %10290 = vmatmul.mubr.msk.f32.vlgmr.msra.gmra.mrb[36].mxu0 %vm3134_vm0, %v6858_v25 }
0x1196   :  { %v6952_v49 = vpop.f32.mrb[34].mxu0 }
0x1197   :  { %v6960_v11 = vrot.slane %v6952_v49, %v14300_v30  ;;  %v6954_v50 = vpop.f32.mrb[35].mxu0 }
0x1198   :  { %v6964_v59 = vrot.slane %v6954_v50, %v14300_v30 }
0x1199   :  { %v6965_v3 = vmul.f32 %v6960_v11, %v14385_v2 }
0x119a   :  { %v6966_v4 = vmul.f32 %v6964_v59, %v14388_v26 }
0x11a6   :  { %v7036_v38 = vpop.f32.mrb[36].mxu0 }
0x11a7   :  { %v7044_v35 = vrot.slane %v7036_v38, %v14300_v30  ;;  %v7038_v29 = vpop.f32.mrb[37].mxu0 }
0x11a8   :  { %v7048_v32 = vrot.slane %v7038_v29, %v14300_v30 }
0x11a9   :  { %v7049_v36 = vadd.f32 %v7044_v35, %v6965_v3 }
0x11aa   :  { %v7050_v13 = vadd.f32 %v7048_v32, %v6966_v4 }
0x11ab   :  { %vm7051_vm1 = vcmp.ge.f32.partialorder %v7049_v36, 0.0  ;;  %v7053_v55 = vmul.f32 0.2, %v7049_v36 }
0x11ac   :  { %vm7052_vm0 = vcmp.ge.f32.partialorder %v7050_v13, 0.0  ;;  %v7054_v34 = vmul.f32 0.2, %v7050_v13 }
0x11ad   :  { %v7055_v28 = vsel %vm7051_vm1, %v7049_v36, %v7053_v55 }
0x11ae   :  { %v7057_v18 = vpack.c.bf16 %v7055_v28, %v7055_v28  ;;  %v7056_v5 = vsel %vm7052_vm0, %v7050_v13, %v7054_v34 }
0x11af   :  { %v14424_v21 = vpack.c.bf16 %v7056_v5, %v7056_v5 }
0x11b0   :  { %12415 = dma.done.wait [#allocation7 + $0x3], 6144 }
0x11b1   :  { %12416 = vsyncadd [#allocation7 + $0x3], 4294961152  ;;  %vm7115_vm2 = vcmask 1043456   ;;  %7154 = vmatprep.mubr.bf16.mxu0 %v15118_v16  ;;  %vm7111_vm3 = vcmask 64512   ;;  %v7110_v26 = vld [vmem:[#allocation23] sm:$0xf] }
0x11b2   :  { %10291 = vmatprep.subr.msk.bf16.mxu0 %vm7115_vm2, %v14424_v21  ;;  %v14430_v2 = vsel %vm7115_vm2, %v7057_v18, 0  ;;  %v7070_v31 = vld [vmem:[#allocation5 + $0x40] sm:$0xff]  ;;  %v7071_v14 = vld [vmem:[#allocation5 + $0x48] sm:$0xff]  ;;  %v7072_v22 = vld [vmem:[#allocation5 + $0x50] sm:$0xff]  ;;  %s15150_s16 = sld [smem:[#allocation64_spill]]  ;;  %vm12482_vm4 = vmmov 0  }
0x11b3   :  { %7123 = vmatpush1.bf16.msra.mxu0 %v14430_v2  ;;  %v7062_v57 = vld [vmem:[#allocation5] sm:$0xff]  ;;  %10881 = vmatprep.subr.bf16.mxu1 %v7070_v31  ;;  %v7063_v20 = vld [vmem:[#allocation5 + $0x8] sm:$0xff]  ;;  %v7064_v33 = vld [vmem:[#allocation5 + $0x10] sm:$0xff]  ;;  %s15151_s20 = sld [smem:[#allocation63_spill]] }
0x11b4   :  { %10293 = vmatprep.subr.msk.bf16.mxu0 %vm7115_vm2, %v14424_v21  ;;  %10882 = vmatpush3.bf16.msra.mxu1 %v7062_v57  ;;  %v7166_v12 = vld [vmem:[#allocation23 + $0x4] sm:$0xf]  ;;  %v7073_v7 = vld [vmem:[#allocation5 + $0x58] sm:$0xff]  ;;  %v7214_v1 = vld [vmem:[#allocation23 + $0x8] sm:$0xf] }
0x11b5   :  { %10883 = vmatprep.subr.bf16.mxu1 %v7071_v14  ;;  %v7086_v27 = vld [vmem:[#allocation5 + $0xc0] sm:$0xff]  ;;  %v7065_v10 = vld [vmem:[#allocation5 + $0x18] sm:$0xff]  ;;  %v7087_v23 = vld [vmem:[#allocation5 + $0xc8] sm:$0xff] }
0x11b6   :  { %10292 = vmatmul.mubr.msk.bf16.vlgmr.msra.gmra.mrb[40].mxu0 %vm7111_vm3, %v7110_v26  ;;  %v7074_v40 = vld [vmem:[#allocation5 + $0x60] sm:$0xff]  ;;  %v7075_v41 = vld [vmem:[#allocation5 + $0x68] sm:$0xff]  ;;  %v7088_v47 = vld [vmem:[#allocation5 + $0xd0] sm:$0xff] }
0x11b7   :  { %7171 = vmatpush1.bf16.msra.mxu0 %v14430_v2  ;;  %7202 = vmatprep.mubr.bf16.mxu0 %v15118_v16  ;;  %v7078_v19 = vld [vmem:[#allocation5 + $0x80] sm:$0xff]  ;;  %v7079_v42 = vld [vmem:[#allocation5 + $0x88] sm:$0xff]  ;;  %v7076_v37 = vld [vmem:[#allocation5 + $0x70] sm:$0xff] }
0x11b8   :  { %10295 = vmatprep.subr.msk.bf16.mxu0 %vm7115_vm2, %v14424_v21  ;;  %10884 = vmatpush3.bf16.msra.mxu1 %v7063_v20  ;;  %v7066_v24 = vld [vmem:[#allocation5 + $0x20] sm:$0xff]  ;;  %v7067_v48 = vld [vmem:[#allocation5 + $0x28] sm:$0xff]  ;;  %v7080_v39 = vld [vmem:[#allocation5 + $0x90] sm:$0xff] }
0x11b9   :  { %10885 = vmatprep.subr.bf16.mxu1 %v7072_v22  ;;  %v7089_v9 = vld [vmem:[#allocation5 + $0xd8] sm:$0xff]  ;;  %v7068_v25 = vld [vmem:[#allocation5 + $0x30] sm:$0xff]  ;;  %v7090_v11 = vld [vmem:[#allocation5 + $0xe0] sm:$0xff] }
0x11ba   :  { %v7081_v49 = vld [vmem:[#allocation5 + $0x98] sm:$0xff]  ;;  %v7082_v50 = vld [vmem:[#allocation5 + $0xa0] sm:$0xff]  ;;  %v7091_v4 = vld [vmem:[#allocation5 + $0xe8] sm:$0xff] }
0x11bb   :  { %v7077_v59 = vld [vmem:[#allocation5 + $0x78] sm:$0xff]  ;;  %v7083_v38 = vld [vmem:[#allocation5 + $0xa8] sm:$0xff]  ;;  %v7102_v35 = vld [vmem:[#allocation5 + $0x140] sm:$0xff] }
0x11bc   :  { %10886 = vmatpush3.bf16.msra.mxu1 %v7064_v33  ;;  %v7069_v3 = vld [vmem:[#allocation5 + $0x38] sm:$0xff]  ;;  %v7092_v29 = vld [vmem:[#allocation5 + $0xf0] sm:$0xff]  ;;  %v7094_v31 = vld [vmem:[#allocation5 + $0x100] sm:$0xff] }
0x11bd   :  { %10887 = vmatprep.subr.bf16.mxu1 %v7073_v7  ;;  %v7084_v32 = vld [vmem:[#allocation5 + $0xb0] sm:$0xff]  ;;  %v7093_v36 = vld [vmem:[#allocation5 + $0xf8] sm:$0xff]  ;;  %v7103_v57 = vld [vmem:[#allocation5 + $0x148] sm:$0xff] }
0x11be   :  { %10294 = vmatmul.mubr.msk.bf16.vlgmr.msra.gmra.mrb[44].mxu0 %vm7111_vm3, %v7166_v12  ;;  %v7085_v13 = vld [vmem:[#allocation5 + $0xb8] sm:$0xff]  ;;  %v7095_v14 = vld [vmem:[#allocation5 + $0x108] sm:$0xff]  ;;  %v7104_v12 = vld [vmem:[#allocation5 + $0x150] sm:$0xff] }
0x11bf   :  { %7219 = vmatpush1.bf16.msra.mxu0 %v14430_v2  ;;  %7250 = vmatprep.mubr.bf16.mxu0 %v15118_v16 }
0x11c0   :  { %10903 = vmatprep.subr.bf16.mxu0 %v7086_v27  ;;  %10888 = vmatpush3.bf16.msra.mxu1 %v7065_v10  ;;  %v7096_v10 = vld [vmem:[#allocation5 + $0x110] sm:$0xff] }
0x11c1   :  { %10889 = vmatprep.subr.bf16.mxu1 %v7074_v40  ;;  %v7105_v40 = vld [vmem:[#allocation5 + $0x158] sm:$0xff] }
0x11c4   :  { %10890 = vmatpush3.bf16.msra.mxu1 %v7066_v24 }
0x11c5   :  { %10891 = vmatprep.subr.bf16.mxu1 %v7075_v41 }
0x11c6   :  { %10296 = vmatmul.mubr.msk.bf16.vlgmr.msra.gmra.mrb[48].mxu0 %vm7111_vm3, %v7214_v1 }
0x11c7   :  { %10904 = vmatpush3.bf16.msra.mxu0 %v7078_v19  ;;  %v7097_v19 = vld [vmem:[#allocation5 + $0x118] sm:$0xff] }
0x11c8   :  { %10905 = vmatprep.subr.bf16.mxu0 %v7087_v23  ;;  %10892 = vmatpush3.bf16.msra.mxu1 %v7067_v48  ;;  %v7106_v23 = vld [vmem:[#allocation5 + $0x160] sm:$0xff] }
0x11c9   :  { %10893 = vmatprep.subr.bf16.mxu1 %v7076_v37  ;;  %v7098_v48 = vld [vmem:[#allocation5 + $0x120] sm:$0xff] }
0x11cb   :  { %10906 = vmatpush3.bf16.msra.mxu0 %v7079_v42 }
0x11cc   :  { %10907 = vmatprep.subr.bf16.mxu0 %v7088_v47  ;;  %10894 = vmatpush3.bf16.msra.mxu1 %v7068_v25  ;;  %v7108_v25 = vld [vmem:[#allocation5 + $0x170] sm:$0xff] }
0x11cd   :  { %10895 = vmatprep.subr.bf16.mxu1 %v7077_v59 }
0x11cf   :  { %10908 = vmatpush3.bf16.msra.mxu0 %v7080_v39  ;;  %v7107_v39 = vld [vmem:[#allocation5 + $0x168] sm:$0xff] }
0x11d0   :  { %10909 = vmatprep.subr.bf16.mxu0 %v7089_v9  ;;  %10896 = vmatpush3.bf16.msra.mxu1 %v7069_v3  ;;  %v7099_v9 = vld [vmem:[#allocation5 + $0x128] sm:$0xff]  ;;  %v11962_v3 = vld [vmem:[%s15150_s16 + $0x80] sm:$0xff]  }
0x11d1   :  { %10925 = vmatprep.subr.bf16.mxu1 %v7102_v35 }
0x11d3   :  { %10910 = vmatpush3.bf16.msra.mxu0 %v7081_v49  ;;  %v7100_v49 = vld [vmem:[#allocation5 + $0x130] sm:$0xff] }
0x11d4   :  { %10911 = vmatprep.subr.bf16.mxu0 %v7090_v11  ;;  %v7109_v11 = vld [vmem:[#allocation5 + $0x178] sm:$0xff] }
0x11d7   :  { %10912 = vmatpush3.bf16.msra.mxu0 %v7082_v50  ;;  %v7101_v50 = vld [vmem:[#allocation5 + $0x138] sm:$0xff] }
0x11d8   :  { %10913 = vmatprep.subr.bf16.mxu0 %v7091_v4  ;;  %v11965_v4 = vld [vmem:[%s15150_s16 + $0x88] sm:$0xff]  }
0x11db   :  { %10914 = vmatpush3.bf16.msra.mxu0 %v7083_v38  ;;  %v11968_v38 = vld [vmem:[%s15150_s16 + $0x90] sm:$0xff]  }
0x11dc   :  { %10915 = vmatprep.subr.bf16.mxu0 %v7092_v29 }
0x11df   :  { %10916 = vmatpush3.bf16.msra.mxu0 %v7084_v32 }
0x11e0   :  { %10917 = vmatprep.subr.bf16.mxu0 %v7093_v36 }
0x11e3   :  { %10918 = vmatpush3.bf16.msra.mxu0 %v7085_v13 }
0x11e4   :  { %11278 = vmatprep.subr.bf16.mxu0 %v12481_v60 }
0x1289   :  { %v7156_v55 = vpop.f32.mrb[40].mxu0 }
0x128a   :  { %v7158_v34 = vpop.f32.mrb[41].mxu0  ;;  %v7163_v5 = vpack.c.bf16 %v7156_v55, %v7156_v55 }
0x128b   :  { %v7160_v28 = vpop.f32.mrb[42].mxu0  ;;  %v7164_v18 = vpack.c.bf16 %v7158_v34, %v7158_v34 }
0x128c   :  { %v7161_v26 = vpop.f32.mrb[43].mxu0 }
0x128d   :  { %7293 = vmatprep.mubr.bf16.mxu1 %v7164_v18 }
0x128e   :  { %7294 = vmatmul.mubr.bf16.vlgmr.msra.gmra.mrb[108].mxu1 %v7163_v5 }
0x128f   :  { %10926 = vmatpush3.bf16.msra.mxu1 %v7094_v31 }
0x1290   :  { %10927 = vmatprep.subr.bf16.mxu1 %v7103_v57 }
0x1291   :  { %v7204_v20 = vpop.f32.mrb[44].mxu0 }
0x1292   :  { %v7211_v22 = vpack.c.bf16 %v7204_v20, %v7204_v20  ;;  %v7206_v33 = vpop.f32.mrb[45].mxu0 }
0x1293   :  { %v7212_v27 = vpack.c.bf16 %v7206_v33, %v7206_v33  ;;  %10928 = vmatpush3.bf16.msra.mxu1 %v7095_v14  ;;  %v7208_v7 = vpop.f32.mrb[46].mxu0 }
0x1294   :  { %10929 = vmatprep.subr.bf16.mxu1 %v7104_v12  ;;  %v7209_v1 = vpop.f32.mrb[47].mxu0 }
0x1295   :  { %7333 = vmatprep.mubr.bf16.mxu0 %v7212_v27  ;;  %v11954_v1 = vld [vmem:[%s15151_s20] sm:$0xff]  }
0x1296   :  { %7334 = vmatmul.mubr.bf16.vlgmr.msra.gmra.mrb[52].mxu0 %v7211_v22 }
0x1297   :  { %10930 = vmatpush3.bf16.msra.mxu1 %v7096_v10  ;;  %11280 = vmatprep.mubr.msk.bf16.mxu0 %vm12482_vm4, %v12481_v60 }
0x1298   :  { %10931 = vmatprep.subr.bf16.mxu1 %v7105_v40  ;;  %v11955_v40 = vld [vmem:[%s15151_s20 + $0x8] sm:$0xff]  }
0x1299   :  { %v7252_v24 = vpop.f32.mrb[48].mxu0 }
0x129a   :  { %v7254_v41 = vpop.f32.mrb[49].mxu0  ;;  %v7259_v59 = vpack.c.bf16 %v7252_v24, %v7252_v24  ;;  %v11958_v24 = vld [vmem:[%s15150_s16] sm:$0xff]  }
0x129b   :  { %10932 = vmatpush3.bf16.msra.mxu1 %v7097_v19  ;;  %v7260_v42 = vpack.c.bf16 %v7254_v41, %v7254_v41  ;;  %v7256_v47 = vpop.f32.mrb[50].mxu0  ;;  %v11957_v19 = vld [vmem:[%s15150_s16 + $0x40] sm:$0xff]   ;;  %v11959_v41 = vld [vmem:[%s15150_s16 + $0x48] sm:$0xff]  }
0x129c   :  { %10933 = vmatprep.subr.bf16.mxu1 %v7106_v23  ;;  %v7257_v37 = vpop.f32.mrb[51].mxu0  ;;  %v11956_v23 = vld [vmem:[%s15151_s20 + $0x10] sm:$0xff]  }
0x129d   :  { %7373 = vmatprep.mubr.bf16.mxu1 %v7260_v42  ;;  %v11960_v42 = vld [vmem:[%s15150_s16 + $0x8] sm:$0xff]   ;;  %v11961_v47 = vld [vmem:[%s15150_s16 + $0x50] sm:$0xff]   ;;  %v11964_v37 = vld [vmem:[%s15150_s16 + $0x58] sm:$0xff]  }
0x129f   :  { %10934 = vmatpush3.bf16.msra.mxu1 %v7098_v48  ;;  %v11963_v48 = vld [vmem:[%s15150_s16 + $0x10] sm:$0xff]  }
0x12a0   :  { %10935 = vmatprep.subr.bf16.mxu1 %v7107_v39  ;;  %v11966_v39 = vld [vmem:[%s15150_s16 + $0x18] sm:$0xff]  }
0x12a3   :  { %10936 = vmatpush3.bf16.msra.mxu1 %v7099_v9  ;;  %v11967_v9 = vld [vmem:[%s15150_s16 + $0x60] sm:$0xff]  }
0x12a4   :  { %10937 = vmatprep.subr.bf16.mxu1 %v7108_v25  ;;  %v11969_v25 = vld [vmem:[%s15150_s16 + $0x20] sm:$0xff]  }
0x12a7   :  { %10938 = vmatpush3.bf16.msra.mxu1 %v7100_v49  ;;  %v11970_v49 = vld [vmem:[%s15150_s16 + $0x68] sm:$0xff]  }
0x12a8   :  { %10939 = vmatprep.subr.bf16.mxu1 %v7109_v11  ;;  %v11971_v11 = vld [vmem:[%s15150_s16 + $0x98] sm:$0xff]  }
0x12ab   :  { %10940 = vmatpush3.bf16.msra.mxu1 %v7101_v50  ;;  %v11972_v50 = vld [vmem:[%s15150_s16 + $0x28] sm:$0xff]  }
0x12ac   :  { %11296 = vmatprep.subr.bf16.mxu1 %v12481_v60 }
0x12ae   :  { %7374 = vmatmul.mubr.bf16.vlgmr.msra.gmra.mrb[112].mxu1 %v7259_v59  ;;  %v11973_v59 = vld [vmem:[%s15150_s16 + $0x70] sm:$0xff]  }
0x12af   :  { %11312 = vmatprep.mubr.msk.bf16.mxu1 %vm12482_vm4, %v12481_v60  ;;  %11297 = vmatpush3.bf16.msra.mxu1 %v11962_v3  ;;  %v11974_v3 = vld [vmem:[%s15150_s16 + $0xa0] sm:$0xff]  }
0x12b0   :  { %11298 = vmatprep.subr.bf16.mxu1 %v12481_v60 }
0x12b3   :  { %11299 = vmatpush3.bf16.msra.mxu1 %v11965_v4  ;;  %v11975_v4 = vld [vmem:[%s15150_s16 + $0x30] sm:$0xff]  }
0x12b4   :  { %11300 = vmatprep.subr.bf16.mxu1 %v12481_v60 }
0x12b7   :  { %11301 = vmatpush3.bf16.msra.mxu1 %v11968_v38  ;;  %v11976_v38 = vld [vmem:[%s15150_s16 + $0x78] sm:$0xff]  }
0x12b8   :  { %11302 = vmatprep.subr.bf16.mxu1 %v12481_v60 }
0x12bb   :  { %11303 = vmatpush3.bf16.msra.mxu1 %v11971_v11 }
0x12bc   :  { %11304 = vmatprep.subr.bf16.mxu1 %v12481_v60 }
0x12bf   :  { %11305 = vmatpush3.bf16.msra.mxu1 %v11974_v3 }
0x12c0   :  { %11306 = vmatprep.subr.bf16.mxu1 %v12481_v60 }
0x1361   :  { %v10897_v35 = vpop.f32.mrb[108].mxu1 }
0x1362   :  { %v10898_v29 = vpop.f32.mrb[109].mxu1 }
0x1363   :  { %v10899_v32 = vadd.f32 %v10898_v29, %v10897_v35  ;;  %v10900_v36 = vpop.f32.mrb[110].mxu1  ;;  %v11977_v35 = vld [vmem:[%s15150_s16 + $0xa8] sm:$0xff]   ;;  %v11978_v29 = vld [vmem:[%s15150_s16 + $0x38] sm:$0xff]  }
0x1364   :  { %v10901_v13 = vpop.f32.mrb[111].mxu1  ;;  %11307 = vmatpush3.bf16.msra.mxu1 %v11977_v35  ;;  %v11980_v36 = vld [vmem:[%s15150_s16 + $0xb8] sm:$0xff]  }
0x1365   :  { %11308 = vmatprep.subr.bf16.mxu1 %v12481_v60 }
0x1369   :  { %v10919_v55 = vpop.f32.mrb[52].mxu0 }
0x136a   :  { %v10920_v34 = vpop.f32.mrb[53].mxu0 }
0x136b   :  { %v10921_v28 = vadd.f32 %v10920_v34, %v10919_v55  ;;  %v10922_v18 = vpop.f32.mrb[54].mxu0 }
0x136c   :  { %v10923_v5 = vpop.f32.mrb[55].mxu0 }
0x136d   :  { %v7336_v26 = vadd.f32 %v10921_v28, %v10899_v32  ;;  %v11979_v32 = vld [vmem:[%s15150_s16 + $0xb0] sm:$0xff]  }
0x136e   :  { %11309 = vmatpush3.bf16.msra.mxu1 %v11979_v32 }
0x136f   :  { %11310 = vmatprep.subr.bf16.mxu1 %v12481_v60 }
0x1372   :  { %11311 = vmatpush3.bf16.msra.mxu1 %v11980_v36 }
0x1381   :  { %v10941_v31 = vpop.f32.mrb[112].mxu1 }
0x1382   :  { %v10942_v57 = vpop.f32.mrb[113].mxu1 }
0x1383   :  { %v10943_v14 = vadd.f32 %v10942_v57, %v10941_v31  ;;  %v10944_v20 = vpop.f32.mrb[114].mxu1 }
0x1384   :  { %v10945_v12 = vpop.f32.mrb[115].mxu1 }
0x1385   :  { %v7376_v22 = vadd.f32 %v10943_v14, %v7336_v26 }
0x1387   :  { %vm7381_vm5 = vcmp.ge.f32.partialorder %v7376_v22, 0.0  ;;  %v7382_v33 = vmul.f32 0.2, %v7376_v22 }
0x1389   :  { %v7383_v27 = vsel %vm7381_vm5, %v7376_v22, %v7382_v33 }
0x138a   :  { %v7384_v7 = vpack.c.bf16 %v7383_v27, %v7383_v27 }
0x138c   :  { %v7444_v10 = vsel %vm7115_vm2, %v7384_v7, 0 }
0x138d   :  { %11279 = vmatpush3.bf16.msra.mxu0 %v7444_v10 }
0x138e   :  { %11284 = vmatprep.subr.bf16.mxu0 %v12481_v60 }
0x1390   :  { %11281 = vmatmul.mubr.msk.bf16.vlgmr.msra.gmra.mrb[56].mxu0 %vm7111_vm3, %v11954_v1 }
0x1391   :  { %11285 = vmatpush3.bf16.msra.mxu0 %v7444_v10  ;;  %11286 = vmatprep.mubr.msk.bf16.mxu0 %vm12482_vm4, %v12481_v60 }
0x1392   :  { %11290 = vmatprep.subr.bf16.mxu0 %v12481_v60 }
0x1398   :  { %11287 = vmatmul.mubr.msk.bf16.vlgmr.msra.gmra.mrb[60].mxu0 %vm7111_vm3, %v11955_v40 }
0x1399   :  { %11291 = vmatpush3.bf16.msra.mxu0 %v7444_v10  ;;  %11292 = vmatprep.mubr.msk.bf16.mxu0 %vm12482_vm4, %v12481_v60 }
0x139a   :  { %10953 = vmatprep.subr.bf16.mxu0 %v11957_v19 }
0x13a0   :  { %11293 = vmatmul.mubr.msk.bf16.vlgmr.msra.gmra.mrb[64].mxu0 %vm7111_vm3, %v11956_v23 }
0x13a1   :  { %10954 = vmatpush3.bf16.msra.mxu0 %v11958_v24 }
0x13a2   :  { %10955 = vmatprep.subr.bf16.mxu0 %v11959_v41 }
0x13a5   :  { %10956 = vmatpush3.bf16.msra.mxu0 %v11960_v42 }
0x13a6   :  { %10957 = vmatprep.subr.bf16.mxu0 %v11961_v47 }
0x13a9   :  { %10958 = vmatpush3.bf16.msra.mxu0 %v11963_v48 }
0x13aa   :  { %10959 = vmatprep.subr.bf16.mxu0 %v11964_v37 }
0x13ad   :  { %10960 = vmatpush3.bf16.msra.mxu0 %v11966_v39 }
0x13ae   :  { %10961 = vmatprep.subr.bf16.mxu0 %v11967_v9 }
0x13b1   :  { %10962 = vmatpush3.bf16.msra.mxu0 %v11969_v25 }
0x13b2   :  { %10963 = vmatprep.subr.bf16.mxu0 %v11970_v49 }
0x13b5   :  { %10964 = vmatpush3.bf16.msra.mxu0 %v11972_v50 }
0x13b6   :  { %10965 = vmatprep.subr.bf16.mxu0 %v11973_v59 }
0x13b9   :  { %10966 = vmatpush3.bf16.msra.mxu0 %v11975_v4 }
0x13ba   :  { %10967 = vmatprep.subr.bf16.mxu0 %v11976_v38 }
0x13bd   :  { %10968 = vmatpush3.bf16.msra.mxu0 %v11978_v29 }
0x1463   :  { %v7480_v13 = vpop.f32.mrb[56].mxu0 }
0x1464   :  { %v11282_v55 = vpop.f32.mrb[57].mxu0 }
0x1465   :  { %v7483_v34 = vpop.f32.mrb[58].mxu0 }
0x1466   :  { %v7487_v28 = vpack.c.bf16 %v7483_v34, %v7480_v13  ;;  %v11283_v18 = vpop.f32.mrb[59].mxu0 }
0x146b   :  { %v7533_v5 = vpop.f32.mrb[60].mxu0 }
0x146c   :  { %v11288_v26 = vpop.f32.mrb[61].mxu0 }
0x146d   :  { %v7536_v31 = vpop.f32.mrb[62].mxu0 }
0x146e   :  { %v7540_v57 = vpack.c.bf16 %v7536_v31, %v7533_v5  ;;  %v11289_v14 = vpop.f32.mrb[63].mxu0 }
0x1470   :  { %7770 = vmatprep.mubr.bf16.mxu0 %v7540_v57 }
0x1471   :  { %7771 = vmatmul.mubr.bf16.vlgmr.msra.gmra.mrb[68].mxu0 %v7487_v28 }
0x1473   :  { %v7586_v20 = vpop.f32.mrb[64].mxu0 }
0x1474   :  { %v11294_v12 = vpop.f32.mrb[65].mxu0 }
0x1475   :  { %v7589_v22 = vpop.f32.mrb[66].mxu0 }
0x1476   :  { %v7593_v33 = vpack.c.bf16 %v7589_v22, %v7586_v20  ;;  %v11295_v27 = vpop.f32.mrb[67].mxu0 }
0x1478   :  { %11313 = vmatmul.mubr.bf16.vlgmr.msra.gmra.mrb[116].mxu1 %v7593_v33 }
0x1544   :  { %v10969_v7 = vpop.f32.mrb[68].mxu0 }
0x1545   :  { %v10970_v10 = vpop.f32.mrb[69].mxu0 }
0x1546   :  { %v10971_v1 = vadd.f32 %v10970_v10, %v10969_v7  ;;  %v10972_v40 = vpop.f32.mrb[70].mxu0 }
0x1547   :  { %v10973_v19 = vpop.f32.mrb[71].mxu0 }
0x1548   :  { %v10974_v23 = vadd.f32 %v10973_v19, %v10972_v40 }
0x154b   :  { %v7813_v24 = vpop.f32.mrb[116].mxu1 }
0x154c   :  { %v14494_v41 = vadd.f32 %v10971_v1, %v7813_v24  ;;  %v11314_v42 = vpop.f32.mrb[117].mxu1 }
0x154d   :  { %v7816_v47 = vpop.f32.mrb[118].mxu1 }
0x154e   :  { %v14496_v48 = vadd.f32 %v10974_v23, %v7816_v47  ;;  %v11315_v37 = vpop.f32.mrb[119].mxu1 }
0x154f   :  { %12417 = dma.done.wait [#allocation7 + $0x4], 16384 }
0x1550   :  { %12418 = vsyncadd [#allocation7 + $0x4], 4294950912  ;;  %10331 = vmatprep.subr.msk.bf16.mxu0 %vm7115_vm2, %v14424_v21  ;;  %7986 = vmatprep.mubr.bf16.mxu0 %v15118_v16  ;;  %v7950_v39 = vld [vmem:[#allocation25] sm:$0x3]  ;;  %v7998_v9 = vld [vmem:[#allocation25 + $0x2] sm:$0x3] }
0x1551   :  { %7955 = vmatpush1.bf16.msra.mxu0 %v14430_v2  ;;  %10333 = vmatprep.subr.msk.bf16.mxu1 %vm7115_vm2, %v14424_v21  ;;  %v7823_v25 = vld [vmem:[#allocation6 + $0x8] sm:$0xff]  ;;  %v7822_v11 = vld [vmem:[#allocation6] sm:$0xff]  ;;  %v7824_v59 = vld [vmem:[#allocation6 + $0x10] sm:$0xff]  ;;  %s15152_s22 = sld [smem:[#allocation65_spill]]  ;;  %s15154_s4 = sld [smem:[#allocation66_spill]]  ;;  %vm8843_vm8 = vcmask 1041408  }
0x1552   :  { %8003 = vmatpush1.bf16.msra.mxu1 %v14430_v2  ;;  %8034 = vmatprep.mubr.bf16.mxu1 %v15118_v16  ;;  %v8046_v49 = vld [vmem:[#allocation25 + $0x4] sm:$0x3]  ;;  %v8094_v50 = vld [vmem:[#allocation25 + $0x6] sm:$0x3]  ;;  %v7826_v4 = vld [vmem:[#allocation6 + $0x20] sm:$0xff]  ;;  %s15155_s3 = sld [smem:[#allocation67_spill]] }
0x1553   :  { %10335 = vmatprep.subr.msk.bf16.mxu0 %vm7115_vm2, %v14424_v21  ;;  %10337 = vmatprep.subr.msk.bf16.mxu1 %vm7115_vm2, %v14424_v21  ;;  %v7825_v21 = vld [vmem:[#allocation6 + $0x18] sm:$0xff]  ;;  %v7827_v3 = vld [vmem:[#allocation6 + $0x28] sm:$0xff]  ;;  %v7828_v35 = vld [vmem:[#allocation6 + $0x30] sm:$0xff]  ;;  %vm8839_vm10 = vcmask 31744   ;;  %s12483_s23 = smov [#allocation31]  }
0x1554   :  { %10332 = vmatmul.mubr.msk.bf16.vlgmr.msra.gmra.mrb[72].mxu0 %vm7111_vm3, %v7950_v39  ;;  %v7829_v38 = vld [vmem:[#allocation6 + $0x38] sm:$0xff]  ;;  %v7830_v29 = vld [vmem:[#allocation6 + $0x40] sm:$0xff]  ;;  %v7832_v36 = vld [vmem:[#allocation6 + $0x50] sm:$0xff]  ;;  %s10058_s21 = sshll.u32 %s12483_s23, 4  ;;  %s10059_s21 = int_to_ptr.vmem [resolvable:$true] %s10058_s21 }
0x1555   :  { %10334 = vmatmul.mubr.msk.bf16.vlgmr.msra.gmra.mrb[120].mxu1 %vm7111_vm3, %v7998_v9  ;;  %8051 = vmatpush1.bf16.msra.mxu0 %v14430_v2  ;;  %v7833_v32 = vld [vmem:[#allocation6 + $0x58] sm:$0xff]  ;;  %v7835_v13 = vld [vmem:[#allocation6 + $0x68] sm:$0xff]  ;;  %v7834_v55 = vld [vmem:[#allocation6 + $0x60] sm:$0xff]  ;;  %s12371_s26 = scalar_lea.vmem %s10059_s21, 256  ;;  %p12376_p9 = scmp.lt.s32.totalorder %s10059_s21, %s10059_s21 }
0x1556   :  { %8082 = vmatprep.mubr.bf16.mxu0 %v15118_v16  ;;  %8141 = vmatprep.subr.bf16.mxu0 %v7823_v25  ;;  %v7837_v34 = vld [vmem:[#allocation6 + $0x78] sm:$0xff]  ;;  %v7836_v28 = vld [vmem:[#allocation6 + $0x70] sm:$0xff]  ;;  %v7839_v18 = vld [vmem:[#allocation6 + $0x88] sm:$0xff]  ;;  %p12372_p8 = scmp.ne.s32.totalorder %s10059_s21, %s12371_s26  ;;  %p12377_p10 = scmp.lt.s32.totalorder %s12371_s26, %s12371_s26 }
0x1557   :  { %8099 = vmatpush1.bf16.msra.mxu1 %v14430_v2  ;;  %8130 = vmatprep.mubr.bf16.mxu1 %v15118_v16  ;;  %v7831_v2 = vld [vmem:[#allocation6 + $0x48] sm:$0xff]  ;;  %v7838_v5 = vld [vmem:[#allocation6 + $0x80] sm:$0xff]  ;;  %v7841_v26 = vld [vmem:[#allocation6 + $0x98] sm:$0xff] }
0x1558   :  { %v7840_v31 = vld [vmem:[#allocation6 + $0x90] sm:$0xff]  ;;  %v7843_v57 = vld [vmem:[#allocation6 + $0xa8] sm:$0xff]  ;;  %v7842_v14 = vld [vmem:[#allocation6 + $0xa0] sm:$0xff]  ;;  %p12378_p11 = por %p12377_p10, %p12376_p9 }
0x1559   :  { %v7845_v20 = vld [vmem:[#allocation6 + $0xb8] sm:$0xff]  ;;  %v7844_v12 = vld [vmem:[#allocation6 + $0xb0] sm:$0xff]  ;;  %v7847_v22 = vld [vmem:[#allocation6 + $0xc8] sm:$0xff] }
0x155a   :  { %v7846_v33 = vld [vmem:[#allocation6 + $0xc0] sm:$0xff]  ;;  %v7849_v27 = vld [vmem:[#allocation6 + $0xd8] sm:$0xff]  ;;  %v7848_v7 = vld [vmem:[#allocation6 + $0xd0] sm:$0xff]  ;;  %p12379_p12 = pnand %p12378_p11, %p12372_p8 }
0x155b   :  { %v7851_v10 = vld [vmem:[#allocation6 + $0xe8] sm:$0xff]  ;;  %v7850_v1 = vld [vmem:[#allocation6 + $0xe0] sm:$0xff]  ;;  %v7853_v40 = vld [vmem:[#allocation6 + $0xf8] sm:$0xff] }
0x155c   :  { %10336 = vmatmul.mubr.msk.bf16.vlgmr.msra.gmra.mrb[76].mxu0 %vm7111_vm3, %v8046_v49  ;;  %v7852_v19 = vld [vmem:[#allocation6 + $0xf0] sm:$0xff]  ;;  %v7855_v23 = vld [vmem:[#allocation6 + $0x108] sm:$0xff] }
0x155d   :  { %10338 = vmatmul.mubr.msk.bf16.vlgmr.msra.gmra.mrb[124].mxu1 %vm7111_vm3, %v8094_v50  ;;  %8142 = vmatpush1.bf16.msra.mxu0 %v7822_v11 }
0x155e   :  { %8143 = vmatprep.subr.bf16.mxu0 %v7825_v21  ;;  %v7854_v21 = vld [vmem:[#allocation6 + $0x100] sm:$0xff] }
0x1561   :  { %8144 = vmatpush1.bf16.msra.mxu0 %v7824_v59 }
0x1562   :  { %8145 = vmatprep.subr.bf16.mxu0 %v7827_v3  ;;  %v7857_v3 = vld [vmem:[#allocation6 + $0x118] sm:$0xff] }
0x1565   :  { %8146 = vmatpush1.bf16.msra.mxu0 %v7826_v4  ;;  %v7856_v4 = vld [vmem:[#allocation6 + $0x110] sm:$0xff] }
0x1566   :  { %8147 = vmatprep.subr.bf16.mxu0 %v7829_v38  ;;  %v7859_v38 = vld [vmem:[#allocation6 + $0x128] sm:$0xff] }
0x1569   :  { %8148 = vmatpush1.bf16.msra.mxu0 %v7828_v35 }
0x156a   :  { %8149 = vmatprep.subr.bf16.mxu0 %v7831_v2 }
0x156d   :  { %8150 = vmatpush1.bf16.msra.mxu0 %v7830_v29 }
0x156e   :  { %8151 = vmatprep.subr.bf16.mxu0 %v7833_v32  ;;  %v7858_v32 = vld [vmem:[#allocation6 + $0x120] sm:$0xff] }
0x1571   :  { %8152 = vmatpush1.bf16.msra.mxu0 %v7832_v36 }
0x1572   :  { %8153 = vmatprep.subr.bf16.mxu0 %v7835_v13  ;;  %v7861_v13 = vld [vmem:[#allocation6 + $0x138] sm:$0xff] }
0x1575   :  { %8154 = vmatpush1.bf16.msra.mxu0 %v7834_v55  ;;  %v7860_v55 = vld [vmem:[#allocation6 + $0x130] sm:$0xff] }
0x1576   :  { %8155 = vmatprep.subr.bf16.mxu0 %v7837_v34  ;;  %v7863_v34 = vld [vmem:[#allocation6 + $0x148] sm:$0xff] }
0x1579   :  { %8156 = vmatpush1.bf16.msra.mxu0 %v7836_v28  ;;  %v7862_v28 = vld [vmem:[#allocation6 + $0x140] sm:$0xff] }
0x157a   :  { %8157 = vmatprep.subr.bf16.mxu0 %v7839_v18  ;;  %v7865_v18 = vld [vmem:[#allocation6 + $0x158] sm:$0xff] }
0x157d   :  { %8158 = vmatpush1.bf16.msra.mxu0 %v7838_v5  ;;  %v7864_v5 = vld [vmem:[#allocation6 + $0x150] sm:$0xff] }
0x157e   :  { %8159 = vmatprep.subr.bf16.mxu0 %v7841_v26  ;;  %v7867_v26 = vld [vmem:[#allocation6 + $0x168] sm:$0xff] }
0x1581   :  { %8160 = vmatpush1.bf16.msra.mxu0 %v7840_v31  ;;  %v7866_v31 = vld [vmem:[#allocation6 + $0x160] sm:$0xff] }
0x1582   :  { %8161 = vmatprep.subr.bf16.mxu0 %v7843_v57  ;;  %v7869_v57 = vld [vmem:[#allocation6 + $0x178] sm:$0xff] }
0x1585   :  { %8162 = vmatpush1.bf16.msra.mxu0 %v7842_v14  ;;  %v7868_v14 = vld [vmem:[#allocation6 + $0x170] sm:$0xff] }
0x1586   :  { %8163 = vmatprep.subr.bf16.mxu0 %v7845_v20  ;;  %v7871_v20 = vld [vmem:[#allocation6 + $0x188] sm:$0xff] }
0x1589   :  { %8164 = vmatpush1.bf16.msra.mxu0 %v7844_v12  ;;  %v7870_v12 = vld [vmem:[#allocation6 + $0x180] sm:$0xff] }
0x158a   :  { %8165 = vmatprep.subr.bf16.mxu0 %v7847_v22  ;;  %v7873_v22 = vld [vmem:[#allocation6 + $0x198] sm:$0xff] }
0x158d   :  { %8166 = vmatpush1.bf16.msra.mxu0 %v7846_v33  ;;  %v7872_v33 = vld [vmem:[#allocation6 + $0x190] sm:$0xff] }
0x158e   :  { %8167 = vmatprep.subr.bf16.mxu0 %v7849_v27  ;;  %v7875_v27 = vld [vmem:[#allocation6 + $0x1a8] sm:$0xff] }
0x1591   :  { %8168 = vmatpush1.bf16.msra.mxu0 %v7848_v7  ;;  %v7874_v7 = vld [vmem:[#allocation6 + $0x1a0] sm:$0xff] }
0x1592   :  { %8169 = vmatprep.subr.bf16.mxu0 %v7851_v10  ;;  %v7877_v10 = vld [vmem:[#allocation6 + $0x1b8] sm:$0xff] }
0x1595   :  { %8170 = vmatpush1.bf16.msra.mxu0 %v7850_v1  ;;  %v7876_v1 = vld [vmem:[#allocation6 + $0x1b0] sm:$0xff] }
0x1596   :  { %8171 = vmatprep.subr.bf16.mxu0 %v7853_v40  ;;  %v7879_v40 = vld [vmem:[#allocation6 + $0x1c8] sm:$0xff] }
0x1599   :  { %8172 = vmatpush1.bf16.msra.mxu0 %v7852_v19  ;;  %v7878_v19 = vld [vmem:[#allocation6 + $0x1c0] sm:$0xff] }
0x159a   :  { %8182 = vmatprep.subr.bf16.mxu0 %v7855_v23  ;;  %v7881_v23 = vld [vmem:[#allocation6 + $0x1d8] sm:$0xff] }
0x1627   :  { %v7988_v24 = vpop.f32.mrb[72].mxu0 }
0x1628   :  { %v14518_v42 = vpop.f32.mrb[120].mxu1  ;;  %v7990_v47 = vpop.f32.mrb[73].mxu0  ;;  %v7995_v11 = vpack.c.bf16 %v7988_v24, %v7988_v24  ;;  %v7880_v24 = vld [vmem:[#allocation6 + $0x1d0] sm:$0xff] }
0x1629   :  { %v8038_v37 = vpop.f32.mrb[121].mxu1  ;;  %v7996_v39 = vpack.c.bf16 %v7990_v47, %v7990_v47  ;;  %v7992_v9 = vpop.f32.mrb[74].mxu0  ;;  %v7883_v47 = vld [vmem:[#allocation6 + $0x1e8] sm:$0xff] }
0x162a   :  { %v8044_v25 = vpack.c.bf16 %v8038_v37, %v8038_v37  ;;  %v8040_v49 = vpop.f32.mrb[122].mxu1  ;;  %v7993_v50 = vpop.f32.mrb[75].mxu0 }
0x162b   :  { %v8041_v59 = vpop.f32.mrb[123].mxu1  ;;  %8173 = vmatprep.mubr.bf16.mxu0 %v7996_v39  ;;  %v7882_v39 = vld [vmem:[#allocation6 + $0x1e0] sm:$0xff]  ;;  %v7884_v50 = vld [vmem:[#allocation6 + $0x1f0] sm:$0xff] }
0x162c   :  { %8174 = vmatmul.mubr.bf16.vlgmr.msra.gmra.mrb[80].mxu0 %v7995_v11  ;;  %v8043_v59 = vpack.c.bf16 %v14518_v42, %v14518_v42  ;;  %v7888_v42 = vld [vmem:[#allocation6 + $0x210] sm:$0xff] }
0x162d   :  { %8183 = vmatpush1.bf16.msra.mxu0 %v7854_v21  ;;  %8214 = vmatprep.mubr.bf16.mxu0 %v8044_v25  ;;  %v7885_v25 = vld [vmem:[#allocation6 + $0x1f8] sm:$0xff]  ;;  %v7887_v21 = vld [vmem:[#allocation6 + $0x208] sm:$0xff] }
0x162e   :  { %8184 = vmatprep.subr.bf16.mxu0 %v7857_v3 }
0x162f   :  { %v14520_v35 = vpop.f32.mrb[76].mxu0 }
0x1630   :  { %v14522_v2 = vpop.f32.mrb[77].mxu0  ;;  %v14524_v37 = vpop.f32.mrb[124].mxu1 }
0x1631   :  { %8185 = vmatpush1.bf16.msra.mxu0 %v7856_v4  ;;  %v8088_v29 = vpop.f32.mrb[78].mxu0  ;;  %v14526_v9 = vpop.f32.mrb[125].mxu1  ;;  %v8092_v3 = vpack.c.bf16 %v14522_v2, %v14522_v2  ;;  %v7886_v4 = vld [vmem:[#allocation6 + $0x200] sm:$0xff]  ;;  %v7891_v2 = vld [vmem:[#allocation6 + $0x228] sm:$0xff] }
0x1632   :  { %8186 = vmatprep.subr.bf16.mxu0 %v7859_v38  ;;  %v8089_v36 = vpop.f32.mrb[79].mxu0  ;;  %v8136_v49 = vpop.f32.mrb[126].mxu1  ;;  %v7889_v38 = vld [vmem:[#allocation6 + $0x218] sm:$0xff]  ;;  %v14533_v29 = vld [vmem:[%s15152_s22 + $0x40] sm:$0xff]  }
0x1633   :  { %v8137_v11 = vpop.f32.mrb[127].mxu1  ;;  %v14539_v36 = vld [vmem:[%s15152_s22 + $0x48] sm:$0xff]   ;;  %11493 = vmatprep.subr.bf16.mxu1 %v14533_v29 }
0x1634   :  { %v7911_v49 = vld [vmem:[#allocation6 + $0x2c8] sm:$0xff]  ;;  %v7910_v11 = vld [vmem:[#allocation6 + $0x2c0] sm:$0xff] }
0x1635   :  { %8187 = vmatpush1.bf16.msra.mxu0 %v7858_v32  ;;  %v14536_v32 = vld [vmem:[%s15152_s22] sm:$0xff]  }
0x1636   :  { %8188 = vmatprep.subr.bf16.mxu0 %v7861_v13  ;;  %11495 = vmatpush3.bf16.msra.mxu1 %v14536_v32  ;;  %v14545_v13 = vld [vmem:[%s15152_s22 + $0x8] sm:$0xff]  }
0x1637   :  { %11497 = vmatprep.subr.bf16.mxu1 %v14539_v36 }
0x1639   :  { %8189 = vmatpush1.bf16.msra.mxu0 %v7860_v55  ;;  %v14548_v55 = vld [vmem:[%s15152_s22 + $0x50] sm:$0xff]  }
0x163a   :  { %8190 = vmatprep.subr.bf16.mxu0 %v7863_v34  ;;  %v7890_v34 = vld [vmem:[#allocation6 + $0x220] sm:$0xff]  ;;  %11499 = vmatpush3.bf16.msra.mxu1 %v14545_v13 }
0x163b   :  { %11501 = vmatprep.subr.bf16.mxu1 %v14548_v55 }
0x163d   :  { %8191 = vmatpush1.bf16.msra.mxu0 %v7862_v28  ;;  %v7893_v28 = vld [vmem:[#allocation6 + $0x238] sm:$0xff] }
0x163e   :  { %8192 = vmatprep.subr.bf16.mxu0 %v7865_v18  ;;  %v14553_v18 = vld [vmem:[%s15152_s22 + $0x10] sm:$0xff]  }
0x163f   :  { %11503 = vmatpush3.bf16.msra.mxu1 %v14553_v18 }
0x1641   :  { %8193 = vmatpush1.bf16.msra.mxu0 %v7864_v5  ;;  %v14556_v5 = vld [vmem:[%s15152_s22 + $0x58] sm:$0xff]  }
0x1642   :  { %8194 = vmatprep.subr.bf16.mxu0 %v7867_v26  ;;  %v7892_v26 = vld [vmem:[#allocation6 + $0x230] sm:$0xff]  ;;  %11505 = vmatprep.subr.bf16.mxu1 %v14556_v5 }
0x1645   :  { %8195 = vmatpush1.bf16.msra.mxu0 %v7866_v31  ;;  %v7895_v31 = vld [vmem:[#allocation6 + $0x248] sm:$0xff] }
0x1646   :  { %8196 = vmatprep.subr.bf16.mxu0 %v7869_v57  ;;  %v14561_v57 = vld [vmem:[%s15152_s22 + $0x18] sm:$0xff]  }
0x1647   :  { %11507 = vmatpush3.bf16.msra.mxu1 %v14561_v57 }
0x1649   :  { %8197 = vmatpush1.bf16.msra.mxu0 %v7868_v14  ;;  %v14564_v14 = vld [vmem:[%s15152_s22 + $0x60] sm:$0xff]  }
0x164a   :  { %8198 = vmatprep.subr.bf16.mxu0 %v7871_v20  ;;  %v7894_v20 = vld [vmem:[#allocation6 + $0x240] sm:$0xff]  ;;  %11509 = vmatprep.subr.bf16.mxu1 %v14564_v14 }
0x164d   :  { %8199 = vmatpush1.bf16.msra.mxu0 %v7870_v12  ;;  %v7897_v12 = vld [vmem:[#allocation6 + $0x258] sm:$0xff] }
0x164e   :  { %8200 = vmatprep.subr.bf16.mxu0 %v7873_v22  ;;  %v7896_v22 = vld [vmem:[#allocation6 + $0x250] sm:$0xff] }
0x1651   :  { %8201 = vmatpush1.bf16.msra.mxu0 %v7872_v33  ;;  %v7899_v33 = vld [vmem:[#allocation6 + $0x268] sm:$0xff] }
0x1652   :  { %8202 = vmatprep.subr.bf16.mxu0 %v7875_v27  ;;  %v7898_v27 = vld [vmem:[#allocation6 + $0x260] sm:$0xff] }
0x1655   :  { %8203 = vmatpush1.bf16.msra.mxu0 %v7874_v7  ;;  %v7901_v7 = vld [vmem:[#allocation6 + $0x278] sm:$0xff] }
0x1656   :  { %8204 = vmatprep.subr.bf16.mxu0 %v7877_v10  ;;  %v7900_v10 = vld [vmem:[#allocation6 + $0x270] sm:$0xff] }
0x1659   :  { %8205 = vmatpush1.bf16.msra.mxu0 %v7876_v1  ;;  %v7903_v1 = vld [vmem:[#allocation6 + $0x288] sm:$0xff] }
0x165a   :  { %8206 = vmatprep.subr.bf16.mxu0 %v7879_v40  ;;  %v7902_v40 = vld [vmem:[#allocation6 + $0x280] sm:$0xff] }
0x165d   :  { %8207 = vmatpush1.bf16.msra.mxu0 %v7878_v19  ;;  %v7905_v19 = vld [vmem:[#allocation6 + $0x298] sm:$0xff] }
0x165e   :  { %8208 = vmatprep.subr.bf16.mxu0 %v7881_v23  ;;  %v7904_v23 = vld [vmem:[#allocation6 + $0x290] sm:$0xff] }
0x1661   :  { %8209 = vmatpush1.bf16.msra.mxu0 %v7880_v24  ;;  %v7907_v24 = vld [vmem:[#allocation6 + $0x2a8] sm:$0xff] }
0x1662   :  { %8210 = vmatprep.subr.bf16.mxu0 %v7883_v47  ;;  %v7906_v47 = vld [vmem:[#allocation6 + $0x2a0] sm:$0xff] }
0x1665   :  { %8211 = vmatpush1.bf16.msra.mxu0 %v7882_v39  ;;  %v7909_v39 = vld [vmem:[#allocation6 + $0x2b8] sm:$0xff] }
0x1666   :  { %8212 = vmatprep.subr.bf16.mxu0 %v7885_v25  ;;  %v7908_v25 = vld [vmem:[#allocation6 + $0x2b0] sm:$0xff] }
0x1669   :  { %8213 = vmatpush1.bf16.msra.mxu0 %v7884_v50  ;;  %v7913_v50 = vld [vmem:[#allocation6 + $0x2d8] sm:$0xff] }
0x166a   :  { %8223 = vmatprep.subr.bf16.mxu0 %v7887_v21  ;;  %v7912_v21 = vld [vmem:[#allocation6 + $0x2d0] sm:$0xff] }
0x166c   :  { %8215 = vmatmul.mubr.bf16.vlgmr.msra.gmra.mrb[80].mxu0 %v8043_v59  ;;  %v7915_v59 = vld [vmem:[#allocation6 + $0x2e8] sm:$0xff] }
0x166d   :  { %8224 = vmatpush1.bf16.msra.mxu0 %v7886_v4  ;;  %8255 = vmatprep.mubr.bf16.mxu0 %v8092_v3  ;;  %v7914_v3 = vld [vmem:[#allocation6 + $0x2e0] sm:$0xff]  ;;  %v7917_v4 = vld [vmem:[#allocation6 + $0x2f8] sm:$0xff] }
0x166e   :  { %8225 = vmatprep.subr.bf16.mxu0 %v7889_v38  ;;  %v7916_v38 = vld [vmem:[#allocation6 + $0x2f0] sm:$0xff] }
0x1671   :  { %8226 = vmatpush1.bf16.msra.mxu0 %v7888_v42  ;;  %v7919_v42 = vld [vmem:[#allocation6 + $0x308] sm:$0xff] }
0x1672   :  { %8227 = vmatprep.subr.bf16.mxu0 %v7891_v2  ;;  %v8091_v2 = vpack.c.bf16 %v14520_v35, %v14520_v35  ;;  %v7924_v35 = vld [vmem:[#allocation6 + $0x330] sm:$0xff] }
0x1675   :  { %8228 = vmatpush1.bf16.msra.mxu0 %v7890_v34  ;;  %v8140_v34 = vpack.c.bf16 %v14526_v9, %v14526_v9  ;;  %v7926_v9 = vld [vmem:[#allocation6 + $0x340] sm:$0xff] }
0x1676   :  { %8229 = vmatprep.subr.bf16.mxu0 %v7893_v28  ;;  %v7918_v28 = vld [vmem:[#allocation6 + $0x300] sm:$0xff] }
0x1679   :  { %8230 = vmatpush1.bf16.msra.mxu0 %v7892_v26  ;;  %v7921_v26 = vld [vmem:[#allocation6 + $0x318] sm:$0xff] }
0x167a   :  { %8231 = vmatprep.subr.bf16.mxu0 %v7895_v31  ;;  %v7920_v31 = vld [vmem:[#allocation6 + $0x310] sm:$0xff] }
0x167d   :  { %8232 = vmatpush1.bf16.msra.mxu0 %v7894_v20  ;;  %v7923_v20 = vld [vmem:[#allocation6 + $0x328] sm:$0xff] }
0x167e   :  { %8233 = vmatprep.subr.bf16.mxu0 %v7897_v12  ;;  %v7922_v12 = vld [vmem:[#allocation6 + $0x320] sm:$0xff] }
0x1681   :  { %8234 = vmatpush1.bf16.msra.mxu0 %v7896_v22  ;;  %v7925_v22 = vld [vmem:[#allocation6 + $0x338] sm:$0xff] }
0x1682   :  { %8235 = vmatprep.subr.bf16.mxu0 %v7899_v33  ;;  %v7927_v33 = vld [vmem:[#allocation6 + $0x348] sm:$0xff] }
0x1685   :  { %8236 = vmatpush1.bf16.msra.mxu0 %v7898_v27  ;;  %v7929_v27 = vld [vmem:[#allocation6 + $0x358] sm:$0xff] }
0x1686   :  { %8237 = vmatprep.subr.bf16.mxu0 %v7901_v7  ;;  %v7928_v7 = vld [vmem:[#allocation6 + $0x350] sm:$0xff] }
0x1689   :  { %8238 = vmatpush1.bf16.msra.mxu0 %v7900_v10  ;;  %v7931_v10 = vld [vmem:[#allocation6 + $0x368] sm:$0xff] }
0x168a   :  { %8239 = vmatprep.subr.bf16.mxu0 %v7903_v1  ;;  %v7930_v1 = vld [vmem:[#allocation6 + $0x360] sm:$0xff] }
0x168d   :  { %8240 = vmatpush1.bf16.msra.mxu0 %v7902_v40  ;;  %v7933_v40 = vld [vmem:[#allocation6 + $0x378] sm:$0xff] }
0x168e   :  { %8241 = vmatprep.subr.bf16.mxu0 %v7905_v19  ;;  %v7932_v19 = vld [vmem:[#allocation6 + $0x370] sm:$0xff] }
0x1691   :  { %8242 = vmatpush1.bf16.msra.mxu0 %v7904_v23  ;;  %v7935_v23 = vld [vmem:[#allocation6 + $0x388] sm:$0xff] }
0x1692   :  { %8243 = vmatprep.subr.bf16.mxu0 %v7907_v24  ;;  %v7934_v24 = vld [vmem:[#allocation6 + $0x380] sm:$0xff] }
0x1695   :  { %8244 = vmatpush1.bf16.msra.mxu0 %v7906_v47  ;;  %v7937_v47 = vld [vmem:[#allocation6 + $0x398] sm:$0xff] }
0x1696   :  { %8245 = vmatprep.subr.bf16.mxu0 %v7909_v39  ;;  %v7936_v39 = vld [vmem:[#allocation6 + $0x390] sm:$0xff] }
0x1699   :  { %8246 = vmatpush1.bf16.msra.mxu0 %v7908_v25  ;;  %v7939_v25 = vld [vmem:[#allocation6 + $0x3a8] sm:$0xff] }
0x169a   :  { %8247 = vmatprep.subr.bf16.mxu0 %v7911_v49  ;;  %v7938_v49 = vld [vmem:[#allocation6 + $0x3a0] sm:$0xff] }
0x169d   :  { %8248 = vmatpush1.bf16.msra.mxu0 %v7910_v11  ;;  %v7941_v11 = vld [vmem:[#allocation6 + $0x3b8] sm:$0xff] }
0x169e   :  { %8249 = vmatprep.subr.bf16.mxu0 %v7913_v50  ;;  %v7940_v50 = vld [vmem:[#allocation6 + $0x3b0] sm:$0xff] }
0x16a1   :  { %8250 = vmatpush1.bf16.msra.mxu0 %v7912_v21  ;;  %v7943_v21 = vld [vmem:[#allocation6 + $0x3c8] sm:$0xff] }
0x16a2   :  { %8251 = vmatprep.subr.bf16.mxu0 %v7915_v59  ;;  %v7942_v59 = vld [vmem:[#allocation6 + $0x3c0] sm:$0xff] }
0x16a5   :  { %8252 = vmatpush1.bf16.msra.mxu0 %v7914_v3  ;;  %v7945_v3 = vld [vmem:[#allocation6 + $0x3d8] sm:$0xff] }
0x16a6   :  { %8253 = vmatprep.subr.bf16.mxu0 %v7917_v4  ;;  %v7944_v4 = vld [vmem:[#allocation6 + $0x3d0] sm:$0xff] }
0x16a9   :  { %8254 = vmatpush1.bf16.msra.mxu0 %v7916_v38  ;;  %v7947_v38 = vld [vmem:[#allocation6 + $0x3e8] sm:$0xff] }
0x16aa   :  { %8264 = vmatprep.subr.bf16.mxu0 %v7919_v42  ;;  %v7946_v42 = vld [vmem:[#allocation6 + $0x3e0] sm:$0xff] }
0x16ac   :  { %8256 = vmatmul.mubr.bf16.vlgmr.msra.gmra.mrb[80].mxu0 %v8091_v2  ;;  %v7949_v2 = vld [vmem:[#allocation6 + $0x3f8] sm:$0xff] }
0x16ad   :  { %8265 = vmatpush1.bf16.msra.mxu0 %v7918_v28  ;;  %8296 = vmatprep.mubr.bf16.mxu0 %v8140_v34  ;;  %v7948_v34 = vld [vmem:[#allocation6 + $0x3f0] sm:$0xff]  ;;  %v8139_v28 = vpack.c.bf16 %v14524_v37, %v14524_v37 }
0x16ae   :  { %8266 = vmatprep.subr.bf16.mxu0 %v7921_v26  ;;  %v15153_v26 = vpack.c.bf16 %v14120_v15, %v14114_v17 }
0x16b1   :  { %8267 = vmatpush1.bf16.msra.mxu0 %v7920_v31  ;;  %v10705_v31 = vld [vmem:[%s15152_s22 + $0x20] sm:$0xff]  }
0x16b2   :  { %8268 = vmatprep.subr.bf16.mxu0 %v7923_v20  ;;  %11511 = vmatpush3.bf16.msra.mxu1 %v10705_v31  ;;  %v10714_v20 = vld [vmem:[%s15152_s22 + $0x68] sm:$0xff]  }
0x16b3   :  { %11513 = vmatprep.subr.bf16.mxu1 %v10714_v20 }
0x16b5   :  { %8269 = vmatpush1.bf16.msra.mxu0 %v7922_v12  ;;  %v10706_v12 = vld [vmem:[%s15152_s22 + $0x28] sm:$0xff]  }
0x16b6   :  { %8270 = vmatprep.subr.bf16.mxu0 %v7925_v22  ;;  %11515 = vmatpush3.bf16.msra.mxu1 %v10706_v12  ;;  %v10715_v22 = vld [vmem:[%s15152_s22 + $0x70] sm:$0xff]  }
0x16b7   :  { %11517 = vmatprep.subr.bf16.mxu1 %v10715_v22 }
0x16b9   :  { %8271 = vmatpush1.bf16.msra.mxu0 %v7924_v35  ;;  %v10707_v35 = vld [vmem:[%s15152_s22 + $0x30] sm:$0xff]  }
0x16ba   :  { %8272 = vmatprep.subr.bf16.mxu0 %v7927_v33  ;;  %11519 = vmatpush3.bf16.msra.mxu1 %v10707_v35  ;;  %v10716_v33 = vld [vmem:[%s15152_s22 + $0x78] sm:$0xff]  }
0x16bb   :  { %11521 = vmatprep.subr.bf16.mxu1 %v10716_v33 }
0x16bd   :  { %8273 = vmatpush1.bf16.msra.mxu0 %v7926_v9  ;;  %v10708_v9 = vld [vmem:[%s15152_s22 + $0x38] sm:$0xff]  }
0x16be   :  { %8274 = vmatprep.subr.bf16.mxu0 %v7929_v27  ;;  %11523 = vmatpush3.bf16.msra.mxu1 %v10708_v9 }
0x16bf   :  { %11525 = vmatprep.subr.bf16.mxu1 %v14533_v29 }
0x16c1   :  { %8275 = vmatpush1.bf16.msra.mxu0 %v7928_v7 }
0x16c2   :  { %8276 = vmatprep.subr.bf16.mxu0 %v7931_v10 }
0x16c5   :  { %8277 = vmatpush1.bf16.msra.mxu0 %v7930_v1 }
0x16c6   :  { %8278 = vmatprep.subr.bf16.mxu0 %v7933_v40 }
0x16c9   :  { %8279 = vmatpush1.bf16.msra.mxu0 %v7932_v19 }
0x16ca   :  { %8280 = vmatprep.subr.bf16.mxu0 %v7935_v23 }
0x16cd   :  { %8281 = vmatpush1.bf16.msra.mxu0 %v7934_v24 }
0x16ce   :  { %8282 = vmatprep.subr.bf16.mxu0 %v7937_v47 }
0x16d1   :  { %8283 = vmatpush1.bf16.msra.mxu0 %v7936_v39 }
0x16d2   :  { %8284 = vmatprep.subr.bf16.mxu0 %v7939_v25 }
0x16d5   :  { %8285 = vmatpush1.bf16.msra.mxu0 %v7938_v49 }
0x16d6   :  { %8286 = vmatprep.subr.bf16.mxu0 %v7941_v11 }
0x16d9   :  { %8287 = vmatpush1.bf16.msra.mxu0 %v7940_v50 }
0x16da   :  { %8288 = vmatprep.subr.bf16.mxu0 %v7943_v21 }
0x16dd   :  { %8289 = vmatpush1.bf16.msra.mxu0 %v7942_v59 }
0x16de   :  { %8290 = vmatprep.subr.bf16.mxu0 %v7945_v3 }
0x16e1   :  { %8291 = vmatpush1.bf16.msra.mxu0 %v7944_v4 }
0x16e2   :  { %8292 = vmatprep.subr.bf16.mxu0 %v7947_v38 }
0x16e5   :  { %8293 = vmatpush1.bf16.msra.mxu0 %v7946_v42 }
0x16e6   :  { %8294 = vmatprep.subr.bf16.mxu0 %v7949_v2 }
0x16e9   :  { %8295 = vmatpush1.bf16.msra.mxu0 %v7948_v34 }
0x16ec   :  { %8297 = vmatmul.mubr.bf16.vlgmr.msra.gmra.mrb[80].mxu0 %v8139_v28 }
0x16ed   :  { %9915 = vmatprep.mubr.bf16.mxu0 %v15153_v26 }
0x17bf   :  { %v14585_v37 = vpop.f32.mrb[80].mxu0 }
0x17c0   :  { %v8305_v17 = vsel %vm7115_vm2, %v14585_v37, 0.0  ;;  %v14589_v15 = vpop.f32.mrb[81].mxu0  ;;  %v8319_v28 = vmul.f32 %v14585_v37, %v14585_v37 }
0x17c1   :  { %v8306_v27 = vrot.slane %v8305_v17, 4  ;;  %v8312_v7 = vsel %vm7115_vm2, %v14589_v15, 0.0  ;;  %v8320_v10 = vmul.f32 %v14589_v15, %v14589_v15  ;;  %v8302_v1 = vpop.f32.mrb[82].mxu0 }
0x17c2   :  { %v8313_v40 = vrot.slane %v8312_v7, 4  ;;  %v8303_v19 = vpop.f32.mrb[83].mxu0  ;;  %v8321_v26 = vsel %vm7115_vm2, %v8319_v28, 0.0  ;;  %v12001_v1 = vld [vmem:[#allocation29 + $0x60] ss:$8 sps:$4 sm:$0xff]  }
0x17c3   :  { %v8307_v23 = vadd.f32 %v8306_v27, %v8305_v17  ;;  %v8328_v29 = vsel %vm7115_vm2, %v8320_v10, 0.0  ;;  %v8322_v17 = vrot.slane %v8321_v26, 4  ;;  %v11999_v10 = vld [vmem:[#allocation29 + $0x64] ss:$8 sps:$4 sm:$0xff]   ;;  %v12004_v19 = vld [vmem:[#allocation29 + $0x70] ss:$8 sps:$4 sm:$0xff]  }
0x17c4   :  { %v8314_v24 = vadd.f32 %v8313_v40, %v8312_v7  ;;  %v8329_v47 = vrot.slane %v8328_v29, 4  ;;  %v11998_v7 = vld [vmem:[#allocation29 + $0x50] ss:$8 sps:$4 sm:$0xff]   ;;  %v12002_v40 = vld [vmem:[#allocation29 + $0x74] ss:$8 sps:$4 sm:$0xff]  }
0x17c5   :  { %v8308_v39 = vrot.slane %v8307_v23, 2 }
0x17c6   :  { %v8315_v25 = vrot.slane %v8314_v24, 2  ;;  %v8330_v49 = vadd.f32 %v8329_v47, %v8328_v29 }
0x17c7   :  { %v8309_v11 = vadd.f32 %v8308_v39, %v8307_v23 }
0x17c8   :  { %v8331_v50 = vrot.slane %v8330_v49, 2  ;;  %v8316_v21 = vadd.f32 %v8315_v25, %v8314_v24 }
0x17c9   :  { %v8310_v59 = vrot.slane %v8309_v11, 1 }
0x17ca   :  { %v8317_v3 = vrot.slane %v8316_v21, 1  ;;  %v8332_v4 = vadd.f32 %v8331_v50, %v8330_v49 }
0x17cb   :  { %v8311_v2 = vadd.f32 %v8310_v59, %v8309_v11 }
0x17cc   :  { %v8318_v38 = vadd.f32 %v8317_v3, %v8316_v21  ;;  %v8333_v42 = vrot.slane %v8332_v4, 1  ;;  %v8543_v3 = vld [vmem:[#allocation26] sm:$0x1] }
0x17ce   :  { %8463 = vmatprep.mubr.f32.mxu1 %v8318_v38  ;;  %v8334_v34 = vadd.f32 %v8333_v42, %v8332_v4 }
0x17cf   :  { %8464 = vmatmul.mubr.f32.vlgmr.msra.gmra.mrb[86].mxu1 %v8311_v2  ;;  %v8547_v2 = vld [vmem:[#allocation28] sm:$0x1] }
0x17d0   :  { %11527 = vmatpush3.bf16.msra.mxu1 %v14536_v32  ;;  %8534 = vmatprep.mubr.f32.mxu1 %v8334_v34  ;;  %v8323_v32 = vadd.f32 %v8322_v17, %v8321_v26 }
0x17d1   :  { %11529 = vmatprep.subr.bf16.mxu1 %v14539_v36 }
0x17d2   :  { %v8324_v36 = vrot.slane %v8323_v32, 2 }
0x17d4   :  { %11531 = vmatpush3.bf16.msra.mxu1 %v14545_v13  ;;  %v8325_v27 = vadd.f32 %v8324_v36, %v8323_v32 }
0x17d5   :  { %11533 = vmatprep.subr.bf16.mxu1 %v14548_v55 }
0x17d6   :  { %v8326_v13 = vrot.slane %v8325_v27, 1 }
0x17d8   :  { %11535 = vmatpush3.bf16.msra.mxu1 %v14553_v18  ;;  %v8327_v55 = vadd.f32 %v8326_v13, %v8325_v27  ;;  %v11981_v18 = vld [vmem:[#allocation29 + $0x4] ss:$8 sps:$4 sm:$0xff]  }
0x17d9   :  { %11537 = vmatprep.subr.bf16.mxu1 %v14556_v5  ;;  %v11983_v5 = vld [vmem:[#allocation29] ss:$8 sps:$4 sm:$0xff]  }
0x17dc   :  { %11539 = vmatpush3.bf16.msra.mxu1 %v14561_v57  ;;  %v11984_v57 = vld [vmem:[#allocation29 + $0x14] ss:$8 sps:$4 sm:$0xff]  }
0x17dd   :  { %11541 = vmatprep.subr.bf16.mxu1 %v14564_v14  ;;  %v11986_v14 = vld [vmem:[#allocation29 + $0x10] ss:$8 sps:$4 sm:$0xff]  }
0x17e0   :  { %11543 = vmatpush3.bf16.msra.mxu1 %v10705_v31  ;;  %v11987_v31 = vld [vmem:[#allocation29 + $0x24] ss:$8 sps:$4 sm:$0xff]  }
0x17e1   :  { %11545 = vmatprep.subr.bf16.mxu1 %v10714_v20  ;;  %v11989_v20 = vld [vmem:[#allocation29 + $0x20] ss:$8 sps:$4 sm:$0xff]  }
0x17e4   :  { %11547 = vmatpush3.bf16.msra.mxu1 %v10706_v12  ;;  %v11990_v12 = vld [vmem:[#allocation29 + $0x34] ss:$8 sps:$4 sm:$0xff]  }
0x17e5   :  { %11549 = vmatprep.subr.bf16.mxu1 %v10715_v22  ;;  %v11992_v22 = vld [vmem:[#allocation29 + $0x30] ss:$8 sps:$4 sm:$0xff]  }
0x17e8   :  { %11551 = vmatpush3.bf16.msra.mxu1 %v10707_v35  ;;  %v11993_v35 = vld [vmem:[#allocation29 + $0x44] ss:$8 sps:$4 sm:$0xff]  }
0x17e9   :  { %11553 = vmatprep.subr.bf16.mxu1 %v10716_v33  ;;  %v11995_v33 = vld [vmem:[#allocation29 + $0x40] ss:$8 sps:$4 sm:$0xff]  }
0x17ec   :  { %11555 = vmatpush3.bf16.msra.mxu1 %v10708_v9  ;;  %v11996_v9 = vld [vmem:[#allocation29 + $0x54] ss:$8 sps:$4 sm:$0xff]  }
0x17ed   :  { %11557 = vmatprep.subr.bf16.mxu1 %v11981_v18 }
0x17ef   :  { %8535 = vmatmul.mubr.f32.vlgmr.msra.gmra.mrb[128].mxu1 %v8327_v55 }
0x17f0   :  { %8662 = vmatprep.mubr.f32.mxu1 %v12481_v60  ;;  %11559 = vmatpush1.bf16.msra.mxu1 %v11983_v5 }
0x17f1   :  { %11561 = vmatprep.subr.bf16.mxu1 %v11984_v57 }
0x17f4   :  { %11563 = vmatpush1.bf16.msra.mxu1 %v11986_v14 }
0x17f5   :  { %11565 = vmatprep.subr.bf16.mxu1 %v11987_v31 }
0x17f8   :  { %11567 = vmatpush1.bf16.msra.mxu1 %v11989_v20 }
0x17f9   :  { %11569 = vmatprep.subr.bf16.mxu1 %v11990_v12 }
0x17fc   :  { %11571 = vmatpush1.bf16.msra.mxu1 %v11992_v22 }
0x17fd   :  { %11573 = vmatprep.subr.bf16.mxu1 %v11993_v35 }
0x1800   :  { %11575 = vmatpush1.bf16.msra.mxu1 %v11995_v33 }
0x1801   :  { %11577 = vmatprep.subr.bf16.mxu1 %v11996_v9 }
0x1804   :  { %11579 = vmatpush1.bf16.msra.mxu1 %v11998_v7 }
0x1805   :  { %11581 = vmatprep.subr.bf16.mxu1 %v11999_v10 }
0x1808   :  { %11583 = vmatpush1.bf16.msra.mxu1 %v12001_v1 }
0x1809   :  { %11585 = vmatprep.subr.bf16.mxu1 %v12002_v40 }
0x180c   :  { %11587 = vmatpush1.bf16.msra.mxu1 %v12004_v19 }
0x180d   :  { %11589 = vmatprep.subr.bf16.mxu1 %v11981_v18 }
0x18a2   :  { %v11016_v23 = vpop.f32.mrb[86].mxu1 }
0x18a3   :  { %v11017_v29 = vpop.f32.mrb[87].mxu1 }
0x18a4   :  { %v11018_v24 = vadd.f32 %v11017_v29, %v11016_v23  ;;  %v12015_v23 = vld [vmem:[%s15155_s3 + $0x60] sm:$0xff]  }
0x18a5   :  { %v12016_v29 = vld [vmem:[%s15155_s3 + $0x20] sm:$0xff]  }
0x18a6   :  { %v8469_v47 = vmul.f32 0.125, %v11018_v24  ;;  %v12017_v24 = vld [vmem:[%s15155_s3 + $0x68] sm:$0xff]  }
0x18a8   :  { %v8541_v11 = vmul.f32 %v8469_v47, %v8469_v47 }
0x18c2   :  { %v11051_v39 = vpop.f32.mrb[128].mxu1 }
0x18c3   :  { %v11052_v25 = vpop.f32.mrb[129].mxu1 }
0x18c4   :  { %v11053_v49 = vadd.f32 %v11052_v25, %v11051_v39  ;;  %v12019_v39 = vld [vmem:[%s15155_s3 + $0x70] sm:$0xff]  }
0x18c5   :  { %v12020_v25 = vld [vmem:[%s15155_s3 + $0x30] sm:$0xff]  }
0x18c6   :  { %v8540_v50 = vmul.f32 0.125, %v11053_v49  ;;  %v12021_v49 = vld [vmem:[%s15155_s3 + $0x78] sm:$0xff]  }
0x18c8   :  { %v8542_v21 = vsub.f32 %v8540_v50, %v8541_v11  ;;  %v12022_v11 = vld [vmem:[%s15155_s3 + $0x38] sm:$0xff]   ;;  %v12023_v50 = vld [vmem:[%s15155_s3 + $0xc0] sm:$0xff]  }
0x18ca   :  { %v8544_v59 = vadd.f32 1e-05, %v8542_v21  ;;  %v10419_v21 = vcombine.low %v13681_v45, %v13684_v46  ;;  %v10422_v45 = vcombine.low %v13699_v61, %v13702_v62  ;;  %v10414_v46 = vcombine.low %v13651_v54, %v13654_v8  ;;  %v15164_v61 = vld [vmem:[#allocation147_spill] sm:$0xff]  ;;  %v15165_v8 = vld [vmem:[#allocation146_spill] sm:$0xff] }
0x18cb   :  { %v10425_v54 = vcombine.low %v15165_v8, %v15164_v61  ;;  %v15166_v62 = vld [vmem:[#allocation139_spill] sm:$0xff] }
0x18cc   :  { %12039 = vrsqrt.f32 %v8544_v59  ;;  %v10411_v59 = vcombine.low %v13633_v51, %v13636_v52  ;;  %11142 = vmatprep.subr.bf16.mxu0 %v10419_v21  ;;  %v15156_v51 = vld [vmem:[#allocation143_spill] sm:$0xff]  ;;  %v15157_v52 = vld [vmem:[#allocation142_spill] sm:$0xff] }
0x18cd   :  { %v15194_v21 = vld [vmem:[#allocation207_spill] sm:$0xff] }
0x18ce   :  { %11143 = vmatpush3.bf16.msra.mxu0 %v10411_v59  ;;  %v15195_v59 = vld [vmem:[#allocation206_spill] sm:$0xff] }
0x18d6   :  { %v12040_v4 = vpop.eup %12039 }
0x18d7   :  { %v8546_v38 = vmul.f32 %v12040_v4, %v8543_v3  ;;  %v10420_v3 = vcombine.low %v13687_v63, %v13690_v0  ;;  %v10412_v4 = vcombine.low %v13639_v6, %v13642_v56  ;;  %v10423_v56 = vcombine.low %v15157_v52, %v15156_v51  ;;  %v15158_v63 = vld [vmem:[#allocation135_spill] sm:$0xff]  ;;  %v15159_v0 = vld [vmem:[#allocation134_spill] sm:$0xff]  ;;  %v15200_v52 = vld [vmem:[#allocation193_spill] sm:$0xff] }
0x18d8   :  { %v10415_v6 = vcombine.low %v15159_v0, %v15158_v63  ;;  %v15202_v0 = vld [vmem:[#allocation211_spill] sm:$0xff] }
0x18d9   :  { %8663 = vmatmul.mubr.f32.vlgmr.msra.gmra.mrb[130].mxu1 %v8546_v38  ;;  %v8548_v42 = vmul.f32 %v8546_v38, %v8469_v47  ;;  %v12018_v47 = vld [vmem:[%s15155_s3 + $0x28] sm:$0xff]   ;;  %11144 = vmatprep.subr.bf16.mxu0 %v10420_v3  ;;  %v10421_v38 = vcombine.low %v13693_v43, %v13696_v44  ;;  %v15160_v43 = vld [vmem:[#allocation145_spill] sm:$0xff]  ;;  %v15161_v44 = vld [vmem:[#allocation144_spill] sm:$0xff]  ;;  %v10455_v3 = vcombine.low %v15195_v59, %v15194_v21 }
0x18da   :  { %11591 = vmatpush1.bf16.msra.mxu1 %v11983_v5  ;;  %8743 = vmatprep.mubr.f32.mxu1 %v12481_v60  ;;  %v15219_v59 = vld [vmem:[#allocation73_spill] sm:$0xff] }
0x18db   :  { %11593 = vmatprep.subr.bf16.mxu1 %v11984_v57  ;;  %v8549_v34 = vsub.f32 %v8547_v2, %v8548_v42  ;;  %11145 = vmatpush3.bf16.msra.mxu0 %v10412_v4  ;;  %v10413_v42 = vcombine.low %v13645_v58, %v13648_v53  ;;  %v10424_v53 = vcombine.low %v15161_v44, %v15160_v43  ;;  %v15162_v58 = vld [vmem:[#allocation137_spill] sm:$0xff]  ;;  %v15163_v2 = vld [vmem:[#allocation136_spill] sm:$0xff]  ;;  %v15196_v4 = vld [vmem:[#allocation191_spill] sm:$0xff] }
0x18dc   :  { %11146 = vmatprep.subr.bf16.mxu0 %v10421_v38  ;;  %v15197_v38 = vld [vmem:[#allocation190_spill] sm:$0xff] }
0x18de   :  { %11595 = vmatpush1.bf16.msra.mxu1 %v11986_v14 }
0x18df   :  { %11597 = vmatprep.subr.bf16.mxu1 %v11987_v31  ;;  %11147 = vmatpush3.bf16.msra.mxu0 %v10413_v42  ;;  %v10447_v42 = vcombine.low %v15197_v38, %v15196_v4  ;;  %v15221_v38 = vld [vmem:[#allocation249_spill] sm:$0xff] }
0x18e0   :  { %11148 = vmatprep.subr.bf16.mxu0 %v10422_v45  ;;  %v15198_v45 = vld [vmem:[#allocation209_spill] sm:$0xff] }
0x18e2   :  { %11599 = vmatpush1.bf16.msra.mxu1 %v11989_v20 }
0x18e3   :  { %11601 = vmatprep.subr.bf16.mxu1 %v11990_v12  ;;  %11149 = vmatpush3.bf16.msra.mxu0 %v10414_v46  ;;  %v15199_v46 = vld [vmem:[#allocation208_spill] sm:$0xff] }
0x18e4   :  { %11150 = vmatprep.subr.bf16.mxu0 %v10423_v56  ;;  %v10456_v51 = vcombine.low %v15199_v46, %v15198_v45  ;;  %v15201_v56 = vld [vmem:[#allocation192_spill] sm:$0xff]  ;;  %v15224_v46 = vld [vmem:[#allocation91_spill] sm:$0xff] }
0x18e5   :  { %v10448_v63 = vcombine.low %v15201_v56, %v15200_v52  ;;  %v15226_v56 = vld [vmem:[#allocation75_spill] sm:$0xff] }
0x18e6   :  { %11603 = vmatpush1.bf16.msra.mxu1 %v11992_v22 }
0x18e7   :  { %11605 = vmatprep.subr.bf16.mxu1 %v11993_v35  ;;  %v12005_v35 = vld [vmem:[%s15154_s4] sm:$0xff]   ;;  %11151 = vmatpush3.bf16.msra.mxu0 %v10415_v6 }
0x18e8   :  { %11152 = vmatprep.subr.bf16.mxu0 %v10424_v53  ;;  %v15203_v6 = vld [vmem:[#allocation210_spill] sm:$0xff]  ;;  %v15204_v53 = vld [vmem:[#allocation195_spill] sm:$0xff] }
0x18e9   :  { %v10457_v43 = vcombine.low %v15203_v6, %v15202_v0  ;;  %v15228_v6 = vld [vmem:[#allocation93_spill] sm:$0xff] }
0x18ea   :  { %11607 = vmatpush1.bf16.msra.mxu1 %v11995_v33  ;;  %v12006_v33 = vld [vmem:[%s15154_s4 + $0x8] sm:$0xff]  }
0x18eb   :  { %11609 = vmatprep.subr.bf16.mxu1 %v11996_v9  ;;  %v12008_v9 = vld [vmem:[%s15155_s3] sm:$0xff]  }
0x18ee   :  { %11611 = vmatpush1.bf16.msra.mxu1 %v11998_v7  ;;  %v12009_v7 = vld [vmem:[%s15155_s3 + $0x48] sm:$0xff]  }
0x18ef   :  { %11613 = vmatprep.subr.bf16.mxu1 %v11999_v10  ;;  %v12010_v10 = vld [vmem:[%s15155_s3 + $0x8] sm:$0xff]  }
0x18f2   :  { %11615 = vmatpush1.bf16.msra.mxu1 %v12001_v1  ;;  %v12011_v1 = vld [vmem:[%s15155_s3 + $0x50] sm:$0xff]  }
0x18f3   :  { %11617 = vmatprep.subr.bf16.mxu1 %v12002_v40  ;;  %v12012_v40 = vld [vmem:[%s15155_s3 + $0x10] sm:$0xff]  }
0x18f6   :  { %11619 = vmatpush1.bf16.msra.mxu1 %v12004_v19  ;;  %v12013_v19 = vld [vmem:[%s15155_s3 + $0x58] sm:$0xff]  }
0x18f9   :  { %8744 = vmatmul.mubr.f32.vlgmr.msra.gmra.mrb[132].mxu1 %v8549_v34  ;;  %v10416_v34 = vcombine.low %v15163_v2, %v15162_v58  ;;  %v15205_v58 = vld [vmem:[#allocation194_spill] sm:$0xff] }
0x18fa   :  { %8882 = vmatprep.mubr.bf16.mxu1 %v15118_v16  ;;  %v10449_v2 = vcombine.low %v15205_v58, %v15204_v53  ;;  %v15230_v53 = vld [vmem:[#allocation77_spill] sm:$0xff]  ;;  %v15231_v58 = vld [vmem:[#allocation76_spill] sm:$0xff] }
0x18fb   :  { %11153 = vmatpush3.bf16.msra.mxu0 %v10416_v34 }
0x18fc   :  { %11154 = vmatprep.subr.bf16.mxu0 %v10425_v54 }
0x19ac   :  { %v8664_v60 = vpop.f32.mrb[130].mxu1 }
0x19ad   :  { %v8672_v28 = vrot.slane %v8664_v60, %v14300_v30  ;;  %v8666_v26 = vpop.f32.mrb[131].mxu1  ;;  %v15167_v60 = vld [vmem:[#allocation138_spill] sm:$0xff] }
0x19ae   :  { %v8676_v17 = vrot.slane %v8666_v26, %v14300_v30  ;;  %v15168_v26 = vld [vmem:[#allocation149_spill] sm:$0xff] }
0x19af   :  { %v8677_v32 = vmul.f32 %v8672_v28, %v14585_v37  ;;  %v10417_v28 = vcombine.low %v15167_v60, %v15166_v62  ;;  %v15206_v62 = vld [vmem:[#allocation213_spill] sm:$0xff]  ;;  %v15207_v60 = vld [vmem:[#allocation212_spill] sm:$0xff] }
0x19b0   :  { %v8678_v36 = vmul.f32 %v8676_v17, %v14589_v15  ;;  %v15169_v17 = vld [vmem:[#allocation148_spill] sm:$0xff] }
0x19b1   :  { %11155 = vmatpush3.bf16.msra.mxu0 %v10417_v28  ;;  %v10458_v28 = vcombine.low %v15207_v60, %v15206_v62  ;;  %v15235_v62 = vld [vmem:[#allocation78_spill] sm:$0xff] }
0x19cc   :  { %v8745_v27 = vpop.f32.mrb[132].mxu1 }
0x19cd   :  { %v8753_v13 = vrot.slane %v8745_v27, %v14300_v30  ;;  %v8747_v55 = vpop.f32.mrb[133].mxu1  ;;  %v15171_v27 = vld [vmem:[#allocation140_spill] sm:$0xff] }
0x19ce   :  { %v8757_v18 = vrot.slane %v8747_v55, %v14300_v30  ;;  %v12007_v30 = vld [vmem:[%s15155_s3 + $0x40] sm:$0xff]   ;;  %v15172_v55 = vld [vmem:[#allocation199_spill] sm:$0xff] }
0x19cf   :  { %v8758_v5 = vadd.f32 %v8753_v13, %v8677_v32  ;;  %v10426_v32 = vcombine.low %v15169_v17, %v15168_v26  ;;  %v12024_v17 = vld [vmem:[%s15155_s3 + $0x80] sm:$0xff]  }
0x19d0   :  { %v8759_v57 = vadd.f32 %v8757_v18, %v8678_v36  ;;  %v15170_v36 = vld [vmem:[#allocation141_spill] sm:$0xff]  ;;  %v15173_v18 = vld [vmem:[#allocation198_spill] sm:$0xff] }
0x19d1   :  { %vm8760_vm6 = vcmp.ge.f32.partialorder %v8758_v5, 0.0  ;;  %v8762_v14 = vmul.f32 0.2, %v8758_v5  ;;  %v10418_v13 = vcombine.low %v15171_v27, %v15170_v36  ;;  %11156 = vmatprep.subr.bf16.mxu0 %v10426_v32  ;;  %v15208_v32 = vld [vmem:[#allocation197_spill] sm:$0xff]  ;;  %v15209_v36 = vld [vmem:[#allocation196_spill] sm:$0xff] }
0x19d2   :  { %vm8761_vm7 = vcmp.ge.f32.partialorder %v8759_v57, 0.0  ;;  %v8763_v31 = vmul.f32 0.2, %v8759_v57  ;;  %v10450_v27 = vcombine.low %v15209_v36, %v15208_v32  ;;  %v15238_v32 = vld [vmem:[#allocation81_spill] sm:$0xff]  ;;  %v15239_v36 = vld [vmem:[#allocation80_spill] sm:$0xff] }
0x19d3   :  { %v8764_v20 = vsel %vm8760_vm6, %v8758_v5, %v8762_v14  ;;  %11157 = vmatpush3.bf16.msra.mxu0 %v10418_v13  ;;  %v10451_v5 = vcombine.low %v15173_v18, %v15172_v55  ;;  %v15175_v14 = vld [vmem:[#allocation182_spill] sm:$0xff] }
0x19d4   :  { %v8765_v37 = vsel %vm8761_vm7, %v8759_v57, %v8763_v31  ;;  %v8766_v15 = vpack.c.bf16 %v8764_v20, %v8764_v20  ;;  %v15174_v57 = vld [vmem:[#allocation183_spill] sm:$0xff] }
0x19d5   :  { %v8767_v12 = vpack.c.bf16 %v8765_v37, %v8765_v37  ;;  %v10443_v31 = vcombine.low %v15175_v14, %v15174_v57  ;;  %v15176_v20 = vld [vmem:[#allocation255_spill] sm:$0xff]  ;;  %v15177_v37 = vld [vmem:[#allocation254_spill] sm:$0xff]  ;;  %11186 = vmatprep.subr.bf16.mxu0 %v10451_v5 }
0x19d6   :  { %v8845_v22 = vsel %vm8843_vm8, %v8766_v15, 0  ;;  %v15178_v15 = vpack.c.bf16 %v15176_v20, %v15177_v37  ;;  %v12025_v13 = vld [vmem:[%s15155_s3 + $0xc8] sm:$0xff]   ;;  %v12027_v5 = vld [vmem:[%s15155_s3 + $0xd0] sm:$0xff]  }
0x19d7   :  { %10340 = vmatprep.subr.msk.bf16.mxu1 %vm8843_vm8, %v8767_v12  ;;  %v12026_v55 = vld [vmem:[%s15155_s3 + $0x88] sm:$0xff]  }
0x19d8   :  { %8851 = vmatpush1.bf16.msra.mxu1 %v8845_v22  ;;  %9916 = vmatmul.mubr.bf16.vlgmr.msra.gmra.mrb[84].mxu0 %v15178_v15  ;;  %v15210_v14 = vld [vmem:[#allocation262_spill] sm:$0xff] }
0x19d9   :  { %10345 = vmatprep.subr.msk.bf16.mxu1 %vm8843_vm8, %v8767_v12  ;;  %11187 = vmatpush3.bf16.msra.mxu0 %v10443_v31  ;;  %v15179_v12 = vld [vmem:[#allocation263_spill] sm:$0xff]  ;;  %v15211_v31 = vld [vmem:[#allocation260_spill] sm:$0xff] }
0x19da   :  { %v15212_v20 = vpack.c.bf16 %v15210_v14, %v15211_v31  ;;  %v15244_v31 = vld [vmem:[#allocation101_spill] sm:$0xff] }
0x19db   :  { %10341 = vmatmul.mubr.msk.bf16.vlgmr.msra.gmra.mrb[136].mxu1 %vm8839_vm10, %v12005_v35 }
0x19dc   :  { %8907 = vmatpush1.bf16.msra.mxu1 %v8845_v22  ;;  %8938 = vmatprep.mubr.bf16.mxu1 %v15118_v16  ;;  %v12014_v16 = vld [vmem:[%s15155_s3 + $0x18] sm:$0xff]  }
0x19dd   :  { %11054 = vmatprep.subr.bf16.mxu1 %v12007_v30  ;;  %v15180_v22 = vld [vmem:[#allocation261_spill] sm:$0xff] }
0x19de   :  { %v15181_v35 = vpack.c.bf16 %v15179_v12, %v15180_v22  ;;  %v15182_v30 = vld [vmem:[#allocation201_spill] sm:$0xff]  ;;  %v12028_v22 = vld [vmem:[%s15155_s3 + $0x90] sm:$0xff]  }
0x19e0   :  { %9997 = vmatprep.mubr.bf16.mxu0 %v15181_v35 }
0x19e3   :  { %10346 = vmatmul.mubr.msk.bf16.vlgmr.msra.gmra.mrb[140].mxu1 %vm8839_vm10, %v12006_v33  ;;  %v15183_v33 = vld [vmem:[#allocation200_spill] sm:$0xff] }
0x19e4   :  { %11055 = vmatpush3.bf16.msra.mxu1 %v12008_v9  ;;  %v10452_v9 = vcombine.low %v15183_v33, %v15182_v30  ;;  %v12029_v30 = vld [vmem:[%s15155_s3 + $0xd8] sm:$0xff]  }
0x19e5   :  { %11056 = vmatprep.subr.bf16.mxu1 %v12009_v7  ;;  %v15184_v7 = vld [vmem:[#allocation185_spill] sm:$0xff] }
0x19e6   :  { %11188 = vmatprep.subr.bf16.mxu0 %v10452_v9  ;;  %v12030_v33 = vld [vmem:[%s15155_s3 + $0x98] sm:$0xff]   ;;  %v12031_v9 = vld [vmem:[%s15155_s3 + $0xe0] sm:$0xff]  }
0x19e8   :  { %11057 = vmatpush3.bf16.msra.mxu1 %v12010_v10  ;;  %v15185_v10 = vld [vmem:[#allocation184_spill] sm:$0xff] }
0x19e9   :  { %11058 = vmatprep.subr.bf16.mxu1 %v12011_v1  ;;  %v10444_v1 = vcombine.low %v15185_v10, %v15184_v7  ;;  %v12032_v7 = vld [vmem:[%s15155_s3 + $0xa0] sm:$0xff]   ;;  %v12033_v10 = vld [vmem:[%s15155_s3 + $0xe8] sm:$0xff]  }
0x19eb   :  { %11189 = vmatpush3.bf16.msra.mxu0 %v10444_v1  ;;  %v12034_v1 = vld [vmem:[%s15155_s3 + $0xa8] sm:$0xff]  }
0x19ec   :  { %11059 = vmatpush3.bf16.msra.mxu1 %v12012_v40  ;;  %v15186_v40 = vld [vmem:[#allocation203_spill] sm:$0xff] }
0x19ed   :  { %11060 = vmatprep.subr.bf16.mxu1 %v12013_v19  ;;  %v15187_v19 = vld [vmem:[#allocation202_spill] sm:$0xff] }
0x19f0   :  { %11061 = vmatpush3.bf16.msra.mxu1 %v12014_v16  ;;  %v10453_v16 = vcombine.low %v15187_v19, %v15186_v40  ;;  %v12035_v40 = vld [vmem:[%s15155_s3 + $0xf0] sm:$0xff]  }
0x19f1   :  { %11062 = vmatprep.subr.bf16.mxu1 %v12015_v23  ;;  %v15188_v23 = vld [vmem:[#allocation187_spill] sm:$0xff] }
0x19f2   :  { %11190 = vmatprep.subr.bf16.mxu0 %v10453_v16  ;;  %v12036_v19 = vld [vmem:[%s15155_s3 + $0xb0] sm:$0xff]   ;;  %v12037_v16 = vld [vmem:[%s15155_s3 + $0xf8] sm:$0xff]  }
0x19f4   :  { %11063 = vmatpush3.bf16.msra.mxu1 %v12016_v29  ;;  %v15189_v29 = vld [vmem:[#allocation186_spill] sm:$0xff] }
0x19f5   :  { %11064 = vmatprep.subr.bf16.mxu1 %v12017_v24  ;;  %v10445_v24 = vcombine.low %v15189_v29, %v15188_v23  ;;  %v12038_v23 = vld [vmem:[%s15155_s3 + $0xb8] sm:$0xff]   ;;  %v15213_v29 = vld [vmem:[#allocation87_spill] sm:$0xff] }
0x19f7   :  { %11191 = vmatpush3.bf16.msra.mxu0 %v10445_v24  ;;  %v15214_v24 = vld [vmem:[#allocation86_spill] sm:$0xff] }
0x19f8   :  { %11065 = vmatpush3.bf16.msra.mxu1 %v12018_v47  ;;  %v15190_v47 = vld [vmem:[#allocation205_spill] sm:$0xff] }
0x19f9   :  { %11066 = vmatprep.subr.bf16.mxu1 %v12019_v39  ;;  %v15191_v39 = vld [vmem:[#allocation204_spill] sm:$0xff] }
0x19fc   :  { %11067 = vmatpush3.bf16.msra.mxu1 %v12020_v25  ;;  %v10454_v25 = vcombine.low %v15191_v39, %v15190_v47  ;;  %v10387_v47 = vcombine.low %v15214_v24, %v15213_v29  ;;  %v15215_v39 = vld [vmem:[#allocation71_spill] sm:$0xff]  ;;  %v15257_v24 = vld [vmem:[#allocation105_spill] sm:$0xff] }
0x19fd   :  { %11068 = vmatprep.subr.bf16.mxu1 %v12021_v49  ;;  %v15192_v49 = vld [vmem:[#allocation189_spill] sm:$0xff] }
0x19fe   :  { %11192 = vmatprep.subr.bf16.mxu0 %v10454_v25  ;;  %v15216_v25 = vld [vmem:[#allocation70_spill] sm:$0xff] }
0x1a00   :  { %11069 = vmatpush3.bf16.msra.mxu1 %v12022_v11  ;;  %v15193_v11 = vld [vmem:[#allocation188_spill] sm:$0xff] }
0x1a01   :  { %11076 = vmatprep.subr.bf16.mxu1 %v12023_v50  ;;  %v10446_v50 = vcombine.low %v15193_v11, %v15192_v49  ;;  %v10379_v49 = vcombine.low %v15216_v25, %v15215_v39  ;;  %v15217_v11 = vld [vmem:[#allocation89_spill] sm:$0xff] }
0x1a02   :  { %v15259_v25 = vld [vmem:[#allocation253_spill] sm:$0xff] }
0x1a03   :  { %11193 = vmatpush3.bf16.msra.mxu0 %v10446_v50  ;;  %v15218_v50 = vld [vmem:[#allocation88_spill] sm:$0xff] }
0x1a04   :  { %11194 = vmatprep.subr.bf16.mxu0 %v10455_v3  ;;  %v10388_v21 = vcombine.low %v15218_v50, %v15217_v11  ;;  %v15220_v3 = vld [vmem:[#allocation72_spill] sm:$0xff]  ;;  %v15262_v50 = vld [vmem:[#allocation123_spill] sm:$0xff] }
0x1a05   :  { %v10380_v4 = vcombine.low %v15220_v3, %v15219_v59  ;;  %v15264_v3 = vld [vmem:[#allocation107_spill] sm:$0xff] }
0x1a07   :  { %11195 = vmatpush3.bf16.msra.mxu0 %v10447_v42  ;;  %v15222_v42 = vld [vmem:[#allocation247_spill] sm:$0xff] }
0x1a08   :  { %11196 = vmatprep.subr.bf16.mxu0 %v10456_v51  ;;  %v15223_v45 = vpack.c.bf16 %v15221_v38, %v15222_v42  ;;  %v15225_v51 = vld [vmem:[#allocation90_spill] sm:$0xff]  ;;  %v15266_v42 = vld [vmem:[#allocation125_spill] sm:$0xff] }
0x1a09   :  { %v10389_v52 = vcombine.low %v15225_v51, %v15224_v46  ;;  %v15268_v51 = vld [vmem:[#allocation109_spill] sm:$0xff] }
0x1a0b   :  { %11197 = vmatpush3.bf16.msra.mxu0 %v10448_v63  ;;  %v15227_v63 = vld [vmem:[#allocation74_spill] sm:$0xff] }
0x1a0c   :  { %11198 = vmatprep.subr.bf16.mxu0 %v10457_v43  ;;  %v10381_v0 = vcombine.low %v15227_v63, %v15226_v56  ;;  %v15229_v43 = vld [vmem:[#allocation92_spill] sm:$0xff]  ;;  %v15270_v63 = vld [vmem:[#allocation127_spill] sm:$0xff] }
0x1a0f   :  { %11199 = vmatpush3.bf16.msra.mxu0 %v10449_v2  ;;  %v10382_v2 = vcombine.low %v15231_v58, %v15230_v53  ;;  %v15274_v58 = vld [vmem:[#allocation129_spill] sm:$0xff] }
0x1a10   :  { %11200 = vmatprep.subr.bf16.mxu0 %v10458_v28  ;;  %v15236_v28 = vld [vmem:[#allocation97_spill] sm:$0xff] }
0x1a13   :  { %11201 = vmatpush3.bf16.msra.mxu0 %v10450_v27  ;;  %v10384_v27 = vcombine.low %v15239_v36, %v15238_v32  ;;  %v15282_v36 = vld [vmem:[#allocation133_spill] sm:$0xff] }
0x1a16   :  { %9998 = vmatmul.mubr.bf16.vlgmr.msra.gmra.mrb[88].mxu0 %v15212_v20  ;;  %v15245_v20 = vld [vmem:[#allocation100_spill] sm:$0xff] }
0x1aae   :  { %v8884_v44 = vpop.f32.mrb[136].mxu1 }
0x1aaf   :  { %v8886_v34 = vpop.f32.mrb[137].mxu1 }
0x1ab0   :  { %v8888_v61 = vpop.f32.mrb[138].mxu1 }
0x1ab1   :  { %v8893_v8 = vpack.c.bf16 %v8888_v61, %v8884_v44  ;;  %v8890_v54 = vpop.f32.mrb[139].mxu1  ;;  %v10390_v44 = vcombine.low %v15229_v43, %v15228_v6  ;;  %v15233_v61 = vld [vmem:[#allocation94_spill] sm:$0xff]  ;;  %v15272_v43 = vld [vmem:[#allocation111_spill] sm:$0xff] }
0x1ab2   :  { %v8894_v26 = vpack.c.bf16 %v8890_v54, %v8886_v34  ;;  %v15232_v34 = vld [vmem:[#allocation95_spill] sm:$0xff] }
0x1ab3   :  { %v15234_v54 = vld [vmem:[#allocation79_spill] sm:$0xff] }
0x1ab4   :  { %9175 = vmatprep.mubr.bf16.mxu1 %v8894_v26  ;;  %v10383_v60 = vcombine.low %v15235_v62, %v15234_v54  ;;  %v15237_v26 = vld [vmem:[#allocation96_spill] sm:$0xff]  ;;  %v15278_v62 = vld [vmem:[#allocation131_spill] sm:$0xff] }
0x1ab5   :  { %9176 = vmatmul.mubr.bf16.vlgmr.msra.gmra.mrb[144].mxu1 %v8893_v8  ;;  %v10391_v8 = vcombine.low %v15233_v61, %v15232_v34  ;;  %v15276_v61 = vld [vmem:[#allocation113_spill] sm:$0xff] }
0x1ab6   :  { %11077 = vmatpush3.bf16.msra.mxu1 %v12024_v17  ;;  %v8940_v18 = vpop.f32.mrb[140].mxu1  ;;  %v10392_v17 = vcombine.low %v15237_v26, %v15236_v28  ;;  %v15280_v26 = vld [vmem:[#allocation115_spill] sm:$0xff] }
0x1ab7   :  { %11078 = vmatprep.subr.bf16.mxu1 %v12025_v13  ;;  %v8942_v57 = vpop.f32.mrb[141].mxu1  ;;  %v15240_v13 = vld [vmem:[#allocation99_spill] sm:$0xff] }
0x1ab8   :  { %v8944_v37 = vpop.f32.mrb[142].mxu1 }
0x1ab9   :  { %v8949_v15 = vpack.c.bf16 %v8944_v37, %v8940_v18  ;;  %v8946_v12 = vpop.f32.mrb[143].mxu1  ;;  %v10394_v37 = vcombine.low %v15245_v20, %v15244_v31  ;;  %v15288_v20 = vld [vmem:[#allocation151_spill] sm:$0xff] }
0x1aba   :  { %11079 = vmatpush3.bf16.msra.mxu1 %v12026_v55  ;;  %v8950_v35 = vpack.c.bf16 %v8946_v12, %v8942_v57  ;;  %v15241_v55 = vld [vmem:[#allocation98_spill] sm:$0xff]  ;;  %v15247_v12 = vld [vmem:[#allocation84_spill] sm:$0xff] }
0x1abb   :  { %11080 = vmatprep.subr.bf16.mxu1 %v12027_v5  ;;  %v10393_v18 = vcombine.low %v15241_v55, %v15240_v13  ;;  %v15242_v5 = vld [vmem:[#allocation83_spill] sm:$0xff]  ;;  %v15243_v57 = vld [vmem:[#allocation82_spill] sm:$0xff]  ;;  %v15284_v55 = vld [vmem:[#allocation117_spill] sm:$0xff] }
0x1abc   :  { %9216 = vmatprep.mubr.bf16.mxu1 %v8950_v35  ;;  %v10385_v14 = vcombine.low %v15243_v57, %v15242_v5  ;;  %v15248_v35 = vld [vmem:[#allocation119_spill] sm:$0xff] }
0x1abd   :  { %v15286_v57 = vld [vmem:[#allocation167_spill] sm:$0xff] }
0x1abe   :  { %11081 = vmatpush3.bf16.msra.mxu1 %v12028_v22 }
0x1abf   :  { %11082 = vmatprep.subr.bf16.mxu1 %v12029_v30  ;;  %v15249_v30 = vld [vmem:[#allocation118_spill] sm:$0xff] }
0x1ac2   :  { %11083 = vmatpush3.bf16.msra.mxu1 %v12030_v33  ;;  %v10403_v33 = vcombine.low %v15249_v30, %v15248_v35  ;;  %v15292_v30 = vld [vmem:[#allocation252_spill] sm:$0xff] }
0x1ac3   :  { %11084 = vmatprep.subr.bf16.mxu1 %v12031_v9  ;;  %v15250_v9 = vld [vmem:[#allocation103_spill] sm:$0xff] }
0x1ac6   :  { %11085 = vmatpush3.bf16.msra.mxu1 %v12032_v7  ;;  %v15251_v7 = vld [vmem:[#allocation102_spill] sm:$0xff] }
0x1ac7   :  { %11086 = vmatprep.subr.bf16.mxu1 %v12033_v10  ;;  %v10395_v10 = vcombine.low %v15251_v7, %v15250_v9  ;;  %v15295_v7 = vld [vmem:[#allocation153_spill] sm:$0xff] }
0x1aca   :  { %11087 = vmatpush3.bf16.msra.mxu1 %v12034_v1  ;;  %v15252_v1 = vld [vmem:[#allocation121_spill] sm:$0xff] }
0x1acb   :  { %11088 = vmatprep.subr.bf16.mxu1 %v12035_v40  ;;  %v15253_v40 = vld [vmem:[#allocation120_spill] sm:$0xff] }
0x1ace   :  { %11089 = vmatpush3.bf16.msra.mxu1 %v12036_v19  ;;  %v10404_v19 = vcombine.low %v15253_v40, %v15252_v1  ;;  %v15297_v40 = vld [vmem:[#allocation259_spill] sm:$0xff] }
0x1acf   :  { %11090 = vmatprep.subr.bf16.mxu1 %v12037_v16  ;;  %v15254_v16 = vld [vmem:[#allocation248_spill] sm:$0xff] }
0x1ad2   :  { %11091 = vmatpush3.bf16.msra.mxu1 %v12038_v23  ;;  %v15255_v23 = vld [vmem:[#allocation246_spill] sm:$0xff] }
0x1ad3   :  { %11098 = vmatprep.subr.bf16.mxu1 %v10387_v47  ;;  %v15256_v29 = vpack.c.bf16 %v15254_v16, %v15255_v23  ;;  %v15258_v47 = vld [vmem:[#allocation104_spill] sm:$0xff]  ;;  %v15300_v23 = vld [vmem:[#allocation171_spill] sm:$0xff] }
0x1ad4   :  { %v10396_v39 = vcombine.low %v15258_v47, %v15257_v24  ;;  %v15302_v47 = vld [vmem:[#allocation155_spill] sm:$0xff] }
0x1ad5   :  { %9217 = vmatmul.mubr.bf16.vlgmr.msra.gmra.mrb[148].mxu1 %v8949_v15  ;;  %v15246_v15 = vld [vmem:[#allocation85_spill] sm:$0xff] }
0x1ad6   :  { %11099 = vmatpush3.bf16.msra.mxu1 %v10379_v49  ;;  %9833 = vmatprep.mubr.bf16.mxu1 %v15223_v45  ;;  %v10386_v22 = vcombine.low %v15247_v12, %v15246_v15  ;;  %v15260_v49 = vld [vmem:[#allocation251_spill] sm:$0xff]  ;;  %v15267_v45 = vld [vmem:[#allocation124_spill] sm:$0xff]  ;;  %v15290_v12 = vld [vmem:[#allocation169_spill] sm:$0xff] }
0x1ad7   :  { %11100 = vmatprep.subr.bf16.mxu1 %v10388_v21  ;;  %v15261_v11 = vpack.c.bf16 %v15259_v25, %v15260_v49  ;;  %v15263_v21 = vld [vmem:[#allocation122_spill] sm:$0xff]  ;;  %v10406_v46 = vcombine.low %v15267_v45, %v15266_v42  ;;  %v15304_v49 = vld [vmem:[#allocation173_spill] sm:$0xff]  ;;  %v15310_v45 = vld [vmem:[#allocation159_spill] sm:$0xff] }
0x1ad8   :  { %v10405_v59 = vcombine.low %v15263_v21, %v15262_v50  ;;  %v15306_v21 = vld [vmem:[#allocation157_spill] sm:$0xff] }
0x1ada   :  { %11101 = vmatpush3.bf16.msra.mxu1 %v10380_v4  ;;  %v15265_v4 = vld [vmem:[#allocation106_spill] sm:$0xff] }
0x1adb   :  { %11102 = vmatprep.subr.bf16.mxu1 %v10389_v52  ;;  %v10397_v38 = vcombine.low %v15265_v4, %v15264_v3  ;;  %v15269_v52 = vld [vmem:[#allocation108_spill] sm:$0xff]  ;;  %v15308_v4 = vld [vmem:[#allocation175_spill] sm:$0xff] }
0x1adc   :  { %v10398_v56 = vcombine.low %v15269_v52, %v15268_v51  ;;  %v15312_v52 = vld [vmem:[#allocation177_spill] sm:$0xff] }
0x1ade   :  { %11103 = vmatpush3.bf16.msra.mxu1 %v10381_v0  ;;  %v15271_v0 = vld [vmem:[#allocation126_spill] sm:$0xff] }
0x1adf   :  { %11104 = vmatprep.subr.bf16.mxu1 %v10390_v44  ;;  %v10407_v6 = vcombine.low %v15271_v0, %v15270_v63  ;;  %v15273_v44 = vld [vmem:[#allocation110_spill] sm:$0xff]  ;;  %v15314_v0 = vld [vmem:[#allocation161_spill] sm:$0xff] }
0x1ae0   :  { %v10399_v53 = vcombine.low %v15273_v44, %v15272_v43  ;;  %v15316_v44 = vld [vmem:[#allocation179_spill] sm:$0xff] }
0x1ae2   :  { %11105 = vmatpush3.bf16.msra.mxu1 %v10382_v2  ;;  %v15275_v2 = vld [vmem:[#allocation128_spill] sm:$0xff] }
0x1ae3   :  { %11106 = vmatprep.subr.bf16.mxu1 %v10391_v8  ;;  %v10408_v34 = vcombine.low %v15275_v2, %v15274_v58  ;;  %v15277_v8 = vld [vmem:[#allocation112_spill] sm:$0xff]  ;;  %v15318_v2 = vld [vmem:[#allocation163_spill] sm:$0xff] }
0x1ae4   :  { %v10400_v54 = vcombine.low %v15277_v8, %v15276_v61  ;;  %v15320_v8 = vld [vmem:[#allocation181_spill] sm:$0xff] }
0x1ae6   :  { %11107 = vmatpush3.bf16.msra.mxu1 %v10383_v60  ;;  %v15279_v60 = vld [vmem:[#allocation130_spill] sm:$0xff] }
0x1ae7   :  { %11108 = vmatprep.subr.bf16.mxu1 %v10392_v17  ;;  %v10409_v28 = vcombine.low %v15279_v60, %v15278_v62  ;;  %v15281_v17 = vld [vmem:[#allocation114_spill] sm:$0xff]  ;;  %v15322_v60 = vld [vmem:[#allocation165_spill] sm:$0xff] }
0x1ae8   :  { %v10401_v32 = vcombine.low %v15281_v17, %v15280_v26  ;;  %v15324_v17 = vld [vmem:[#allocation231_spill] sm:$0xff] }
0x1aea   :  { %11109 = vmatpush3.bf16.msra.mxu1 %v10384_v27  ;;  %v15283_v27 = vld [vmem:[#allocation132_spill] sm:$0xff] }
0x1aeb   :  { %11110 = vmatprep.subr.bf16.mxu1 %v10393_v18  ;;  %v10410_v13 = vcombine.low %v15283_v27, %v15282_v36  ;;  %v15285_v18 = vld [vmem:[#allocation116_spill] sm:$0xff]  ;;  %v15326_v27 = vld [vmem:[#allocation215_spill] sm:$0xff] }
0x1aec   :  { %v10402_v5 = vcombine.low %v15285_v18, %v15284_v55  ;;  %v15328_v18 = vld [vmem:[#allocation233_spill] sm:$0xff] }
0x1aee   :  { %11111 = vmatpush3.bf16.msra.mxu1 %v10385_v14  ;;  %v15287_v14 = vld [vmem:[#allocation166_spill] sm:$0xff] }
0x1aef   :  { %11112 = vmatprep.subr.bf16.mxu1 %v10394_v37  ;;  %v10435_v31 = vcombine.low %v15287_v14, %v15286_v57  ;;  %v15289_v37 = vld [vmem:[#allocation150_spill] sm:$0xff] }
0x1af0   :  { %v10427_v15 = vcombine.low %v15289_v37, %v15288_v20  ;;  %v15330_v14 = vld [vmem:[#allocation258_spill] sm:$0xff]  ;;  %v15333_v37 = vld [vmem:[#allocation217_spill] sm:$0xff] }
0x1af2   :  { %11113 = vmatpush3.bf16.msra.mxu1 %v10386_v22  ;;  %v15291_v22 = vld [vmem:[#allocation168_spill] sm:$0xff] }
0x1af3   :  { %11120 = vmatprep.subr.bf16.mxu1 %v10403_v33  ;;  %v10436_v35 = vcombine.low %v15291_v22, %v15290_v12  ;;  %v15293_v33 = vld [vmem:[#allocation250_spill] sm:$0xff]  ;;  %v15335_v22 = vld [vmem:[#allocation267_spill] sm:$0xff] }
0x1af4   :  { %v15294_v9 = vpack.c.bf16 %v15292_v30, %v15293_v33  ;;  %v15338_v33 = vld [vmem:[#allocation235_spill] sm:$0xff] }
0x1af5   :  { %9834 = vmatmul.mubr.bf16.vlgmr.msra.gmra.mrb[152].mxu1 %v15256_v29  ;;  %v15301_v29 = vld [vmem:[#allocation170_spill] sm:$0xff] }
0x1af6   :  { %11121 = vmatpush3.bf16.msra.mxu1 %v10395_v10  ;;  %9874 = vmatprep.mubr.bf16.mxu1 %v15261_v11  ;;  %v15296_v10 = vld [vmem:[#allocation152_spill] sm:$0xff]  ;;  %v10437_v24 = vcombine.low %v15301_v29, %v15300_v23  ;;  %v15344_v29 = vld [vmem:[#allocation221_spill] sm:$0xff] }
0x1af7   :  { %11122 = vmatprep.subr.bf16.mxu1 %v10404_v19  ;;  %v10428_v1 = vcombine.low %v15296_v10, %v15295_v7  ;;  %v15298_v19 = vld [vmem:[#allocation257_spill] sm:$0xff]  ;;  %v15305_v11 = vld [vmem:[#allocation172_spill] sm:$0xff]  ;;  %v15340_v10 = vld [vmem:[#allocation219_spill] sm:$0xff] }
0x1af8   :  { %v15299_v16 = vpack.c.bf16 %v15297_v40, %v15298_v19  ;;  %v10438_v50 = vcombine.low %v15305_v11, %v15304_v49  ;;  %v15342_v19 = vld [vmem:[#allocation237_spill] sm:$0xff]  ;;  %v15348_v11 = vld [vmem:[#allocation223_spill] sm:$0xff] }
0x1afa   :  { %11123 = vmatpush3.bf16.msra.mxu1 %v10396_v39  ;;  %v15303_v39 = vld [vmem:[#allocation154_spill] sm:$0xff] }
0x1afb   :  { %11124 = vmatprep.subr.bf16.mxu1 %v10405_v59  ;;  %v10429_v25 = vcombine.low %v15303_v39, %v15302_v47  ;;  %v15307_v59 = vld [vmem:[#allocation156_spill] sm:$0xff]  ;;  %v15346_v39 = vld [vmem:[#allocation239_spill] sm:$0xff] }
0x1afc   :  { %v10430_v3 = vcombine.low %v15307_v59, %v15306_v21  ;;  %v15350_v59 = vld [vmem:[#allocation241_spill] sm:$0xff] }
0x1afe   :  { %11125 = vmatpush3.bf16.msra.mxu1 %v10397_v38  ;;  %v15309_v38 = vld [vmem:[#allocation174_spill] sm:$0xff] }
0x1aff   :  { %11126 = vmatprep.subr.bf16.mxu1 %v10406_v46  ;;  %v10439_v42 = vcombine.low %v15309_v38, %v15308_v4  ;;  %v15311_v46 = vld [vmem:[#allocation158_spill] sm:$0xff]  ;;  %v15352_v38 = vld [vmem:[#allocation225_spill] sm:$0xff] }
0x1b00   :  { %v10431_v51 = vcombine.low %v15311_v46, %v15310_v45  ;;  %v15354_v46 = vld [vmem:[#allocation243_spill] sm:$0xff] }
0x1b02   :  { %11127 = vmatpush3.bf16.msra.mxu1 %v10398_v56  ;;  %v15313_v56 = vld [vmem:[#allocation176_spill] sm:$0xff] }
0x1b03   :  { %11128 = vmatprep.subr.bf16.mxu1 %v10407_v6  ;;  %v10440_v63 = vcombine.low %v15313_v56, %v15312_v52  ;;  %v15315_v6 = vld [vmem:[#allocation160_spill] sm:$0xff]  ;;  %v15356_v56 = vld [vmem:[#allocation227_spill] sm:$0xff] }
0x1b04   :  { %v10432_v43 = vcombine.low %v15315_v6, %v15314_v0  ;;  %v15358_v6 = vld [vmem:[#allocation245_spill] sm:$0xff] }
0x1b06   :  { %11129 = vmatpush3.bf16.msra.mxu1 %v10399_v53  ;;  %v15317_v53 = vld [vmem:[#allocation178_spill] sm:$0xff] }
0x1b07   :  { %11130 = vmatprep.subr.bf16.mxu1 %v10408_v34  ;;  %v10441_v58 = vcombine.low %v15317_v53, %v15316_v44  ;;  %v15319_v34 = vld [vmem:[#allocation162_spill] sm:$0xff]  ;;  %v15360_v53 = vld [vmem:[#allocation229_spill] sm:$0xff] }
0x1b08   :  { %v10433_v61 = vcombine.low %v15319_v34, %v15318_v2  ;;  %v15362_v34 = vld [vmem:[#allocation266_spill] sm:$0xff] }
0x1b0a   :  { %11131 = vmatpush3.bf16.msra.mxu1 %v10400_v54  ;;  %v15321_v54 = vld [vmem:[#allocation180_spill] sm:$0xff] }
0x1b0b   :  { %11132 = vmatprep.subr.bf16.mxu1 %v10409_v28  ;;  %v10442_v62 = vcombine.low %v15321_v54, %v15320_v8  ;;  %v15323_v28 = vld [vmem:[#allocation164_spill] sm:$0xff]  ;;  %v11158_v54 = vpop.f32.mrb[84].mxu0 }
0x1b0c   :  { %v10434_v26 = vcombine.low %v15323_v28, %v15322_v60 }
0x1b0e   :  { %11133 = vmatpush3.bf16.msra.mxu1 %v10401_v32  ;;  %v15325_v32 = vld [vmem:[#allocation230_spill] sm:$0xff] }
0x1b0f   :  { %11134 = vmatprep.subr.bf16.mxu1 %v10410_v13  ;;  %v10467_v36 = vcombine.low %v15325_v32, %v15324_v17  ;;  %v15327_v13 = vld [vmem:[#allocation214_spill] sm:$0xff] }
0x1b10   :  { %v10459_v55 = vcombine.low %v15327_v13, %v15326_v27 }
0x1b12   :  { %11135 = vmatpush3.bf16.msra.mxu1 %v10402_v5  ;;  %v15329_v5 = vld [vmem:[#allocation232_spill] sm:$0xff] }
0x1b13   :  { %11164 = vmatprep.subr.bf16.mxu1 %v10435_v31  ;;  %v10468_v57 = vcombine.low %v15329_v5, %v15328_v18  ;;  %v15331_v31 = vld [vmem:[#allocation256_spill] sm:$0xff] }
0x1b14   :  { %v15332_v20 = vpack.c.bf16 %v15330_v14, %v15331_v31 }
0x1b15   :  { %9875 = vmatmul.mubr.bf16.vlgmr.msra.gmra.mrb[156].mxu1 %v15294_v9  ;;  %v15339_v9 = vld [vmem:[#allocation234_spill] sm:$0xff] }
0x1b16   :  { %11165 = vmatpush3.bf16.msra.mxu1 %v10427_v15  ;;  %9956 = vmatprep.mubr.bf16.mxu1 %v15299_v16  ;;  %v15334_v15 = vld [vmem:[#allocation216_spill] sm:$0xff]  ;;  %v10469_v7 = vcombine.low %v15339_v9, %v15338_v33 }
0x1b17   :  { %11166 = vmatprep.subr.bf16.mxu1 %v10436_v35  ;;  %v10460_v12 = vcombine.low %v15334_v15, %v15333_v37  ;;  %v15336_v35 = vld [vmem:[#allocation265_spill] sm:$0xff]  ;;  %v15343_v16 = vld [vmem:[#allocation236_spill] sm:$0xff] }
0x1b18   :  { %v15337_v30 = vpack.c.bf16 %v15335_v22, %v15336_v35  ;;  %v10470_v23 = vcombine.low %v15343_v16, %v15342_v19 }
0x1b1a   :  { %11167 = vmatpush3.bf16.msra.mxu1 %v10428_v1  ;;  %v15341_v1 = vld [vmem:[#allocation218_spill] sm:$0xff] }
0x1b1b   :  { %11168 = vmatprep.subr.bf16.mxu1 %v10437_v24  ;;  %v10461_v40 = vcombine.low %v15341_v1, %v15340_v10  ;;  %v15345_v24 = vld [vmem:[#allocation220_spill] sm:$0xff] }
0x1b1c   :  { %v10462_v47 = vcombine.low %v15345_v24, %v15344_v29 }
0x1b1e   :  { %11169 = vmatpush3.bf16.msra.mxu1 %v10429_v25  ;;  %v15347_v25 = vld [vmem:[#allocation238_spill] sm:$0xff] }
0x1b1f   :  { %11170 = vmatprep.subr.bf16.mxu1 %v10438_v50  ;;  %v10471_v49 = vcombine.low %v15347_v25, %v15346_v39  ;;  %v15349_v50 = vld [vmem:[#allocation222_spill] sm:$0xff] }
0x1b20   :  { %v10463_v21 = vcombine.low %v15349_v50, %v15348_v11 }
0x1b22   :  { %11171 = vmatpush3.bf16.msra.mxu1 %v10430_v3  ;;  %v15351_v3 = vld [vmem:[#allocation240_spill] sm:$0xff] }
0x1b23   :  { %11172 = vmatprep.subr.bf16.mxu1 %v10439_v42  ;;  %v10472_v4 = vcombine.low %v15351_v3, %v15350_v59  ;;  %v15353_v42 = vld [vmem:[#allocation224_spill] sm:$0xff] }
0x1b24   :  { %v10464_v45 = vcombine.low %v15353_v42, %v15352_v38 }
0x1b26   :  { %11173 = vmatpush3.bf16.msra.mxu1 %v10431_v51  ;;  %v15355_v51 = vld [vmem:[#allocation242_spill] sm:$0xff] }
0x1b27   :  { %11174 = vmatprep.subr.bf16.mxu1 %v10440_v63  ;;  %v10473_v52 = vcombine.low %v15355_v51, %v15354_v46  ;;  %v15357_v63 = vld [vmem:[#allocation226_spill] sm:$0xff] }
0x1b28   :  { %v10465_v0 = vcombine.low %v15357_v63, %v15356_v56 }
0x1b2a   :  { %11175 = vmatpush3.bf16.msra.mxu1 %v10432_v43  ;;  %v15359_v43 = vld [vmem:[#allocation244_spill] sm:$0xff] }
0x1b2b   :  { %11176 = vmatprep.subr.bf16.mxu1 %v10441_v58  ;;  %v10474_v44 = vcombine.low %v15359_v43, %v15358_v6  ;;  %v15361_v58 = vld [vmem:[#allocation228_spill] sm:$0xff] }
0x1b2c   :  { %v10466_v2 = vcombine.low %v15361_v58, %v15360_v53 }
0x1b2e   :  { %11177 = vmatpush3.bf16.msra.mxu1 %v10433_v61  ;;  %v15363_v61 = vld [vmem:[#allocation264_spill] sm:$0xff] }
0x1b2f   :  { %11178 = vmatprep.subr.bf16.mxu1 %v10442_v62  ;;  %v15364_v8 = vpack.c.bf16 %v15362_v34, %v15363_v61  ;;  %v11159_v62 = vpop.f32.mrb[85].mxu0 }
0x1b30   :  { %v11160_v60 = vadd.f32 %v11159_v62, %v11158_v54  ;;  %v11161_v28 = vpop.f32.mrb[86].mxu0 }
0x1b32   :  { %11179 = vmatpush3.bf16.msra.mxu1 %v10434_v26  ;;  %v11162_v26 = vpop.f32.mrb[87].mxu0 }
0x1b33   :  { %11208 = vmatprep.subr.bf16.mxu1 %v10467_v36  ;;  %v11163_v17 = vadd.f32 %v11162_v26, %v11161_v28 }
0x1b35   :  { %9957 = vmatmul.mubr.bf16.vlgmr.msra.gmra.mrb[160].mxu1 %v15332_v20 }
0x1b36   :  { %11209 = vmatpush3.bf16.msra.mxu1 %v10459_v55  ;;  %10038 = vmatprep.mubr.bf16.mxu1 %v15337_v30  ;;  %v11202_v55 = vpop.f32.mrb[88].mxu0 }
0x1b37   :  { %11210 = vmatprep.subr.bf16.mxu1 %v10468_v57  ;;  %v11203_v5 = vpop.f32.mrb[89].mxu0 }
0x1b38   :  { %v11204_v14 = vadd.f32 %v11203_v5, %v11202_v55  ;;  %v11205_v31 = vpop.f32.mrb[90].mxu0 }
0x1b39   :  { %v11206_v20 = vpop.f32.mrb[91].mxu0 }
0x1b3a   :  { %11211 = vmatpush3.bf16.msra.mxu1 %v10460_v12  ;;  %v11207_v37 = vadd.f32 %v11206_v20, %v11205_v31 }
0x1b3b   :  { %11212 = vmatprep.subr.bf16.mxu1 %v10469_v7 }
0x1b3e   :  { %11213 = vmatpush3.bf16.msra.mxu1 %v10461_v40 }
0x1b3f   :  { %11214 = vmatprep.subr.bf16.mxu1 %v10470_v23 }
0x1b42   :  { %11215 = vmatpush3.bf16.msra.mxu1 %v10462_v47 }
0x1b43   :  { %11216 = vmatprep.subr.bf16.mxu1 %v10471_v49 }
0x1b46   :  { %11217 = vmatpush3.bf16.msra.mxu1 %v10463_v21 }
0x1b47   :  { %11218 = vmatprep.subr.bf16.mxu1 %v10472_v4 }
0x1b4a   :  { %11219 = vmatpush3.bf16.msra.mxu1 %v10464_v45 }
0x1b4b   :  { %11220 = vmatprep.subr.bf16.mxu1 %v10473_v52 }
0x1b4e   :  { %11221 = vmatpush3.bf16.msra.mxu1 %v10465_v0 }
0x1b4f   :  { %11222 = vmatprep.subr.bf16.mxu1 %v10474_v44 }
0x1b52   :  { %11223 = vmatpush3.bf16.msra.mxu1 %v10466_v2 }
0x1b55   :  { %10039 = vmatmul.mubr.bf16.vlgmr.msra.gmra.mrb[164].mxu1 %v15364_v8 }
0x1b88   :  { %v11070_v32 = vpop.f32.mrb[144].mxu1 }
0x1b89   :  { %v11071_v36 = vpop.f32.mrb[145].mxu1 }
0x1b8a   :  { %v11072_v27 = vadd.f32 %v11071_v36, %v11070_v32  ;;  %v11073_v13 = vpop.f32.mrb[146].mxu1 }
0x1b8b   :  { %v11074_v18 = vpop.f32.mrb[147].mxu1 }
0x1b8c   :  { %v11075_v57 = vadd.f32 %v11074_v18, %v11073_v13 }
0x1ba8   :  { %v11092_v15 = vpop.f32.mrb[148].mxu1 }
0x1ba9   :  { %v11093_v12 = vpop.f32.mrb[149].mxu1 }
0x1baa   :  { %v11094_v22 = vadd.f32 %v11093_v12, %v11092_v15  ;;  %v11095_v35 = vpop.f32.mrb[150].mxu1 }
0x1bab   :  { %v11096_v30 = vpop.f32.mrb[151].mxu1 }
0x1bac   :  { %v9219_v33 = vadd.f32 %v11094_v22, %v11072_v27  ;;  %v11097_v9 = vadd.f32 %v11096_v30, %v11095_v35 }
0x1bae   :  { %v9222_v7 = vadd.f32 %v11097_v9, %v11075_v57 }
0x1bc8   :  { %v11114_v10 = vpop.f32.mrb[152].mxu1 }
0x1bc9   :  { %v11115_v1 = vpop.f32.mrb[153].mxu1 }
0x1bca   :  { %v11116_v40 = vadd.f32 %v11115_v1, %v11114_v10  ;;  %v11117_v19 = vpop.f32.mrb[154].mxu1 }
0x1bcb   :  { %v11118_v16 = vpop.f32.mrb[155].mxu1 }
0x1bcc   :  { %v11119_v23 = vadd.f32 %v11118_v16, %v11117_v19  ;;  %v9836_v47 = vadd.f32 %v11116_v40, %v14494_v41 }
0x1bce   :  { %v9839_v11 = vadd.f32 %v11119_v23, %v14496_v48 }
0x1be8   :  { %v11136_v29 = vpop.f32.mrb[156].mxu1 }
0x1be9   :  { %v11137_v24 = vpop.f32.mrb[157].mxu1 }
0x1bea   :  { %v11138_v39 = vadd.f32 %v11137_v24, %v11136_v29  ;;  %v11139_v25 = vpop.f32.mrb[158].mxu1 }
0x1beb   :  { %v11140_v49 = vpop.f32.mrb[159].mxu1 }
0x1bec   :  { %v9877_v50 = vadd.f32 %v11138_v39, %v9836_v47  ;;  %v11141_v21 = vadd.f32 %v11140_v49, %v11139_v25 }
0x1bee   :  { %v9880_v59 = vadd.f32 %v11141_v21, %v9839_v11  ;;  %v9918_v3 = vadd.f32 %v11160_v60, %v9877_v50 }
0x1bf0   :  { %v9921_v4 = vadd.f32 %v11163_v17, %v9880_v59 }
0x1c08   :  { %v11180_v38 = vpop.f32.mrb[160].mxu1 }
0x1c09   :  { %v11181_v42 = vpop.f32.mrb[161].mxu1 }
0x1c0a   :  { %v11182_v45 = vadd.f32 %v11181_v42, %v11180_v38  ;;  %v11183_v46 = vpop.f32.mrb[162].mxu1 }
0x1c0b   :  { %v11184_v51 = vpop.f32.mrb[163].mxu1 }
0x1c0c   :  { %v9959_v52 = vadd.f32 %v11182_v45, %v9918_v3  ;;  %v11185_v56 = vadd.f32 %v11184_v51, %v11183_v46 }
0x1c0e   :  { %v9962_v63 = vadd.f32 %v11185_v56, %v9921_v4  ;;  %v10000_v0 = vadd.f32 %v11204_v14, %v9959_v52 }
0x1c10   :  { %v10003_v41 = vadd.f32 %v11207_v37, %v9962_v63 }
0x1c28   :  { %v11224_v6 = vpop.f32.mrb[164].mxu1 }
0x1c29   :  { %v11225_v43 = vpop.f32.mrb[165].mxu1 }
0x1c2a   :  { %v11226_v44 = vadd.f32 %v11225_v43, %v11224_v6  ;;  %v11227_v53 = vpop.f32.mrb[166].mxu1 }
0x1c2b   :  { %v11228_v48 = vpop.f32.mrb[167].mxu1 }
0x1c2c   :  { %v10041_v58 = vadd.f32 %v11226_v44, %v10000_v0  ;;  %v11229_v2 = vadd.f32 %v11228_v48, %v11227_v53 }
0x1c2e   :  { %v10047_v34 = vadd.f32 %v10041_v58, %v9219_v33  ;;  %v10044_v61 = vadd.f32 %v11229_v2, %v10003_v41 }
0x1c30   :  { %v10049_v8 = vmul.f32 0.33333334, %v10047_v34  ;;  %v10048_v54 = vadd.f32 %v10044_v61, %v9222_v7 }
0x1c32   :  { %10051 = vst.msk [vmem:[#allocation31] sm:$0xff] %vm7111_vm3, %v10049_v8  ;;  %v10050_v62 = vmul.f32 0.33333334, %v10048_v54 }
0x1c34   :  { %10052 = vst.msk [vmem:[#allocation31 + $0x8] sm:$0xff] %vm7111_vm3, %v10050_v62 }
0x1c35   :  { %12382 = shalt.err (!%p12379_p12)
}
0x1c36   :  { %s12383_s29 = scalar_lea.hbm %s12647_s5, 256 }
0x1c37   :  { %p12384_p13 = scmp.ne.s32.totalorder %s12647_s5, %s12383_s29  ;;  %p12387_p0 = scmp.lt.u32.totalorder %s12383_s29, %s12647_s5 }
0x1c39   :  { %p12389_p1 = pnand %p12387_p0, %p12384_p13 }
0x1c3b   :  { %12392 = shalt.err (!%p12389_p1)
}
0x1c3c   :  { %10064 = dma.vmem_to_hbm [thread:$0]  %s10059_s21, 256, %s12647_s5, [#allocation10], %s12453_s28, %s12453_s28, %s12454_s1  }
0x1c3d   :  { %12419 = dma.done.wait [#allocation10], 256  }
0x1c3e   :  { %12420 = vsyncadd [#allocation10], 4294967040 }
0x1c3f   :  { %10068 = vsyncpa [#allocation9], 1 }
0x1c40   :  { %10069 = vsyncpa [#allocation12], 1 }
0x1c41   :  { %10070 = vsyncpa [#allocation15], 1 }
0x1c42   :  { %10071 = vsyncpa [#allocation18], 1 }
0x1c43   :  { %10072 = vsyncpa [#allocation21], 1 }
0x1c44   :  { %10073 = vsyncpa [#allocation24], 1 }
0x1c45   :  { %10074 = vsyncpa [#allocation27], 1 }
0x1c46   :  { %10075 = vsyncpa [#allocation30], 1 }
0x1c47   :  { %10076 = vsyncpa [#allocation10], 1 }
0x1c48   :  { %10077 = vsyncmov [#allocation7] }
0x1c4b   :  { %s10078_s0 = vpop.sfrf %10077 }
0x1c4c   :  { %p10475_p2 = scmp.ne.s32.totalorder %s10078_s0, 0 }
0x1c4e   :  { %10082 = shalt.err (%p10475_p2)  }
0x1c4f   :  { %10084 = vsyncmov [#allocation7 + $0x1] }
0x1c52   :  { %s10085_s27 = vpop.sfrf %10084 }
0x1c53   :  { %p10476_p3 = scmp.ne.s32.totalorder %s10085_s27, 0 }
0x1c55   :  { %10089 = shalt.err (%p10476_p3)  }
0x1c56   :  { %10091 = vsyncmov [#allocation7 + $0x2] }
0x1c59   :  { %s10092_s5 = vpop.sfrf %10091 }
0x1c5a   :  { %p10477_p4 = scmp.ne.s32.totalorder %s10092_s5, 0 }
0x1c5c   :  { %10096 = shalt.err (%p10477_p4)  }
0x1c5d   :  { %10098 = vsyncmov [#allocation7 + $0x3] }
0x1c60   :  { %s10099_s28 = vpop.sfrf %10098 }
0x1c61   :  { %p10478_p5 = scmp.ne.s32.totalorder %s10099_s28, 0 }
0x1c63   :  { %10103 = shalt.err (%p10478_p5)  }
0x1c64   :  { %10105 = vsyncmov [#allocation7 + $0x4] }
0x1c67   :  { %s10106_s1 = vpop.sfrf %10105 }
0x1c68   :  { %p10479_p6 = scmp.ne.s32.totalorder %s10106_s1, 0 }
0x1c6a   :  { %10110 = shalt.err (%p10479_p6)  }

</bundles_post_ra>
